<compile_context>
chip_gen: v6e
topology: v6e:2x2x1
jax: 0.10.0
libtpu: 0.0.40
codegen_flags: <defaults>
</compile_context>

<pallas_src>
import functools

import jax
import jax.numpy as jnp
from jax.experimental import pallas as pl
from jax.experimental.pallas import tpu as pltpu


# Tile caps chosen so 2x(A tile) + B + bias + 2x(out tile) stays comfortably
# under v7x's 64 MiB VMEM (and the default scoped limits on v5e/v6e).
_CONV_TILE_M = 512
_FC_TILE_M = 256


def _pick_tile_m(m, cap):
    # Full-array block (always legal) when small, else a multiple-of-8 cap;
    # the edge block (if m % cap != 0) is handled by Pallas' masked OOB rules.
    return m if m <= cap else cap


# ----------------------------------------------------------------------------
# Pallas kernel: out = relu(A @ B + bias)   A:(tile_m,K) bf16  B:(K,N) bf16
# ----------------------------------------------------------------------------
def _matmul_bias_relu_kernel(a_ref, b_ref, bias_ref, o_ref):
    acc = jnp.dot(a_ref[...], b_ref[...], preferred_element_type=jnp.float32)
    acc = jnp.maximum(acc + bias_ref[...], 0.0)
    o_ref[...] = acc.astype(o_ref.dtype)


def _matmul_bias_relu(a, b, bias, *, out_dtype):
    M, K = a.shape
    K2, N = b.shape
    assert K == K2, (K, K2)
    tile_m = _pick_tile_m(M, _CONV_TILE_M)
    return pl.pallas_call(
        _matmul_bias_relu_kernel,
        grid=(pl.cdiv(M, tile_m),),
        in_specs=[
            pl.BlockSpec((tile_m, K), lambda i: (i, 0)),   # pipelined over M
            pl.BlockSpec((K, N), lambda i: (0, 0)),        # weights resident
            pl.BlockSpec((1, N), lambda i: (0, 0)),        # bias resident
        ],
        out_specs=pl.BlockSpec((tile_m, N), lambda i: (i, 0)),
        out_shape=jax.ShapeDtypeStruct((M, N), out_dtype),
        compiler_params=pltpu.CompilerParams(
            dimension_semantics=("parallel",)),
    )(a, b, bias)


# ----------------------------------------------------------------------------
# Fused FC head: probs = softmax(relu(x @ W1 + b1) @ W2 + b2)
# ----------------------------------------------------------------------------
def _fc_head_kernel(x_ref, w1_ref, b1_ref, w2_ref, b2_ref, o_ref):
    h = jnp.dot(x_ref[...], w1_ref[...], preferred_element_type=jnp.float32)
    h = jnp.maximum(h + b1_ref[...], 0.0)
    logits = jnp.dot(h.astype(w2_ref.dtype), w2_ref[...],
                     preferred_element_type=jnp.float32)
    logits = logits + b2_ref[...]
    m = jnp.max(logits, axis=-1, keepdims=True)
    e = jnp.exp(logits - m)
    denom = jnp.sum(e, axis=-1, keepdims=True)
    o_ref[...] = e * pl.reciprocal(denom, approx=True)


def _fc_head(x, w1, b1, w2, b2):
    B, K1 = x.shape
    H = w1.shape[1]
    N = w2.shape[1]
    tile_b = _pick_tile_m(B, _FC_TILE_M)
    return pl.pallas_call(
        _fc_head_kernel,
        grid=(pl.cdiv(B, tile_b),),
        in_specs=[
            pl.BlockSpec((tile_b, K1), lambda i: (i, 0)),
            pl.BlockSpec((K1, H), lambda i: (0, 0)),
            pl.BlockSpec((1, H), lambda i: (0, 0)),
            pl.BlockSpec((H, N), lambda i: (0, 0)),
            pl.BlockSpec((1, N), lambda i: (0, 0)),
        ],
        out_specs=pl.BlockSpec((tile_b, N), lambda i: (i, 0)),
        out_shape=jax.ShapeDtypeStruct((B, N), jnp.float32),
        compiler_params=pltpu.CompilerParams(
            dimension_semantics=("parallel",)),
    )(x, w1, b1, w2, b2)


# ----------------------------------------------------------------------------
# Conv via im2col (plain-JAX gather glue, bf16) + Pallas matmul kernel
# ----------------------------------------------------------------------------
def _im2col(x_nhwc, k, stride):
    B, H, W, C = x_nhwc.shape
    Ho = (H - k) // stride + 1
    Wo = (W - k) // stride + 1
    row_idx = (jnp.arange(Ho) * stride)[:, None] + jnp.arange(k)[None, :]
    col_idx = (jnp.arange(Wo) * stride)[:, None] + jnp.arange(k)[None, :]
    p = x_nhwc[:, row_idx, :, :]                 # (B, Ho, k, W, C)
    p = p[:, :, :, col_idx, :]                   # (B, Ho, k, Wo, k, C)
    p = jnp.transpose(p, (0, 1, 3, 2, 4, 5))     # (B, Ho, Wo, kh, kw, C)
    return p.reshape(B * Ho * Wo, k * k * C), B, Ho, Wo


# TODO(synk): conv3 (3x3/s1) could skip im2col entirely by accumulating 9
# shifted matmuls inside a kernel; kept as bf16 im2col for simplicity.
def conv2d_relu(x_nhwc, w_mat, bias, k, stride):
    """VALID conv + ReLU; w_mat already in (KH*KW*C, O) im2col layout (bf16)."""
    patches, B, Ho, Wo = _im2col(x_nhwc, k, stride)
    y = _matmul_bias_relu(patches, w_mat, bias, out_dtype=jnp.bfloat16)
    return y.reshape(B, Ho, Wo, w_mat.shape[1])


# ----------------------------------------------------------------------------
# Parameters (PyTorch layouts) + one-time kernel-ready relayout + forward
# ----------------------------------------------------------------------------
def init_actor_params(key, in_dim, out_dim):
    """Deterministic PyTorch-default-style uniform init (PyTorch layouts)."""
    def u(k, shape, fan_in):
        bound = 1.0 / jnp.sqrt(jnp.float32(fan_in))
        return jax.random.uniform(k, shape, jnp.float32, -bound, bound)

    ks = jax.random.split(key, 10)
    p = {}
    p["w1"] = u(ks[0], (32, in_dim, 8, 8), in_dim * 8 * 8)
    p["b1"] = u(ks[1], (32,), in_dim * 8 * 8)
    p["w2"] = u(ks[2], (64, 32, 4, 4), 32 * 4 * 4)
    p["b2"] = u(ks[3], (64,), 32 * 4 * 4)
    p["w3"] = u(ks[4], (64, 64, 3, 3), 64 * 3 * 3)
    p["b3"] = u(ks[5], (64,), 64 * 3 * 3)
    p["wfc1"] = u(ks[6], (512, 64 * 7 * 7), 64 * 7 * 7)   # PyTorch (out, in)
    p["bfc1"] = u(ks[7], (512,), 64 * 7 * 7)
    p["wfc2"] = u(ks[8], (out_dim, 512), 512)
    p["bfc2"] = u(ks[9], (out_dim,), 512)
    return p


def prepare_params(p):
    """One-time relayout of PyTorch-layout params into kernel-ready tensors."""
    def conv_w(w):  # (O, C, KH, KW) -> (KH*KW*C, O) matching im2col row order
        O, C, KH, KW = w.shape
        return (jnp.transpose(w, (2, 3, 1, 0))
                .reshape(KH * KW * C, O).astype(jnp.bfloat16))

    def bias2d(b):
        return b.reshape(1, -1).astype(jnp.float32)

    # fc1: permute input rows from NCHW-flatten order (c,h,w) to NHWC-flatten
    # order (h,w,c) so the forward needs no activation transpose before fc1.
    wfc1 = p["wfc1"].T.reshape(64, 7, 7, 512)            # rows indexed (c,h,w)
    wfc1 = (jnp.transpose(wfc1, (1, 2, 0, 3))            # -> (h,w,c,out)
            .reshape(64 * 7 * 7, 512).astype(jnp.bfloat16))

    return {
        "w1": conv_w(p["w1"]), "b1": bias2d(p["b1"]),
        "w2": conv_w(p["w2"]), "b2": bias2d(p["b2"]),
        "w3": conv_w(p["w3"]), "b3": bias2d(p["b3"]),
        "wfc1": wfc1, "bfc1": bias2d(p["bfc1"]),
        "wfc2": p["wfc2"].T.astype(jnp.bfloat16), "bfc2": bias2d(p["bfc2"]),
    }


def actor_forward(params, x_nchw):
    # NCHW -> NHWC once; bf16 activations (f32 accumulation inside the kernels)
    x = jnp.transpose(x_nchw, (0, 2, 3, 1)).astype(jnp.bfloat16)
    x = conv2d_relu(x, params["w1"], params["b1"], k=8, stride=4)  # (B,20,20,32)
    x = conv2d_relu(x, params["w2"], params["b2"], k=4, stride=2)  # (B, 9, 9,64)
    x = conv2d_relu(x, params["w3"], params["b3"], k=3, stride=1)  # (B, 7, 7,64)
    B = x.shape[0]
    x = x.reshape(B, 7 * 7 * 64)   # NHWC flatten; wfc1 rows pre-permuted
    return _fc_head(x, params["wfc1"], params["bfc1"],
                    params["wfc2"], params["bfc2"])


if __name__ == "__main__":
    key = jax.random.PRNGKey(0)
    k_param, k_x = jax.random.split(key)

    batch, in_dim, hw, out_dim = 2, 4, 84, 6   # 84x84 required by 64*7*7 flatten
    raw_params = init_actor_params(k_param, in_dim, out_dim)
    params = prepare_params(raw_params)        # one-time weight relayout
    x = jax.random.normal(k_x, (batch, in_dim, hw, hw), jnp.float32)

    fwd = jax.jit(actor_forward)
    probs = jax.block_until_ready(fwd(params, x))

    assert probs.shape == (batch, out_dim), probs.shape
    assert bool(jnp.all(jnp.isfinite(probs)))
    assert bool(jnp.all(probs >= 0.0))
    # tolerance accounts for the EUP approx-reciprocal softmax denominator
    assert bool(jnp.allclose(jnp.sum(probs, axis=-1), 1.0, atol=5e-3))
    print("KERNEL_OK")
</pallas_src>

<mosaic_0001>
module attributes {stable_mosaic.version = 11 : i64} {
  func.func @_matmul_bias_relu_kernel(%arg0: i32, %arg1: memref<512x256xbf16, #tpu.memory_space<vmem>>, %arg2: memref<256x32xbf16, #tpu.memory_space<vmem>>, %arg3: memref<1x32xf32, #tpu.memory_space<vmem>>, %arg4: memref<512x32xbf16, #tpu.memory_space<vmem>>) attributes {dimension_semantics = [#tpu.dimension_semantics<parallel>], iteration_bounds = array<i64: 2>, scalar_prefetch = 0 : i64, scratch_operands = 0 : i64, tpu.core_type = #tpu.core_type<tc>, window_params = [{transform_indices = @transform_0, window_bounds = array<i64: 512, 256>}, {pipeline_mode = #tpu.pipeline_mode<synchronous>, transform_indices = @transform_1, window_bounds = array<i64: 256, 32>}, {pipeline_mode = #tpu.pipeline_mode<synchronous>, transform_indices = @transform_2, window_bounds = array<i64: 1, 32>}, {transform_indices = @transform_3, window_bounds = array<i64: 512, 32>}]} {
    %c0 = arith.constant 0 : index
    %c0_0 = arith.constant 0 : index
    %0 = vector.load %arg1[%c0, %c0_0] : memref<512x256xbf16, #tpu.memory_space<vmem>>, vector<512x256xbf16>
    %c0_1 = arith.constant 0 : index
    %c0_2 = arith.constant 0 : index
    %1 = vector.load %arg2[%c0_1, %c0_2] : memref<256x32xbf16, #tpu.memory_space<vmem>>, vector<256x32xbf16>
    %cst = arith.constant dense<0.000000e+00> : vector<512x32xf32>
    %2 = tpu.matmul %0, %1, %cst {dimension_numbers = #tpu.dot_dimension_numbers<[1], [0], [0], [1], [0, 0, 1, 1], [], []>} : vector<512x256xbf16>, vector<256x32xbf16>, vector<512x32xf32> -> vector<512x32xf32>
    %c0_3 = arith.constant 0 : index
    %c0_4 = arith.constant 0 : index
    %3 = vector.load %arg3[%c0_3, %c0_4] : memref<1x32xf32, #tpu.memory_space<vmem>>, vector<1x32xf32>
    %4 = vector.broadcast %3 : vector<1x32xf32> to vector<512x32xf32>
    %5 = arith.addf %2, %4 : vector<512x32xf32>
    %cst_5 = arith.constant 0.000000e+00 : f32
    %6 = vector.broadcast %cst_5 : f32 to vector<512x32xf32>
    %7 = arith.maximumf %5, %6 : vector<512x32xf32>
    %8 = arith.truncf %7 : vector<512x32xf32> to vector<512x32xbf16>
    %c0_6 = arith.constant 0 : index
    %c0_7 = arith.constant 0 : index
    %9 = vector.load %arg4[%c0_6, %c0_7] : memref<512x32xbf16, #tpu.memory_space<vmem>>, vector<512x32xbf16>
    tpu.vector_store %arg4[%c0_6, %c0_7], %8 {strides = array<i32>} : memref<512x32xbf16, #tpu.memory_space<vmem>>, vector<512x32xbf16>,
    return
  }
  func.func @transform_0(%arg0: i32) -> (i32, i32) {
    %c0_i32 = arith.constant 0 : i32
    %c0_i32_0 = arith.constant 0 : i32
    return %arg0, %c0_i32 : i32, i32
  }
  func.func @transform_1(%arg0: i32) -> (i32, i32) {
    %c0_i32 = arith.constant 0 : i32
    %c0_i32_0 = arith.constant 0 : i32
    %c0_i32_1 = arith.constant 0 : i32
    return %c0_i32, %c0_i32_0 : i32, i32
  }
  func.func @transform_2(%arg0: i32) -> (i32, i32) {
    %c0_i32 = arith.constant 0 : i32
    %c0_i32_0 = arith.constant 0 : i32
    %c0_i32_1 = arith.constant 0 : i32
    return %c0_i32, %c0_i32_0 : i32, i32
  }
  func.func @transform_3(%arg0: i32) -> (i32, i32) {
    %c0_i32 = arith.constant 0 : i32
    %c0_i32_0 = arith.constant 0 : i32
    return %arg0, %c0_i32 : i32, i32
  }
}

module attributes {stable_mosaic.version = 11 : i64} {
  func.func @_matmul_bias_relu_kernel(%arg0: i32, %arg1: memref<162x512xbf16, #tpu.memory_space<vmem>>, %arg2: memref<512x64xbf16, #tpu.memory_space<vmem>>, %arg3: memref<1x64xf32, #tpu.memory_space<vmem>>, %arg4: memref<162x64xbf16, #tpu.memory_space<vmem>>) attributes {dimension_semantics = [#tpu.dimension_semantics<parallel>], iteration_bounds = array<i64: 1>, scalar_prefetch = 0 : i64, scratch_operands = 0 : i64, tpu.core_type = #tpu.core_type<tc>, window_params = [{transform_indices = @transform_0, window_bounds = array<i64: 162, 512>}, {pipeline_mode = #tpu.pipeline_mode<synchronous>, transform_indices = @transform_1, window_bounds = array<i64: 512, 64>}, {pipeline_mode = #tpu.pipeline_mode<synchronous>, transform_indices = @transform_2, window_bounds = array<i64: 1, 64>}, {transform_indices = @transform_3, window_bounds = array<i64: 162, 64>}]} {
    %c0 = arith.constant 0 : index
    %c0_0 = arith.constant 0 : index
    %0 = vector.load %arg1[%c0, %c0_0] : memref<162x512xbf16, #tpu.memory_space<vmem>>, vector<162x512xbf16>
    %c0_1 = arith.constant 0 : index
    %c0_2 = arith.constant 0 : index
    %1 = vector.load %arg2[%c0_1, %c0_2] : memref<512x64xbf16, #tpu.memory_space<vmem>>, vector<512x64xbf16>
    %cst = arith.constant dense<0.000000e+00> : vector<162x64xf32>
    %2 = tpu.matmul %0, %1, %cst {dimension_numbers = #tpu.dot_dimension_numbers<[1], [0], [0], [1], [0, 0, 1, 1], [], []>} : vector<162x512xbf16>, vector<512x64xbf16>, vector<162x64xf32> -> vector<162x64xf32>
    %c0_3 = arith.constant 0 : index
    %c0_4 = arith.constant 0 : index
    %3 = vector.load %arg3[%c0_3, %c0_4] : memref<1x64xf32, #tpu.memory_space<vmem>>, vector<1x64xf32>
    %4 = vector.broadcast %3 : vector<1x64xf32> to vector<162x64xf32>
    %5 = arith.addf %2, %4 : vector<162x64xf32>
    %cst_5 = arith.constant 0.000000e+00 : f32
    %6 = vector.broadcast %cst_5 : f32 to vector<162x64xf32>
    %7 = arith.maximumf %5, %6 : vector<162x64xf32>
    %8 = arith.truncf %7 : vector<162x64xf32> to vector<162x64xbf16>
    %c0_6 = arith.constant 0 : index
    %c0_7 = arith.constant 0 : index
    %9 = vector.load %arg4[%c0_6, %c0_7] : memref<162x64xbf16, #tpu.memory_space<vmem>>, vector<162x64xbf16>
    tpu.vector_store %arg4[%c0_6, %c0_7], %8 {strides = array<i32>} : memref<162x64xbf16, #tpu.memory_space<vmem>>, vector<162x64xbf16>,
    return
  }
  func.func @transform_0(%arg0: i32) -> (i32, i32) {
    %c0_i32 = arith.constant 0 : i32
    %c0_i32_0 = arith.constant 0 : i32
    return %arg0, %c0_i32 : i32, i32
  }
  func.func @transform_1(%arg0: i32) -> (i32, i32) {
    %c0_i32 = arith.constant 0 : i32
    %c0_i32_0 = arith.constant 0 : i32
    %c0_i32_1 = arith.constant 0 : i32
    return %c0_i32, %c0_i32_0 : i32, i32
  }
  func.func @transform_2(%arg0: i32) -> (i32, i32) {
    %c0_i32 = arith.constant 0 : i32
    %c0_i32_0 = arith.constant 0 : i32
    %c0_i32_1 = arith.constant 0 : i32
    return %c0_i32, %c0_i32_0 : i32, i32
  }
  func.func @transform_3(%arg0: i32) -> (i32, i32) {
    %c0_i32 = arith.constant 0 : i32
    %c0_i32_0 = arith.constant 0 : i32
    return %arg0, %c0_i32 : i32, i32
  }
}

module attributes {stable_mosaic.version = 11 : i64} {
  func.func @_matmul_bias_relu_kernel(%arg0: i32, %arg1: memref<98x576xbf16, #tpu.memory_space<vmem>>, %arg2: memref<576x64xbf16, #tpu.memory_space<vmem>>, %arg3: memref<1x64xf32, #tpu.memory_space<vmem>>, %arg4: memref<98x64xbf16, #tpu.memory_space<vmem>>) attributes {dimension_semantics = [#tpu.dimension_semantics<parallel>], iteration_bounds = array<i64: 1>, scalar_prefetch = 0 : i64, scratch_operands = 0 : i64, tpu.core_type = #tpu.core_type<tc>, window_params = [{transform_indices = @transform_0, window_bounds = array<i64: 98, 576>}, {pipeline_mode = #tpu.pipeline_mode<synchronous>, transform_indices = @transform_1, window_bounds = array<i64: 576, 64>}, {pipeline_mode = #tpu.pipeline_mode<synchronous>, transform_indices = @transform_2, window_bounds = array<i64: 1, 64>}, {transform_indices = @transform_3, window_bounds = array<i64: 98, 64>}]} {
    %c0 = arith.constant 0 : index
    %c0_0 = arith.constant 0 : index
    %0 = vector.load %arg1[%c0, %c0_0] : memref<98x576xbf16, #tpu.memory_space<vmem>>, vector<98x576xbf16>
    %c0_1 = arith.constant 0 : index
    %c0_2 = arith.constant 0 : index
    %1 = vector.load %arg2[%c0_1, %c0_2] : memref<576x64xbf16, #tpu.memory_space<vmem>>, vector<576x64xbf16>
    %cst = arith.constant dense<0.000000e+00> : vector<98x64xf32>
    %2 = tpu.matmul %0, %1, %cst {dimension_numbers = #tpu.dot_dimension_numbers<[1], [0], [0], [1], [0, 0, 1, 1], [], []>} : vector<98x576xbf16>, vector<576x64xbf16>, vector<98x64xf32> -> vector<98x64xf32>
    %c0_3 = arith.constant 0 : index
    %c0_4 = arith.constant 0 : index
    %3 = vector.load %arg3[%c0_3, %c0_4] : memref<1x64xf32, #tpu.memory_space<vmem>>, vector<1x64xf32>
    %4 = vector.broadcast %3 : vector<1x64xf32> to vector<98x64xf32>
    %5 = arith.addf %2, %4 : vector<98x64xf32>
    %cst_5 = arith.constant 0.000000e+00 : f32
    %6 = vector.broadcast %cst_5 : f32 to vector<98x64xf32>
    %7 = arith.maximumf %5, %6 : vector<98x64xf32>
    %8 = arith.truncf %7 : vector<98x64xf32> to vector<98x64xbf16>
    %c0_6 = arith.constant 0 : index
    %c0_7 = arith.constant 0 : index
    %9 = vector.load %arg4[%c0_6, %c0_7] : memref<98x64xbf16, #tpu.memory_space<vmem>>, vector<98x64xbf16>
    tpu.vector_store %arg4[%c0_6, %c0_7], %8 {strides = array<i32>} : memref<98x64xbf16, #tpu.memory_space<vmem>>, vector<98x64xbf16>,
    return
  }
  func.func @transform_0(%arg0: i32) -> (i32, i32) {
    %c0_i32 = arith.constant 0 : i32
    %c0_i32_0 = arith.constant 0 : i32
    return %arg0, %c0_i32 : i32, i32
  }
  func.func @transform_1(%arg0: i32) -> (i32, i32) {
    %c0_i32 = arith.constant 0 : i32
    %c0_i32_0 = arith.constant 0 : i32
    %c0_i32_1 = arith.constant 0 : i32
    return %c0_i32, %c0_i32_0 : i32, i32
  }
  func.func @transform_2(%arg0: i32) -> (i32, i32) {
    %c0_i32 = arith.constant 0 : i32
    %c0_i32_0 = arith.constant 0 : i32
    %c0_i32_1 = arith.constant 0 : i32
    return %c0_i32, %c0_i32_0 : i32, i32
  }
  func.func @transform_3(%arg0: i32) -> (i32, i32) {
    %c0_i32 = arith.constant 0 : i32
    %c0_i32_0 = arith.constant 0 : i32
    return %arg0, %c0_i32 : i32, i32
  }
}

module attributes {stable_mosaic.version = 11 : i64} {
  func.func @_fc_head_kernel(%arg0: i32, %arg1: memref<2x3136xbf16, #tpu.memory_space<vmem>>, %arg2: memref<3136x512xbf16, #tpu.memory_space<vmem>>, %arg3: memref<1x512xf32, #tpu.memory_space<vmem>>, %arg4: memref<512x6xbf16, #tpu.memory_space<vmem>>, %arg5: memref<1x6xf32, #tpu.memory_space<vmem>>, %arg6: memref<2x6xf32, #tpu.memory_space<vmem>>) attributes {dimension_semantics = [#tpu.dimension_semantics<parallel>], iteration_bounds = array<i64: 1>, scalar_prefetch = 0 : i64, scratch_operands = 0 : i64, tpu.core_type = #tpu.core_type<tc>, window_params = [{transform_indices = @transform_0, window_bounds = array<i64: 2, 3136>}, {pipeline_mode = #tpu.pipeline_mode<synchronous>, transform_indices = @transform_1, window_bounds = array<i64: 3136, 512>}, {pipeline_mode = #tpu.pipeline_mode<synchronous>, transform_indices = @transform_2, window_bounds = array<i64: 1, 512>}, {pipeline_mode = #tpu.pipeline_mode<synchronous>, transform_indices = @transform_3, window_bounds = array<i64: 512, 6>}, {pipeline_mode = #tpu.pipeline_mode<synchronous>, transform_indices = @transform_4, window_bounds = array<i64: 1, 6>}, {transform_indices = @transform_5, window_bounds = array<i64: 2, 6>}]} {
    %c0 = arith.constant 0 : index
    %c0_0 = arith.constant 0 : index
    %0 = vector.load %arg1[%c0, %c0_0] : memref<2x3136xbf16, #tpu.memory_space<vmem>>, vector<2x3136xbf16>
    %c0_1 = arith.constant 0 : index
    %c0_2 = arith.constant 0 : index
    %1 = vector.load %arg2[%c0_1, %c0_2] : memref<3136x512xbf16, #tpu.memory_space<vmem>>, vector<3136x512xbf16>
    %cst = arith.constant dense<0.000000e+00> : vector<2x512xf32>
    %2 = tpu.matmul %0, %1, %cst {dimension_numbers = #tpu.dot_dimension_numbers<[1], [0], [0], [1], [0, 0, 1, 1], [], []>} : vector<2x3136xbf16>, vector<3136x512xbf16>, vector<2x512xf32> -> vector<2x512xf32>
    %c0_3 = arith.constant 0 : index
    %c0_4 = arith.constant 0 : index
    %3 = vector.load %arg3[%c0_3, %c0_4] : memref<1x512xf32, #tpu.memory_space<vmem>>, vector<1x512xf32>
    %4 = vector.broadcast %3 : vector<1x512xf32> to vector<2x512xf32>
    %5 = arith.addf %2, %4 : vector<2x512xf32>
    %cst_5 = arith.constant 0.000000e+00 : f32
    %6 = vector.broadcast %cst_5 : f32 to vector<2x512xf32>
    %7 = arith.maximumf %5, %6 : vector<2x512xf32>
    %8 = arith.truncf %7 : vector<2x512xf32> to vector<2x512xbf16>
    %c0_6 = arith.constant 0 : index
    %c0_7 = arith.constant 0 : index
    %9 = vector.load %arg4[%c0_6, %c0_7] : memref<512x6xbf16, #tpu.memory_space<vmem>>, vector<512x6xbf16>
    %cst_8 = arith.constant dense<0.000000e+00> : vector<2x6xf32>
    %10 = tpu.matmul %8, %9, %cst_8 {dimension_numbers = #tpu.dot_dimension_numbers<[1], [0], [0], [1], [0, 0, 1, 1], [], []>} : vector<2x512xbf16>, vector<512x6xbf16>, vector<2x6xf32> -> vector<2x6xf32>
    %c0_9 = arith.constant 0 : index
    %c0_10 = arith.constant 0 : index
    %11 = vector.load %arg5[%c0_9, %c0_10] : memref<1x6xf32, #tpu.memory_space<vmem>>, vector<1x6xf32>
    %12 = vector.broadcast %11 : vector<1x6xf32> to vector<2x6xf32>
    %13 = arith.addf %10, %12 : vector<2x6xf32>
    %cst_11 = arith.constant dense<0xFF800000> : vector<2xf32>
    %14 = vector.multi_reduction <maximumf>, %13, %cst_11 [1] : vector<2x6xf32> to vector<2xf32>
    %15 = vector.shape_cast %14 : vector<2xf32> to vector<2x1xf32>
    %16 = vector.broadcast %15 : vector<2x1xf32> to vector<2x6xf32>
    %17 = arith.subf %13, %16 : vector<2x6xf32>
    %18 = math.exp %17 : vector<2x6xf32>
    %cst_12 = arith.constant dense<0.000000e+00> : vector<2xf32>
    %19 = vector.multi_reduction <add>, %18, %cst_12 [1] : vector<2x6xf32> to vector<2xf32>
    %20 = vector.shape_cast %19 : vector<2xf32> to vector<2x1xf32>
    %21 = tpu.reciprocal %20 {approx = true} : vector<2x1xf32> -> vector<2x1xf32>
    %22 = vector.broadcast %21 : vector<2x1xf32> to vector<2x6xf32>
    %23 = arith.mulf %18, %22 : vector<2x6xf32>
    %c0_13 = arith.constant 0 : index
    %c0_14 = arith.constant 0 : index
    %24 = vector.load %arg6[%c0_13, %c0_14] : memref<2x6xf32, #tpu.memory_space<vmem>>, vector<2x6xf32>
    tpu.vector_store %arg6[%c0_13, %c0_14], %23 {strides = array<i32>} : memref<2x6xf32, #tpu.memory_space<vmem>>, vector<2x6xf32>,
    return
  }
  func.func @transform_0(%arg0: i32) -> (i32, i32) {
    %c0_i32 = arith.constant 0 : i32
    %c0_i32_0 = arith.constant 0 : i32
    return %arg0, %c0_i32 : i32, i32
  }
  func.func @transform_1(%arg0: i32) -> (i32, i32) {
    %c0_i32 = arith.constant 0 : i32
    %c0_i32_0 = arith.constant 0 : i32
    %c0_i32_1 = arith.constant 0 : i32
    return %c0_i32, %c0_i32_0 : i32, i32
  }
  func.func @transform_2(%arg0: i32) -> (i32, i32) {
    %c0_i32 = arith.constant 0 : i32
    %c0_i32_0 = arith.constant 0 : i32
    %c0_i32_1 = arith.constant 0 : i32
    return %c0_i32, %c0_i32_0 : i32, i32
  }
  func.func @transform_3(%arg0: i32) -> (i32, i32) {
    %c0_i32 = arith.constant 0 : i32
    %c0_i32_0 = arith.constant 0 : i32
    %c0_i32_1 = arith.constant 0 : i32
    return %c0_i32, %c0_i32_0 : i32, i32
  }
  func.func @transform_4(%arg0: i32) -> (i32, i32) {
    %c0_i32 = arith.constant 0 : i32
    %c0_i32_0 = arith.constant 0 : i32
    %c0_i32_1 = arith.constant 0 : i32
    return %c0_i32, %c0_i32_0 : i32, i32
  }
  func.func @transform_5(%arg0: i32) -> (i32, i32) {
    %c0_i32 = arith.constant 0 : i32
    %c0_i32_0 = arith.constant 0 : i32
    return %arg0, %c0_i32 : i32, i32
  }
}

</mosaic_0001>

<bundles_post_ra>
// kernel: actor_forward.4
= control target key start
LH: loop header
LB: loop body
LE: loop exit
PB: predicated region body
PF: predicated region fallthrough
CT: control target
= control target key end

     0   :  { %s2442_s12 = smov 0   ;;  %s2444_s13 = smov 0   ;;  %s3024_s0 = inlined_call_operand.vmem [shape: bf16[800,256], index: 0, kind: input, shape index: {}]   ;;  %s3025_s1 = inlined_call_operand.vmem [shape: bf16[256,32], index: 1, kind: input, shape index: {}]   ;;  %s3026_s2 = inlined_call_operand.vmem [shape: f32[1,32], index: 2, kind: input, shape index: {}]   ;;  %s3027_s3 = inlined_call_operand.vmem [shape: bf16[800,32], index: 3, kind: output, shape index: {}]  }
   0x1   :  { %s2446_s14 = smov 0  }
   0x2 LB: > { %s2455_s15 = sadd.s32 4294967295, %s2387_s14   ;;  %s2457_s16 = sadd.s32 1, %s2387_s14   ;;  %s2387_s14 = sphi %s2446_s14, %s3034_s14   ;;  %s2383_s13 = sphi %s2444_s13, %s3033_s13   ;;  %s2379_s12 = sphi %s2442_s12, %s3032_s12  }
   0x3   : > { %s85_s17 = ssub.s32 %s2387_s14, %s2457_s16  ;;  %s88_s18 = sadd.s32 1, %s2383_s13 }
   0x4   : > { %p86_p0 = scmp.eq.s32.totalorder %s85_s17, 0  ;;  %p98_p1 = scmp.ne.s32.totalorder %s2383_s13, %s2379_s12 }
   0x5   : > { %p99_p2 = scmp.eq.s32.totalorder %s2455_s15, 1  ;;  %p1865_p3 = scmp.ge.s32.totalorder %s2387_s14, 1 }
   0x6   : > { %s2465_s19 = scalar_select %p86_p0, %s2383_s13, %s88_s18  }
   0x7   : > { %p2467_p4 = por %p99_p2, %p98_p1  ;;  %p149_p5 = scmp.lt.s32.totalorder %s2387_s14, 3 }
   0x9   : > { %p150_p6 = pnand %p1865_p3, %p149_p5 }
   0xa   : > { %s2477_s23 = sshll.u32 (!%p150_p6), %s2455_s15, 6  ;;  %s175_s17 = sand.u32 (!%p150_p6), 1, %s2379_s12  }
   0xb   : > { %153 = sbr.rel (%p150_p6) target bundleno = 487 (0x1e7), region = 32  ;;  %p184_p7 = scmp.lt.s32.totalorder (!%p150_p6), %s2477_s23, 99 }
   0xc   : > { %s1866_s22 = sshll.u32 (!%p150_p6), %s175_s17, 8 }
   0xd   : > { %s2635_s12 = scalar_lea.vmem (!%p150_p6), [#allocation2], %s1866_s22  }
  0x10   : > { %v2221_v0 = vld [vmem:[%s3025_s1 + $0x38] sm:$0xff]   ;;  %v2421_v1 = vmov 0   ;;  %v2222_v2 = vld [vmem:[%s3025_s1 + $0x30] sm:$0xff]   ;;  %v2223_v3 = vld [vmem:[%s3025_s1 + $0x28] sm:$0xff]   ;;  %s185_s28 = scalar_select %p184_p7, %s2477_s23, 99  ;;  %vm1329_vm0 = vcmask 257024  }
  0x11   : > { %720 = vmatprep.subr.bf16.mxu0 %v2421_v1  ;;  %2100 = vmatprep.subr.bf16.mxu1 %v2421_v1  ;;  %v2224_v4 = vld [vmem:[%s3025_s1 + $0x20] sm:$0xff]   ;;  %v2225_v5 = vld [vmem:[%s3025_s1 + $0x18] sm:$0xff]   ;;  %v2226_v7 = vld [vmem:[%s3025_s1 + $0x10] sm:$0xff]   ;;  %s2097_s24 = sshll.u32 (%p2467_p4), %s2455_s15, 8 }
  0x12   : > { %721 = vmatpush1.bf16.msra.mxu0 %v2221_v0  ;;  %2116 = vmatpush1.bf16.msra.mxu1 %v2221_v0  ;;  %s2032_s4 = sshll.u32 %s185_s28, 3  ;;  %v2227_v9 = vld [vmem:[%s3025_s1 + $0x8] sm:$0xff]   ;;  %v2228_v10 = vld [vmem:[%s3025_s1] sm:$0xff]   ;;  %v2229_v11 = vld [vmem:[%s3025_s1 + $0x78] sm:$0xff]   ;;  %s2832_s27 = scalar_lea.vmem (%p2467_p4), %s3027_s3, %s2097_s24  }
  0x13   : > { %722 = vmatprep.subr.bf16.mxu0 %v2421_v1  ;;  %2101 = vmatprep.subr.bf16.mxu1 %v2421_v1  ;;  %s2502_s9 = scalar_lea.vmem %s3024_s0, %s2032_s4  ;;  %v2230_v12 = vld [vmem:[%s3025_s1 + $0x70] sm:$0xff]   ;;  %v2231_v13 = vld [vmem:[%s3025_s1 + $0x68] sm:$0xff]   ;;  %v2232_v14 = vld [vmem:[%s3025_s1 + $0x60] sm:$0xff]  }
  0x14   : > { %v2239_v6 = vld [vmem:[%s2502_s9 + $0x4] ss:$8 sps:$4 sm:$0xff]   ;;  %v2233_v15 = vld [vmem:[%s3025_s1 + $0x58] sm:$0xff]   ;;  %v2234_v16 = vld [vmem:[%s3025_s1 + $0x50] sm:$0xff]  }
  0x15   : > { %v2242_v8 = vld [vmem:[%s2502_s9 + $0x104] ss:$8 sps:$4 sm:$0xff]   ;;  %752 = vmatprep.mubr.bf16.mxu0 %v2239_v6  ;;  %v2237_v19 = vld [vmem:[%s2502_s9] ss:$8 sps:$4 sm:$0xff]   ;;  %v2243_v21 = vld [vmem:[%s2502_s9 + $0x14] ss:$8 sps:$4 sm:$0xff]  }
  0x16   : > { %723 = vmatpush1.bf16.msra.mxu0 %v2222_v2  ;;  %2117 = vmatpush1.bf16.msra.mxu1 %v2222_v2  ;;  %v2235_v17 = vld [vmem:[%s3025_s1 + $0x48] sm:$0xff]   ;;  %v2236_v18 = vld [vmem:[%s3025_s1 + $0x40] sm:$0xff]   ;;  %v2245_v22 = vld [vmem:[%s2502_s9 + $0x114] ss:$8 sps:$4 sm:$0xff]  }
  0x17   : > { %724 = vmatprep.subr.bf16.mxu0 %v2421_v1  ;;  %2102 = vmatprep.subr.bf16.mxu1 %v2421_v1  ;;  %v2240_v20 = vld [vmem:[%s2502_s9 + $0x100] ss:$8 sps:$4 sm:$0xff]   ;;  %v2247_v23 = vld [vmem:[%s2502_s9 + $0x10] ss:$8 sps:$4 sm:$0xff]   ;;  %v2249_v25 = vld [vmem:[%s2502_s9 + $0x24] ss:$8 sps:$4 sm:$0xff]  }
  0x18   : > { %880 = vmatprep.mubr.bf16.mxu1 %v2242_v8  ;;  %v2248_v24 = vld [vmem:[%s2502_s9 + $0x110] ss:$8 sps:$4 sm:$0xff]   ;;  %v2251_v26 = vld [vmem:[%s2502_s9 + $0x124] ss:$8 sps:$4 sm:$0xff]   ;;  %v2253_v27 = vld [vmem:[%s2502_s9 + $0x20] ss:$8 sps:$4 sm:$0xff]  }
  0x19   : > { %v2254_v28 = vld [vmem:[%s2502_s9 + $0x120] ss:$8 sps:$4 sm:$0xff]   ;;  %v2255_v29 = vld [vmem:[%s2502_s9 + $0x34] ss:$8 sps:$4 sm:$0xff]   ;;  %v2259_v31 = vld [vmem:[%s2502_s9 + $0x30] ss:$8 sps:$4 sm:$0xff]  }
  0x1a   : > { %725 = vmatpush1.bf16.msra.mxu0 %v2223_v3  ;;  %2118 = vmatpush1.bf16.msra.mxu1 %v2223_v3  ;;  %v2257_v30 = vld [vmem:[%s2502_s9 + $0x134] ss:$8 sps:$4 sm:$0xff]   ;;  %v2260_v32 = vld [vmem:[%s2502_s9 + $0x130] ss:$8 sps:$4 sm:$0xff]   ;;  %v2261_v33 = vld [vmem:[%s2502_s9 + $0x44] ss:$8 sps:$4 sm:$0xff]  }
  0x1b   : > { %726 = vmatprep.subr.bf16.mxu0 %v2421_v1  ;;  %2103 = vmatprep.subr.bf16.mxu1 %v2421_v1  ;;  %v2263_v34 = vld [vmem:[%s2502_s9 + $0x144] ss:$8 sps:$4 sm:$0xff]   ;;  %v2265_v35 = vld [vmem:[%s2502_s9 + $0x40] ss:$8 sps:$4 sm:$0xff]   ;;  %v2267_v37 = vld [vmem:[%s2502_s9 + $0x54] ss:$8 sps:$4 sm:$0xff]  }
  0x1c   : > { %v2266_v36 = vld [vmem:[%s2502_s9 + $0x140] ss:$8 sps:$4 sm:$0xff]   ;;  %v2269_v38 = vld [vmem:[%s2502_s9 + $0x154] ss:$8 sps:$4 sm:$0xff]   ;;  %v2271_v39 = vld [vmem:[%s2502_s9 + $0x50] ss:$8 sps:$4 sm:$0xff]  }
  0x1d   : > { %v2272_v40 = vld [vmem:[%s2502_s9 + $0x150] ss:$8 sps:$4 sm:$0xff]   ;;  %v2273_v41 = vld [vmem:[%s2502_s9 + $0x64] ss:$8 sps:$4 sm:$0xff]   ;;  %v2277_v43 = vld [vmem:[%s2502_s9 + $0x60] ss:$8 sps:$4 sm:$0xff]  }
  0x1e   : > { %727 = vmatpush1.bf16.msra.mxu0 %v2224_v4  ;;  %2119 = vmatpush1.bf16.msra.mxu1 %v2224_v4  ;;  %v2275_v42 = vld [vmem:[%s2502_s9 + $0x164] ss:$8 sps:$4 sm:$0xff]   ;;  %v2278_v44 = vld [vmem:[%s2502_s9 + $0x160] ss:$8 sps:$4 sm:$0xff]   ;;  %v2279_v45 = vld [vmem:[%s2502_s9 + $0x74] ss:$8 sps:$4 sm:$0xff]  }
  0x1f   : > { %728 = vmatprep.subr.bf16.mxu0 %v2421_v1  ;;  %2104 = vmatprep.subr.bf16.mxu1 %v2421_v1  ;;  %v2281_v46 = vld [vmem:[%s2502_s9 + $0x174] ss:$8 sps:$4 sm:$0xff]   ;;  %v2283_v47 = vld [vmem:[%s2502_s9 + $0x70] ss:$8 sps:$4 sm:$0xff]   ;;  %v2285_v49 = vld [vmem:[%s2502_s9 + $0x84] ss:$8 sps:$4 sm:$0xff]  }
  0x20   : > { %v2284_v48 = vld [vmem:[%s2502_s9 + $0x170] ss:$8 sps:$4 sm:$0xff]   ;;  %v2287_v50 = vld [vmem:[%s2502_s9 + $0x184] ss:$8 sps:$4 sm:$0xff]   ;;  %v2289_v51 = vld [vmem:[%s2502_s9 + $0x80] ss:$8 sps:$4 sm:$0xff]  }
  0x21   : > { %v2290_v52 = vld [vmem:[%s2502_s9 + $0x180] ss:$8 sps:$4 sm:$0xff]   ;;  %v2291_v53 = vld [vmem:[%s2502_s9 + $0x94] ss:$8 sps:$4 sm:$0xff]   ;;  %v2295_v55 = vld [vmem:[%s2502_s9 + $0x90] ss:$8 sps:$4 sm:$0xff]  }
  0x22   : > { %729 = vmatpush1.bf16.msra.mxu0 %v2225_v5  ;;  %2120 = vmatpush1.bf16.msra.mxu1 %v2225_v5  ;;  %v2293_v54 = vld [vmem:[%s2502_s9 + $0x194] ss:$8 sps:$4 sm:$0xff]   ;;  %v2296_v56 = vld [vmem:[%s2502_s9 + $0x190] ss:$8 sps:$4 sm:$0xff]   ;;  %v2297_v57 = vld [vmem:[%s2502_s9 + $0xa4] ss:$8 sps:$4 sm:$0xff]  }
  0x23   : > { %730 = vmatprep.subr.bf16.mxu0 %v2421_v1  ;;  %2105 = vmatprep.subr.bf16.mxu1 %v2421_v1  ;;  %v2299_v58 = vld [vmem:[%s2502_s9 + $0x1a4] ss:$8 sps:$4 sm:$0xff]   ;;  %v2301_v59 = vld [vmem:[%s2502_s9 + $0xa0] ss:$8 sps:$4 sm:$0xff]   ;;  %v2303_v61 = vld [vmem:[%s2502_s9 + $0xb4] ss:$8 sps:$4 sm:$0xff]  }
  0x24   : > { %v2302_v60 = vld [vmem:[%s2502_s9 + $0x1a0] ss:$8 sps:$4 sm:$0xff]   ;;  %v2305_v62 = vld [vmem:[%s2502_s9 + $0x1b4] ss:$8 sps:$4 sm:$0xff]   ;;  %v2307_v63 = vld [vmem:[%s2502_s9 + $0xb0] ss:$8 sps:$4 sm:$0xff]  }
  0x25   : > { %v2308_v0 = vld [vmem:[%s2502_s9 + $0x1b0] ss:$8 sps:$4 sm:$0xff]   ;;  %v2311_v2 = vld [vmem:[%s2502_s9 + $0x1c4] ss:$8 sps:$4 sm:$0xff]   ;;  %v2313_v3 = vld [vmem:[%s2502_s9 + $0xc0] ss:$8 sps:$4 sm:$0xff]  }
  0x26   : > { %731 = vmatpush1.bf16.msra.mxu0 %v2226_v7  ;;  %2121 = vmatpush1.bf16.msra.mxu1 %v2226_v7  ;;  %v2314_v4 = vld [vmem:[%s2502_s9 + $0x1c0] ss:$8 sps:$4 sm:$0xff]   ;;  %v2315_v5 = vld [vmem:[%s2502_s9 + $0xd4] ss:$8 sps:$4 sm:$0xff]   ;;  %v2319_v7 = vld [vmem:[%s2502_s9 + $0xd0] ss:$8 sps:$4 sm:$0xff]  }
  0x27   : > { %732 = vmatprep.subr.bf16.mxu0 %v2421_v1  ;;  %2106 = vmatprep.subr.bf16.mxu1 %v2421_v1  ;;  %v2317_v6 = vld [vmem:[%s2502_s9 + $0x1d4] ss:$8 sps:$4 sm:$0xff]   ;;  %v2320_v8 = vld [vmem:[%s2502_s9 + $0x1d0] ss:$8 sps:$4 sm:$0xff]  }
  0x2a   : > { %733 = vmatpush1.bf16.msra.mxu0 %v2227_v9  ;;  %2122 = vmatpush1.bf16.msra.mxu1 %v2227_v9  ;;  %v2321_v9 = vld [vmem:[%s2502_s9 + $0xe4] ss:$8 sps:$4 sm:$0xff]  }
  0x2b   : > { %734 = vmatprep.subr.bf16.mxu0 %v2421_v1  ;;  %2107 = vmatprep.subr.bf16.mxu1 %v2421_v1 }
  0x2e   : > { %735 = vmatpush1.bf16.msra.mxu0 %v2228_v10  ;;  %2123 = vmatpush1.bf16.msra.mxu1 %v2228_v10  ;;  %v2323_v10 = vld [vmem:[%s2502_s9 + $0x1e4] ss:$8 sps:$4 sm:$0xff]  }
  0x2f   : > { %736 = vmatprep.subr.bf16.mxu0 %v2421_v1  ;;  %2108 = vmatprep.subr.bf16.mxu1 %v2421_v1 }
  0x32   : > { %737 = vmatpush2.bf16.msra.mxu0 %v2229_v11  ;;  %2124 = vmatpush2.bf16.msra.mxu1 %v2229_v11  ;;  %v2325_v11 = vld [vmem:[%s2502_s9 + $0xe0] ss:$8 sps:$4 sm:$0xff]  }
  0x33   : > { %738 = vmatprep.subr.bf16.mxu0 %v2421_v1  ;;  %2109 = vmatprep.subr.bf16.mxu1 %v2421_v1 }
  0x36   : > { %739 = vmatpush2.bf16.msra.mxu0 %v2230_v12  ;;  %2125 = vmatpush2.bf16.msra.mxu1 %v2230_v12  ;;  %v2326_v12 = vld [vmem:[%s2502_s9 + $0x1e0] ss:$8 sps:$4 sm:$0xff]  }
  0x37   : > { %740 = vmatprep.subr.bf16.mxu0 %v2421_v1  ;;  %2110 = vmatprep.subr.bf16.mxu1 %v2421_v1 }
  0x3a   : > { %741 = vmatpush2.bf16.msra.mxu0 %v2231_v13  ;;  %2126 = vmatpush2.bf16.msra.mxu1 %v2231_v13  ;;  %v2327_v13 = vld [vmem:[%s2502_s9 + $0xf4] ss:$8 sps:$4 sm:$0xff]  }
  0x3b   : > { %742 = vmatprep.subr.bf16.mxu0 %v2421_v1  ;;  %2111 = vmatprep.subr.bf16.mxu1 %v2421_v1 }
  0x3e   : > { %743 = vmatpush2.bf16.msra.mxu0 %v2232_v14  ;;  %2127 = vmatpush2.bf16.msra.mxu1 %v2232_v14  ;;  %v2329_v14 = vld [vmem:[%s2502_s9 + $0x1f4] ss:$8 sps:$4 sm:$0xff]  }
  0x3f   : > { %744 = vmatprep.subr.bf16.mxu0 %v2421_v1  ;;  %2112 = vmatprep.subr.bf16.mxu1 %v2421_v1 }
  0x42   : > { %745 = vmatpush2.bf16.msra.mxu0 %v2233_v15  ;;  %2128 = vmatpush2.bf16.msra.mxu1 %v2233_v15  ;;  %v2331_v15 = vld [vmem:[%s2502_s9 + $0xf0] ss:$8 sps:$4 sm:$0xff]  }
  0x43   : > { %746 = vmatprep.subr.bf16.mxu0 %v2421_v1  ;;  %2113 = vmatprep.subr.bf16.mxu1 %v2421_v1 }
  0x46   : > { %747 = vmatpush2.bf16.msra.mxu0 %v2234_v16  ;;  %2129 = vmatpush2.bf16.msra.mxu1 %v2234_v16  ;;  %v2332_v16 = vld [vmem:[%s2502_s9 + $0x1f0] ss:$8 sps:$4 sm:$0xff]  }
  0x47   : > { %748 = vmatprep.subr.bf16.mxu0 %v2421_v1  ;;  %2114 = vmatprep.subr.bf16.mxu1 %v2421_v1 }
  0x4a   : > { %749 = vmatpush2.bf16.msra.mxu0 %v2235_v17  ;;  %2130 = vmatpush2.bf16.msra.mxu1 %v2235_v17  ;;  %v2629_v17 = vld [vmem:[%s3026_s2] ss:$0 sm:$0xff] }
  0x4b   : > { %750 = vmatprep.subr.bf16.mxu0 %v2421_v1  ;;  %2115 = vmatprep.subr.bf16.mxu1 %v2421_v1  ;;  %v2309_v1 = vld [vmem:[%s2502_s9 + $0xc4] ss:$8 sps:$4 sm:$0xff]   ;;  %s1402_s9 = ssub.s32 (%p2467_p4), 100, %s2477_s23 }
  0x4c   : > { %p1403_p8 = scmp.lt.s32.totalorder (%p2467_p4), %s1402_s9, 64 }
  0x4e   : > { %751 = vmatpush2.bf16.msra.mxu0 %v2236_v18  ;;  %2131 = vmatpush2.bf16.msra.mxu1 %v2236_v18 }
  0x51   : > { %753 = vmatmul.mubr.bf16.vlgmr.msra.gmra.mxu0 %v2237_v19  ;;  %881 = vmatmul.mubr.bf16.vlgmr.msra.gmra.mxu1 %v2240_v20 }
  0x52   : > { %760 = vmatprep.mubr.bf16.mxu0 %v2243_v21  ;;  %888 = vmatprep.mubr.bf16.mxu1 %v2245_v22 }
  0x59   : > { %761 = vmatmul.mubr.bf16.gmra.mxu0 %v2247_v23  ;;  %889 = vmatmul.mubr.bf16.gmra.mxu1 %v2248_v24 }
  0x5a   : > { %768 = vmatprep.mubr.bf16.mxu0 %v2249_v25  ;;  %896 = vmatprep.mubr.bf16.mxu1 %v2251_v26 }
  0x61   : > { %769 = vmatmul.mubr.bf16.gmra.mxu0 %v2253_v27  ;;  %897 = vmatmul.mubr.bf16.gmra.mxu1 %v2254_v28 }
  0x62   : > { %776 = vmatprep.mubr.bf16.mxu0 %v2255_v29  ;;  %904 = vmatprep.mubr.bf16.mxu1 %v2257_v30 }
  0x69   : > { %777 = vmatmul.mubr.bf16.gmra.mxu0 %v2259_v31  ;;  %905 = vmatmul.mubr.bf16.gmra.mxu1 %v2260_v32 }
  0x6a   : > { %784 = vmatprep.mubr.bf16.mxu0 %v2261_v33  ;;  %912 = vmatprep.mubr.bf16.mxu1 %v2263_v34 }
  0x71   : > { %785 = vmatmul.mubr.bf16.gmra.mxu0 %v2265_v35  ;;  %913 = vmatmul.mubr.bf16.gmra.mxu1 %v2266_v36 }
  0x72   : > { %792 = vmatprep.mubr.bf16.mxu0 %v2267_v37  ;;  %920 = vmatprep.mubr.bf16.mxu1 %v2269_v38 }
  0x79   : > { %793 = vmatmul.mubr.bf16.gmra.mxu0 %v2271_v39  ;;  %921 = vmatmul.mubr.bf16.gmra.mxu1 %v2272_v40 }
  0x7a   : > { %800 = vmatprep.mubr.bf16.mxu0 %v2273_v41  ;;  %928 = vmatprep.mubr.bf16.mxu1 %v2275_v42 }
  0x81   : > { %801 = vmatmul.mubr.bf16.gmra.mxu0 %v2277_v43  ;;  %929 = vmatmul.mubr.bf16.gmra.mxu1 %v2278_v44 }
  0x82   : > { %808 = vmatprep.mubr.bf16.mxu0 %v2279_v45  ;;  %936 = vmatprep.mubr.bf16.mxu1 %v2281_v46 }
  0x89   : > { %809 = vmatmul.mubr.bf16.gmra.mxu0 %v2283_v47  ;;  %937 = vmatmul.mubr.bf16.gmra.mxu1 %v2284_v48 }
  0x8a   : > { %816 = vmatprep.mubr.bf16.mxu0 %v2285_v49  ;;  %944 = vmatprep.mubr.bf16.mxu1 %v2287_v50 }
  0x91   : > { %817 = vmatmul.mubr.bf16.gmra.mxu0 %v2289_v51  ;;  %945 = vmatmul.mubr.bf16.gmra.mxu1 %v2290_v52 }
  0x92   : > { %824 = vmatprep.mubr.bf16.mxu0 %v2291_v53  ;;  %952 = vmatprep.mubr.bf16.mxu1 %v2293_v54 }
  0x99   : > { %825 = vmatmul.mubr.bf16.gmra.mxu0 %v2295_v55  ;;  %953 = vmatmul.mubr.bf16.gmra.mxu1 %v2296_v56 }
  0x9a   : > { %832 = vmatprep.mubr.bf16.mxu0 %v2297_v57  ;;  %960 = vmatprep.mubr.bf16.mxu1 %v2299_v58 }
  0xa1   : > { %833 = vmatmul.mubr.bf16.gmra.mxu0 %v2301_v59  ;;  %961 = vmatmul.mubr.bf16.gmra.mxu1 %v2302_v60 }
  0xa2   : > { %840 = vmatprep.mubr.bf16.mxu0 %v2303_v61  ;;  %968 = vmatprep.mubr.bf16.mxu1 %v2305_v62 }
  0xa9   : > { %841 = vmatmul.mubr.bf16.gmra.mxu0 %v2307_v63  ;;  %969 = vmatmul.mubr.bf16.gmra.mxu1 %v2308_v0 }
  0xaa   : > { %848 = vmatprep.mubr.bf16.mxu0 %v2309_v1  ;;  %976 = vmatprep.mubr.bf16.mxu1 %v2311_v2 }
  0xb1   : > { %849 = vmatmul.mubr.bf16.gmra.mxu0 %v2313_v3  ;;  %977 = vmatmul.mubr.bf16.gmra.mxu1 %v2314_v4 }
  0xb2   : > { %856 = vmatprep.mubr.bf16.mxu0 %v2315_v5  ;;  %984 = vmatprep.mubr.bf16.mxu1 %v2317_v6 }
  0xb9   : > { %857 = vmatmul.mubr.bf16.gmra.mxu0 %v2319_v7  ;;  %985 = vmatmul.mubr.bf16.gmra.mxu1 %v2320_v8 }
  0xba   : > { %864 = vmatprep.mubr.bf16.mxu0 %v2321_v9  ;;  %992 = vmatprep.mubr.bf16.mxu1 %v2323_v10 }
  0xc1   : > { %865 = vmatmul.mubr.bf16.gmra.mxu0 %v2325_v11  ;;  %993 = vmatmul.mubr.bf16.gmra.mxu1 %v2326_v12 }
  0xc2   : > { %872 = vmatprep.mubr.bf16.mxu0 %v2327_v13  ;;  %1000 = vmatprep.mubr.bf16.mxu1 %v2329_v14 }
  0xc9   : > { %873 = vmatmul.mubr.bf16.gmra.mxu0 %v2331_v15  ;;  %1001 = vmatmul.mubr.bf16.gmra.mxu1 %v2332_v16 }
 0x111   : > { %v754_v18 = vpop.f32.mrf.mxu0  ;;  %v882_v19 = vpop.f32.mrf.mxu1 }
 0x112   : > { %v755_v20 = vadd.f32 %v2629_v17, %v754_v18  ;;  %v883_v21 = vadd.f32 %v2629_v17, %v882_v19 }
 0x113   : > { %v756_v22 = vpop.f32.mrf.mxu0  ;;  %v884_v23 = vpop.f32.mrf.mxu1 }
 0x114   : > { %v1009_v24 = vmax.f32 %v755_v20, 0.0  ;;  %v1041_v25 = vmax.f32 %v883_v21, 0.0 }
 0x115   : > { %v757_v26 = vpop.f32.mrf.mxu0  ;;  %v885_v27 = vpop.f32.mrf.mxu1 }
 0x116   : > { %v2033_v28 = vpack.c.bf16 %v1009_v24, %v1009_v24  ;;  %v2065_v29 = vpack.c.bf16 %v1041_v25, %v1041_v25  ;;  %v758_v30 = vadd.f32 %v2629_v17, %v757_v26  ;;  %v886_v31 = vadd.f32 %v2629_v17, %v885_v27 }
 0x117   : > { %v759_v32 = vpop.f32.mrf.mxu0  ;;  %v887_v33 = vpop.f32.mrf.mxu1 }
 0x118   : > { %1330 = vst.msk [vmem:[%s2635_s12] sm:$0xf] %vm1329_vm0, %v2033_v28  ;;  %1362 = vst.msk [vmem:[%s2635_s12 + $0x80] sm:$0xf] %vm1329_vm0, %v2065_v29  ;;  %v1010_v34 = vmax.f32 %v758_v30, 0.0  ;;  %v1042_v35 = vmax.f32 %v886_v31, 0.0 }
 0x119   : > { %v762_v36 = vpop.f32.mrf.mxu0  ;;  %v890_v37 = vpop.f32.mrf.mxu1 }
 0x11a   : > { %v2034_v38 = vpack.c.bf16 %v1010_v34, %v1010_v34  ;;  %v2066_v39 = vpack.c.bf16 %v1042_v35, %v1042_v35  ;;  %v763_v40 = vadd.f32 %v2629_v17, %v762_v36  ;;  %v891_v41 = vadd.f32 %v2629_v17, %v890_v37 }
 0x11b   : > { %v764_v42 = vpop.f32.mrf.mxu0  ;;  %v892_v43 = vpop.f32.mrf.mxu1 }
 0x11c   : > { %1331 = vst.msk [vmem:[%s2635_s12 + $0x4] sm:$0xf] %vm1329_vm0, %v2034_v38  ;;  %1363 = vst.msk [vmem:[%s2635_s12 + $0x84] sm:$0xf] %vm1329_vm0, %v2066_v39  ;;  %v1011_v44 = vmax.f32 %v763_v40, 0.0  ;;  %v1043_v45 = vmax.f32 %v891_v41, 0.0 }
 0x11d   : > { %v765_v46 = vpop.f32.mrf.mxu0  ;;  %v893_v47 = vpop.f32.mrf.mxu1 }
 0x11e   : > { %v2035_v48 = vpack.c.bf16 %v1011_v44, %v1011_v44  ;;  %v2067_v49 = vpack.c.bf16 %v1043_v45, %v1043_v45  ;;  %v766_v50 = vadd.f32 %v2629_v17, %v765_v46  ;;  %v894_v51 = vadd.f32 %v2629_v17, %v893_v47 }
 0x11f   : > { %v767_v52 = vpop.f32.mrf.mxu0  ;;  %v895_v53 = vpop.f32.mrf.mxu1 }
 0x120   : > { %1332 = vst.msk [vmem:[%s2635_s12 + $0x8] sm:$0xf] %vm1329_vm0, %v2035_v48  ;;  %1364 = vst.msk [vmem:[%s2635_s12 + $0x88] sm:$0xf] %vm1329_vm0, %v2067_v49  ;;  %v1012_v54 = vmax.f32 %v766_v50, 0.0  ;;  %v1044_v55 = vmax.f32 %v894_v51, 0.0 }
 0x121   : > { %v770_v56 = vpop.f32.mrf.mxu0  ;;  %v898_v57 = vpop.f32.mrf.mxu1 }
 0x122   : > { %v2036_v58 = vpack.c.bf16 %v1012_v54, %v1012_v54  ;;  %v2068_v59 = vpack.c.bf16 %v1044_v55, %v1044_v55  ;;  %v771_v60 = vadd.f32 %v2629_v17, %v770_v56  ;;  %v899_v61 = vadd.f32 %v2629_v17, %v898_v57 }
 0x123   : > { %v772_v62 = vpop.f32.mrf.mxu0  ;;  %v900_v63 = vpop.f32.mrf.mxu1 }
 0x124   : > { %1333 = vst.msk [vmem:[%s2635_s12 + $0xc] sm:$0xf] %vm1329_vm0, %v2036_v58  ;;  %1365 = vst.msk [vmem:[%s2635_s12 + $0x8c] sm:$0xf] %vm1329_vm0, %v2068_v59  ;;  %v1013_v0 = vmax.f32 %v771_v60, 0.0  ;;  %v1045_v1 = vmax.f32 %v899_v61, 0.0 }
 0x125   : > { %v773_v2 = vpop.f32.mrf.mxu0  ;;  %v901_v3 = vpop.f32.mrf.mxu1 }
 0x126   : > { %v2037_v4 = vpack.c.bf16 %v1013_v0, %v1013_v0  ;;  %v2069_v5 = vpack.c.bf16 %v1045_v1, %v1045_v1  ;;  %v774_v6 = vadd.f32 %v2629_v17, %v773_v2  ;;  %v902_v7 = vadd.f32 %v2629_v17, %v901_v3 }
 0x127   : > { %v775_v8 = vpop.f32.mrf.mxu0  ;;  %v903_v9 = vpop.f32.mrf.mxu1 }
 0x128   : > { %1334 = vst.msk [vmem:[%s2635_s12 + $0x10] sm:$0xf] %vm1329_vm0, %v2037_v4  ;;  %1366 = vst.msk [vmem:[%s2635_s12 + $0x90] sm:$0xf] %vm1329_vm0, %v2069_v5  ;;  %v1014_v10 = vmax.f32 %v774_v6, 0.0  ;;  %v1046_v11 = vmax.f32 %v902_v7, 0.0 }
 0x129   : > { %v778_v12 = vpop.f32.mrf.mxu0  ;;  %v906_v13 = vpop.f32.mrf.mxu1 }
 0x12a   : > { %v2038_v14 = vpack.c.bf16 %v1014_v10, %v1014_v10  ;;  %v2070_v15 = vpack.c.bf16 %v1046_v11, %v1046_v11  ;;  %v779_v16 = vadd.f32 %v2629_v17, %v778_v12  ;;  %v907_v18 = vadd.f32 %v2629_v17, %v906_v13 }
 0x12b   : > { %v780_v19 = vpop.f32.mrf.mxu0  ;;  %v908_v20 = vpop.f32.mrf.mxu1 }
 0x12c   : > { %1335 = vst.msk [vmem:[%s2635_s12 + $0x14] sm:$0xf] %vm1329_vm0, %v2038_v14  ;;  %1367 = vst.msk [vmem:[%s2635_s12 + $0x94] sm:$0xf] %vm1329_vm0, %v2070_v15  ;;  %v1015_v21 = vmax.f32 %v779_v16, 0.0  ;;  %v1047_v22 = vmax.f32 %v907_v18, 0.0 }
 0x12d   : > { %v781_v23 = vpop.f32.mrf.mxu0  ;;  %v909_v24 = vpop.f32.mrf.mxu1 }
 0x12e   : > { %v2039_v25 = vpack.c.bf16 %v1015_v21, %v1015_v21  ;;  %v2071_v26 = vpack.c.bf16 %v1047_v22, %v1047_v22  ;;  %v782_v27 = vadd.f32 %v2629_v17, %v781_v23  ;;  %v910_v28 = vadd.f32 %v2629_v17, %v909_v24 }
 0x12f   : > { %v783_v29 = vpop.f32.mrf.mxu0  ;;  %v911_v30 = vpop.f32.mrf.mxu1 }
 0x130   : > { %1336 = vst.msk [vmem:[%s2635_s12 + $0x18] sm:$0xf] %vm1329_vm0, %v2039_v25  ;;  %1368 = vst.msk [vmem:[%s2635_s12 + $0x98] sm:$0xf] %vm1329_vm0, %v2071_v26  ;;  %v1016_v31 = vmax.f32 %v782_v27, 0.0  ;;  %v1048_v32 = vmax.f32 %v910_v28, 0.0 }
 0x131   : > { %v786_v33 = vpop.f32.mrf.mxu0  ;;  %v914_v34 = vpop.f32.mrf.mxu1 }
 0x132   : > { %v2040_v35 = vpack.c.bf16 %v1016_v31, %v1016_v31  ;;  %v2072_v36 = vpack.c.bf16 %v1048_v32, %v1048_v32  ;;  %v787_v37 = vadd.f32 %v2629_v17, %v786_v33  ;;  %v915_v38 = vadd.f32 %v2629_v17, %v914_v34 }
 0x133   : > { %v788_v39 = vpop.f32.mrf.mxu0  ;;  %v916_v40 = vpop.f32.mrf.mxu1 }
 0x134   : > { %1337 = vst.msk [vmem:[%s2635_s12 + $0x1c] sm:$0xf] %vm1329_vm0, %v2040_v35  ;;  %1369 = vst.msk [vmem:[%s2635_s12 + $0x9c] sm:$0xf] %vm1329_vm0, %v2072_v36  ;;  %v1017_v41 = vmax.f32 %v787_v37, 0.0  ;;  %v1049_v42 = vmax.f32 %v915_v38, 0.0 }
 0x135   : > { %v789_v43 = vpop.f32.mrf.mxu0  ;;  %v917_v44 = vpop.f32.mrf.mxu1 }
 0x136   : > { %v2041_v45 = vpack.c.bf16 %v1017_v41, %v1017_v41  ;;  %v2073_v46 = vpack.c.bf16 %v1049_v42, %v1049_v42  ;;  %v790_v47 = vadd.f32 %v2629_v17, %v789_v43  ;;  %v918_v48 = vadd.f32 %v2629_v17, %v917_v44 }
 0x137   : > { %v791_v49 = vpop.f32.mrf.mxu0  ;;  %v919_v50 = vpop.f32.mrf.mxu1 }
 0x138   : > { %1338 = vst.msk [vmem:[%s2635_s12 + $0x20] sm:$0xf] %vm1329_vm0, %v2041_v45  ;;  %1370 = vst.msk [vmem:[%s2635_s12 + $0xa0] sm:$0xf] %vm1329_vm0, %v2073_v46  ;;  %v1018_v51 = vmax.f32 %v790_v47, 0.0  ;;  %v1050_v52 = vmax.f32 %v918_v48, 0.0 }
 0x139   : > { %v794_v53 = vpop.f32.mrf.mxu0  ;;  %v922_v54 = vpop.f32.mrf.mxu1 }
 0x13a   : > { %v2042_v55 = vpack.c.bf16 %v1018_v51, %v1018_v51  ;;  %v2074_v56 = vpack.c.bf16 %v1050_v52, %v1050_v52  ;;  %v795_v57 = vadd.f32 %v2629_v17, %v794_v53  ;;  %v923_v58 = vadd.f32 %v2629_v17, %v922_v54 }
 0x13b   : > { %v796_v59 = vpop.f32.mrf.mxu0  ;;  %v924_v60 = vpop.f32.mrf.mxu1 }
 0x13c   : > { %1339 = vst.msk [vmem:[%s2635_s12 + $0x24] sm:$0xf] %vm1329_vm0, %v2042_v55  ;;  %1371 = vst.msk [vmem:[%s2635_s12 + $0xa4] sm:$0xf] %vm1329_vm0, %v2074_v56  ;;  %v1019_v61 = vmax.f32 %v795_v57, 0.0  ;;  %v1051_v62 = vmax.f32 %v923_v58, 0.0 }
 0x13d   : > { %v797_v63 = vpop.f32.mrf.mxu0  ;;  %v925_v0 = vpop.f32.mrf.mxu1 }
 0x13e   : > { %v2043_v1 = vpack.c.bf16 %v1019_v61, %v1019_v61  ;;  %v2075_v2 = vpack.c.bf16 %v1051_v62, %v1051_v62  ;;  %v798_v3 = vadd.f32 %v2629_v17, %v797_v63  ;;  %v926_v4 = vadd.f32 %v2629_v17, %v925_v0 }
 0x13f   : > { %v799_v5 = vpop.f32.mrf.mxu0  ;;  %v927_v6 = vpop.f32.mrf.mxu1 }
 0x140   : > { %1340 = vst.msk [vmem:[%s2635_s12 + $0x28] sm:$0xf] %vm1329_vm0, %v2043_v1  ;;  %1372 = vst.msk [vmem:[%s2635_s12 + $0xa8] sm:$0xf] %vm1329_vm0, %v2075_v2  ;;  %v1020_v7 = vmax.f32 %v798_v3, 0.0  ;;  %v1052_v8 = vmax.f32 %v926_v4, 0.0 }
 0x141   : > { %v802_v9 = vpop.f32.mrf.mxu0  ;;  %v930_v10 = vpop.f32.mrf.mxu1 }
 0x142   : > { %v2044_v11 = vpack.c.bf16 %v1020_v7, %v1020_v7  ;;  %v2076_v12 = vpack.c.bf16 %v1052_v8, %v1052_v8  ;;  %v803_v13 = vadd.f32 %v2629_v17, %v802_v9  ;;  %v931_v14 = vadd.f32 %v2629_v17, %v930_v10 }
 0x143   : > { %v804_v15 = vpop.f32.mrf.mxu0  ;;  %v932_v16 = vpop.f32.mrf.mxu1 }
 0x144   : > { %1341 = vst.msk [vmem:[%s2635_s12 + $0x2c] sm:$0xf] %vm1329_vm0, %v2044_v11  ;;  %1373 = vst.msk [vmem:[%s2635_s12 + $0xac] sm:$0xf] %vm1329_vm0, %v2076_v12  ;;  %v1021_v18 = vmax.f32 %v803_v13, 0.0  ;;  %v1053_v19 = vmax.f32 %v931_v14, 0.0 }
 0x145   : > { %v805_v20 = vpop.f32.mrf.mxu0  ;;  %v933_v21 = vpop.f32.mrf.mxu1 }
 0x146   : > { %v2045_v22 = vpack.c.bf16 %v1021_v18, %v1021_v18  ;;  %v2077_v23 = vpack.c.bf16 %v1053_v19, %v1053_v19  ;;  %v806_v24 = vadd.f32 %v2629_v17, %v805_v20  ;;  %v934_v25 = vadd.f32 %v2629_v17, %v933_v21 }
 0x147   : > { %v807_v26 = vpop.f32.mrf.mxu0  ;;  %v935_v27 = vpop.f32.mrf.mxu1 }
 0x148   : > { %1342 = vst.msk [vmem:[%s2635_s12 + $0x30] sm:$0xf] %vm1329_vm0, %v2045_v22  ;;  %1374 = vst.msk [vmem:[%s2635_s12 + $0xb0] sm:$0xf] %vm1329_vm0, %v2077_v23  ;;  %v1022_v28 = vmax.f32 %v806_v24, 0.0  ;;  %v1054_v29 = vmax.f32 %v934_v25, 0.0 }
 0x149   : > { %v810_v30 = vpop.f32.mrf.mxu0  ;;  %v938_v31 = vpop.f32.mrf.mxu1 }
 0x14a   : > { %v2046_v32 = vpack.c.bf16 %v1022_v28, %v1022_v28  ;;  %v2078_v33 = vpack.c.bf16 %v1054_v29, %v1054_v29  ;;  %v811_v34 = vadd.f32 %v2629_v17, %v810_v30  ;;  %v939_v35 = vadd.f32 %v2629_v17, %v938_v31 }
 0x14b   : > { %v812_v36 = vpop.f32.mrf.mxu0  ;;  %v940_v37 = vpop.f32.mrf.mxu1 }
 0x14c   : > { %1343 = vst.msk [vmem:[%s2635_s12 + $0x34] sm:$0xf] %vm1329_vm0, %v2046_v32  ;;  %1375 = vst.msk [vmem:[%s2635_s12 + $0xb4] sm:$0xf] %vm1329_vm0, %v2078_v33  ;;  %v1023_v38 = vmax.f32 %v811_v34, 0.0  ;;  %v1055_v39 = vmax.f32 %v939_v35, 0.0 }
 0x14d   : > { %v813_v40 = vpop.f32.mrf.mxu0  ;;  %v941_v41 = vpop.f32.mrf.mxu1 }
 0x14e   : > { %v2047_v42 = vpack.c.bf16 %v1023_v38, %v1023_v38  ;;  %v2079_v43 = vpack.c.bf16 %v1055_v39, %v1055_v39  ;;  %v814_v44 = vadd.f32 %v2629_v17, %v813_v40  ;;  %v942_v45 = vadd.f32 %v2629_v17, %v941_v41 }
 0x14f   : > { %v815_v46 = vpop.f32.mrf.mxu0  ;;  %v943_v47 = vpop.f32.mrf.mxu1 }
 0x150   : > { %1344 = vst.msk [vmem:[%s2635_s12 + $0x38] sm:$0xf] %vm1329_vm0, %v2047_v42  ;;  %1376 = vst.msk [vmem:[%s2635_s12 + $0xb8] sm:$0xf] %vm1329_vm0, %v2079_v43  ;;  %v1024_v48 = vmax.f32 %v814_v44, 0.0  ;;  %v1056_v49 = vmax.f32 %v942_v45, 0.0 }
 0x151   : > { %v818_v50 = vpop.f32.mrf.mxu0  ;;  %v946_v51 = vpop.f32.mrf.mxu1 }
 0x152   : > { %v2048_v52 = vpack.c.bf16 %v1024_v48, %v1024_v48  ;;  %v2080_v53 = vpack.c.bf16 %v1056_v49, %v1056_v49  ;;  %v819_v54 = vadd.f32 %v2629_v17, %v818_v50  ;;  %v947_v55 = vadd.f32 %v2629_v17, %v946_v51 }
 0x153   : > { %v820_v56 = vpop.f32.mrf.mxu0  ;;  %v948_v57 = vpop.f32.mrf.mxu1 }
 0x154   : > { %1345 = vst.msk [vmem:[%s2635_s12 + $0x3c] sm:$0xf] %vm1329_vm0, %v2048_v52  ;;  %1377 = vst.msk [vmem:[%s2635_s12 + $0xbc] sm:$0xf] %vm1329_vm0, %v2080_v53  ;;  %v1025_v58 = vmax.f32 %v819_v54, 0.0  ;;  %v1057_v59 = vmax.f32 %v947_v55, 0.0 }
 0x155   : > { %v821_v60 = vpop.f32.mrf.mxu0  ;;  %v949_v61 = vpop.f32.mrf.mxu1 }
 0x156   : > { %v2049_v62 = vpack.c.bf16 %v1025_v58, %v1025_v58  ;;  %v2081_v63 = vpack.c.bf16 %v1057_v59, %v1057_v59  ;;  %v822_v0 = vadd.f32 %v2629_v17, %v821_v60  ;;  %v950_v1 = vadd.f32 %v2629_v17, %v949_v61 }
 0x157   : > { %v823_v2 = vpop.f32.mrf.mxu0  ;;  %v951_v3 = vpop.f32.mrf.mxu1 }
 0x158   : > { %1346 = vst.msk [vmem:[%s2635_s12 + $0x40] sm:$0xf] %vm1329_vm0, %v2049_v62  ;;  %1378 = vst.msk [vmem:[%s2635_s12 + $0xc0] sm:$0xf] %vm1329_vm0, %v2081_v63  ;;  %v1026_v4 = vmax.f32 %v822_v0, 0.0  ;;  %v1058_v5 = vmax.f32 %v950_v1, 0.0 }
 0x159   : > { %v826_v6 = vpop.f32.mrf.mxu0  ;;  %v954_v7 = vpop.f32.mrf.mxu1 }
 0x15a   : > { %v2050_v8 = vpack.c.bf16 %v1026_v4, %v1026_v4  ;;  %v2082_v9 = vpack.c.bf16 %v1058_v5, %v1058_v5  ;;  %v827_v10 = vadd.f32 %v2629_v17, %v826_v6  ;;  %v955_v11 = vadd.f32 %v2629_v17, %v954_v7 }
 0x15b   : > { %v828_v12 = vpop.f32.mrf.mxu0  ;;  %v956_v13 = vpop.f32.mrf.mxu1 }
 0x15c   : > { %1347 = vst.msk [vmem:[%s2635_s12 + $0x44] sm:$0xf] %vm1329_vm0, %v2050_v8  ;;  %1379 = vst.msk [vmem:[%s2635_s12 + $0xc4] sm:$0xf] %vm1329_vm0, %v2082_v9  ;;  %v1027_v14 = vmax.f32 %v827_v10, 0.0  ;;  %v1059_v15 = vmax.f32 %v955_v11, 0.0 }
 0x15d   : > { %v829_v16 = vpop.f32.mrf.mxu0  ;;  %v957_v18 = vpop.f32.mrf.mxu1 }
 0x15e   : > { %v2051_v19 = vpack.c.bf16 %v1027_v14, %v1027_v14  ;;  %v2083_v20 = vpack.c.bf16 %v1059_v15, %v1059_v15  ;;  %v830_v21 = vadd.f32 %v2629_v17, %v829_v16  ;;  %v958_v22 = vadd.f32 %v2629_v17, %v957_v18 }
 0x15f   : > { %v831_v23 = vpop.f32.mrf.mxu0  ;;  %v959_v24 = vpop.f32.mrf.mxu1 }
 0x160   : > { %1348 = vst.msk [vmem:[%s2635_s12 + $0x48] sm:$0xf] %vm1329_vm0, %v2051_v19  ;;  %1380 = vst.msk [vmem:[%s2635_s12 + $0xc8] sm:$0xf] %vm1329_vm0, %v2083_v20  ;;  %v1028_v25 = vmax.f32 %v830_v21, 0.0  ;;  %v1060_v26 = vmax.f32 %v958_v22, 0.0 }
 0x161   : > { %v834_v27 = vpop.f32.mrf.mxu0  ;;  %v962_v28 = vpop.f32.mrf.mxu1 }
 0x162   : > { %v2052_v29 = vpack.c.bf16 %v1028_v25, %v1028_v25  ;;  %v2084_v30 = vpack.c.bf16 %v1060_v26, %v1060_v26  ;;  %v835_v31 = vadd.f32 %v2629_v17, %v834_v27  ;;  %v963_v32 = vadd.f32 %v2629_v17, %v962_v28 }
 0x163   : > { %v836_v33 = vpop.f32.mrf.mxu0  ;;  %v964_v34 = vpop.f32.mrf.mxu1 }
 0x164   : > { %1349 = vst.msk [vmem:[%s2635_s12 + $0x4c] sm:$0xf] %vm1329_vm0, %v2052_v29  ;;  %1381 = vst.msk [vmem:[%s2635_s12 + $0xcc] sm:$0xf] %vm1329_vm0, %v2084_v30  ;;  %v1029_v35 = vmax.f32 %v835_v31, 0.0  ;;  %v1061_v36 = vmax.f32 %v963_v32, 0.0 }
 0x165   : > { %v837_v37 = vpop.f32.mrf.mxu0  ;;  %v965_v38 = vpop.f32.mrf.mxu1 }
 0x166   : > { %v2053_v39 = vpack.c.bf16 %v1029_v35, %v1029_v35  ;;  %v2085_v40 = vpack.c.bf16 %v1061_v36, %v1061_v36  ;;  %v838_v41 = vadd.f32 %v2629_v17, %v837_v37  ;;  %v966_v42 = vadd.f32 %v2629_v17, %v965_v38 }
 0x167   : > { %v839_v43 = vpop.f32.mrf.mxu0  ;;  %v967_v44 = vpop.f32.mrf.mxu1 }
 0x168   : > { %1350 = vst.msk [vmem:[%s2635_s12 + $0x50] sm:$0xf] %vm1329_vm0, %v2053_v39  ;;  %1382 = vst.msk [vmem:[%s2635_s12 + $0xd0] sm:$0xf] %vm1329_vm0, %v2085_v40  ;;  %v1030_v45 = vmax.f32 %v838_v41, 0.0  ;;  %v1062_v46 = vmax.f32 %v966_v42, 0.0 }
 0x169   : > { %v842_v47 = vpop.f32.mrf.mxu0  ;;  %v970_v48 = vpop.f32.mrf.mxu1 }
 0x16a   : > { %v2054_v49 = vpack.c.bf16 %v1030_v45, %v1030_v45  ;;  %v2086_v50 = vpack.c.bf16 %v1062_v46, %v1062_v46  ;;  %v843_v51 = vadd.f32 %v2629_v17, %v842_v47  ;;  %v971_v52 = vadd.f32 %v2629_v17, %v970_v48 }
 0x16b   : > { %v844_v53 = vpop.f32.mrf.mxu0  ;;  %v972_v54 = vpop.f32.mrf.mxu1 }
 0x16c   : > { %1351 = vst.msk [vmem:[%s2635_s12 + $0x54] sm:$0xf] %vm1329_vm0, %v2054_v49  ;;  %1383 = vst.msk [vmem:[%s2635_s12 + $0xd4] sm:$0xf] %vm1329_vm0, %v2086_v50  ;;  %v1031_v55 = vmax.f32 %v843_v51, 0.0  ;;  %v1063_v56 = vmax.f32 %v971_v52, 0.0 }
 0x16d   : > { %v845_v57 = vpop.f32.mrf.mxu0  ;;  %v973_v58 = vpop.f32.mrf.mxu1 }
 0x16e   : > { %v2055_v59 = vpack.c.bf16 %v1031_v55, %v1031_v55  ;;  %v2087_v60 = vpack.c.bf16 %v1063_v56, %v1063_v56  ;;  %v846_v61 = vadd.f32 %v2629_v17, %v845_v57  ;;  %v974_v62 = vadd.f32 %v2629_v17, %v973_v58 }
 0x16f   : > { %v847_v63 = vpop.f32.mrf.mxu0  ;;  %v975_v0 = vpop.f32.mrf.mxu1 }
 0x170   : > { %1352 = vst.msk [vmem:[%s2635_s12 + $0x58] sm:$0xf] %vm1329_vm0, %v2055_v59  ;;  %1384 = vst.msk [vmem:[%s2635_s12 + $0xd8] sm:$0xf] %vm1329_vm0, %v2087_v60  ;;  %v1032_v1 = vmax.f32 %v846_v61, 0.0  ;;  %v1064_v2 = vmax.f32 %v974_v62, 0.0 }
 0x171   : > { %v850_v3 = vpop.f32.mrf.mxu0  ;;  %v978_v4 = vpop.f32.mrf.mxu1 }
 0x172   : > { %v2056_v5 = vpack.c.bf16 %v1032_v1, %v1032_v1  ;;  %v2088_v6 = vpack.c.bf16 %v1064_v2, %v1064_v2  ;;  %v851_v7 = vadd.f32 %v2629_v17, %v850_v3  ;;  %v979_v8 = vadd.f32 %v2629_v17, %v978_v4 }
 0x173   : > { %v852_v9 = vpop.f32.mrf.mxu0  ;;  %v980_v10 = vpop.f32.mrf.mxu1 }
 0x174   : > { %1353 = vst.msk [vmem:[%s2635_s12 + $0x5c] sm:$0xf] %vm1329_vm0, %v2056_v5  ;;  %1385 = vst.msk [vmem:[%s2635_s12 + $0xdc] sm:$0xf] %vm1329_vm0, %v2088_v6  ;;  %v1033_v11 = vmax.f32 %v851_v7, 0.0  ;;  %v1065_v12 = vmax.f32 %v979_v8, 0.0 }
 0x175   : > { %v853_v13 = vpop.f32.mrf.mxu0  ;;  %v981_v14 = vpop.f32.mrf.mxu1 }
 0x176   : > { %v2057_v15 = vpack.c.bf16 %v1033_v11, %v1033_v11  ;;  %v2089_v16 = vpack.c.bf16 %v1065_v12, %v1065_v12  ;;  %v854_v18 = vadd.f32 %v2629_v17, %v853_v13  ;;  %v982_v19 = vadd.f32 %v2629_v17, %v981_v14 }
 0x177   : > { %v855_v20 = vpop.f32.mrf.mxu0  ;;  %v983_v21 = vpop.f32.mrf.mxu1 }
 0x178   : > { %1354 = vst.msk [vmem:[%s2635_s12 + $0x60] sm:$0xf] %vm1329_vm0, %v2057_v15  ;;  %1386 = vst.msk [vmem:[%s2635_s12 + $0xe0] sm:$0xf] %vm1329_vm0, %v2089_v16  ;;  %v1034_v22 = vmax.f32 %v854_v18, 0.0  ;;  %v1066_v23 = vmax.f32 %v982_v19, 0.0 }
 0x179   : > { %v858_v24 = vpop.f32.mrf.mxu0  ;;  %v986_v25 = vpop.f32.mrf.mxu1 }
 0x17a   : > { %v2058_v26 = vpack.c.bf16 %v1034_v22, %v1034_v22  ;;  %v2090_v27 = vpack.c.bf16 %v1066_v23, %v1066_v23  ;;  %v859_v28 = vadd.f32 %v2629_v17, %v858_v24  ;;  %v987_v29 = vadd.f32 %v2629_v17, %v986_v25 }
 0x17b   : > { %v860_v30 = vpop.f32.mrf.mxu0  ;;  %v988_v31 = vpop.f32.mrf.mxu1 }
 0x17c   : > { %1355 = vst.msk [vmem:[%s2635_s12 + $0x64] sm:$0xf] %vm1329_vm0, %v2058_v26  ;;  %1387 = vst.msk [vmem:[%s2635_s12 + $0xe4] sm:$0xf] %vm1329_vm0, %v2090_v27  ;;  %v1035_v32 = vmax.f32 %v859_v28, 0.0  ;;  %v1067_v33 = vmax.f32 %v987_v29, 0.0 }
 0x17d   : > { %v861_v34 = vpop.f32.mrf.mxu0  ;;  %v989_v35 = vpop.f32.mrf.mxu1 }
 0x17e   : > { %v2059_v36 = vpack.c.bf16 %v1035_v32, %v1035_v32  ;;  %v2091_v37 = vpack.c.bf16 %v1067_v33, %v1067_v33  ;;  %v862_v38 = vadd.f32 %v2629_v17, %v861_v34  ;;  %v990_v39 = vadd.f32 %v2629_v17, %v989_v35 }
 0x17f   : > { %v863_v40 = vpop.f32.mrf.mxu0  ;;  %v991_v41 = vpop.f32.mrf.mxu1 }
 0x180   : > { %1356 = vst.msk [vmem:[%s2635_s12 + $0x68] sm:$0xf] %vm1329_vm0, %v2059_v36  ;;  %1388 = vst.msk [vmem:[%s2635_s12 + $0xe8] sm:$0xf] %vm1329_vm0, %v2091_v37  ;;  %v1036_v42 = vmax.f32 %v862_v38, 0.0  ;;  %v1068_v43 = vmax.f32 %v990_v39, 0.0 }
 0x181   : > { %v866_v44 = vpop.f32.mrf.mxu0  ;;  %v994_v45 = vpop.f32.mrf.mxu1 }
 0x182   : > { %v2060_v46 = vpack.c.bf16 %v1036_v42, %v1036_v42  ;;  %v2092_v47 = vpack.c.bf16 %v1068_v43, %v1068_v43  ;;  %v867_v48 = vadd.f32 %v2629_v17, %v866_v44  ;;  %v995_v49 = vadd.f32 %v2629_v17, %v994_v45 }
 0x183   : > { %v868_v50 = vpop.f32.mrf.mxu0  ;;  %v996_v51 = vpop.f32.mrf.mxu1 }
 0x184   : > { %1357 = vst.msk [vmem:[%s2635_s12 + $0x6c] sm:$0xf] %vm1329_vm0, %v2060_v46  ;;  %1389 = vst.msk [vmem:[%s2635_s12 + $0xec] sm:$0xf] %vm1329_vm0, %v2092_v47  ;;  %v1037_v52 = vmax.f32 %v867_v48, 0.0  ;;  %v1069_v53 = vmax.f32 %v995_v49, 0.0 }
 0x185   : > { %v869_v54 = vpop.f32.mrf.mxu0  ;;  %v997_v55 = vpop.f32.mrf.mxu1 }
 0x186   : > { %v2061_v56 = vpack.c.bf16 %v1037_v52, %v1037_v52  ;;  %v2093_v57 = vpack.c.bf16 %v1069_v53, %v1069_v53  ;;  %v870_v58 = vadd.f32 %v2629_v17, %v869_v54  ;;  %v998_v59 = vadd.f32 %v2629_v17, %v997_v55 }
 0x187   : > { %v871_v60 = vpop.f32.mrf.mxu0  ;;  %v999_v61 = vpop.f32.mrf.mxu1 }
 0x188   : > { %1358 = vst.msk [vmem:[%s2635_s12 + $0x70] sm:$0xf] %vm1329_vm0, %v2061_v56  ;;  %1390 = vst.msk [vmem:[%s2635_s12 + $0xf0] sm:$0xf] %vm1329_vm0, %v2093_v57  ;;  %v1038_v62 = vmax.f32 %v870_v58, 0.0  ;;  %v1070_v63 = vmax.f32 %v998_v59, 0.0 }
 0x189   : > { %v874_v0 = vpop.f32.mrf.mxu0  ;;  %v1002_v1 = vpop.f32.mrf.mxu1 }
 0x18a   : > { %v2062_v2 = vpack.c.bf16 %v1038_v62, %v1038_v62  ;;  %v2094_v3 = vpack.c.bf16 %v1070_v63, %v1070_v63  ;;  %v875_v4 = vadd.f32 %v2629_v17, %v874_v0  ;;  %v1003_v5 = vadd.f32 %v2629_v17, %v1002_v1 }
 0x18b   : > { %v876_v6 = vpop.f32.mrf.mxu0  ;;  %v1004_v7 = vpop.f32.mrf.mxu1 }
 0x18c   : > { %1359 = vst.msk [vmem:[%s2635_s12 + $0x74] sm:$0xf] %vm1329_vm0, %v2062_v2  ;;  %1391 = vst.msk [vmem:[%s2635_s12 + $0xf4] sm:$0xf] %vm1329_vm0, %v2094_v3  ;;  %v1039_v8 = vmax.f32 %v875_v4, 0.0  ;;  %v1071_v9 = vmax.f32 %v1003_v5, 0.0 }
 0x18d   : > { %v877_v10 = vpop.f32.mrf.mxu0  ;;  %v1005_v11 = vpop.f32.mrf.mxu1 }
 0x18e   : > { %v2063_v12 = vpack.c.bf16 %v1039_v8, %v1039_v8  ;;  %v2095_v13 = vpack.c.bf16 %v1071_v9, %v1071_v9  ;;  %v878_v14 = vadd.f32 %v2629_v17, %v877_v10  ;;  %v1006_v15 = vadd.f32 %v2629_v17, %v1005_v11 }
 0x18f   : > { %v879_v16 = vpop.f32.mrf.mxu0  ;;  %v1007_v18 = vpop.f32.mrf.mxu1 }
 0x190   : > { %1360 = vst.msk [vmem:[%s2635_s12 + $0x78] sm:$0xf] %vm1329_vm0, %v2063_v12  ;;  %1392 = vst.msk [vmem:[%s2635_s12 + $0xf8] sm:$0xf] %vm1329_vm0, %v2095_v13  ;;  %v1040_v19 = vmax.f32 %v878_v14, 0.0  ;;  %v1072_v20 = vmax.f32 %v1006_v15, 0.0 }
 0x191   : > { %1400 = sbr.rel (!%p2467_p4) target bundleno = 487 (0x1e7), region = 36 }
 0x192   : > { %v2064_v21 = vpack.c.bf16 %v1040_v19, %v1040_v19  ;;  %v2096_v22 = vpack.c.bf16 %v1072_v20, %v1072_v20 }
 0x194   : > { %1361 = vst.msk [vmem:[%s2635_s12 + $0x7c] sm:$0xf] %vm1329_vm0, %v2064_v21  ;;  %1393 = vst.msk [vmem:[%s2635_s12 + $0xfc] sm:$0xf] %vm1329_vm0, %v2096_v22 }
 0x196   : > { %s3036_s9 = smov (!%p1403_p8, %s1402_s9), 64 }
 0x197   : > { %s2017_s28 = sshll.u32 %s3036_s9, 6 }
 0x198   : > { %p2020_p9 = scmp.eq.s32.totalorder %s2017_s28, 0 }
 0x199   : > { %s2838_s29 = sshrl.u32 (!%p2020_p9), %s3036_s9, 6 }
 0x19a   : > { %1411 = sbr.rel (%p2020_p9) target bundleno = 487 (0x1e7), region = 40  ;;  %p2021_p10 = scmp.le.s32.totalorder (!%p2020_p9), %s2838_s29, 0 }
 0x19f   : > { %1818 = sbr.rel (%p2021_p10) target bundleno = 470 (0x1d6), region = 112  ;;  %s3029_s15 = smov (!%p2021_p10), %s2832_s27 }
 0x1a0   : > { %s3030_s20 = smov (!%p2021_p10), %s2635_s12  ;;  %s2847_s23 = smov (!%p2021_p10), 0  }
 0x1a1   : > { %s2849_s30 = smov (!%p2021_p10), 0  }
 0x1a4 LB: >> { %v1428_v17 = vld [vmem:[%s2395_s20] sm:$0xf]  ;;  %v1430_v23 = vld [vmem:[%s2395_s20 + $0x4] sm:$0xf]  ;;  %v1432_v24 = vld [vmem:[%s2395_s20 + $0x8] sm:$0xf]  ;;  %s2403_s30 = sphi %s2849_s30, %s1422_s30   ;;  %s2399_s23 = sphi %s2847_s23, %s3031_s23   ;;  %s2395_s20 = sphi %s3030_s20, %s1561_s20   ;;  %s2391_s15 = sphi %s3029_s15, %s1562_s15  }
 0x1a5   : >> { %1429 = vst [vmem:[%s2391_s15] sm:$0xf] %v1428_v17  ;;  %1431 = vst [vmem:[%s2391_s15 + $0x4] sm:$0xf] %v1430_v23  ;;  %v1434_v25 = vld [vmem:[%s2395_s20 + $0xc] sm:$0xf]  ;;  %s1556_s4 = sadd.s32 1, %s2399_s23 }
 0x1a6   : >> { %1433 = vst [vmem:[%s2391_s15 + $0x8] sm:$0xf] %v1432_v24  ;;  %v1436_v26 = vld [vmem:[%s2395_s20 + $0x10] sm:$0xf]  ;;  %v1438_v27 = vld [vmem:[%s2395_s20 + $0x14] sm:$0xf]  ;;  %p1557_p11 = scmp.ge.s32.totalorder %s1556_s4, %s2838_s29 }
 0x1a7   : >> { %1435 = vst [vmem:[%s2391_s15 + $0xc] sm:$0xf] %v1434_v25  ;;  %1437 = vst [vmem:[%s2391_s15 + $0x10] sm:$0xf] %v1436_v26  ;;  %v1440_v28 = vld [vmem:[%s2395_s20 + $0x18] sm:$0xf] }
 0x1a8   : >> { %1439 = vst [vmem:[%s2391_s15 + $0x14] sm:$0xf] %v1438_v27  ;;  %v1442_v29 = vld [vmem:[%s2395_s20 + $0x1c] sm:$0xf]  ;;  %v1444_v30 = vld [vmem:[%s2395_s20 + $0x20] sm:$0xf] }
 0x1a9   : >> { %1441 = vst [vmem:[%s2391_s15 + $0x18] sm:$0xf] %v1440_v28  ;;  %1443 = vst [vmem:[%s2391_s15 + $0x1c] sm:$0xf] %v1442_v29  ;;  %v1446_v31 = vld [vmem:[%s2395_s20 + $0x24] sm:$0xf] }
 0x1aa   : >> { %1445 = vst [vmem:[%s2391_s15 + $0x20] sm:$0xf] %v1444_v30  ;;  %v1448_v32 = vld [vmem:[%s2395_s20 + $0x28] sm:$0xf]  ;;  %v1450_v33 = vld [vmem:[%s2395_s20 + $0x2c] sm:$0xf] }
 0x1ab   : >> { %1447 = vst [vmem:[%s2391_s15 + $0x24] sm:$0xf] %v1446_v31  ;;  %1449 = vst [vmem:[%s2391_s15 + $0x28] sm:$0xf] %v1448_v32  ;;  %v1452_v34 = vld [vmem:[%s2395_s20 + $0x30] sm:$0xf] }
 0x1ac   : >> { %1451 = vst [vmem:[%s2391_s15 + $0x2c] sm:$0xf] %v1450_v33  ;;  %v1454_v35 = vld [vmem:[%s2395_s20 + $0x34] sm:$0xf]  ;;  %v1456_v36 = vld [vmem:[%s2395_s20 + $0x38] sm:$0xf] }
 0x1ad   : >> { %1453 = vst [vmem:[%s2391_s15 + $0x30] sm:$0xf] %v1452_v34  ;;  %1455 = vst [vmem:[%s2391_s15 + $0x34] sm:$0xf] %v1454_v35  ;;  %v1458_v37 = vld [vmem:[%s2395_s20 + $0x3c] sm:$0xf] }
 0x1ae   : >> { %1457 = vst [vmem:[%s2391_s15 + $0x38] sm:$0xf] %v1456_v36  ;;  %v1460_v38 = vld [vmem:[%s2395_s20 + $0x40] sm:$0xf]  ;;  %v1462_v39 = vld [vmem:[%s2395_s20 + $0x44] sm:$0xf] }
 0x1af   : >> { %1459 = vst [vmem:[%s2391_s15 + $0x3c] sm:$0xf] %v1458_v37  ;;  %1461 = vst [vmem:[%s2391_s15 + $0x40] sm:$0xf] %v1460_v38  ;;  %v1464_v40 = vld [vmem:[%s2395_s20 + $0x48] sm:$0xf] }
 0x1b0   : >> { %1463 = vst [vmem:[%s2391_s15 + $0x44] sm:$0xf] %v1462_v39  ;;  %v1466_v41 = vld [vmem:[%s2395_s20 + $0x4c] sm:$0xf]  ;;  %v1468_v42 = vld [vmem:[%s2395_s20 + $0x50] sm:$0xf] }
 0x1b1   : >> { %1465 = vst [vmem:[%s2391_s15 + $0x48] sm:$0xf] %v1464_v40  ;;  %1467 = vst [vmem:[%s2391_s15 + $0x4c] sm:$0xf] %v1466_v41  ;;  %v1470_v43 = vld [vmem:[%s2395_s20 + $0x54] sm:$0xf] }
 0x1b2   : >> { %1469 = vst [vmem:[%s2391_s15 + $0x50] sm:$0xf] %v1468_v42  ;;  %v1472_v44 = vld [vmem:[%s2395_s20 + $0x58] sm:$0xf]  ;;  %v1474_v45 = vld [vmem:[%s2395_s20 + $0x5c] sm:$0xf] }
 0x1b3   : >> { %1471 = vst [vmem:[%s2391_s15 + $0x54] sm:$0xf] %v1470_v43  ;;  %1473 = vst [vmem:[%s2391_s15 + $0x58] sm:$0xf] %v1472_v44  ;;  %v1476_v46 = vld [vmem:[%s2395_s20 + $0x60] sm:$0xf] }
 0x1b4   : >> { %1475 = vst [vmem:[%s2391_s15 + $0x5c] sm:$0xf] %v1474_v45  ;;  %v1478_v47 = vld [vmem:[%s2395_s20 + $0x64] sm:$0xf]  ;;  %v1480_v48 = vld [vmem:[%s2395_s20 + $0x68] sm:$0xf] }
 0x1b5   : >> { %1477 = vst [vmem:[%s2391_s15 + $0x60] sm:$0xf] %v1476_v46  ;;  %1479 = vst [vmem:[%s2391_s15 + $0x64] sm:$0xf] %v1478_v47  ;;  %v1482_v49 = vld [vmem:[%s2395_s20 + $0x6c] sm:$0xf] }
 0x1b6   : >> { %1481 = vst [vmem:[%s2391_s15 + $0x68] sm:$0xf] %v1480_v48  ;;  %v1484_v50 = vld [vmem:[%s2395_s20 + $0x70] sm:$0xf]  ;;  %v1486_v51 = vld [vmem:[%s2395_s20 + $0x74] sm:$0xf] }
 0x1b7   : >> { %1483 = vst [vmem:[%s2391_s15 + $0x6c] sm:$0xf] %v1482_v49  ;;  %1485 = vst [vmem:[%s2391_s15 + $0x70] sm:$0xf] %v1484_v50  ;;  %v1488_v52 = vld [vmem:[%s2395_s20 + $0x78] sm:$0xf] }
 0x1b8   : >> { %1487 = vst [vmem:[%s2391_s15 + $0x74] sm:$0xf] %v1486_v51  ;;  %v1490_v53 = vld [vmem:[%s2395_s20 + $0x7c] sm:$0xf]  ;;  %v1492_v54 = vld [vmem:[%s2395_s20 + $0x80] sm:$0xf] }
 0x1b9   : >> { %1489 = vst [vmem:[%s2391_s15 + $0x78] sm:$0xf] %v1488_v52  ;;  %1491 = vst [vmem:[%s2391_s15 + $0x7c] sm:$0xf] %v1490_v53  ;;  %v1494_v55 = vld [vmem:[%s2395_s20 + $0x84] sm:$0xf] }
 0x1ba   : >> { %1493 = vst [vmem:[%s2391_s15 + $0x80] sm:$0xf] %v1492_v54  ;;  %v1496_v56 = vld [vmem:[%s2395_s20 + $0x88] sm:$0xf]  ;;  %v1498_v57 = vld [vmem:[%s2395_s20 + $0x8c] sm:$0xf] }
 0x1bb   : >> { %1495 = vst [vmem:[%s2391_s15 + $0x84] sm:$0xf] %v1494_v55  ;;  %1497 = vst [vmem:[%s2391_s15 + $0x88] sm:$0xf] %v1496_v56  ;;  %v1500_v58 = vld [vmem:[%s2395_s20 + $0x90] sm:$0xf] }
 0x1bc   : >> { %1499 = vst [vmem:[%s2391_s15 + $0x8c] sm:$0xf] %v1498_v57  ;;  %v1502_v59 = vld [vmem:[%s2395_s20 + $0x94] sm:$0xf]  ;;  %v1504_v60 = vld [vmem:[%s2395_s20 + $0x98] sm:$0xf] }
 0x1bd   : >> { %1501 = vst [vmem:[%s2391_s15 + $0x90] sm:$0xf] %v1500_v58  ;;  %1503 = vst [vmem:[%s2391_s15 + $0x94] sm:$0xf] %v1502_v59  ;;  %v1506_v61 = vld [vmem:[%s2395_s20 + $0x9c] sm:$0xf] }
 0x1be   : >> { %1505 = vst [vmem:[%s2391_s15 + $0x98] sm:$0xf] %v1504_v60  ;;  %v1508_v62 = vld [vmem:[%s2395_s20 + $0xa0] sm:$0xf]  ;;  %v1510_v63 = vld [vmem:[%s2395_s20 + $0xa4] sm:$0xf] }
 0x1bf   : >> { %1507 = vst [vmem:[%s2391_s15 + $0x9c] sm:$0xf] %v1506_v61  ;;  %1509 = vst [vmem:[%s2391_s15 + $0xa0] sm:$0xf] %v1508_v62  ;;  %v1512_v0 = vld [vmem:[%s2395_s20 + $0xa8] sm:$0xf] }
 0x1c0   : >> { %1511 = vst [vmem:[%s2391_s15 + $0xa4] sm:$0xf] %v1510_v63  ;;  %v1514_v1 = vld [vmem:[%s2395_s20 + $0xac] sm:$0xf]  ;;  %v1516_v2 = vld [vmem:[%s2395_s20 + $0xb0] sm:$0xf] }
 0x1c1   : >> { %1513 = vst [vmem:[%s2391_s15 + $0xa8] sm:$0xf] %v1512_v0  ;;  %1515 = vst [vmem:[%s2391_s15 + $0xac] sm:$0xf] %v1514_v1  ;;  %v1518_v3 = vld [vmem:[%s2395_s20 + $0xb4] sm:$0xf] }
 0x1c2   : >> { %1517 = vst [vmem:[%s2391_s15 + $0xb0] sm:$0xf] %v1516_v2  ;;  %v1520_v4 = vld [vmem:[%s2395_s20 + $0xb8] sm:$0xf]  ;;  %v1522_v5 = vld [vmem:[%s2395_s20 + $0xbc] sm:$0xf] }
 0x1c3   : >> { %1519 = vst [vmem:[%s2391_s15 + $0xb4] sm:$0xf] %v1518_v3  ;;  %1521 = vst [vmem:[%s2391_s15 + $0xb8] sm:$0xf] %v1520_v4  ;;  %v1524_v6 = vld [vmem:[%s2395_s20 + $0xc0] sm:$0xf] }
 0x1c4   : >> { %1523 = vst [vmem:[%s2391_s15 + $0xbc] sm:$0xf] %v1522_v5  ;;  %v1526_v7 = vld [vmem:[%s2395_s20 + $0xc4] sm:$0xf]  ;;  %v1528_v8 = vld [vmem:[%s2395_s20 + $0xc8] sm:$0xf] }
 0x1c5   : >> { %1525 = vst [vmem:[%s2391_s15 + $0xc0] sm:$0xf] %v1524_v6  ;;  %1527 = vst [vmem:[%s2391_s15 + $0xc4] sm:$0xf] %v1526_v7  ;;  %v1530_v9 = vld [vmem:[%s2395_s20 + $0xcc] sm:$0xf] }
 0x1c6   : >> { %1529 = vst [vmem:[%s2391_s15 + $0xc8] sm:$0xf] %v1528_v8  ;;  %v1532_v10 = vld [vmem:[%s2395_s20 + $0xd0] sm:$0xf]  ;;  %v1534_v11 = vld [vmem:[%s2395_s20 + $0xd4] sm:$0xf] }
 0x1c7   : >> { %1531 = vst [vmem:[%s2391_s15 + $0xcc] sm:$0xf] %v1530_v9  ;;  %1533 = vst [vmem:[%s2391_s15 + $0xd0] sm:$0xf] %v1532_v10  ;;  %v1536_v12 = vld [vmem:[%s2395_s20 + $0xd8] sm:$0xf] }
 0x1c8   : >> { %1535 = vst [vmem:[%s2391_s15 + $0xd4] sm:$0xf] %v1534_v11  ;;  %v1538_v13 = vld [vmem:[%s2395_s20 + $0xdc] sm:$0xf]  ;;  %v1540_v14 = vld [vmem:[%s2395_s20 + $0xe0] sm:$0xf] }
 0x1c9   : >> { %1537 = vst [vmem:[%s2391_s15 + $0xd8] sm:$0xf] %v1536_v12  ;;  %1539 = vst [vmem:[%s2391_s15 + $0xdc] sm:$0xf] %v1538_v13  ;;  %v1542_v15 = vld [vmem:[%s2395_s20 + $0xe4] sm:$0xf] }
 0x1ca   : >> { %1541 = vst [vmem:[%s2391_s15 + $0xe0] sm:$0xf] %v1540_v14  ;;  %v1544_v16 = vld [vmem:[%s2395_s20 + $0xe8] sm:$0xf]  ;;  %v1546_v18 = vld [vmem:[%s2395_s20 + $0xec] sm:$0xf] }
 0x1cb   : >> { %1543 = vst [vmem:[%s2391_s15 + $0xe4] sm:$0xf] %v1542_v15  ;;  %1545 = vst [vmem:[%s2391_s15 + $0xe8] sm:$0xf] %v1544_v16  ;;  %v1548_v19 = vld [vmem:[%s2395_s20 + $0xf0] sm:$0xf] }
 0x1cc   : >> { %1547 = vst [vmem:[%s2391_s15 + $0xec] sm:$0xf] %v1546_v18  ;;  %v1550_v20 = vld [vmem:[%s2395_s20 + $0xf4] sm:$0xf]  ;;  %v1552_v21 = vld [vmem:[%s2395_s20 + $0xf8] sm:$0xf] }
 0x1cd   : >> { %1549 = vst [vmem:[%s2391_s15 + $0xf0] sm:$0xf] %v1548_v19  ;;  %1551 = vst [vmem:[%s2391_s15 + $0xf4] sm:$0xf] %v1550_v20  ;;  %v1554_v22 = vld [vmem:[%s2395_s20 + $0xfc] sm:$0xf] }
 0x1ce   : >> { %1553 = vst [vmem:[%s2391_s15 + $0xf8] sm:$0xf] %v1552_v21  ;;  %1555 = vst [vmem:[%s2391_s15 + $0xfc] sm:$0xf] %v1554_v22  ;;  %s3038_s4 = smov (%p1557_p11, %s1556_s4), 0  ;;  %s1422_s30 = sadd.s32 1, %s2403_s30  }
 0x1cf   : >> { %s2022_s5 = sshll.u32 %s3038_s4, 8  ;;  %p1421_p12 = scmp.ge.s32.totalorder %s1422_s30, %s2838_s29 }
 0x1d0   : >> { %s1561_s20 = scalar_lea.vmem %s2635_s12, %s2022_s5 [#allocation2]   ;;  %s1562_s15 = scalar_lea.vmem %s2832_s27, %s2022_s5  }
 0x1d1   : >> { %s3031_s23 = smov %s3038_s4  ;;  %1424 = sbr.rel (!%p1421_p12) target bundleno = 420 (0x1a4), region = 118 }
 0x1d6 PF: > { %s3006_s6 = sand.u32 63, %s3036_s9   ;;  %s2098_s7 = sshll.u32 %s2838_s29, 8 }
 0x1d7   : > { %s1567_s8 = scalar_lea.vmem %s2635_s12, %s2098_s7 [#allocation2]   ;;  %s1569_s10 = scalar_lea.vmem %s2832_s27, %s2098_s7  }
 0x1d8   : > { %p2027_p13 = scmp.le.s32.totalorder %s3006_s6, 0 }
 0x1d9   : > { %s2405_s11 = smov (!%p2027_p13), %s1569_s10   ;;  %s2409_s14 = smov (!%p2027_p13), %s1567_s8  }
 0x1da   : > { %1832 = sbr.rel (%p2027_p13) target bundleno = 487 (0x1e7), region = 123  ;;  %s2413_s17 = smov (!%p2027_p13), 0  }
 0x1db   : > { %s2417_s18 = smov (!%p2027_p13), 0  }
 0x1df LB: >> { %v1579_v17 = vld [vmem:[%s2411_s14] sm:$0xf]  ;;  %s1581_s21 = sadd.s32 1, %s2415_s17  ;;  %s1573_s18 = sadd.s32 1, %s2419_s18   ;;  %s2419_s18 = sphi %s2417_s18, %s1573_s18   ;;  %s2415_s17 = sphi %s2413_s17, %s2414_s17   ;;  %s2411_s14 = sphi %s2409_s14, %s1586_s14   ;;  %s2407_s11 = sphi %s2405_s11, %s1587_s11  }
 0x1e0   : >> { %1580 = vst [vmem:[%s2407_s11] sm:$0xf] %v1579_v17  ;;  %p1582_p0 = scmp.ge.s32.totalorder %s1581_s21, %s3006_s6  ;;  %p1572_p1 = scmp.ge.s32.totalorder %s1573_s18, %s3006_s6 }
 0x1e2   : >> { %s3040_s21 = smov (%p1582_p0, %s1581_s21), 0  ;;  %1575 = sbr.rel (!%p1572_p1) target bundleno = 479 (0x1df), region = 129 }
 0x1e3   : >> { %s2028_s22 = sshll.u32 %s3040_s21, 2  ;;  %s2414_s17 = smov %s3040_s21  }
 0x1e4   : >> { %s1586_s14 = scalar_lea.vmem %s1567_s8, %s2028_s22 [#allocation2]   ;;  %s1587_s11 = scalar_lea.vmem %s1569_s10, %s2028_s22  }
 0x1e7 PF: > { %p10_p2 = scmp.ge.s32.totalorder %s2457_s16, 4   ;;  %s3032_s12 = smov %s2383_s13 }
 0x1e8   : > { %s3033_s13 = smov %s2465_s19  ;;  %s3034_s14 = smov %s2457_s16 }
 0x1e9   :  { %12 = sbr.rel (!%p10_p2) target bundleno = 2 (0x2), region = 140 }

// kernel: actor_forward.5
= control target key start
LH: loop header
LB: loop body
LE: loop exit
PB: predicated region body
PF: predicated region fallthrough
CT: control target
= control target key end

     0   :  { %vm880_vm0 = vcmask 519168   ;;  %vm901_vm1 = vcmask 516096   ;;  %s1637_s1 = inlined_call_operand.vmem [shape: bf16[512,64], index: 1, kind: input, shape index: {}]   ;;  %s1638_s0 = inlined_call_operand.vmem [shape: bf16[162,512], index: 0, kind: input, shape index: {}]   ;;  %s1639_s2 = inlined_call_operand.vmem [shape: f32[1,64], index: 2, kind: input, shape index: {}]   ;;  %s1640_s3 = inlined_call_operand.vmem [shape: bf16[162,64], index: 3, kind: output, shape index: {}]  }
   0x1   :  { %v1190_v0 = vld [vmem:[%s1637_s1 + $0x78] sm:$0xff]   ;;  %v1194_v4 = vld [vmem:[%s1637_s1 + $0x70] sm:$0xff]   ;;  %v1198_v8 = vld [vmem:[%s1637_s1 + $0x68] sm:$0xff]  }
   0x2   :  { %v1191_v1 = vld [vmem:[%s1637_s1 + $0xf8] sm:$0xff]   ;;  %1026 = vmatprep.subr.bf16.mxu0 %v1190_v0  ;;  %v1195_v5 = vld [vmem:[%s1637_s1 + $0xf0] sm:$0xff]   ;;  %v1199_v9 = vld [vmem:[%s1637_s1 + $0xe8] sm:$0xff]  }
   0x3   :  { %v1192_v2 = vld [vmem:[%s1637_s1 + $0x38] sm:$0xff]   ;;  %1108 = vmatprep.subr.bf16.mxu1 %v1191_v1  ;;  %v1196_v6 = vld [vmem:[%s1637_s1 + $0x30] sm:$0xff]   ;;  %v1200_v10 = vld [vmem:[%s1637_s1 + $0x28] sm:$0xff]  }
   0x4   :  { %v1193_v3 = vld [vmem:[%s1637_s1 + $0xb8] sm:$0xff]   ;;  %1027 = vmatpush3.bf16.msra.mxu0 %v1192_v2  ;;  %v1197_v7 = vld [vmem:[%s1637_s1 + $0xb0] sm:$0xff]   ;;  %v1201_v11 = vld [vmem:[%s1637_s1 + $0xa8] sm:$0xff]  }
   0x5   :  { %1109 = vmatpush3.bf16.msra.mxu1 %v1193_v3  ;;  %1028 = vmatprep.subr.bf16.mxu0 %v1194_v4  ;;  %v1202_v12 = vld [vmem:[%s1637_s1 + $0x60] sm:$0xff]   ;;  %v1206_v16 = vld [vmem:[%s1637_s1 + $0x58] sm:$0xff]   ;;  %v1210_v20 = vld [vmem:[%s1637_s1 + $0x50] sm:$0xff]  }
   0x6   :  { %1110 = vmatprep.subr.bf16.mxu1 %v1195_v5  ;;  %v1203_v13 = vld [vmem:[%s1637_s1 + $0xe0] sm:$0xff]   ;;  %v1207_v17 = vld [vmem:[%s1637_s1 + $0xd8] sm:$0xff]   ;;  %v1211_v21 = vld [vmem:[%s1637_s1 + $0xd0] sm:$0xff]  }
   0x7   :  { %v1204_v14 = vld [vmem:[%s1637_s1 + $0x20] sm:$0xff]   ;;  %v1208_v18 = vld [vmem:[%s1637_s1 + $0x18] sm:$0xff]   ;;  %v1212_v22 = vld [vmem:[%s1637_s1 + $0x10] sm:$0xff]  }
   0x8   :  { %1029 = vmatpush3.bf16.msra.mxu0 %v1196_v6  ;;  %v1205_v15 = vld [vmem:[%s1637_s1 + $0xa0] sm:$0xff]   ;;  %v1209_v19 = vld [vmem:[%s1637_s1 + $0x98] sm:$0xff]   ;;  %v1213_v23 = vld [vmem:[%s1637_s1 + $0x90] sm:$0xff]  }
   0x9   :  { %1111 = vmatpush3.bf16.msra.mxu1 %v1197_v7  ;;  %1030 = vmatprep.subr.bf16.mxu0 %v1198_v8  ;;  %v1214_v24 = vld [vmem:[%s1637_s1 + $0x48] sm:$0xff]   ;;  %v1218_v28 = vld [vmem:[%s1637_s1 + $0x40] sm:$0xff]  }
   0xa   :  { %1112 = vmatprep.subr.bf16.mxu1 %v1199_v9  ;;  %v1215_v25 = vld [vmem:[%s1637_s1 + $0xc8] sm:$0xff]   ;;  %v1219_v29 = vld [vmem:[%s1637_s1 + $0xc0] sm:$0xff]  }
   0xb   :  { %v1216_v26 = vld [vmem:[%s1637_s1 + $0x8] sm:$0xff]   ;;  %v1220_v30 = vld [vmem:[%s1637_s1] sm:$0xff]  }
   0xc   :  { %1031 = vmatpush3.bf16.msra.mxu0 %v1200_v10  ;;  %v1217_v27 = vld [vmem:[%s1637_s1 + $0x88] sm:$0xff]   ;;  %v1221_v31 = vld [vmem:[%s1637_s1 + $0x80] sm:$0xff]  }
   0xd   :  { %1113 = vmatpush3.bf16.msra.mxu1 %v1201_v11  ;;  %1032 = vmatprep.subr.bf16.mxu0 %v1202_v12  ;;  %v1222_v32 = vld [vmem:[%s1638_s0] ss:$16 sps:$4 sm:$0xff]   ;;  %v1224_v33 = vld [vmem:[%s1638_s0 + $0x4] ss:$16 sps:$4 sm:$0xff]   ;;  %v1225_v34 = vld [vmem:[%s1638_s0 + $0x8] ss:$16 sps:$4 sm:$0xff]  }
   0xe   :  { %1114 = vmatprep.subr.bf16.mxu1 %v1203_v13  ;;  %v1227_v35 = vld [vmem:[%s1638_s0 + $0xc] ss:$16 sps:$4 sm:$0xff]   ;;  %566 = vmatprep.mubr.bf16.mxu0 %v1224_v33  ;;  %v1228_v36 = vld [vmem:[%s1638_s0 + $0x24] ss:$16 sps:$4 sm:$0xff]   ;;  %v1232_v38 = vld [vmem:[%s1638_s0 + $0x20] ss:$16 sps:$4 sm:$0xff]  }
   0xf   :  { %686 = vmatprep.mubr.bf16.mxu1 %v1227_v35  ;;  %v1230_v37 = vld [vmem:[%s1638_s0 + $0x2c] ss:$16 sps:$4 sm:$0xff]   ;;  %v1233_v39 = vld [vmem:[%s1638_s0 + $0x28] ss:$16 sps:$4 sm:$0xff]   ;;  %v1234_v40 = vld [vmem:[%s1638_s0 + $0x44] ss:$16 sps:$4 sm:$0xff]  }
  0x10   :  { %1033 = vmatpush3.bf16.msra.mxu0 %v1204_v14  ;;  %v1236_v41 = vld [vmem:[%s1638_s0 + $0x4c] ss:$16 sps:$4 sm:$0xff]   ;;  %v1238_v42 = vld [vmem:[%s1638_s0 + $0x40] ss:$16 sps:$4 sm:$0xff]   ;;  %v1239_v43 = vld [vmem:[%s1638_s0 + $0x48] ss:$16 sps:$4 sm:$0xff]  }
  0x11   :  { %1115 = vmatpush3.bf16.msra.mxu1 %v1205_v15  ;;  %1034 = vmatprep.subr.bf16.mxu0 %v1206_v16  ;;  %v1240_v44 = vld [vmem:[%s1638_s0 + $0x64] ss:$16 sps:$4 sm:$0xff]   ;;  %v1242_v45 = vld [vmem:[%s1638_s0 + $0x6c] ss:$16 sps:$4 sm:$0xff]   ;;  %v1244_v46 = vld [vmem:[%s1638_s0 + $0x60] ss:$16 sps:$4 sm:$0xff]  }
  0x12   :  { %1116 = vmatprep.subr.bf16.mxu1 %v1207_v17  ;;  %v1245_v47 = vld [vmem:[%s1638_s0 + $0x68] ss:$16 sps:$4 sm:$0xff]   ;;  %v1246_v48 = vld [vmem:[%s1638_s0 + $0x84] ss:$16 sps:$4 sm:$0xff]   ;;  %v1248_v49 = vld [vmem:[%s1638_s0 + $0x8c] ss:$16 sps:$4 sm:$0xff]  }
  0x13   :  { %v1250_v50 = vld [vmem:[%s1638_s0 + $0x80] ss:$16 sps:$4 sm:$0xff]   ;;  %v1251_v51 = vld [vmem:[%s1638_s0 + $0x88] ss:$16 sps:$4 sm:$0xff]   ;;  %v1252_v52 = vld [vmem:[%s1638_s0 + $0xa4] ss:$16 sps:$4 sm:$0xff]  }
  0x14   :  { %1035 = vmatpush3.bf16.msra.mxu0 %v1208_v18  ;;  %v1254_v53 = vld [vmem:[%s1638_s0 + $0xac] ss:$16 sps:$4 sm:$0xff]   ;;  %v1256_v54 = vld [vmem:[%s1638_s0 + $0xa0] ss:$16 sps:$4 sm:$0xff]   ;;  %v1257_v55 = vld [vmem:[%s1638_s0 + $0xa8] ss:$16 sps:$4 sm:$0xff]  }
  0x15   :  { %1117 = vmatpush3.bf16.msra.mxu1 %v1209_v19  ;;  %1036 = vmatprep.subr.bf16.mxu0 %v1210_v20  ;;  %v1258_v56 = vld [vmem:[%s1638_s0 + $0xc4] ss:$16 sps:$4 sm:$0xff]   ;;  %v1260_v57 = vld [vmem:[%s1638_s0 + $0xcc] ss:$16 sps:$4 sm:$0xff]   ;;  %v1262_v58 = vld [vmem:[%s1638_s0 + $0xc0] ss:$16 sps:$4 sm:$0xff]  }
  0x16   :  { %1118 = vmatprep.subr.bf16.mxu1 %v1211_v21  ;;  %v1263_v59 = vld [vmem:[%s1638_s0 + $0xc8] ss:$16 sps:$4 sm:$0xff]   ;;  %v1264_v60 = vld [vmem:[%s1638_s0 + $0xe4] ss:$16 sps:$4 sm:$0xff]   ;;  %v1266_v61 = vld [vmem:[%s1638_s0 + $0xec] ss:$16 sps:$4 sm:$0xff]  }
  0x17   :  { %v1268_v62 = vld [vmem:[%s1638_s0 + $0xe0] ss:$16 sps:$4 sm:$0xff]   ;;  %v1269_v63 = vld [vmem:[%s1638_s0 + $0xe8] ss:$16 sps:$4 sm:$0xff]   ;;  %v1270_v0 = vld [vmem:[%s1638_s0 + $0x104] ss:$16 sps:$4 sm:$0xff]  }
  0x18   :  { %1037 = vmatpush3.bf16.msra.mxu0 %v1212_v22  ;;  %v1272_v1 = vld [vmem:[%s1638_s0 + $0x10c] ss:$16 sps:$4 sm:$0xff]   ;;  %v1274_v2 = vld [vmem:[%s1638_s0 + $0x100] ss:$16 sps:$4 sm:$0xff]   ;;  %v1275_v3 = vld [vmem:[%s1638_s0 + $0x108] ss:$16 sps:$4 sm:$0xff]  }
  0x19   :  { %1119 = vmatpush3.bf16.msra.mxu1 %v1213_v23  ;;  %1038 = vmatprep.subr.bf16.mxu0 %v1214_v24  ;;  %v1276_v4 = vld [vmem:[%s1638_s0 + $0x124] ss:$16 sps:$4 sm:$0xff]   ;;  %v1278_v5 = vld [vmem:[%s1638_s0 + $0x12c] ss:$16 sps:$4 sm:$0xff]   ;;  %v1280_v8 = vld [vmem:[%s1638_s0 + $0x120] ss:$16 sps:$4 sm:$0xff]  }
  0x1a   :  { %1120 = vmatprep.subr.bf16.mxu1 %v1215_v25  ;;  %v55_v6 = vld [vmem:[%s1638_s0 + $0x140] sm:$0x11]  ;;  %v56_v7 = vld [vmem:[%s1638_s0 + $0x148] sm:$0x11] }
  0x1b   :  { %v1281_v9 = vld [vmem:[%s1638_s0 + $0x128] ss:$16 sps:$4 sm:$0xff]   ;;  %v949_v10 = vcombine.high %v55_v6, %v55_v6  ;;  %v951_v11 = vcombine.high %v56_v7, %v56_v7  ;;  %v948_v12 = vcombine.low %v55_v6, %v55_v6  ;;  %v950_v13 = vcombine.low %v56_v7, %v56_v7  ;;  %v1531_v16 = vld [vmem:[%s1639_s2] ss:$0 sm:$0xff] }
  0x1c   :  { %1039 = vmatpush3.bf16.msra.mxu0 %v1216_v26 }
  0x1d   :  { %1121 = vmatpush3.bf16.msra.mxu1 %v1217_v27  ;;  %1040 = vmatprep.subr.bf16.mxu0 %v1218_v28 }
  0x1e   :  { %1122 = vmatprep.subr.bf16.mxu1 %v1219_v29 }
  0x20   :  { %1041 = vmatpush3.bf16.msra.mxu0 %v1220_v30 }
  0x21   :  { %1123 = vmatpush3.bf16.msra.mxu1 %v1221_v31 }
  0x23   :  { %567 = vmatmul.mubr.bf16.vlgmr.msra.gmra.mxu0 %v1222_v32 }
  0x24   :  { %687 = vmatmul.mubr.bf16.vlgmr.msra.gmra.mxu1 %v1225_v34  ;;  %574 = vmatprep.mubr.bf16.mxu0 %v1228_v36 }
  0x25   :  { %694 = vmatprep.mubr.bf16.mxu1 %v1230_v37 }
  0x2b   :  { %575 = vmatmul.mubr.bf16.gmra.mxu0 %v1232_v38 }
  0x2c   :  { %695 = vmatmul.mubr.bf16.gmra.mxu1 %v1233_v39  ;;  %582 = vmatprep.mubr.bf16.mxu0 %v1234_v40 }
  0x2d   :  { %702 = vmatprep.mubr.bf16.mxu1 %v1236_v41 }
  0x33   :  { %583 = vmatmul.mubr.bf16.gmra.mxu0 %v1238_v42 }
  0x34   :  { %703 = vmatmul.mubr.bf16.gmra.mxu1 %v1239_v43  ;;  %590 = vmatprep.mubr.bf16.mxu0 %v1240_v44 }
  0x35   :  { %710 = vmatprep.mubr.bf16.mxu1 %v1242_v45 }
  0x3b   :  { %591 = vmatmul.mubr.bf16.gmra.mxu0 %v1244_v46 }
  0x3c   :  { %711 = vmatmul.mubr.bf16.gmra.mxu1 %v1245_v47  ;;  %598 = vmatprep.mubr.bf16.mxu0 %v1246_v48 }
  0x3d   :  { %718 = vmatprep.mubr.bf16.mxu1 %v1248_v49 }
  0x43   :  { %599 = vmatmul.mubr.bf16.gmra.mxu0 %v1250_v50 }
  0x44   :  { %719 = vmatmul.mubr.bf16.gmra.mxu1 %v1251_v51  ;;  %606 = vmatprep.mubr.bf16.mxu0 %v1252_v52 }
  0x45   :  { %726 = vmatprep.mubr.bf16.mxu1 %v1254_v53 }
  0x4b   :  { %607 = vmatmul.mubr.bf16.gmra.mxu0 %v1256_v54 }
  0x4c   :  { %727 = vmatmul.mubr.bf16.gmra.mxu1 %v1257_v55  ;;  %614 = vmatprep.mubr.bf16.mxu0 %v1258_v56 }
  0x4d   :  { %734 = vmatprep.mubr.bf16.mxu1 %v1260_v57 }
  0x53   :  { %615 = vmatmul.mubr.bf16.gmra.mxu0 %v1262_v58 }
  0x54   :  { %735 = vmatmul.mubr.bf16.gmra.mxu1 %v1263_v59  ;;  %622 = vmatprep.mubr.bf16.mxu0 %v1264_v60 }
  0x55   :  { %742 = vmatprep.mubr.bf16.mxu1 %v1266_v61 }
  0x5b   :  { %623 = vmatmul.mubr.bf16.gmra.mxu0 %v1268_v62 }
  0x5c   :  { %743 = vmatmul.mubr.bf16.gmra.mxu1 %v1269_v63  ;;  %630 = vmatprep.mubr.bf16.mxu0 %v1270_v0 }
  0x5d   :  { %750 = vmatprep.mubr.bf16.mxu1 %v1272_v1 }
  0x63   :  { %631 = vmatmul.mubr.bf16.gmra.mxu0 %v1274_v2 }
  0x64   :  { %751 = vmatmul.mubr.bf16.gmra.mxu1 %v1275_v3  ;;  %638 = vmatprep.mubr.bf16.mxu0 %v1276_v4 }
  0x65   :  { %758 = vmatprep.mubr.bf16.mxu1 %v1278_v5 }
  0x6b   :  { %639 = vmatmul.mubr.bf16.gmra.mxu0 %v1280_v8 }
  0x6c   :  { %759 = vmatmul.mubr.bf16.gmra.mxu1 %v1281_v9  ;;  %646 = vmatprep.mubr.bf16.mxu0 %v949_v10 }
  0x6d   :  { %766 = vmatprep.mubr.bf16.mxu1 %v951_v11 }
  0x73   :  { %647 = vmatmul.mubr.bf16.gmra.mxu0 %v948_v12 }
  0x74   :  { %767 = vmatmul.mubr.bf16.gmra.mxu1 %v950_v13 }
  0xe3   :  { %v1042_v14 = vpop.f32.mrf.mxu0 }
  0xe4   :  { %v1124_v15 = vpop.f32.mrf.mxu1 }
  0xe5   :  { %v1043_v17 = vpop.f32.mrf.mxu0 }
  0xe6   :  { %v1044_v18 = vadd.f32 %v1043_v17, %v1042_v14  ;;  %v1125_v19 = vpop.f32.mrf.mxu1 }
  0xe7   :  { %v1045_v20 = vpop.f32.mrf.mxu0  ;;  %v1126_v22 = vadd.f32 %v1125_v19, %v1124_v15 }
  0xe8   :  { %v569_v21 = vadd.f32 %v1044_v18, %v1531_v16  ;;  %v1127_v23 = vpop.f32.mrf.mxu1 }
  0xe9   :  { %v1046_v24 = vpop.f32.mrf.mxu0 }
  0xea   :  { %v689_v25 = vadd.f32 %v1126_v22, %v569_v21  ;;  %v1047_v26 = vadd.f32 %v1046_v24, %v1045_v20  ;;  %v1128_v27 = vpop.f32.mrf.mxu1 }
  0xeb   :  { %v1048_v28 = vpop.f32.mrf.mxu0  ;;  %v1129_v31 = vadd.f32 %v1128_v27, %v1127_v23 }
  0xec   :  { %v774_v29 = vmax.f32 %v689_v25, 0.0  ;;  %v572_v30 = vadd.f32 %v1047_v26, %v1531_v16  ;;  %v1130_v32 = vpop.f32.mrf.mxu1 }
  0xed   :  { %v1049_v33 = vpop.f32.mrf.mxu0 }
  0xee   :  { %v1005_v34 = vpack.c.bf16 %v774_v29, %v774_v29  ;;  %v692_v35 = vadd.f32 %v1129_v31, %v572_v30  ;;  %v1050_v36 = vadd.f32 %v1049_v33, %v1048_v28  ;;  %v1131_v37 = vpop.f32.mrf.mxu1 }
  0xef   :  { %v1051_v38 = vpop.f32.mrf.mxu0  ;;  %v1132_v41 = vadd.f32 %v1131_v37, %v1130_v32 }
  0xf0   :  { %881 = vst.msk [vmem:[%s1640_s3] sm:$0xf] %vm880_vm0, %v1005_v34  ;;  %v775_v39 = vmax.f32 %v692_v35, 0.0  ;;  %v577_v40 = vadd.f32 %v1050_v36, %v1531_v16  ;;  %v1133_v42 = vpop.f32.mrf.mxu1 }
  0xf1   :  { %v1052_v43 = vpop.f32.mrf.mxu0 }
  0xf2   :  { %v1006_v44 = vpack.c.bf16 %v775_v39, %v775_v39  ;;  %v697_v45 = vadd.f32 %v1132_v41, %v577_v40  ;;  %v1053_v46 = vadd.f32 %v1052_v43, %v1051_v38  ;;  %v1134_v47 = vpop.f32.mrf.mxu1 }
  0xf3   :  { %v1054_v48 = vpop.f32.mrf.mxu0  ;;  %v1135_v51 = vadd.f32 %v1134_v47, %v1133_v42 }
  0xf4   :  { %882 = vst.msk [vmem:[%s1640_s3 + $0x4] sm:$0xf] %vm880_vm0, %v1006_v44  ;;  %v776_v49 = vmax.f32 %v697_v45, 0.0  ;;  %v580_v50 = vadd.f32 %v1053_v46, %v1531_v16  ;;  %v1136_v52 = vpop.f32.mrf.mxu1 }
  0xf5   :  { %v1055_v53 = vpop.f32.mrf.mxu0 }
  0xf6   :  { %v1007_v54 = vpack.c.bf16 %v776_v49, %v776_v49  ;;  %v700_v55 = vadd.f32 %v1135_v51, %v580_v50  ;;  %v1056_v56 = vadd.f32 %v1055_v53, %v1054_v48  ;;  %v1137_v57 = vpop.f32.mrf.mxu1 }
  0xf7   :  { %v1057_v58 = vpop.f32.mrf.mxu0  ;;  %v1138_v61 = vadd.f32 %v1137_v57, %v1136_v52 }
  0xf8   :  { %883 = vst.msk [vmem:[%s1640_s3 + $0x8] sm:$0xf] %vm880_vm0, %v1007_v54  ;;  %v777_v59 = vmax.f32 %v700_v55, 0.0  ;;  %v585_v60 = vadd.f32 %v1056_v56, %v1531_v16  ;;  %v1139_v62 = vpop.f32.mrf.mxu1 }
  0xf9   :  { %v1058_v63 = vpop.f32.mrf.mxu0 }
  0xfa   :  { %v1008_v0 = vpack.c.bf16 %v777_v59, %v777_v59  ;;  %v705_v1 = vadd.f32 %v1138_v61, %v585_v60  ;;  %v1059_v2 = vadd.f32 %v1058_v63, %v1057_v58  ;;  %v1140_v3 = vpop.f32.mrf.mxu1 }
  0xfb   :  { %v1060_v4 = vpop.f32.mrf.mxu0  ;;  %v1141_v7 = vadd.f32 %v1140_v3, %v1139_v62 }
  0xfc   :  { %884 = vst.msk [vmem:[%s1640_s3 + $0xc] sm:$0xf] %vm880_vm0, %v1008_v0  ;;  %v778_v5 = vmax.f32 %v705_v1, 0.0  ;;  %v588_v6 = vadd.f32 %v1059_v2, %v1531_v16  ;;  %v1142_v8 = vpop.f32.mrf.mxu1 }
  0xfd   :  { %v1061_v9 = vpop.f32.mrf.mxu0 }
  0xfe   :  { %v1009_v10 = vpack.c.bf16 %v778_v5, %v778_v5  ;;  %v708_v11 = vadd.f32 %v1141_v7, %v588_v6  ;;  %v1062_v12 = vadd.f32 %v1061_v9, %v1060_v4  ;;  %v1143_v13 = vpop.f32.mrf.mxu1 }
  0xff   :  { %v1063_v14 = vpop.f32.mrf.mxu0  ;;  %v1144_v18 = vadd.f32 %v1143_v13, %v1142_v8 }
 0x100   :  { %885 = vst.msk [vmem:[%s1640_s3 + $0x10] sm:$0xf] %vm880_vm0, %v1009_v10  ;;  %v779_v15 = vmax.f32 %v708_v11, 0.0  ;;  %v593_v17 = vadd.f32 %v1062_v12, %v1531_v16  ;;  %v1145_v19 = vpop.f32.mrf.mxu1 }
 0x101   :  { %v1064_v20 = vpop.f32.mrf.mxu0 }
 0x102   :  { %v1010_v21 = vpack.c.bf16 %v779_v15, %v779_v15  ;;  %v713_v22 = vadd.f32 %v1144_v18, %v593_v17  ;;  %v1065_v23 = vadd.f32 %v1064_v20, %v1063_v14  ;;  %v1146_v24 = vpop.f32.mrf.mxu1 }
 0x103   :  { %v1066_v25 = vpop.f32.mrf.mxu0  ;;  %v1147_v28 = vadd.f32 %v1146_v24, %v1145_v19 }
 0x104   :  { %886 = vst.msk [vmem:[%s1640_s3 + $0x14] sm:$0xf] %vm880_vm0, %v1010_v21  ;;  %v780_v26 = vmax.f32 %v713_v22, 0.0  ;;  %v596_v27 = vadd.f32 %v1065_v23, %v1531_v16  ;;  %v1148_v29 = vpop.f32.mrf.mxu1 }
 0x105   :  { %v1067_v30 = vpop.f32.mrf.mxu0 }
 0x106   :  { %v1011_v31 = vpack.c.bf16 %v780_v26, %v780_v26  ;;  %v716_v32 = vadd.f32 %v1147_v28, %v596_v27  ;;  %v1068_v33 = vadd.f32 %v1067_v30, %v1066_v25  ;;  %v1149_v34 = vpop.f32.mrf.mxu1 }
 0x107   :  { %v1069_v35 = vpop.f32.mrf.mxu0  ;;  %v1150_v38 = vadd.f32 %v1149_v34, %v1148_v29 }
 0x108   :  { %887 = vst.msk [vmem:[%s1640_s3 + $0x18] sm:$0xf] %vm880_vm0, %v1011_v31  ;;  %v781_v36 = vmax.f32 %v716_v32, 0.0  ;;  %v601_v37 = vadd.f32 %v1068_v33, %v1531_v16  ;;  %v1151_v39 = vpop.f32.mrf.mxu1 }
 0x109   :  { %v1070_v40 = vpop.f32.mrf.mxu0 }
 0x10a   :  { %v1012_v41 = vpack.c.bf16 %v781_v36, %v781_v36  ;;  %v721_v42 = vadd.f32 %v1150_v38, %v601_v37  ;;  %v1071_v43 = vadd.f32 %v1070_v40, %v1069_v35  ;;  %v1152_v44 = vpop.f32.mrf.mxu1 }
 0x10b   :  { %v1072_v45 = vpop.f32.mrf.mxu0  ;;  %v1153_v48 = vadd.f32 %v1152_v44, %v1151_v39 }
 0x10c   :  { %888 = vst.msk [vmem:[%s1640_s3 + $0x1c] sm:$0xf] %vm880_vm0, %v1012_v41  ;;  %v782_v46 = vmax.f32 %v721_v42, 0.0  ;;  %v604_v47 = vadd.f32 %v1071_v43, %v1531_v16  ;;  %v1154_v49 = vpop.f32.mrf.mxu1 }
 0x10d   :  { %v1073_v50 = vpop.f32.mrf.mxu0 }
 0x10e   :  { %v1013_v51 = vpack.c.bf16 %v782_v46, %v782_v46  ;;  %v724_v52 = vadd.f32 %v1153_v48, %v604_v47  ;;  %v1074_v53 = vadd.f32 %v1073_v50, %v1072_v45  ;;  %v1155_v54 = vpop.f32.mrf.mxu1 }
 0x10f   :  { %v1075_v55 = vpop.f32.mrf.mxu0  ;;  %v1156_v58 = vadd.f32 %v1155_v54, %v1154_v49 }
 0x110   :  { %889 = vst.msk [vmem:[%s1640_s3 + $0x20] sm:$0xf] %vm880_vm0, %v1013_v51  ;;  %v783_v56 = vmax.f32 %v724_v52, 0.0  ;;  %v609_v57 = vadd.f32 %v1074_v53, %v1531_v16  ;;  %v1157_v59 = vpop.f32.mrf.mxu1 }
 0x111   :  { %v1076_v60 = vpop.f32.mrf.mxu0 }
 0x112   :  { %v1014_v61 = vpack.c.bf16 %v783_v56, %v783_v56  ;;  %v729_v62 = vadd.f32 %v1156_v58, %v609_v57  ;;  %v1077_v63 = vadd.f32 %v1076_v60, %v1075_v55  ;;  %v1158_v0 = vpop.f32.mrf.mxu1 }
 0x113   :  { %v1078_v1 = vpop.f32.mrf.mxu0  ;;  %v1159_v4 = vadd.f32 %v1158_v0, %v1157_v59 }
 0x114   :  { %890 = vst.msk [vmem:[%s1640_s3 + $0x24] sm:$0xf] %vm880_vm0, %v1014_v61  ;;  %v784_v2 = vmax.f32 %v729_v62, 0.0  ;;  %v612_v3 = vadd.f32 %v1077_v63, %v1531_v16  ;;  %v1160_v5 = vpop.f32.mrf.mxu1 }
 0x115   :  { %v1079_v6 = vpop.f32.mrf.mxu0 }
 0x116   :  { %v1015_v7 = vpack.c.bf16 %v784_v2, %v784_v2  ;;  %v732_v8 = vadd.f32 %v1159_v4, %v612_v3  ;;  %v1080_v9 = vadd.f32 %v1079_v6, %v1078_v1  ;;  %v1161_v10 = vpop.f32.mrf.mxu1 }
 0x117   :  { %v1081_v11 = vpop.f32.mrf.mxu0  ;;  %v1162_v14 = vadd.f32 %v1161_v10, %v1160_v5 }
 0x118   :  { %891 = vst.msk [vmem:[%s1640_s3 + $0x28] sm:$0xf] %vm880_vm0, %v1015_v7  ;;  %v785_v12 = vmax.f32 %v732_v8, 0.0  ;;  %v617_v13 = vadd.f32 %v1080_v9, %v1531_v16  ;;  %v1163_v15 = vpop.f32.mrf.mxu1 }
 0x119   :  { %v1082_v17 = vpop.f32.mrf.mxu0 }
 0x11a   :  { %v1016_v18 = vpack.c.bf16 %v785_v12, %v785_v12  ;;  %v737_v19 = vadd.f32 %v1162_v14, %v617_v13  ;;  %v1083_v20 = vadd.f32 %v1082_v17, %v1081_v11  ;;  %v1164_v21 = vpop.f32.mrf.mxu1 }
 0x11b   :  { %v1084_v22 = vpop.f32.mrf.mxu0  ;;  %v1165_v25 = vadd.f32 %v1164_v21, %v1163_v15 }
 0x11c   :  { %892 = vst.msk [vmem:[%s1640_s3 + $0x2c] sm:$0xf] %vm880_vm0, %v1016_v18  ;;  %v786_v23 = vmax.f32 %v737_v19, 0.0  ;;  %v620_v24 = vadd.f32 %v1083_v20, %v1531_v16  ;;  %v1166_v26 = vpop.f32.mrf.mxu1 }
 0x11d   :  { %v1085_v27 = vpop.f32.mrf.mxu0 }
 0x11e   :  { %v1017_v28 = vpack.c.bf16 %v786_v23, %v786_v23  ;;  %v740_v29 = vadd.f32 %v1165_v25, %v620_v24  ;;  %v1086_v30 = vadd.f32 %v1085_v27, %v1084_v22  ;;  %v1167_v31 = vpop.f32.mrf.mxu1 }
 0x11f   :  { %v1087_v32 = vpop.f32.mrf.mxu0  ;;  %v1168_v35 = vadd.f32 %v1167_v31, %v1166_v26 }
 0x120   :  { %893 = vst.msk [vmem:[%s1640_s3 + $0x30] sm:$0xf] %vm880_vm0, %v1017_v28  ;;  %v787_v33 = vmax.f32 %v740_v29, 0.0  ;;  %v625_v34 = vadd.f32 %v1086_v30, %v1531_v16  ;;  %v1169_v36 = vpop.f32.mrf.mxu1 }
 0x121   :  { %v1088_v37 = vpop.f32.mrf.mxu0 }
 0x122   :  { %v1018_v38 = vpack.c.bf16 %v787_v33, %v787_v33  ;;  %v745_v39 = vadd.f32 %v1168_v35, %v625_v34  ;;  %v1089_v40 = vadd.f32 %v1088_v37, %v1087_v32  ;;  %v1170_v41 = vpop.f32.mrf.mxu1 }
 0x123   :  { %v1090_v42 = vpop.f32.mrf.mxu0  ;;  %v1171_v45 = vadd.f32 %v1170_v41, %v1169_v36 }
 0x124   :  { %894 = vst.msk [vmem:[%s1640_s3 + $0x34] sm:$0xf] %vm880_vm0, %v1018_v38  ;;  %v788_v43 = vmax.f32 %v745_v39, 0.0  ;;  %v628_v44 = vadd.f32 %v1089_v40, %v1531_v16  ;;  %v1172_v46 = vpop.f32.mrf.mxu1 }
 0x125   :  { %v1091_v47 = vpop.f32.mrf.mxu0 }
 0x126   :  { %v1019_v48 = vpack.c.bf16 %v788_v43, %v788_v43  ;;  %v748_v49 = vadd.f32 %v1171_v45, %v628_v44  ;;  %v1092_v50 = vadd.f32 %v1091_v47, %v1090_v42  ;;  %v1173_v51 = vpop.f32.mrf.mxu1 }
 0x127   :  { %v1093_v52 = vpop.f32.mrf.mxu0  ;;  %v1174_v55 = vadd.f32 %v1173_v51, %v1172_v46 }
 0x128   :  { %895 = vst.msk [vmem:[%s1640_s3 + $0x38] sm:$0xf] %vm880_vm0, %v1019_v48  ;;  %v789_v53 = vmax.f32 %v748_v49, 0.0  ;;  %v633_v54 = vadd.f32 %v1092_v50, %v1531_v16  ;;  %v1175_v56 = vpop.f32.mrf.mxu1 }
 0x129   :  { %v1094_v57 = vpop.f32.mrf.mxu0 }
 0x12a   :  { %v1020_v58 = vpack.c.bf16 %v789_v53, %v789_v53  ;;  %v753_v59 = vadd.f32 %v1174_v55, %v633_v54  ;;  %v1095_v60 = vadd.f32 %v1094_v57, %v1093_v52  ;;  %v1176_v61 = vpop.f32.mrf.mxu1 }
 0x12b   :  { %v1096_v62 = vpop.f32.mrf.mxu0  ;;  %v1177_v1 = vadd.f32 %v1176_v61, %v1175_v56 }
 0x12c   :  { %896 = vst.msk [vmem:[%s1640_s3 + $0x3c] sm:$0xf] %vm880_vm0, %v1020_v58  ;;  %v790_v63 = vmax.f32 %v753_v59, 0.0  ;;  %v636_v0 = vadd.f32 %v1095_v60, %v1531_v16  ;;  %v1178_v2 = vpop.f32.mrf.mxu1 }
 0x12d   :  { %v1097_v3 = vpop.f32.mrf.mxu0 }
 0x12e   :  { %v1021_v4 = vpack.c.bf16 %v790_v63, %v790_v63  ;;  %v756_v5 = vadd.f32 %v1177_v1, %v636_v0  ;;  %v1098_v6 = vadd.f32 %v1097_v3, %v1096_v62  ;;  %v1179_v7 = vpop.f32.mrf.mxu1 }
 0x12f   :  { %v1099_v8 = vpop.f32.mrf.mxu0  ;;  %v1180_v11 = vadd.f32 %v1179_v7, %v1178_v2 }
 0x130   :  { %897 = vst.msk [vmem:[%s1640_s3 + $0x40] sm:$0xf] %vm880_vm0, %v1021_v4  ;;  %v791_v9 = vmax.f32 %v756_v5, 0.0  ;;  %v641_v10 = vadd.f32 %v1098_v6, %v1531_v16  ;;  %v1181_v12 = vpop.f32.mrf.mxu1 }
 0x131   :  { %v1100_v13 = vpop.f32.mrf.mxu0 }
 0x132   :  { %v1022_v14 = vpack.c.bf16 %v791_v9, %v791_v9  ;;  %v761_v15 = vadd.f32 %v1180_v11, %v641_v10  ;;  %v1101_v17 = vadd.f32 %v1100_v13, %v1099_v8  ;;  %v1182_v18 = vpop.f32.mrf.mxu1 }
 0x133   :  { %v1102_v19 = vpop.f32.mrf.mxu0  ;;  %v1183_v22 = vadd.f32 %v1182_v18, %v1181_v12 }
 0x134   :  { %898 = vst.msk [vmem:[%s1640_s3 + $0x44] sm:$0xf] %vm880_vm0, %v1022_v14  ;;  %v792_v20 = vmax.f32 %v761_v15, 0.0  ;;  %v644_v21 = vadd.f32 %v1101_v17, %v1531_v16  ;;  %v1184_v23 = vpop.f32.mrf.mxu1 }
 0x135   :  { %v1103_v24 = vpop.f32.mrf.mxu0 }
 0x136   :  { %v1023_v25 = vpack.c.bf16 %v792_v20, %v792_v20  ;;  %v764_v26 = vadd.f32 %v1183_v22, %v644_v21  ;;  %v1104_v27 = vadd.f32 %v1103_v24, %v1102_v19  ;;  %v1185_v28 = vpop.f32.mrf.mxu1 }
 0x137   :  { %v1105_v29 = vpop.f32.mrf.mxu0  ;;  %v1186_v32 = vadd.f32 %v1185_v28, %v1184_v23 }
 0x138   :  { %899 = vst.msk [vmem:[%s1640_s3 + $0x48] sm:$0xf] %vm880_vm0, %v1023_v25  ;;  %v793_v30 = vmax.f32 %v764_v26, 0.0  ;;  %v649_v31 = vadd.f32 %v1104_v27, %v1531_v16  ;;  %v1187_v33 = vpop.f32.mrf.mxu1 }
 0x139   :  { %v1106_v34 = vpop.f32.mrf.mxu0 }
 0x13a   :  { %v1024_v35 = vpack.c.bf16 %v793_v30, %v793_v30  ;;  %v769_v36 = vadd.f32 %v1186_v32, %v649_v31  ;;  %v1188_v37 = vpop.f32.mrf.mxu1 }
 0x13c   :  { %900 = vst.msk [vmem:[%s1640_s3 + $0x4c] sm:$0xf] %vm880_vm0, %v1024_v35  ;;  %v794_v38 = vmax.f32 %v769_v36, 0.0 }
 0x13e   :  { %v1025_v39 = vpack.c.bf16 %v794_v38, %v794_v38 }
 0x140   :  { %902 = vst.msk [vmem:[%s1640_s3 + $0x50] sm:$0x1] %vm901_vm1, %v1025_v39 }

// kernel: actor_forward.6
= control target key start
LH: loop header
LB: loop body
LE: loop exit
PB: predicated region body
PF: predicated region fallthrough
CT: control target
= control target key end

     0   :  { %v1248_v34 = vmov 0.0   ;;  %vm1249_vm0 = vmmov 0   ;;  %vm516_vm1 = vcmask 523264   ;;  %vm868_vm2 = vcmask 519168   ;;  %s1647_s1 = inlined_call_operand.vmem [shape: bf16[576,64], index: 1, kind: input, shape index: {}]   ;;  %s1648_s0 = inlined_call_operand.vmem [shape: bf16[98,576], index: 0, kind: input, shape index: {}]   ;;  %s1649_s2 = inlined_call_operand.vmem [shape: f32[1,64], index: 2, kind: input, shape index: {}]   ;;  %s1650_s3 = inlined_call_operand.vmem [shape: bf16[98,64], index: 3, kind: output, shape index: {}]  }
   0x1   :  { %v1165_v0 = vld [vmem:[%s1647_s1 + $0x78] sm:$0xff]   ;;  %v1169_v4 = vld [vmem:[%s1647_s1 + $0x70] sm:$0xff]   ;;  %v1173_v8 = vld [vmem:[%s1647_s1 + $0x68] sm:$0xff]   ;;  %vm881_vm3 = vcmask 516096  }
   0x2   :  { %v1166_v1 = vld [vmem:[%s1647_s1 + $0xf8] sm:$0xff]   ;;  %992 = vmatprep.subr.bf16.mxu0 %v1165_v0  ;;  %v1170_v5 = vld [vmem:[%s1647_s1 + $0xf0] sm:$0xff]   ;;  %v1174_v9 = vld [vmem:[%s1647_s1 + $0xe8] sm:$0xff]  }
   0x3   :  { %v1167_v2 = vld [vmem:[%s1647_s1 + $0x38] sm:$0xff]   ;;  %1050 = vmatprep.subr.bf16.mxu1 %v1166_v1  ;;  %v1171_v6 = vld [vmem:[%s1647_s1 + $0x30] sm:$0xff]   ;;  %v1175_v10 = vld [vmem:[%s1647_s1 + $0x28] sm:$0xff]  }
   0x4   :  { %v1168_v3 = vld [vmem:[%s1647_s1 + $0xb8] sm:$0xff]   ;;  %993 = vmatpush3.bf16.msra.mxu0 %v1167_v2  ;;  %v1172_v7 = vld [vmem:[%s1647_s1 + $0xb0] sm:$0xff]   ;;  %v1176_v11 = vld [vmem:[%s1647_s1 + $0xa8] sm:$0xff]  }
   0x5   :  { %1051 = vmatpush3.bf16.msra.mxu1 %v1168_v3  ;;  %994 = vmatprep.subr.bf16.mxu0 %v1169_v4  ;;  %v1177_v12 = vld [vmem:[%s1647_s1 + $0x60] sm:$0xff]   ;;  %v1181_v16 = vld [vmem:[%s1647_s1 + $0x58] sm:$0xff]   ;;  %v1185_v20 = vld [vmem:[%s1647_s1 + $0x50] sm:$0xff]  }
   0x6   :  { %1052 = vmatprep.subr.bf16.mxu1 %v1170_v5  ;;  %v1178_v13 = vld [vmem:[%s1647_s1 + $0xe0] sm:$0xff]   ;;  %v1182_v17 = vld [vmem:[%s1647_s1 + $0xd8] sm:$0xff]   ;;  %v1186_v21 = vld [vmem:[%s1647_s1 + $0xd0] sm:$0xff]  }
   0x7   :  { %v1179_v14 = vld [vmem:[%s1647_s1 + $0x20] sm:$0xff]   ;;  %v1183_v18 = vld [vmem:[%s1647_s1 + $0x18] sm:$0xff]   ;;  %v1187_v22 = vld [vmem:[%s1647_s1 + $0x10] sm:$0xff]  }
   0x8   :  { %995 = vmatpush3.bf16.msra.mxu0 %v1171_v6  ;;  %v1180_v15 = vld [vmem:[%s1647_s1 + $0xa0] sm:$0xff]   ;;  %v1184_v19 = vld [vmem:[%s1647_s1 + $0x98] sm:$0xff]   ;;  %v1188_v23 = vld [vmem:[%s1647_s1 + $0x90] sm:$0xff]  }
   0x9   :  { %1053 = vmatpush3.bf16.msra.mxu1 %v1172_v7  ;;  %996 = vmatprep.subr.bf16.mxu0 %v1173_v8  ;;  %v1189_v24 = vld [vmem:[%s1647_s1 + $0x48] sm:$0xff]   ;;  %v1193_v28 = vld [vmem:[%s1647_s1 + $0x40] sm:$0xff]   ;;  %v1203_v37 = vld [vmem:[%s1647_s1 + $0x118] sm:$0xff]  }
   0xa   :  { %1054 = vmatprep.subr.bf16.mxu1 %v1174_v9  ;;  %v1190_v25 = vld [vmem:[%s1647_s1 + $0xc8] sm:$0xff]   ;;  %v1194_v29 = vld [vmem:[%s1647_s1 + $0xc0] sm:$0xff]   ;;  %v1214_v43 = vld [vmem:[%s1647_s1 + $0x110] sm:$0xff]  }
   0xb   :  { %v1191_v26 = vld [vmem:[%s1647_s1 + $0x8] sm:$0xff]   ;;  %v1195_v30 = vld [vmem:[%s1647_s1] sm:$0xff]   ;;  %v1212_v44 = vld [vmem:[%s1648_s0 + $0x5c] ss:$20 sps:$4 sm:$0xff]  }
   0xc   :  { %997 = vmatpush3.bf16.msra.mxu0 %v1175_v10  ;;  %v1192_v27 = vld [vmem:[%s1647_s1 + $0x88] sm:$0xff]   ;;  %v1196_v31 = vld [vmem:[%s1647_s1 + $0x80] sm:$0xff]   ;;  %v1217_v48 = vld [vmem:[%s1648_s0 + $0x7c] ss:$20 sps:$4 sm:$0xff]  }
   0xd   :  { %1055 = vmatpush3.bf16.msra.mxu1 %v1176_v11  ;;  %998 = vmatprep.subr.bf16.mxu0 %v1177_v12  ;;  %v1197_v32 = vld [vmem:[%s1648_s0] ss:$20 sps:$4 sm:$0xff]   ;;  %v1199_v33 = vld [vmem:[%s1648_s0 + $0x4] ss:$20 sps:$4 sm:$0xff]   ;;  %v1200_v35 = vld [vmem:[%s1648_s0 + $0x8] ss:$20 sps:$4 sm:$0xff]  }
   0xe   :  { %1056 = vmatprep.subr.bf16.mxu1 %v1178_v13  ;;  %v1202_v36 = vld [vmem:[%s1648_s0 + $0xc] ss:$20 sps:$4 sm:$0xff]   ;;  %570 = vmatprep.mubr.bf16.mxu0 %v1199_v33  ;;  %v1206_v39 = vld [vmem:[%s1648_s0 + $0x34] ss:$20 sps:$4 sm:$0xff]   ;;  %v1209_v41 = vld [vmem:[%s1648_s0 + $0x30] ss:$20 sps:$4 sm:$0xff]  }
   0xf   :  { %658 = vmatprep.mubr.bf16.mxu1 %v1202_v36  ;;  %v1204_v38 = vld [vmem:[%s1648_s0 + $0x2c] ss:$20 sps:$4 sm:$0xff]   ;;  %v1208_v40 = vld [vmem:[%s1648_s0 + $0x28] ss:$20 sps:$4 sm:$0xff]   ;;  %v1215_v46 = vld [vmem:[%s1648_s0 + $0x50] ss:$20 sps:$4 sm:$0xff]  }
  0x10   :  { %999 = vmatpush3.bf16.msra.mxu0 %v1179_v14  ;;  %v1210_v42 = vld [vmem:[%s1648_s0 + $0x54] ss:$20 sps:$4 sm:$0xff]   ;;  %v1216_v47 = vld [vmem:[%s1648_s0 + $0x58] ss:$20 sps:$4 sm:$0xff]   ;;  %v1236_v50 = vld [vmem:[%s1647_s1 + $0x100] sm:$0xff]  }
  0x11   :  { %1057 = vmatpush3.bf16.msra.mxu1 %v1180_v15  ;;  %1000 = vmatprep.subr.bf16.mxu0 %v1181_v16  ;;  %v1223_v45 = vld [vmem:[%s1647_s1 + $0x108] sm:$0xff]   ;;  %v1219_v49 = vld [vmem:[%s1648_s0 + $0x84] ss:$20 sps:$4 sm:$0xff]   ;;  %v1222_v52 = vld [vmem:[%s1648_s0 + $0x80] ss:$20 sps:$4 sm:$0xff]  }
  0x12   :  { %1058 = vmatprep.subr.bf16.mxu1 %v1182_v17  ;;  %v1221_v51 = vld [vmem:[%s1648_s0 + $0x78] ss:$20 sps:$4 sm:$0xff]   ;;  %v1228_v55 = vld [vmem:[%s1648_s0 + $0xa0] ss:$20 sps:$4 sm:$0xff]   ;;  %v1229_v56 = vld [vmem:[%s1648_s0 + $0xa8] ss:$20 sps:$4 sm:$0xff]  }
  0x13   :  { %v1224_v53 = vld [vmem:[%s1648_s0 + $0xa4] ss:$20 sps:$4 sm:$0xff]   ;;  %v1226_v54 = vld [vmem:[%s1648_s0 + $0xac] ss:$20 sps:$4 sm:$0xff]   ;;  %v1232_v58 = vld [vmem:[%s1648_s0 + $0xd4] ss:$20 sps:$4 sm:$0xff]  }
  0x14   :  { %1001 = vmatpush3.bf16.msra.mxu0 %v1183_v18  ;;  %v1230_v57 = vld [vmem:[%s1648_s0 + $0xcc] ss:$20 sps:$4 sm:$0xff]   ;;  %v51_v59 = vld [vmem:[%s1648_s0 + $0xf0] sm:$0x11]  ;;  %v52_v60 = vld [vmem:[%s1648_s0 + $0xf8] sm:$0x11] }
  0x15   :  { %1059 = vmatpush3.bf16.msra.mxu1 %v1184_v19  ;;  %1002 = vmatprep.subr.bf16.mxu0 %v1185_v20  ;;  %v1234_v61 = vld [vmem:[%s1648_s0 + $0xc8] ss:$20 sps:$4 sm:$0xff]   ;;  %v1235_v62 = vld [vmem:[%s1648_s0 + $0xd0] ss:$20 sps:$4 sm:$0xff]   ;;  %v919_v63 = vcombine.high %v51_v59, %v51_v59  ;;  %v921_v0 = vcombine.high %v52_v60, %v52_v60  ;;  %v918_v1 = vcombine.low %v51_v59, %v51_v59  ;;  %v1243_v5 = vld [vmem:[%s1648_s0 + $0x38] ss:$20 sps:$4 sm:$0xff]  }
  0x16   :  { %1060 = vmatprep.subr.bf16.mxu1 %v1186_v21  ;;  %v920_v2 = vcombine.low %v52_v60, %v52_v60  ;;  %v1241_v3 = vld [vmem:[%s1648_s0 + $0x10] ss:$20 sps:$4 sm:$0xff]   ;;  %v1244_v6 = vld [vmem:[%s1648_s0 + $0xd8] ss:$20 sps:$4 sm:$0xff]   ;;  %v1245_v7 = vld [vmem:[%s1648_s0 + $0x60] ss:$20 sps:$4 sm:$0xff]  }
  0x17   :  { %v1242_v4 = vld [vmem:[%s1648_s0 + $0xb0] ss:$20 sps:$4 sm:$0xff]   ;;  %v1246_v8 = vld [vmem:[%s1648_s0 + $0x100] ss:$0 sps:$4 sm:$0x11]  }
  0x18   :  { %1003 = vmatpush3.bf16.msra.mxu0 %v1187_v22  ;;  %v1247_v9 = vld [vmem:[%s1648_s0 + $0x88] ss:$20 sps:$4 sm:$0xff]   ;;  %v1553_v59 = vld [vmem:[%s1649_s2] ss:$0 sm:$0xff] }
  0x19   :  { %1061 = vmatpush3.bf16.msra.mxu1 %v1188_v23  ;;  %1004 = vmatprep.subr.bf16.mxu0 %v1189_v24 }
  0x1a   :  { %1062 = vmatprep.subr.bf16.mxu1 %v1190_v25 }
  0x1c   :  { %1005 = vmatpush3.bf16.msra.mxu0 %v1191_v26 }
  0x1d   :  { %1063 = vmatpush3.bf16.msra.mxu1 %v1192_v27  ;;  %1006 = vmatprep.subr.bf16.mxu0 %v1193_v28 }
  0x1e   :  { %1064 = vmatprep.subr.bf16.mxu1 %v1194_v29 }
  0x20   :  { %1007 = vmatpush3.bf16.msra.mxu0 %v1195_v30 }
  0x21   :  { %1065 = vmatpush3.bf16.msra.mxu1 %v1196_v31  ;;  %1119 = vmatprep.subr.bf16.mxu0 %v1248_v34 }
  0x22   :  { %1155 = vmatprep.subr.bf16.mxu1 %v1248_v34 }
  0x23   :  { %571 = vmatmul.mubr.bf16.vlgmr.msra.gmra.mxu0 %v1197_v32 }
  0x24   :  { %659 = vmatmul.mubr.bf16.vlgmr.msra.gmra.mxu1 %v1200_v35  ;;  %1120 = vmatpush3.bf16.msra.mxu0 %v1203_v37 }
  0x25   :  { %578 = vmatprep.mubr.bf16.mxu0 %v1204_v38  ;;  %1159 = vmatpush3.bf16.msra.mxu1 %v1203_v37 }
  0x26   :  { %666 = vmatprep.mubr.bf16.mxu1 %v1206_v39  ;;  %1121 = vmatprep.subr.bf16.mxu0 %v1248_v34 }
  0x27   :  { %1156 = vmatprep.subr.bf16.mxu1 %v1248_v34 }
  0x28   :  { %1122 = vmatpush3.bf16.msra.mxu0 %v1214_v43 }
  0x29   :  { %1160 = vmatpush3.bf16.msra.mxu1 %v1214_v43  ;;  %1123 = vmatprep.subr.bf16.mxu0 %v1248_v34 }
  0x2a   :  { %1157 = vmatprep.subr.bf16.mxu1 %v1248_v34 }
  0x2b   :  { %579 = vmatmul.mubr.bf16.gmra.mxu0 %v1208_v40 }
  0x2c   :  { %667 = vmatmul.mubr.bf16.gmra.mxu1 %v1209_v41  ;;  %586 = vmatprep.mubr.bf16.mxu0 %v1210_v42 }
  0x2d   :  { %674 = vmatprep.mubr.bf16.mxu1 %v1212_v44  ;;  %1124 = vmatpush3.bf16.msra.mxu0 %v1223_v45 }
  0x2e   :  { %1161 = vmatpush3.bf16.msra.mxu1 %v1223_v45  ;;  %1125 = vmatprep.subr.bf16.mxu0 %v1248_v34 }
  0x2f   :  { %1158 = vmatprep.subr.bf16.mxu1 %v1248_v34 }
  0x31   :  { %1126 = vmatpush3.bf16.msra.mxu0 %v1236_v50 }
  0x32   :  { %1162 = vmatpush3.bf16.msra.mxu1 %v1236_v50 }
  0x33   :  { %587 = vmatmul.mubr.bf16.gmra.mxu0 %v1215_v46 }
  0x34   :  { %675 = vmatmul.mubr.bf16.gmra.mxu1 %v1216_v47  ;;  %594 = vmatprep.mubr.bf16.mxu0 %v1217_v48 }
  0x35   :  { %682 = vmatprep.mubr.bf16.mxu1 %v1219_v49 }
  0x3b   :  { %595 = vmatmul.mubr.bf16.gmra.mxu0 %v1221_v51 }
  0x3c   :  { %683 = vmatmul.mubr.bf16.gmra.mxu1 %v1222_v52  ;;  %602 = vmatprep.mubr.bf16.mxu0 %v1224_v53 }
  0x3d   :  { %690 = vmatprep.mubr.bf16.mxu1 %v1226_v54 }
  0x43   :  { %603 = vmatmul.mubr.bf16.gmra.mxu0 %v1228_v55 }
  0x44   :  { %691 = vmatmul.mubr.bf16.gmra.mxu1 %v1229_v56  ;;  %610 = vmatprep.mubr.bf16.mxu0 %v1230_v57 }
  0x45   :  { %698 = vmatprep.mubr.bf16.mxu1 %v1232_v58 }
  0x4b   :  { %611 = vmatmul.mubr.bf16.gmra.mxu0 %v1234_v61 }
  0x4c   :  { %699 = vmatmul.mubr.bf16.gmra.mxu1 %v1235_v62  ;;  %618 = vmatprep.mubr.bf16.mxu0 %v919_v63 }
  0x4d   :  { %706 = vmatprep.mubr.bf16.mxu1 %v921_v0 }
  0x53   :  { %619 = vmatmul.mubr.bf16.gmra.mxu0 %v918_v1 }
  0x54   :  { %707 = vmatmul.mubr.bf16.gmra.mxu1 %v920_v2  ;;  %1127 = vmatprep.mubr.msk.bf16.mxu0 %vm1249_vm0, %v1248_v34 }
  0x55   :  { %1143 = vmatprep.mubr.msk.bf16.mxu1 %vm1249_vm0, %v1248_v34 }
  0x5b   :  { %1128 = vmatmul.mubr.msk.bf16.vlgmr.msra.gmra.mxu0 %vm516_vm1, %v1241_v3 }
  0x5c   :  { %1144 = vmatmul.mubr.msk.bf16.vlgmr.msra.gmra.mxu1 %vm516_vm1, %v1242_v4  ;;  %1131 = vmatprep.mubr.msk.bf16.mxu0 %vm1249_vm0, %v1248_v34 }
  0x5d   :  { %1147 = vmatprep.mubr.msk.bf16.mxu1 %vm1249_vm0, %v1248_v34 }
  0x63   :  { %1132 = vmatmul.mubr.msk.bf16.gmra.mxu0 %vm516_vm1, %v1243_v5 }
  0x64   :  { %1148 = vmatmul.mubr.msk.bf16.gmra.mxu1 %vm516_vm1, %v1244_v6  ;;  %1135 = vmatprep.mubr.msk.bf16.mxu0 %vm1249_vm0, %v1248_v34 }
  0x65   :  { %1151 = vmatprep.mubr.msk.bf16.mxu1 %vm1249_vm0, %v1248_v34 }
  0x6b   :  { %1136 = vmatmul.mubr.msk.bf16.gmra.mxu0 %vm516_vm1, %v1245_v7 }
  0x6c   :  { %1152 = vmatmul.mubr.msk.bf16.gmra.mxu1 %vm516_vm1, %v1246_v8  ;;  %1139 = vmatprep.mubr.msk.bf16.mxu0 %vm1249_vm0, %v1248_v34 }
  0x73   :  { %1140 = vmatmul.mubr.msk.bf16.gmra.mxu0 %vm516_vm1, %v1247_v9 }
  0xe3   :  { %v1008_v10 = vpop.f32.mrf.mxu0 }
  0xe4   :  { %v1066_v11 = vpop.f32.mrf.mxu1 }
  0xe5   :  { %v1009_v12 = vpop.f32.mrf.mxu0 }
  0xe6   :  { %v1067_v13 = vpop.f32.mrf.mxu1  ;;  %v1010_v57 = vadd.f32 %v1009_v12, %v1008_v10 }
  0xe7   :  { %v1011_v14 = vpop.f32.mrf.mxu0  ;;  %v1068_v2 = vadd.f32 %v1067_v13, %v1066_v11 }
  0xe8   :  { %v1069_v15 = vpop.f32.mrf.mxu1  ;;  %v573_v1 = vadd.f32 %v1010_v57, %v1553_v59 }
  0xe9   :  { %v1012_v16 = vpop.f32.mrf.mxu0 }
  0xea   :  { %v1070_v17 = vpop.f32.mrf.mxu1  ;;  %v1013_v63 = vadd.f32 %v1012_v16, %v1011_v14  ;;  %v661_v14 = vadd.f32 %v1068_v2, %v573_v1 }
  0xeb   :  { %v1014_v18 = vpop.f32.mrf.mxu0  ;;  %v1071_v10 = vadd.f32 %v1070_v17, %v1069_v15 }
  0xec   :  { %v1506_v19 = vpop.f32.mrf.mxu1  ;;  %v576_v9 = vadd.f32 %v1013_v63, %v1553_v59 }
  0xed   :  { %v1015_v20 = vpop.f32.mrf.mxu0 }
  0xee   :  { %v1508_v21 = vpop.f32.mrf.mxu1  ;;  %v1016_v12 = vadd.f32 %v1015_v20, %v1014_v18  ;;  %v664_v15 = vadd.f32 %v1071_v10, %v576_v9 }
  0xef   :  { %v1510_v22 = vpop.f32.mrf.mxu0 }
  0xf0   :  { %v1512_v23 = vpop.f32.mrf.mxu1 }
  0xf1   :  { %v1514_v24 = vpop.f32.mrf.mxu0 }
  0xf2   :  { %v1516_v25 = vpop.f32.mrf.mxu1  ;;  %v1019_v17 = vadd.f32 %v1514_v24, %v1510_v22 }
  0xf3   :  { %v1518_v26 = vpop.f32.mrf.mxu0 }
  0xf4   :  { %v1520_v27 = vpop.f32.mrf.mxu1  ;;  %v584_v24 = vadd.f32 %v1019_v17, %v1553_v59 }
  0xf5   :  { %v1522_v28 = vpop.f32.mrf.mxu0 }
  0xf6   :  { %v1524_v29 = vpop.f32.mrf.mxu1 }
  0xf7   :  { %v1526_v30 = vpop.f32.mrf.mxu0 }
  0xf8   :  { %v1528_v31 = vpop.f32.mrf.mxu1 }
  0xf9   :  { %v1530_v32 = vpop.f32.mrf.mxu0 }
  0xfa   :  { %v1532_v33 = vpop.f32.mrf.mxu1 }
  0xfb   :  { %v1534_v34 = vpop.f32.mrf.mxu0 }
  0xfc   :  { %v1536_v35 = vpop.f32.mrf.mxu1 }
  0xfd   :  { %v1538_v36 = vpop.f32.mrf.mxu0 }
  0xfe   :  { %v1540_v37 = vpop.f32.mrf.mxu1 }
  0xff   :  { %v1542_v38 = vpop.f32.mrf.mxu0 }
 0x100   :  { %v1544_v39 = vpop.f32.mrf.mxu1 }
 0x101   :  { %1651 = vst [vmem:[#allocation2_spill] sm:$0xff] %v1544_v39  ;;  %v1546_v40 = vpop.f32.mrf.mxu0 }
 0x102   :  { %1652 = vst [vmem:[#allocation3_spill] sm:$0xff] %v1546_v40  ;;  %v1548_v41 = vpop.f32.mrf.mxu1 }
 0x103   :  { %1653 = vst [vmem:[#allocation4_spill] sm:$0xff] %v1548_v41  ;;  %v1032_v42 = vpop.f32.mrf.mxu0 }
 0x104   :  { %v1090_v43 = vpop.f32.mrf.mxu1 }
 0x105   :  { %v1033_v44 = vpop.f32.mrf.mxu0 }
 0x106   :  { %v1091_v45 = vpop.f32.mrf.mxu1  ;;  %v1034_v60 = vadd.f32 %v1033_v44, %v1032_v42 }
 0x107   :  { %v1035_v46 = vpop.f32.mrf.mxu0  ;;  %v1092_v5 = vadd.f32 %v1091_v45, %v1090_v43  ;;  %v581_v43 = vadd.f32 %v1016_v12, %v1553_v59  ;;  %v1074_v45 = vadd.f32 %v1508_v21, %v1506_v19  ;;  %v1077_v19 = vadd.f32 %v1516_v25, %v1512_v23 }
 0x108   :  { %v1093_v47 = vpop.f32.mrf.mxu1  ;;  %v605_v4 = vadd.f32 %v1034_v60, %v1553_v59 }
 0x109   :  { %v1036_v48 = vpop.f32.mrf.mxu0  ;;  %v669_v22 = vadd.f32 %v1074_v45, %v581_v43 }
 0x10a   :  { %v1094_v49 = vpop.f32.mrf.mxu1  ;;  %v1037_v6 = vadd.f32 %v1036_v48, %v1035_v46  ;;  %v693_v13 = vadd.f32 %v1092_v5, %v605_v4 }
 0x10b   :  { %v1038_v50 = vpop.f32.mrf.mxu0  ;;  %v1095_v57 = vadd.f32 %v1094_v49, %v1093_v47 }
 0x10c   :  { %v1096_v51 = vpop.f32.mrf.mxu1  ;;  %v608_v16 = vadd.f32 %v1037_v6, %v1553_v59 }
 0x10d   :  { %v1039_v52 = vpop.f32.mrf.mxu0 }
 0x10e   :  { %v1097_v53 = vpop.f32.mrf.mxu1  ;;  %v1040_v44 = vadd.f32 %v1039_v52, %v1038_v50  ;;  %v696_v60 = vadd.f32 %v1095_v57, %v608_v16 }
 0x10f   :  { %v1041_v54 = vpop.f32.mrf.mxu0  ;;  %v1098_v20 = vadd.f32 %v1097_v53, %v1096_v51 }
 0x110   :  { %v1099_v55 = vpop.f32.mrf.mxu1  ;;  %v613_v18 = vadd.f32 %v1040_v44, %v1553_v59 }
 0x111   :  { %v1042_v56 = vpop.f32.mrf.mxu0 }
 0x112   :  { %v1100_v58 = vpop.f32.mrf.mxu1  ;;  %v1043_v49 = vadd.f32 %v1042_v56, %v1041_v54  ;;  %v701_v54 = vadd.f32 %v1098_v20, %v613_v18 }
 0x113   :  { %v1044_v61 = vpop.f32.mrf.mxu0  ;;  %v1101_v23 = vadd.f32 %v1100_v58, %v1099_v55  ;;  %v1080_v55 = vadd.f32 %v1524_v29, %v1520_v27 }
 0x114   :  { %v1555_v62 = vpop.f32.mrf.mxu1  ;;  %v616_v56 = vadd.f32 %v1043_v49, %v1553_v59 }
 0x115   :  { %v1045_v0 = vpop.f32.mrf.mxu0 }
 0x116   :  { %v1558_v3 = vpop.f32.mrf.mxu1  ;;  %v1046_v25 = vadd.f32 %v1045_v0, %v1044_v61  ;;  %v672_v0 = vadd.f32 %v1077_v19, %v584_v24  ;;  %v704_v29 = vadd.f32 %v1101_v23, %v616_v56  ;;  %v1655_v24 = vld [vmem:[#allocation2_spill] sm:$0xff] }
 0x117   :  { %v1047_v7 = vpop.f32.mrf.mxu0 }
 0x118   :  { %v1105_v8 = vpop.f32.mrf.mxu1  ;;  %v621_v44 = vadd.f32 %v1046_v25, %v1553_v59 }
 0x119   :  { %v1048_v42 = vpop.f32.mrf.mxu0  ;;  %v1025_v8 = vadd.f32 %v1530_v32, %v1526_v30  ;;  %v1104_v30 = vadd.f32 %v1558_v3, %v1555_v62  ;;  %v1028_v62 = vadd.f32 %v1538_v36, %v1534_v34 }
 0x11a   :  { %v1106_v41 = vpop.f32.mrf.mxu1 }
 0x11b   :  { %v748_v11 = vpop.f32.mrf.mxu0  ;;  %v709_v17 = vadd.f32 %v1104_v30, %v621_v44 }
 0x11c   :  { %v749_v39 = vadd.f32 %v748_v11, %v661_v14  ;;  %v780_v40 = vpop.f32.mrf.mxu1  ;;  %v592_v11 = vadd.f32 %v1025_v8, %v1553_v59 }
 0x11d   :  { %v781_v46 = vadd.f32 %v780_v40, %v693_v13  ;;  %v1129_v48 = vpop.f32.mrf.mxu0  ;;  %v1083_v13 = vadd.f32 %v1532_v33, %v1528_v31 }
 0x11e   :  { %v802_v41 = vmax.f32 %v749_v39, 0.0  ;;  %v1145_v47 = vpop.f32.mrf.mxu1  ;;  %v1022_v39 = vadd.f32 %v1522_v28, %v1518_v26 }
 0x11f   :  { %v810_v50 = vmax.f32 %v781_v46, 0.0  ;;  %v751_v52 = vpop.f32.mrf.mxu0  ;;  %v680_v49 = vadd.f32 %v1083_v13, %v592_v11 }
 0x120   :  { %v979_v63 = vpack.c.bf16 %v802_v41, %v802_v41  ;;  %v752_v1 = vadd.f32 %v751_v52, %v664_v15  ;;  %v783_v2 = vpop.f32.mrf.mxu1  ;;  %v589_v42 = vadd.f32 %v1022_v39, %v1553_v59  ;;  %v1086_v52 = vadd.f32 %v1540_v37, %v1536_v35  ;;  %v1656_v39 = vld [vmem:[#allocation4_spill] sm:$0xff] }
 0x121   :  { %v987_v21 = vpack.c.bf16 %v810_v50, %v810_v50  ;;  %v784_v40 = vadd.f32 %v783_v2, %v696_v60  ;;  %v1130_v4 = vpop.f32.mrf.mxu0  ;;  %v597_v50 = vadd.f32 %v1028_v62, %v1553_v59  ;;  %v1654_v60 = vld [vmem:[#allocation3_spill] sm:$0xff] }
 0x122   :  { %869 = vst.msk [vmem:[%s1650_s3] sm:$0xf] %vm868_vm2, %v979_v63  ;;  %v803_v51 = vmax.f32 %v752_v1, 0.0  ;;  %v1146_v53 = vpop.f32.mrf.mxu1  ;;  %v677_v15 = vadd.f32 %v1080_v55, %v589_v42  ;;  %v1031_v63 = vadd.f32 %v1654_v60, %v1542_v38 }
 0x123   :  { %877 = vst.msk [vmem:[%s1650_s3 + $0x20] sm:$0xf] %vm868_vm2, %v987_v21  ;;  %v811_v5 = vmax.f32 %v784_v40, 0.0  ;;  %v756_v6 = vpop.f32.mrf.mxu0 }
 0x124   :  { %v980_v26 = vpack.c.bf16 %v803_v51, %v803_v51  ;;  %v757_v28 = vadd.f32 %v756_v6, %v669_v22  ;;  %v788_v7 = vpop.f32.mrf.mxu1  ;;  %v600_v22 = vadd.f32 %v1031_v63, %v1553_v59  ;;  %v1089_v51 = vadd.f32 %v1656_v39, %v1655_v24 }
 0x125   :  { %v988_v9 = vpack.c.bf16 %v811_v5, %v811_v5  ;;  %v789_v10 = vadd.f32 %v788_v7, %v701_v54  ;;  %v1133_v12 = vpop.f32.mrf.mxu0  ;;  %v685_v54 = vadd.f32 %v1086_v52, %v597_v50 }
 0x126   :  { %870 = vst.msk [vmem:[%s1650_s3 + $0x4] sm:$0xf] %vm868_vm2, %v980_v26  ;;  %v804_v58 = vmax.f32 %v757_v28, 0.0  ;;  %v1149_v61 = vpop.f32.mrf.mxu1  ;;  %v688_v26 = vadd.f32 %v1089_v51, %v600_v22 }
 0x127   :  { %878 = vst.msk [vmem:[%s1650_s3 + $0x24] sm:$0xf] %vm868_vm2, %v988_v9  ;;  %v812_v32 = vmax.f32 %v789_v10, 0.0  ;;  %v759_v27 = vpop.f32.mrf.mxu0 }
 0x128   :  { %v981_v14 = vpack.c.bf16 %v804_v58, %v804_v58  ;;  %v760_v16 = vadd.f32 %v759_v27, %v672_v0  ;;  %v791_v57 = vpop.f32.mrf.mxu1 }
 0x129   :  { %v989_v43 = vpack.c.bf16 %v812_v32, %v812_v32  ;;  %v792_v45 = vadd.f32 %v791_v57, %v704_v29  ;;  %v1134_v46 = vpop.f32.mrf.mxu0 }
 0x12a   :  { %871 = vst.msk [vmem:[%s1650_s3 + $0x8] sm:$0xf] %vm868_vm2, %v981_v14  ;;  %v805_v3 = vmax.f32 %v760_v16, 0.0  ;;  %v1150_v48 = vpop.f32.mrf.mxu1 }
 0x12b   :  { %879 = vst.msk [vmem:[%s1650_s3 + $0x28] sm:$0xf] %vm868_vm2, %v989_v43  ;;  %v813_v31 = vmax.f32 %v792_v45, 0.0  ;;  %v764_v33 = vpop.f32.mrf.mxu0 }
 0x12c   :  { %v982_v18 = vpack.c.bf16 %v805_v3, %v805_v3  ;;  %v765_v20 = vadd.f32 %v764_v33, %v677_v15  ;;  %v796_v41 = vpop.f32.mrf.mxu1 }
 0x12d   :  { %v990_v34 = vpack.c.bf16 %v813_v31, %v813_v31  ;;  %v797_v36 = vadd.f32 %v796_v41, %v709_v17  ;;  %v1137_v47 = vpop.f32.mrf.mxu0 }
 0x12e   :  { %872 = vst.msk [vmem:[%s1650_s3 + $0xc] sm:$0xf] %vm868_vm2, %v982_v18  ;;  %v806_v1 = vmax.f32 %v765_v20, 0.0  ;;  %v1153_v2 = vpop.f32.mrf.mxu1 }
 0x12f   :  { %880 = vst.msk [vmem:[%s1650_s3 + $0x2c] sm:$0xf] %vm868_vm2, %v990_v34  ;;  %v814_v19 = vmax.f32 %v797_v36, 0.0  ;;  %v767_v21 = vpop.f32.mrf.mxu0 }
 0x130   :  { %v983_v40 = vpack.c.bf16 %v806_v1, %v806_v1  ;;  %v768_v35 = vadd.f32 %v767_v21, %v680_v49  ;;  %v799_v37 = vpop.f32.mrf.mxu1 }
 0x131   :  { %v991_v4 = vpack.c.bf16 %v814_v19, %v814_v19  ;;  %v1138_v38 = vpop.f32.mrf.mxu0 }
 0x132   :  { %873 = vst.msk [vmem:[%s1650_s3 + $0x10] sm:$0xf] %vm868_vm2, %v983_v40  ;;  %v807_v53 = vmax.f32 %v768_v35, 0.0  ;;  %v1154_v56 = vpop.f32.mrf.mxu1 }
 0x133   :  { %882 = vst.msk [vmem:[%s1650_s3 + $0x30] sm:$0x1] %vm881_vm3, %v991_v4  ;;  %v772_v23 = vpop.f32.mrf.mxu0 }
 0x134   :  { %v984_v25 = vpack.c.bf16 %v807_v53, %v807_v53  ;;  %v773_v5 = vadd.f32 %v772_v23, %v685_v54 }
 0x135   :  { %v1141_v6 = vpop.f32.mrf.mxu0 }
 0x136   :  { %874 = vst.msk [vmem:[%s1650_s3 + $0x14] sm:$0xf] %vm868_vm2, %v984_v25  ;;  %v808_v59 = vmax.f32 %v773_v5, 0.0 }
 0x137   :  { %v775_v28 = vpop.f32.mrf.mxu0 }
 0x138   :  { %v985_v7 = vpack.c.bf16 %v808_v59, %v808_v59  ;;  %v776_v8 = vadd.f32 %v775_v28, %v688_v26 }
 0x139   :  { %v1142_v9 = vpop.f32.mrf.mxu0 }
 0x13a   :  { %875 = vst.msk [vmem:[%s1650_s3 + $0x18] sm:$0xf] %vm868_vm2, %v985_v7  ;;  %v809_v10 = vmax.f32 %v776_v8, 0.0 }
 0x13c   :  { %v986_v12 = vpack.c.bf16 %v809_v10, %v809_v10 }
 0x13e   :  { %876 = vst.msk [vmem:[%s1650_s3 + $0x1c] sm:$0xf] %vm868_vm2, %v986_v12 }

// kernel: actor_forward.7
= control target key start
LH: loop header
LB: loop body
LE: loop exit
PB: predicated region body
PF: predicated region fallthrough
CT: control target
= control target key end

     0   :  { %v812_v36 = vlaneseq  ;;  %v8494_v37 = vmov 1966171168   ;;  %vm4941_vm0 = vcmask 523264   ;;  %s11241_s0 = inlined_call_operand.vmem [shape: bf16[2,3136], index: 0, kind: input, shape index: {}]   ;;  %s11242_s1 = inlined_call_operand.vmem [shape: bf16[3136,512], index: 1, kind: input, shape index: {}]   ;;  %s11243_s2 = inlined_call_operand.vmem [shape: f32[1,512], index: 2, kind: input, shape index: {}]   ;;  %s11244_s3 = inlined_call_operand.vmem [shape: bf16[512,6], index: 3, kind: input, shape index: {}]   ;;  %s11245_s4 = inlined_call_operand.vmem [shape: f32[1,6], index: 4, kind: input, shape index: {}]   ;;  %s11246_s5 = inlined_call_operand.hbm [shape: f32[2,6], index: 5, kind: output, shape index: {}]  }
   0x1   :  { %v7256_v0 = vld [vmem:[%s11242_s1 + $0xe4] ss:$16 sps:$4 sm:$0xff]   ;;  %v7260_v2 = vld [vmem:[%s11242_s1 + $0xe0] ss:$16 sps:$4 sm:$0xff]   ;;  %v838_v38 = vunpack.c.l.s4 %v8494_v37 }
   0x2   :  { %v7258_v1 = vld [vmem:[%s11242_s1 + $0x2e4] ss:$16 sps:$4 sm:$0xff]   ;;  %4945 = vmatprep.subr.bf16.mxu0 %v7256_v0  ;;  %v7261_v3 = vld [vmem:[%s11242_s1 + $0x2e0] ss:$16 sps:$4 sm:$0xff]   ;;  %v8644_v42 = vshrl.u32 %v812_v36, 7 }
   0x3   :  { %4986 = vmatprep.subr.bf16.mxu1 %v7258_v1  ;;  %v7262_v4 = vld [vmem:[%s11242_s1 + $0xc4] ss:$16 sps:$4 sm:$0xff]   ;;  %4946 = vmatpush1.bf16.msra.mxu0 %v7260_v2  ;;  %v7266_v6 = vld [vmem:[%s11242_s1 + $0xc0] ss:$16 sps:$4 sm:$0xff]   ;;  %v839_v43 = vunpack.c.0.s8 %v838_v38 }
   0x4   :  { %4987 = vmatpush1.bf16.msra.mxu1 %v7261_v3  ;;  %v7264_v5 = vld [vmem:[%s11242_s1 + $0x2c4] ss:$16 sps:$4 sm:$0xff]   ;;  %4947 = vmatprep.subr.bf16.mxu0 %v7262_v4  ;;  %v7267_v7 = vld [vmem:[%s11242_s1 + $0x2c0] ss:$16 sps:$4 sm:$0xff]  }
   0x5   :  { %4988 = vmatprep.subr.bf16.mxu1 %v7264_v5  ;;  %v7268_v8 = vld [vmem:[%s11242_s1 + $0xa4] ss:$16 sps:$4 sm:$0xff]   ;;  %v7272_v10 = vld [vmem:[%s11242_s1 + $0xa0] ss:$16 sps:$4 sm:$0xff]   ;;  %v8662_v49 = vsub.s32 %v839_v43, %v8644_v42 }
   0x6   :  { %v7270_v9 = vld [vmem:[%s11242_s1 + $0x2a4] ss:$16 sps:$4 sm:$0xff]   ;;  %v7273_v11 = vld [vmem:[%s11242_s1 + $0x2a0] ss:$16 sps:$4 sm:$0xff]  }
   0x7   :  { %4948 = vmatpush1.bf16.msra.mxu0 %v7266_v6  ;;  %v7274_v12 = vld [vmem:[%s11242_s1 + $0x84] ss:$16 sps:$4 sm:$0xff]   ;;  %v7278_v14 = vld [vmem:[%s11242_s1 + $0x80] ss:$16 sps:$4 sm:$0xff]  }
   0x8   :  { %4989 = vmatpush1.bf16.msra.mxu1 %v7267_v7  ;;  %4949 = vmatprep.subr.bf16.mxu0 %v7268_v8  ;;  %v7276_v13 = vld [vmem:[%s11242_s1 + $0x284] ss:$16 sps:$4 sm:$0xff]   ;;  %v7279_v15 = vld [vmem:[%s11242_s1 + $0x280] ss:$16 sps:$4 sm:$0xff]  }
   0x9   :  { %4990 = vmatprep.subr.bf16.mxu1 %v7270_v9  ;;  %v7280_v16 = vld [vmem:[%s11242_s1 + $0x64] ss:$16 sps:$4 sm:$0xff]   ;;  %v7284_v18 = vld [vmem:[%s11242_s1 + $0x60] ss:$16 sps:$4 sm:$0xff]  }
   0xa   :  { %v7282_v17 = vld [vmem:[%s11242_s1 + $0x264] ss:$16 sps:$4 sm:$0xff]   ;;  %v7285_v19 = vld [vmem:[%s11242_s1 + $0x260] ss:$16 sps:$4 sm:$0xff]  }
   0xb   :  { %4950 = vmatpush1.bf16.msra.mxu0 %v7272_v10  ;;  %v7286_v20 = vld [vmem:[%s11242_s1 + $0x44] ss:$16 sps:$4 sm:$0xff]   ;;  %v7290_v22 = vld [vmem:[%s11242_s1 + $0x40] ss:$16 sps:$4 sm:$0xff]  }
   0xc   :  { %4991 = vmatpush1.bf16.msra.mxu1 %v7273_v11  ;;  %4951 = vmatprep.subr.bf16.mxu0 %v7274_v12  ;;  %v7288_v21 = vld [vmem:[%s11242_s1 + $0x244] ss:$16 sps:$4 sm:$0xff]   ;;  %v7291_v23 = vld [vmem:[%s11242_s1 + $0x240] ss:$16 sps:$4 sm:$0xff]  }
   0xd   :  { %4992 = vmatprep.subr.bf16.mxu1 %v7276_v13  ;;  %v7292_v24 = vld [vmem:[%s11242_s1 + $0x24] ss:$16 sps:$4 sm:$0xff]   ;;  %v7296_v26 = vld [vmem:[%s11242_s1 + $0x20] ss:$16 sps:$4 sm:$0xff]  }
   0xe   :  { %v7294_v25 = vld [vmem:[%s11242_s1 + $0x224] ss:$16 sps:$4 sm:$0xff]   ;;  %v7297_v27 = vld [vmem:[%s11242_s1 + $0x220] ss:$16 sps:$4 sm:$0xff]  }
   0xf   :  { %4952 = vmatpush1.bf16.msra.mxu0 %v7278_v14  ;;  %v7298_v28 = vld [vmem:[%s11242_s1 + $0x4] ss:$16 sps:$4 sm:$0xff]   ;;  %v7302_v30 = vld [vmem:[%s11242_s1] ss:$16 sps:$4 sm:$0xff]  }
  0x10   :  { %4993 = vmatpush1.bf16.msra.mxu1 %v7279_v15  ;;  %4953 = vmatprep.subr.bf16.mxu0 %v7280_v16  ;;  %v7300_v29 = vld [vmem:[%s11242_s1 + $0x204] ss:$16 sps:$4 sm:$0xff]   ;;  %v7303_v31 = vld [vmem:[%s11242_s1 + $0x200] ss:$16 sps:$4 sm:$0xff]  }
  0x11   :  { %4994 = vmatprep.subr.bf16.mxu1 %v7282_v17  ;;  %v7304_v32 = vld [vmem:[%s11242_s1 + $0x1e4] ss:$16 sps:$4 sm:$0xff]   ;;  %v7308_v34 = vld [vmem:[%s11242_s1 + $0x1e0] ss:$16 sps:$4 sm:$0xff]  }
  0x12   :  { %v7306_v33 = vld [vmem:[%s11242_s1 + $0x3e4] ss:$16 sps:$4 sm:$0xff]   ;;  %v7309_v35 = vld [vmem:[%s11242_s1 + $0x3e0] ss:$16 sps:$4 sm:$0xff]  }
  0x13   :  { %4954 = vmatpush1.bf16.msra.mxu0 %v7284_v18  ;;  %v7310_v39 = vld [vmem:[%s11242_s1 + $0x1c4] ss:$16 sps:$4 sm:$0xff]   ;;  %v7314_v41 = vld [vmem:[%s11242_s1 + $0x1c0] ss:$16 sps:$4 sm:$0xff]  }
  0x14   :  { %4995 = vmatpush1.bf16.msra.mxu1 %v7285_v19  ;;  %4955 = vmatprep.subr.bf16.mxu0 %v7286_v20  ;;  %v7312_v40 = vld [vmem:[%s11242_s1 + $0x3c4] ss:$16 sps:$4 sm:$0xff]   ;;  %v7315_v44 = vld [vmem:[%s11242_s1 + $0x3c0] ss:$16 sps:$4 sm:$0xff]  }
  0x15   :  { %4996 = vmatprep.subr.bf16.mxu1 %v7288_v21  ;;  %v7316_v45 = vld [vmem:[%s11242_s1 + $0x1a4] ss:$16 sps:$4 sm:$0xff]   ;;  %v7320_v47 = vld [vmem:[%s11242_s1 + $0x1a0] ss:$16 sps:$4 sm:$0xff]  }
  0x16   :  { %v7318_v46 = vld [vmem:[%s11242_s1 + $0x3a4] ss:$16 sps:$4 sm:$0xff]   ;;  %v7321_v48 = vld [vmem:[%s11242_s1 + $0x3a0] ss:$16 sps:$4 sm:$0xff]  }
  0x17   :  { %4956 = vmatpush1.bf16.msra.mxu0 %v7290_v22  ;;  %v7322_v50 = vld [vmem:[%s11242_s1 + $0x184] ss:$16 sps:$4 sm:$0xff]   ;;  %v7326_v53 = vld [vmem:[%s11242_s1 + $0x180] ss:$16 sps:$4 sm:$0xff]  }
  0x18   :  { %4997 = vmatpush1.bf16.msra.mxu1 %v7291_v23  ;;  %4957 = vmatprep.subr.bf16.mxu0 %v7292_v24  ;;  %v7324_v51 = vld [vmem:[%s11242_s1 + $0x384] ss:$16 sps:$4 sm:$0xff]   ;;  %v7327_v55 = vld [vmem:[%s11242_s1 + $0x380] ss:$16 sps:$4 sm:$0xff]  }
  0x19   :  { %4998 = vmatprep.subr.bf16.mxu1 %v7294_v25  ;;  %v22_v52 = vld [vmem:[%s11241_s0] sm:$0xff] }
  0x1a   :  { %v843_v54 = vrot.slane %v22_v52, %v8662_v49  ;;  %v7328_v56 = vld [vmem:[%s11242_s1 + $0x164] ss:$16 sps:$4 sm:$0xff]   ;;  %v7332_v59 = vld [vmem:[%s11242_s1 + $0x160] ss:$16 sps:$4 sm:$0xff]   ;;  %v836_v1 = vcombine.high %v22_v52, %v22_v52 }
  0x1b   :  { %4958 = vmatpush1.bf16.msra.mxu0 %v7296_v26  ;;  %v7330_v57 = vld [vmem:[%s11242_s1 + $0x364] ss:$16 sps:$4 sm:$0xff]   ;;  %v7333_v61 = vld [vmem:[%s11242_s1 + $0x360] ss:$16 sps:$4 sm:$0xff]  }
  0x1c   :  { %4999 = vmatpush1.bf16.msra.mxu1 %v7297_v27  ;;  %4959 = vmatprep.subr.bf16.mxu0 %v7298_v28  ;;  %v851_v58 = vcombine.high %v843_v54, %v843_v54  ;;  %v7334_v62 = vld [vmem:[%s11242_s1 + $0x144] ss:$16 sps:$4 sm:$0xff]   ;;  %v7338_v2 = vld [vmem:[%s11242_s1 + $0x140] ss:$16 sps:$4 sm:$0xff]   ;;  %v8720_v6 = vrot.slane %v836_v1, %v8662_v49  ;;  %v8740_v13 = vrot.slane %v843_v54, %v8662_v49 }
  0x1d   :  { %5000 = vmatprep.subr.bf16.mxu1 %v7300_v29  ;;  %v7336_v63 = vld [vmem:[%s11242_s1 + $0x344] ss:$16 sps:$4 sm:$0xff]   ;;  %v7339_v3 = vld [vmem:[%s11242_s1 + $0x340] ss:$16 sps:$4 sm:$0xff]  }
  0x1e   :  { %v8690_v60 = vrot.slane %v851_v58, %v8662_v49  ;;  %v7340_v4 = vld [vmem:[%s11242_s1 + $0x124] ss:$16 sps:$4 sm:$0xff]   ;;  %v7344_v7 = vld [vmem:[%s11242_s1 + $0x120] ss:$16 sps:$4 sm:$0xff]   ;;  %v852_v11 = vcombine.high %v8720_v6, %v8720_v6  ;;  %v8756_v18 = vcombine.high %v8740_v13, %v8740_v13 }
  0x1f   :  { %4960 = vmatpush1.bf16.msra.mxu0 %v7302_v30  ;;  %v7342_v5 = vld [vmem:[%s11242_s1 + $0x324] ss:$16 sps:$4 sm:$0xff]   ;;  %v7345_v8 = vld [vmem:[%s11242_s1 + $0x320] ss:$16 sps:$4 sm:$0xff]  }
  0x20   :  { %5001 = vmatpush1.bf16.msra.mxu1 %v7303_v31  ;;  %4961 = vmatprep.subr.bf16.mxu0 %v7304_v32  ;;  %v8703_v0 = vcombine.high %v8690_v60, %v8690_v60  ;;  %v7346_v9 = vld [vmem:[%s11242_s1 + $0x104] ss:$16 sps:$4 sm:$0xff]   ;;  %v7350_v12 = vld [vmem:[%s11242_s1 + $0x100] ss:$16 sps:$4 sm:$0xff]   ;;  %v8752_v17 = vrot.slane %v852_v11, %v8662_v49 }
  0x21   :  { %5002 = vmatprep.subr.bf16.mxu1 %v7306_v33  ;;  %4977 = vmatprep.mubr.bf16.mxu0 %v8690_v60  ;;  %v7348_v10 = vld [vmem:[%s11242_s1 + $0x304] ss:$16 sps:$4 sm:$0xff]   ;;  %v7351_v14 = vld [vmem:[%s11242_s1 + $0x300] ss:$16 sps:$4 sm:$0xff]  }
  0x22   :  { %5018 = vmatprep.mubr.bf16.mxu1 %v8703_v0  ;;  %v7354_v15 = vld [vmem:[%s11242_s1 + $0x4e4] ss:$16 sps:$4 sm:$0xff]   ;;  %v7352_v19 = vld [vmem:[%s11242_s1 + $0x4e0] ss:$16 sps:$4 sm:$0xff]   ;;  %v8772_v23 = vcombine.high %v8752_v17, %v8752_v17 }
  0x23   :  { %4962 = vmatpush2.bf16.msra.mxu0 %v7308_v34  ;;  %v7357_v16 = vld [vmem:[%s11242_s1 + $0x6e4] ss:$16 sps:$4 sm:$0xff]   ;;  %v7355_v20 = vld [vmem:[%s11242_s1 + $0x6e0] ss:$16 sps:$4 sm:$0xff]  }
  0x24   :  { %5003 = vmatpush2.bf16.msra.mxu1 %v7309_v35  ;;  %4963 = vmatprep.subr.bf16.mxu0 %v7310_v39  ;;  %v7360_v21 = vld [vmem:[%s11242_s1 + $0x4c4] ss:$16 sps:$4 sm:$0xff]   ;;  %v7358_v24 = vld [vmem:[%s11242_s1 + $0x4c0] ss:$16 sps:$4 sm:$0xff]  }
  0x25   :  { %5004 = vmatprep.subr.bf16.mxu1 %v7312_v40  ;;  %v7363_v22 = vld [vmem:[%s11242_s1 + $0x6c4] ss:$16 sps:$4 sm:$0xff]   ;;  %v7361_v25 = vld [vmem:[%s11242_s1 + $0x6c0] ss:$16 sps:$4 sm:$0xff]  }
  0x26   :  { %v7366_v26 = vld [vmem:[%s11242_s1 + $0x4a4] ss:$16 sps:$4 sm:$0xff]   ;;  %v7364_v28 = vld [vmem:[%s11242_s1 + $0x4a0] ss:$16 sps:$4 sm:$0xff]  }
  0x27   :  { %4964 = vmatpush2.bf16.msra.mxu0 %v7314_v41  ;;  %v7369_v27 = vld [vmem:[%s11242_s1 + $0x6a4] ss:$16 sps:$4 sm:$0xff]   ;;  %v7367_v29 = vld [vmem:[%s11242_s1 + $0x6a0] ss:$16 sps:$4 sm:$0xff]  }
  0x28   :  { %5005 = vmatpush2.bf16.msra.mxu1 %v7315_v44  ;;  %4965 = vmatprep.subr.bf16.mxu0 %v7316_v45  ;;  %v7372_v30 = vld [vmem:[%s11242_s1 + $0x484] ss:$16 sps:$4 sm:$0xff]   ;;  %v7370_v32 = vld [vmem:[%s11242_s1 + $0x480] ss:$16 sps:$4 sm:$0xff]  }
  0x29   :  { %5006 = vmatprep.subr.bf16.mxu1 %v7318_v46  ;;  %v7375_v31 = vld [vmem:[%s11242_s1 + $0x684] ss:$16 sps:$4 sm:$0xff]   ;;  %v7373_v33 = vld [vmem:[%s11242_s1 + $0x680] ss:$16 sps:$4 sm:$0xff]  }
  0x2a   :  { %v7378_v34 = vld [vmem:[%s11242_s1 + $0x464] ss:$16 sps:$4 sm:$0xff]   ;;  %v7376_v36 = vld [vmem:[%s11242_s1 + $0x460] ss:$16 sps:$4 sm:$0xff]  }
  0x2b   :  { %4966 = vmatpush2.bf16.msra.mxu0 %v7320_v47  ;;  %v7381_v35 = vld [vmem:[%s11242_s1 + $0x664] ss:$16 sps:$4 sm:$0xff]   ;;  %v7379_v37 = vld [vmem:[%s11242_s1 + $0x660] ss:$16 sps:$4 sm:$0xff]  }
  0x2c   :  { %5007 = vmatpush2.bf16.msra.mxu1 %v7321_v48  ;;  %4967 = vmatprep.subr.bf16.mxu0 %v7322_v50  ;;  %v7384_v38 = vld [vmem:[%s11242_s1 + $0x444] ss:$16 sps:$4 sm:$0xff]   ;;  %v7382_v40 = vld [vmem:[%s11242_s1 + $0x440] ss:$16 sps:$4 sm:$0xff]  }
  0x2d   :  { %5008 = vmatprep.subr.bf16.mxu1 %v7324_v51  ;;  %v7387_v39 = vld [vmem:[%s11242_s1 + $0x644] ss:$16 sps:$4 sm:$0xff]   ;;  %v7385_v41 = vld [vmem:[%s11242_s1 + $0x640] ss:$16 sps:$4 sm:$0xff]  }
  0x2e   :  { %v7390_v43 = vld [vmem:[%s11242_s1 + $0x424] ss:$16 sps:$4 sm:$0xff]   ;;  %v7388_v45 = vld [vmem:[%s11242_s1 + $0x420] ss:$16 sps:$4 sm:$0xff]  }
  0x2f   :  { %4968 = vmatpush2.bf16.msra.mxu0 %v7326_v53  ;;  %v7393_v44 = vld [vmem:[%s11242_s1 + $0x624] ss:$16 sps:$4 sm:$0xff]   ;;  %v7391_v46 = vld [vmem:[%s11242_s1 + $0x620] ss:$16 sps:$4 sm:$0xff]  }
  0x30   :  { %5009 = vmatpush2.bf16.msra.mxu1 %v7327_v55  ;;  %4969 = vmatprep.subr.bf16.mxu0 %v7328_v56  ;;  %v7396_v47 = vld [vmem:[%s11242_s1 + $0x404] ss:$16 sps:$4 sm:$0xff]   ;;  %v7394_v50 = vld [vmem:[%s11242_s1 + $0x400] ss:$16 sps:$4 sm:$0xff]  }
  0x31   :  { %5010 = vmatprep.subr.bf16.mxu1 %v7330_v57  ;;  %v7399_v48 = vld [vmem:[%s11242_s1 + $0x604] ss:$16 sps:$4 sm:$0xff]   ;;  %v7397_v51 = vld [vmem:[%s11242_s1 + $0x600] ss:$16 sps:$4 sm:$0xff]  }
  0x32   :  { %v7402_v52 = vld [vmem:[%s11242_s1 + $0x5e4] ss:$16 sps:$4 sm:$0xff]   ;;  %v7400_v54 = vld [vmem:[%s11242_s1 + $0x5e0] ss:$16 sps:$4 sm:$0xff]  }
  0x33   :  { %4970 = vmatpush2.bf16.msra.mxu0 %v7332_v59  ;;  %v7405_v53 = vld [vmem:[%s11242_s1 + $0x7e4] ss:$16 sps:$4 sm:$0xff]   ;;  %v7403_v55 = vld [vmem:[%s11242_s1 + $0x7e0] ss:$16 sps:$4 sm:$0xff]  }
  0x34   :  { %5011 = vmatpush2.bf16.msra.mxu1 %v7333_v61  ;;  %4971 = vmatprep.subr.bf16.mxu0 %v7334_v62  ;;  %v7408_v56 = vld [vmem:[%s11242_s1 + $0x5c4] ss:$16 sps:$4 sm:$0xff]   ;;  %v7406_v58 = vld [vmem:[%s11242_s1 + $0x5c0] ss:$16 sps:$4 sm:$0xff]  }
  0x35   :  { %5012 = vmatprep.subr.bf16.mxu1 %v7336_v63  ;;  %v7411_v57 = vld [vmem:[%s11242_s1 + $0x7c4] ss:$16 sps:$4 sm:$0xff]   ;;  %v7409_v59 = vld [vmem:[%s11242_s1 + $0x7c0] ss:$16 sps:$4 sm:$0xff]  }
  0x36   :  { %v7414_v61 = vld [vmem:[%s11242_s1 + $0x5a4] ss:$16 sps:$4 sm:$0xff]   ;;  %v7412_v63 = vld [vmem:[%s11242_s1 + $0x5a0] ss:$16 sps:$4 sm:$0xff]  }
  0x37   :  { %4972 = vmatpush2.bf16.msra.mxu0 %v7338_v2  ;;  %v7417_v62 = vld [vmem:[%s11242_s1 + $0x7a4] ss:$16 sps:$4 sm:$0xff]   ;;  %v7415_v1 = vld [vmem:[%s11242_s1 + $0x7a0] ss:$16 sps:$4 sm:$0xff]  }
  0x38   :  { %5013 = vmatpush2.bf16.msra.mxu1 %v7339_v3  ;;  %4973 = vmatprep.subr.bf16.mxu0 %v7340_v4  ;;  %v7420_v2 = vld [vmem:[%s11242_s1 + $0x584] ss:$16 sps:$4 sm:$0xff]   ;;  %v7418_v4 = vld [vmem:[%s11242_s1 + $0x580] ss:$16 sps:$4 sm:$0xff]  }
  0x39   :  { %5014 = vmatprep.subr.bf16.mxu1 %v7342_v5  ;;  %v7423_v3 = vld [vmem:[%s11242_s1 + $0x784] ss:$16 sps:$4 sm:$0xff]   ;;  %v7421_v5 = vld [vmem:[%s11242_s1 + $0x780] ss:$16 sps:$4 sm:$0xff]  }
  0x3a   :  { %v7432_v11 = vld [vmem:[%s11242_s1 + $0x544] ss:$16 sps:$4 sm:$0xff]  }
  0x3b   :  { %4974 = vmatpush2.bf16.msra.mxu0 %v7344_v7  ;;  %v7426_v7 = vld [vmem:[%s11242_s1 + $0x564] ss:$16 sps:$4 sm:$0xff]  }
  0x3c   :  { %5015 = vmatpush2.bf16.msra.mxu1 %v7345_v8  ;;  %4975 = vmatprep.subr.bf16.mxu0 %v7346_v9  ;;  %v7429_v8 = vld [vmem:[%s11242_s1 + $0x764] ss:$16 sps:$4 sm:$0xff]   ;;  %v7424_v9 = vld [vmem:[%s11242_s1 + $0x560] ss:$16 sps:$4 sm:$0xff]  }
  0x3d   :  { %5016 = vmatprep.subr.bf16.mxu1 %v7348_v10  ;;  %v7427_v10 = vld [vmem:[%s11242_s1 + $0x760] ss:$16 sps:$4 sm:$0xff]  }
  0x3f   :  { %4976 = vmatpush2.bf16.msra.mxu0 %v7350_v12  ;;  %v7435_v12 = vld [vmem:[%s11242_s1 + $0x744] ss:$16 sps:$4 sm:$0xff]  }
  0x40   :  { %5017 = vmatpush2.bf16.msra.mxu1 %v7351_v14  ;;  %5027 = vmatprep.subr.bf16.mxu0 %v7354_v15  ;;  %v7430_v14 = vld [vmem:[%s11242_s1 + $0x540] ss:$16 sps:$4 sm:$0xff]  }
  0x41   :  { %5068 = vmatprep.subr.bf16.mxu1 %v7357_v16  ;;  %v7433_v15 = vld [vmem:[%s11242_s1 + $0x740] ss:$16 sps:$4 sm:$0xff]   ;;  %v7438_v16 = vld [vmem:[%s11242_s1 + $0x524] ss:$16 sps:$4 sm:$0xff]  }
  0x42   :  { %4978 = vmatmul.mubr.bf16.vlgmr.msra.gmra.mxu0 %v8740_v13 }
  0x43   :  { %5019 = vmatmul.mubr.bf16.vlgmr.msra.gmra.mxu1 %v8756_v18  ;;  %5028 = vmatpush1.bf16.msra.mxu0 %v7352_v19  ;;  %v7441_v19 = vld [vmem:[%s11242_s1 + $0x724] ss:$16 sps:$4 sm:$0xff]  }
  0x44   :  { %5069 = vmatpush1.bf16.msra.mxu1 %v7355_v20  ;;  %5029 = vmatprep.subr.bf16.mxu0 %v7360_v21  ;;  %v7436_v20 = vld [vmem:[%s11242_s1 + $0x520] ss:$16 sps:$4 sm:$0xff]  }
  0x45   :  { %5070 = vmatprep.subr.bf16.mxu1 %v7363_v22  ;;  %5059 = vmatprep.mubr.bf16.mxu0 %v8752_v17  ;;  %v7439_v21 = vld [vmem:[%s11242_s1 + $0x720] ss:$16 sps:$4 sm:$0xff]   ;;  %v7444_v22 = vld [vmem:[%s11242_s1 + $0x504] ss:$16 sps:$4 sm:$0xff]  }
  0x46   :  { %5100 = vmatprep.mubr.bf16.mxu1 %v8772_v23 }
  0x47   :  { %5030 = vmatpush1.bf16.msra.mxu0 %v7358_v24  ;;  %v7447_v24 = vld [vmem:[%s11242_s1 + $0x704] ss:$16 sps:$4 sm:$0xff]  }
  0x48   :  { %5071 = vmatpush1.bf16.msra.mxu1 %v7361_v25  ;;  %5031 = vmatprep.subr.bf16.mxu0 %v7366_v26  ;;  %v7442_v25 = vld [vmem:[%s11242_s1 + $0x500] ss:$16 sps:$4 sm:$0xff]   ;;  %v8951_v26 = vrot.slane %v8720_v6, %v8662_v49 }
  0x49   :  { %5072 = vmatprep.subr.bf16.mxu1 %v7369_v27  ;;  %v7445_v27 = vld [vmem:[%s11242_s1 + $0x700] ss:$16 sps:$4 sm:$0xff]  }
  0x4a   :  { %v8964_v6 = vcombine.high %v8951_v26, %v8951_v26 }
  0x4b   :  { %5032 = vmatpush1.bf16.msra.mxu0 %v7364_v28  ;;  %v7451_v28 = vld [vmem:[%s11242_s1 + $0x8e4] ss:$16 sps:$4 sm:$0xff]  }
  0x4c   :  { %5073 = vmatpush1.bf16.msra.mxu1 %v7367_v29  ;;  %5033 = vmatprep.subr.bf16.mxu0 %v7372_v30  ;;  %v7454_v29 = vld [vmem:[%s11242_s1 + $0xae4] ss:$16 sps:$4 sm:$0xff]   ;;  %v7449_v30 = vld [vmem:[%s11242_s1 + $0x8e0] ss:$16 sps:$4 sm:$0xff]  }
  0x4d   :  { %5074 = vmatprep.subr.bf16.mxu1 %v7375_v31  ;;  %v7452_v31 = vld [vmem:[%s11242_s1 + $0xae0] ss:$16 sps:$4 sm:$0xff]  }
  0x4f   :  { %5034 = vmatpush1.bf16.msra.mxu0 %v7370_v32  ;;  %v8975_v32 = vld [vmem:[%s11241_s0 + $0x8] sm:$0xff] }
  0x50   :  { %5075 = vmatpush1.bf16.msra.mxu1 %v7373_v33  ;;  %5035 = vmatprep.subr.bf16.mxu0 %v7378_v34  ;;  %v7457_v33 = vld [vmem:[%s11242_s1 + $0x8c4] ss:$16 sps:$4 sm:$0xff]  }
  0x51   :  { %5076 = vmatprep.subr.bf16.mxu1 %v7381_v35  ;;  %v7460_v34 = vld [vmem:[%s11242_s1 + $0xac4] ss:$16 sps:$4 sm:$0xff]   ;;  %v8985_v35 = vrot.slane %v8975_v32, %v8662_v49 }
  0x53   :  { %5036 = vmatpush1.bf16.msra.mxu0 %v7376_v36  ;;  %v900_v36 = vcombine.high %v8985_v35, %v8985_v35 }
  0x54   :  { %5077 = vmatpush1.bf16.msra.mxu1 %v7379_v37  ;;  %5037 = vmatprep.subr.bf16.mxu0 %v7384_v38  ;;  %v7455_v37 = vld [vmem:[%s11242_s1 + $0x8c0] ss:$16 sps:$4 sm:$0xff]  }
  0x55   :  { %5078 = vmatprep.subr.bf16.mxu1 %v7387_v39  ;;  %v7458_v38 = vld [vmem:[%s11242_s1 + $0xac0] ss:$16 sps:$4 sm:$0xff]   ;;  %v7463_v39 = vld [vmem:[%s11242_s1 + $0x8a4] ss:$16 sps:$4 sm:$0xff]  }
  0x57   :  { %5038 = vmatpush1.bf16.msra.mxu0 %v7382_v40  ;;  %v7466_v40 = vld [vmem:[%s11242_s1 + $0xaa4] ss:$16 sps:$4 sm:$0xff]  }
  0x58   :  { %5079 = vmatpush1.bf16.msra.mxu1 %v7385_v41  ;;  %5039 = vmatprep.subr.bf16.mxu0 %v7390_v43  ;;  %v9004_v41 = vrot.slane %v900_v36, %v8662_v49  ;;  %v7527_v36 = vld [vmem:[%s11242_s1 + $0x940] ss:$16 sps:$4 sm:$0xff]  }
  0x59   :  { %5080 = vmatprep.subr.bf16.mxu1 %v7393_v44  ;;  %v7461_v44 = vld [vmem:[%s11242_s1 + $0x8a0] ss:$16 sps:$4 sm:$0xff]  }
  0x5a   :  { %v9009_v43 = vcombine.high %v9004_v41, %v9004_v41 }
  0x5b   :  { %5040 = vmatpush1.bf16.msra.mxu0 %v7388_v45  ;;  %v7464_v45 = vld [vmem:[%s11242_s1 + $0xaa0] ss:$16 sps:$4 sm:$0xff]  }
  0x5c   :  { %5081 = vmatpush1.bf16.msra.mxu1 %v7391_v46  ;;  %5041 = vmatprep.subr.bf16.mxu0 %v7396_v47  ;;  %v7469_v46 = vld [vmem:[%s11242_s1 + $0x884] ss:$16 sps:$4 sm:$0xff]  }
  0x5d   :  { %5082 = vmatprep.subr.bf16.mxu1 %v7399_v48  ;;  %v7472_v47 = vld [vmem:[%s11242_s1 + $0xa84] ss:$16 sps:$4 sm:$0xff]   ;;  %v7467_v48 = vld [vmem:[%s11242_s1 + $0x880] ss:$16 sps:$4 sm:$0xff]  }
  0x5f   :  { %5042 = vmatpush1.bf16.msra.mxu0 %v7394_v50  ;;  %v7470_v50 = vld [vmem:[%s11242_s1 + $0xa80] ss:$16 sps:$4 sm:$0xff]  }
  0x60   :  { %5083 = vmatpush1.bf16.msra.mxu1 %v7397_v51  ;;  %5043 = vmatprep.subr.bf16.mxu0 %v7402_v52  ;;  %v7475_v51 = vld [vmem:[%s11242_s1 + $0x864] ss:$16 sps:$4 sm:$0xff]  }
  0x61   :  { %5084 = vmatprep.subr.bf16.mxu1 %v7405_v53  ;;  %v7478_v52 = vld [vmem:[%s11242_s1 + $0xa64] ss:$16 sps:$4 sm:$0xff]   ;;  %v7473_v53 = vld [vmem:[%s11242_s1 + $0x860] ss:$16 sps:$4 sm:$0xff]  }
  0x63   :  { %5044 = vmatpush2.bf16.msra.mxu0 %v7400_v54  ;;  %v7476_v54 = vld [vmem:[%s11242_s1 + $0xa60] ss:$16 sps:$4 sm:$0xff]  }
  0x64   :  { %5085 = vmatpush2.bf16.msra.mxu1 %v7403_v55  ;;  %5045 = vmatprep.subr.bf16.mxu0 %v7408_v56  ;;  %v7481_v55 = vld [vmem:[%s11242_s1 + $0x844] ss:$16 sps:$4 sm:$0xff]  }
  0x65   :  { %5086 = vmatprep.subr.bf16.mxu1 %v7411_v57  ;;  %v7484_v56 = vld [vmem:[%s11242_s1 + $0xa44] ss:$16 sps:$4 sm:$0xff]   ;;  %v7479_v57 = vld [vmem:[%s11242_s1 + $0x840] ss:$16 sps:$4 sm:$0xff]  }
  0x67   :  { %5046 = vmatpush2.bf16.msra.mxu0 %v7406_v58  ;;  %v7482_v58 = vld [vmem:[%s11242_s1 + $0xa40] ss:$16 sps:$4 sm:$0xff]  }
  0x68   :  { %5087 = vmatpush2.bf16.msra.mxu1 %v7409_v59  ;;  %5047 = vmatprep.subr.bf16.mxu0 %v7414_v61  ;;  %v7487_v59 = vld [vmem:[%s11242_s1 + $0x824] ss:$16 sps:$4 sm:$0xff]  }
  0x69   :  { %5088 = vmatprep.subr.bf16.mxu1 %v7417_v62  ;;  %v7490_v61 = vld [vmem:[%s11242_s1 + $0xa24] ss:$16 sps:$4 sm:$0xff]   ;;  %v7485_v62 = vld [vmem:[%s11242_s1 + $0x820] ss:$16 sps:$4 sm:$0xff]  }
  0x6b   :  { %5048 = vmatpush2.bf16.msra.mxu0 %v7412_v63  ;;  %v7488_v63 = vld [vmem:[%s11242_s1 + $0xa20] ss:$16 sps:$4 sm:$0xff]  }
  0x6c   :  { %5089 = vmatpush2.bf16.msra.mxu1 %v7415_v1  ;;  %5049 = vmatprep.subr.bf16.mxu0 %v7420_v2  ;;  %v7493_v1 = vld [vmem:[%s11242_s1 + $0x804] ss:$16 sps:$4 sm:$0xff]  }
  0x6d   :  { %5090 = vmatprep.subr.bf16.mxu1 %v7423_v3  ;;  %v7496_v2 = vld [vmem:[%s11242_s1 + $0xa04] ss:$16 sps:$4 sm:$0xff]   ;;  %v7491_v3 = vld [vmem:[%s11242_s1 + $0x800] ss:$16 sps:$4 sm:$0xff]  }
  0x6f   :  { %5050 = vmatpush2.bf16.msra.mxu0 %v7418_v4  ;;  %v7494_v4 = vld [vmem:[%s11242_s1 + $0xa00] ss:$16 sps:$4 sm:$0xff]  }
  0x70   :  { %5091 = vmatpush2.bf16.msra.mxu1 %v7421_v5  ;;  %5051 = vmatprep.subr.bf16.mxu0 %v7426_v7  ;;  %v7499_v5 = vld [vmem:[%s11242_s1 + $0x9e4] ss:$16 sps:$4 sm:$0xff]  }
  0x71   :  { %5092 = vmatprep.subr.bf16.mxu1 %v7429_v8  ;;  %v7502_v7 = vld [vmem:[%s11242_s1 + $0xbe4] ss:$16 sps:$4 sm:$0xff]   ;;  %v7497_v8 = vld [vmem:[%s11242_s1 + $0x9e0] ss:$16 sps:$4 sm:$0xff]  }
  0x73   :  { %5052 = vmatpush2.bf16.msra.mxu0 %v7424_v9  ;;  %v7500_v9 = vld [vmem:[%s11242_s1 + $0xbe0] ss:$16 sps:$4 sm:$0xff]  }
  0x74   :  { %5093 = vmatpush2.bf16.msra.mxu1 %v7427_v10  ;;  %5053 = vmatprep.subr.bf16.mxu0 %v7432_v11  ;;  %v7505_v10 = vld [vmem:[%s11242_s1 + $0x9c4] ss:$16 sps:$4 sm:$0xff]  }
  0x75   :  { %5094 = vmatprep.subr.bf16.mxu1 %v7435_v12  ;;  %v7508_v11 = vld [vmem:[%s11242_s1 + $0xbc4] ss:$16 sps:$4 sm:$0xff]   ;;  %v7503_v12 = vld [vmem:[%s11242_s1 + $0x9c0] ss:$16 sps:$4 sm:$0xff]  }
  0x77   :  { %5054 = vmatpush2.bf16.msra.mxu0 %v7430_v14  ;;  %v7506_v14 = vld [vmem:[%s11242_s1 + $0xbc0] ss:$16 sps:$4 sm:$0xff]  }
  0x78   :  { %5095 = vmatpush2.bf16.msra.mxu1 %v7433_v15  ;;  %5055 = vmatprep.subr.bf16.mxu0 %v7438_v16  ;;  %v7511_v15 = vld [vmem:[%s11242_s1 + $0x9a4] ss:$16 sps:$4 sm:$0xff]  }
  0x79   :  { %5096 = vmatprep.subr.bf16.mxu1 %v7441_v19  ;;  %v7514_v16 = vld [vmem:[%s11242_s1 + $0xba4] ss:$16 sps:$4 sm:$0xff]   ;;  %v7509_v19 = vld [vmem:[%s11242_s1 + $0x9a0] ss:$16 sps:$4 sm:$0xff]  }
  0x7b   :  { %5056 = vmatpush2.bf16.msra.mxu0 %v7436_v20  ;;  %v7512_v20 = vld [vmem:[%s11242_s1 + $0xba0] ss:$16 sps:$4 sm:$0xff]  }
  0x7c   :  { %5097 = vmatpush2.bf16.msra.mxu1 %v7439_v21  ;;  %5057 = vmatprep.subr.bf16.mxu0 %v7444_v22  ;;  %v7517_v21 = vld [vmem:[%s11242_s1 + $0x984] ss:$16 sps:$4 sm:$0xff]  }
  0x7d   :  { %5098 = vmatprep.subr.bf16.mxu1 %v7447_v24  ;;  %v7520_v22 = vld [vmem:[%s11242_s1 + $0xb84] ss:$16 sps:$4 sm:$0xff]   ;;  %v7515_v24 = vld [vmem:[%s11242_s1 + $0x980] ss:$16 sps:$4 sm:$0xff]  }
  0x7f   :  { %5058 = vmatpush2.bf16.msra.mxu0 %v7442_v25  ;;  %v7518_v25 = vld [vmem:[%s11242_s1 + $0xb80] ss:$16 sps:$4 sm:$0xff]  }
  0x80   :  { %5099 = vmatpush2.bf16.msra.mxu1 %v7445_v27  ;;  %5109 = vmatprep.subr.bf16.mxu0 %v7451_v28  ;;  %v7523_v27 = vld [vmem:[%s11242_s1 + $0x964] ss:$16 sps:$4 sm:$0xff]  }
  0x81   :  { %5150 = vmatprep.subr.bf16.mxu1 %v7454_v29  ;;  %v7526_v28 = vld [vmem:[%s11242_s1 + $0xb64] ss:$16 sps:$4 sm:$0xff]   ;;  %v7521_v29 = vld [vmem:[%s11242_s1 + $0x960] ss:$16 sps:$4 sm:$0xff]  }
  0x82   :  { %5060 = vmatmul.mubr.bf16.vlgmr.msra.gmra.mxu0 %v8951_v26 }
  0x83   :  { %5101 = vmatmul.mubr.bf16.vlgmr.msra.gmra.mxu1 %v8964_v6  ;;  %5110 = vmatpush1.bf16.msra.mxu0 %v7449_v30  ;;  %v7524_v30 = vld [vmem:[%s11242_s1 + $0xb60] ss:$16 sps:$4 sm:$0xff]  }
  0x84   :  { %5151 = vmatpush1.bf16.msra.mxu1 %v7452_v31  ;;  %5111 = vmatprep.subr.bf16.mxu0 %v7457_v33  ;;  %v7529_v31 = vld [vmem:[%s11242_s1 + $0x944] ss:$16 sps:$4 sm:$0xff]  }
  0x85   :  { %5152 = vmatprep.subr.bf16.mxu1 %v7460_v34  ;;  %5141 = vmatprep.mubr.bf16.mxu0 %v9004_v41  ;;  %v7532_v33 = vld [vmem:[%s11242_s1 + $0xb44] ss:$16 sps:$4 sm:$0xff]   ;;  %v885_v34 = vcombine.high %v8975_v32, %v8975_v32 }
  0x86   :  { %5182 = vmatprep.mubr.bf16.mxu1 %v9009_v43  ;;  %v7538_v32 = vld [vmem:[%s11242_s1 + $0xb24] ss:$16 sps:$4 sm:$0xff]  }
  0x87   :  { %5112 = vmatpush1.bf16.msra.mxu0 %v7455_v37  ;;  %v7530_v37 = vld [vmem:[%s11242_s1 + $0xb40] ss:$16 sps:$4 sm:$0xff]  }
  0x88   :  { %5153 = vmatpush1.bf16.msra.mxu1 %v7458_v38  ;;  %5113 = vmatprep.subr.bf16.mxu0 %v7463_v39  ;;  %v7535_v38 = vld [vmem:[%s11242_s1 + $0x924] ss:$16 sps:$4 sm:$0xff]   ;;  %v9159_v39 = vrot.slane %v885_v34, %v8662_v49  ;;  %v7596_v34 = vld [vmem:[%s11242_s1 + $0xfe0] ss:$16 sps:$4 sm:$0xff]  }
  0x89   :  { %5154 = vmatprep.subr.bf16.mxu1 %v7466_v40  ;;  %v7533_v40 = vld [vmem:[%s11242_s1 + $0x920] ss:$16 sps:$4 sm:$0xff]  }
  0x8b   :  { %5114 = vmatpush1.bf16.msra.mxu0 %v7461_v44  ;;  %v7536_v44 = vld [vmem:[%s11242_s1 + $0xb20] ss:$16 sps:$4 sm:$0xff]  }
  0x8c   :  { %5155 = vmatpush1.bf16.msra.mxu1 %v7464_v45  ;;  %5115 = vmatprep.subr.bf16.mxu0 %v7469_v46  ;;  %v7541_v45 = vld [vmem:[%s11242_s1 + $0x904] ss:$16 sps:$4 sm:$0xff]  }
  0x8d   :  { %5156 = vmatprep.subr.bf16.mxu1 %v7472_v47  ;;  %v7544_v46 = vld [vmem:[%s11242_s1 + $0xb04] ss:$16 sps:$4 sm:$0xff]   ;;  %v901_v47 = vcombine.high %v9159_v39, %v9159_v39 }
  0x8f   :  { %5116 = vmatpush1.bf16.msra.mxu0 %v7467_v48  ;;  %v7539_v48 = vld [vmem:[%s11242_s1 + $0x900] ss:$16 sps:$4 sm:$0xff]  }
  0x90   :  { %5157 = vmatpush1.bf16.msra.mxu1 %v7470_v50  ;;  %5117 = vmatprep.subr.bf16.mxu0 %v7475_v51  ;;  %v9180_v50 = vrot.slane %v8985_v35, %v8662_v49  ;;  %v7542_v51 = vld [vmem:[%s11242_s1 + $0xb00] ss:$16 sps:$4 sm:$0xff]  }
  0x91   :  { %5158 = vmatprep.subr.bf16.mxu1 %v7478_v52  ;;  %v7547_v52 = vld [vmem:[%s11242_s1 + $0xce4] ss:$16 sps:$4 sm:$0xff]  }
  0x92   :  { %v9196_v35 = vcombine.high %v9180_v50, %v9180_v50 }
  0x93   :  { %5118 = vmatpush1.bf16.msra.mxu0 %v7473_v53  ;;  %v7550_v53 = vld [vmem:[%s11242_s1 + $0xee4] ss:$16 sps:$4 sm:$0xff]  }
  0x94   :  { %5159 = vmatpush1.bf16.msra.mxu1 %v7476_v54  ;;  %5119 = vmatprep.subr.bf16.mxu0 %v7481_v55  ;;  %v9192_v54 = vrot.slane %v901_v47, %v8662_v49  ;;  %v7545_v55 = vld [vmem:[%s11242_s1 + $0xce0] ss:$16 sps:$4 sm:$0xff]   ;;  %v7613_v47 = vld [vmem:[%s11242_s1 + $0xd84] ss:$16 sps:$4 sm:$0xff]  }
  0x95   :  { %5160 = vmatprep.subr.bf16.mxu1 %v7484_v56  ;;  %v7548_v56 = vld [vmem:[%s11242_s1 + $0xee0] ss:$16 sps:$4 sm:$0xff]  }
  0x97   :  { %5120 = vmatpush1.bf16.msra.mxu0 %v7479_v57  ;;  %v7553_v57 = vld [vmem:[%s11242_s1 + $0xcc4] ss:$16 sps:$4 sm:$0xff]  }
  0x98   :  { %5161 = vmatpush1.bf16.msra.mxu1 %v7482_v58  ;;  %5121 = vmatprep.subr.bf16.mxu0 %v7487_v59  ;;  %v7556_v58 = vld [vmem:[%s11242_s1 + $0xec4] ss:$16 sps:$4 sm:$0xff]   ;;  %v9212_v59 = vcombine.high %v9192_v54, %v9192_v54 }
  0x99   :  { %5162 = vmatprep.subr.bf16.mxu1 %v7490_v61  ;;  %v7551_v61 = vld [vmem:[%s11242_s1 + $0xcc0] ss:$16 sps:$4 sm:$0xff]  }
  0x9b   :  { %5122 = vmatpush1.bf16.msra.mxu0 %v7485_v62  ;;  %v7554_v62 = vld [vmem:[%s11242_s1 + $0xec0] ss:$16 sps:$4 sm:$0xff]  }
  0x9c   :  { %5163 = vmatpush1.bf16.msra.mxu1 %v7488_v63  ;;  %5123 = vmatprep.subr.bf16.mxu0 %v7493_v1  ;;  %v7559_v63 = vld [vmem:[%s11242_s1 + $0xca4] ss:$16 sps:$4 sm:$0xff]  }
  0x9d   :  { %5164 = vmatprep.subr.bf16.mxu1 %v7496_v2  ;;  %v7562_v1 = vld [vmem:[%s11242_s1 + $0xea4] ss:$16 sps:$4 sm:$0xff]   ;;  %v7557_v2 = vld [vmem:[%s11242_s1 + $0xca0] ss:$16 sps:$4 sm:$0xff]  }
  0x9f   :  { %5124 = vmatpush1.bf16.msra.mxu0 %v7491_v3  ;;  %v7560_v3 = vld [vmem:[%s11242_s1 + $0xea0] ss:$16 sps:$4 sm:$0xff]  }
  0xa0   :  { %5165 = vmatpush1.bf16.msra.mxu1 %v7494_v4  ;;  %5125 = vmatprep.subr.bf16.mxu0 %v7499_v5  ;;  %v7565_v4 = vld [vmem:[%s11242_s1 + $0xc84] ss:$16 sps:$4 sm:$0xff]  }
  0xa1   :  { %5166 = vmatprep.subr.bf16.mxu1 %v7502_v7  ;;  %v7568_v5 = vld [vmem:[%s11242_s1 + $0xe84] ss:$16 sps:$4 sm:$0xff]   ;;  %v7563_v7 = vld [vmem:[%s11242_s1 + $0xc80] ss:$16 sps:$4 sm:$0xff]  }
  0xa3   :  { %5126 = vmatpush2.bf16.msra.mxu0 %v7497_v8  ;;  %v7566_v8 = vld [vmem:[%s11242_s1 + $0xe80] ss:$16 sps:$4 sm:$0xff]  }
  0xa4   :  { %5167 = vmatpush2.bf16.msra.mxu1 %v7500_v9  ;;  %5127 = vmatprep.subr.bf16.mxu0 %v7505_v10  ;;  %v7571_v9 = vld [vmem:[%s11242_s1 + $0xc64] ss:$16 sps:$4 sm:$0xff]  }
  0xa5   :  { %5168 = vmatprep.subr.bf16.mxu1 %v7508_v11  ;;  %v7574_v10 = vld [vmem:[%s11242_s1 + $0xe64] ss:$16 sps:$4 sm:$0xff]   ;;  %v7569_v11 = vld [vmem:[%s11242_s1 + $0xc60] ss:$16 sps:$4 sm:$0xff]  }
  0xa7   :  { %5128 = vmatpush2.bf16.msra.mxu0 %v7503_v12  ;;  %v7572_v12 = vld [vmem:[%s11242_s1 + $0xe60] ss:$16 sps:$4 sm:$0xff]  }
  0xa8   :  { %5169 = vmatpush2.bf16.msra.mxu1 %v7506_v14  ;;  %5129 = vmatprep.subr.bf16.mxu0 %v7511_v15  ;;  %v7577_v14 = vld [vmem:[%s11242_s1 + $0xc44] ss:$16 sps:$4 sm:$0xff]  }
  0xa9   :  { %5170 = vmatprep.subr.bf16.mxu1 %v7514_v16  ;;  %v7580_v15 = vld [vmem:[%s11242_s1 + $0xe44] ss:$16 sps:$4 sm:$0xff]   ;;  %v7575_v16 = vld [vmem:[%s11242_s1 + $0xc40] ss:$16 sps:$4 sm:$0xff]  }
  0xab   :  { %5130 = vmatpush2.bf16.msra.mxu0 %v7509_v19  ;;  %v7578_v19 = vld [vmem:[%s11242_s1 + $0xe40] ss:$16 sps:$4 sm:$0xff]  }
  0xac   :  { %5171 = vmatpush2.bf16.msra.mxu1 %v7512_v20  ;;  %5131 = vmatprep.subr.bf16.mxu0 %v7517_v21  ;;  %v7583_v20 = vld [vmem:[%s11242_s1 + $0xc24] ss:$16 sps:$4 sm:$0xff]  }
  0xad   :  { %5172 = vmatprep.subr.bf16.mxu1 %v7520_v22  ;;  %v7586_v21 = vld [vmem:[%s11242_s1 + $0xe24] ss:$16 sps:$4 sm:$0xff]   ;;  %v7581_v22 = vld [vmem:[%s11242_s1 + $0xc20] ss:$16 sps:$4 sm:$0xff]  }
  0xaf   :  { %5132 = vmatpush2.bf16.msra.mxu0 %v7515_v24  ;;  %v7584_v24 = vld [vmem:[%s11242_s1 + $0xe20] ss:$16 sps:$4 sm:$0xff]  }
  0xb0   :  { %5173 = vmatpush2.bf16.msra.mxu1 %v7518_v25  ;;  %5133 = vmatprep.subr.bf16.mxu0 %v7523_v27  ;;  %v7589_v25 = vld [vmem:[%s11242_s1 + $0xc04] ss:$16 sps:$4 sm:$0xff]  }
  0xb1   :  { %5174 = vmatprep.subr.bf16.mxu1 %v7526_v28  ;;  %v7592_v27 = vld [vmem:[%s11242_s1 + $0xe04] ss:$16 sps:$4 sm:$0xff]   ;;  %v7587_v28 = vld [vmem:[%s11242_s1 + $0xc00] ss:$16 sps:$4 sm:$0xff]  }
  0xb3   :  { %5134 = vmatpush2.bf16.msra.mxu0 %v7521_v29  ;;  %v7590_v29 = vld [vmem:[%s11242_s1 + $0xe00] ss:$16 sps:$4 sm:$0xff]  }
  0xb4   :  { %5175 = vmatpush2.bf16.msra.mxu1 %v7524_v30  ;;  %5135 = vmatprep.subr.bf16.mxu0 %v7529_v31  ;;  %v7595_v30 = vld [vmem:[%s11242_s1 + $0xde4] ss:$16 sps:$4 sm:$0xff]  }
  0xb5   :  { %5176 = vmatprep.subr.bf16.mxu1 %v7532_v33  ;;  %v7598_v31 = vld [vmem:[%s11242_s1 + $0xfe4] ss:$16 sps:$4 sm:$0xff]   ;;  %v7593_v33 = vld [vmem:[%s11242_s1 + $0xde0] ss:$16 sps:$4 sm:$0xff]  }
  0xb7   :  { %5136 = vmatpush2.bf16.msra.mxu0 %v7527_v36  ;;  %v7601_v36 = vld [vmem:[%s11242_s1 + $0xdc4] ss:$16 sps:$4 sm:$0xff]  }
  0xb8   :  { %5177 = vmatpush2.bf16.msra.mxu1 %v7530_v37  ;;  %5137 = vmatprep.subr.bf16.mxu0 %v7535_v38  ;;  %v7604_v37 = vld [vmem:[%s11242_s1 + $0xfc4] ss:$16 sps:$4 sm:$0xff]   ;;  %v7599_v38 = vld [vmem:[%s11242_s1 + $0xdc0] ss:$16 sps:$4 sm:$0xff]  }
  0xb9   :  { %5178 = vmatprep.subr.bf16.mxu1 %v7538_v32  ;;  %v7602_v32 = vld [vmem:[%s11242_s1 + $0xfc0] ss:$16 sps:$4 sm:$0xff]  }
  0xbb   :  { %5138 = vmatpush2.bf16.msra.mxu0 %v7533_v40  ;;  %v7607_v40 = vld [vmem:[%s11242_s1 + $0xda4] ss:$16 sps:$4 sm:$0xff]  }
  0xbc   :  { %5179 = vmatpush2.bf16.msra.mxu1 %v7536_v44  ;;  %5139 = vmatprep.subr.bf16.mxu0 %v7541_v45  ;;  %v7610_v44 = vld [vmem:[%s11242_s1 + $0xfa4] ss:$16 sps:$4 sm:$0xff]   ;;  %v7605_v45 = vld [vmem:[%s11242_s1 + $0xda0] ss:$16 sps:$4 sm:$0xff]  }
  0xbd   :  { %5180 = vmatprep.subr.bf16.mxu1 %v7544_v46  ;;  %v7608_v46 = vld [vmem:[%s11242_s1 + $0xfa0] ss:$16 sps:$4 sm:$0xff]  }
  0xbf   :  { %5140 = vmatpush2.bf16.msra.mxu0 %v7539_v48  ;;  %v7616_v48 = vld [vmem:[%s11242_s1 + $0xf84] ss:$16 sps:$4 sm:$0xff]  }
  0xc0   :  { %5181 = vmatpush2.bf16.msra.mxu1 %v7542_v51  ;;  %5191 = vmatprep.subr.bf16.mxu0 %v7547_v52  ;;  %v7611_v51 = vld [vmem:[%s11242_s1 + $0xd80] ss:$16 sps:$4 sm:$0xff]  }
  0xc1   :  { %5232 = vmatprep.subr.bf16.mxu1 %v7550_v53  ;;  %v7614_v52 = vld [vmem:[%s11242_s1 + $0xf80] ss:$16 sps:$4 sm:$0xff]   ;;  %v7619_v53 = vld [vmem:[%s11242_s1 + $0xd64] ss:$16 sps:$4 sm:$0xff]  }
  0xc2   :  { %5142 = vmatmul.mubr.bf16.vlgmr.msra.gmra.mxu0 %v9180_v50 }
  0xc3   :  { %5183 = vmatmul.mubr.bf16.vlgmr.msra.gmra.mxu1 %v9196_v35  ;;  %5192 = vmatpush1.bf16.msra.mxu0 %v7545_v55  ;;  %v7622_v55 = vld [vmem:[%s11242_s1 + $0xf64] ss:$16 sps:$4 sm:$0xff]  }
  0xc4   :  { %5233 = vmatpush1.bf16.msra.mxu1 %v7548_v56  ;;  %5193 = vmatprep.subr.bf16.mxu0 %v7553_v57  ;;  %v7617_v56 = vld [vmem:[%s11242_s1 + $0xd60] ss:$16 sps:$4 sm:$0xff]  }
  0xc5   :  { %5234 = vmatprep.subr.bf16.mxu1 %v7556_v58  ;;  %5223 = vmatprep.mubr.bf16.mxu0 %v9192_v54  ;;  %v7620_v57 = vld [vmem:[%s11242_s1 + $0xf60] ss:$16 sps:$4 sm:$0xff]   ;;  %v7625_v58 = vld [vmem:[%s11242_s1 + $0xd44] ss:$16 sps:$4 sm:$0xff]  }
  0xc6   :  { %5264 = vmatprep.mubr.bf16.mxu1 %v9212_v59 }
  0xc7   :  { %5194 = vmatpush1.bf16.msra.mxu0 %v7551_v61  ;;  %v7628_v61 = vld [vmem:[%s11242_s1 + $0xf44] ss:$16 sps:$4 sm:$0xff]  }
  0xc8   :  { %5235 = vmatpush1.bf16.msra.mxu1 %v7554_v62  ;;  %5195 = vmatprep.subr.bf16.mxu0 %v7559_v63  ;;  %v7623_v62 = vld [vmem:[%s11242_s1 + $0xd40] ss:$16 sps:$4 sm:$0xff]  }
  0xc9   :  { %5236 = vmatprep.subr.bf16.mxu1 %v7562_v1  ;;  %v7626_v63 = vld [vmem:[%s11242_s1 + $0xf40] ss:$16 sps:$4 sm:$0xff]  }
  0xca   :  { %v9371_v1 = vld [vmem:[%s11241_s0 + $0x10] sm:$0xff] }
  0xcb   :  { %5196 = vmatpush1.bf16.msra.mxu0 %v7557_v2  ;;  %v7631_v2 = vld [vmem:[%s11242_s1 + $0xd24] ss:$16 sps:$4 sm:$0xff]  }
  0xcc   :  { %5237 = vmatpush1.bf16.msra.mxu1 %v7560_v3  ;;  %5197 = vmatprep.subr.bf16.mxu0 %v7565_v4  ;;  %v7634_v3 = vld [vmem:[%s11242_s1 + $0xf24] ss:$16 sps:$4 sm:$0xff]   ;;  %v9381_v4 = vrot.slane %v9371_v1, %v8662_v49 }
  0xcd   :  { %5238 = vmatprep.subr.bf16.mxu1 %v7568_v5  ;;  %v7629_v5 = vld [vmem:[%s11242_s1 + $0xd20] ss:$16 sps:$4 sm:$0xff]  }
  0xcf   :  { %5198 = vmatpush1.bf16.msra.mxu0 %v7563_v7  ;;  %v7632_v7 = vld [vmem:[%s11242_s1 + $0xf20] ss:$16 sps:$4 sm:$0xff]  }
  0xd0   :  { %5239 = vmatpush1.bf16.msra.mxu1 %v7566_v8  ;;  %5199 = vmatprep.subr.bf16.mxu0 %v7571_v9  ;;  %v7637_v8 = vld [vmem:[%s11242_s1 + $0xd04] ss:$16 sps:$4 sm:$0xff]  }
  0xd1   :  { %5240 = vmatprep.subr.bf16.mxu1 %v7574_v10  ;;  %v7640_v9 = vld [vmem:[%s11242_s1 + $0xf04] ss:$16 sps:$4 sm:$0xff]   ;;  %v7635_v10 = vld [vmem:[%s11242_s1 + $0xd00] ss:$16 sps:$4 sm:$0xff]  }
  0xd3   :  { %5200 = vmatpush1.bf16.msra.mxu0 %v7569_v11  ;;  %v949_v11 = vcombine.high %v9381_v4, %v9381_v4 }
  0xd4   :  { %5241 = vmatpush1.bf16.msra.mxu1 %v7572_v12  ;;  %5201 = vmatprep.subr.bf16.mxu0 %v7577_v14  ;;  %v7638_v12 = vld [vmem:[%s11242_s1 + $0xf00] ss:$16 sps:$4 sm:$0xff]  }
  0xd5   :  { %5242 = vmatprep.subr.bf16.mxu1 %v7580_v15  ;;  %v810_v14 = vld [vmem:[%s11243_s2] sm:$0xf]  ;;  %v9408_v15 = vrot.slane %v9159_v39, %v8662_v49 }
  0xd7   :  { %5202 = vmatpush1.bf16.msra.mxu0 %v7575_v16  ;;  %v814_v16 = vsub.s32 0, %v8644_v42  ;;  %v9423_v39 = vcombine.high %v9408_v15, %v9408_v15 }
  0xd8   :  { %5243 = vmatpush1.bf16.msra.mxu1 %v7578_v19  ;;  %5203 = vmatprep.subr.bf16.mxu0 %v7583_v20  ;;  %v7644_v19 = vld [vmem:[%s11242_s1 + $0x10e4] ss:$16 sps:$4 sm:$0xff]  }
  0xd9   :  { %5244 = vmatprep.subr.bf16.mxu1 %v7586_v21  ;;  %v7647_v20 = vld [vmem:[%s11242_s1 + $0x12e4] ss:$16 sps:$4 sm:$0xff]   ;;  %v818_v21 = vsub.s32 1, %v8644_v42 }
  0xdb   :  { %5204 = vmatpush1.bf16.msra.mxu0 %v7581_v22  ;;  %v9419_v22 = vrot.slane %v949_v11, %v8662_v49  ;;  %v7675_v11 = vld [vmem:[%s11242_s1 + $0x1240] ss:$16 sps:$4 sm:$0xff]  }
  0xdc   :  { %5245 = vmatpush1.bf16.msra.mxu1 %v7584_v24  ;;  %5205 = vmatprep.subr.bf16.mxu0 %v7589_v25  ;;  %v7642_v24 = vld [vmem:[%s11242_s1 + $0x10e0] ss:$16 sps:$4 sm:$0xff]  }
  0xdd   :  { %5246 = vmatprep.subr.bf16.mxu1 %v7592_v27  ;;  %v7645_v25 = vld [vmem:[%s11242_s1 + $0x12e0] ss:$16 sps:$4 sm:$0xff]   ;;  %v815_v27 = vrot.slane %v810_v14, %v814_v16 }
  0xde   :  { %v7678_v16 = vld [vmem:[%s11242_s1 + $0x1020] ss:$16 sps:$4 sm:$0xff]  }
  0xdf   :  { %5206 = vmatpush1.bf16.msra.mxu0 %v7587_v28  ;;  %v7650_v28 = vld [vmem:[%s11242_s1 + $0x10c4] ss:$16 sps:$4 sm:$0xff]  }
  0xe0   :  { %5247 = vmatpush1.bf16.msra.mxu1 %v7590_v29  ;;  %5207 = vmatprep.subr.bf16.mxu0 %v7595_v30  ;;  %v7653_v29 = vld [vmem:[%s11242_s1 + $0x12c4] ss:$16 sps:$4 sm:$0xff]   ;;  %v819_v30 = vrot.slane %v810_v14, %v818_v21 }
  0xe1   :  { %5248 = vmatprep.subr.bf16.mxu1 %v7598_v31  ;;  %v9439_v31 = vcombine.high %v9419_v22, %v9419_v22  ;;  %v7683_v14 = vld [vmem:[%s11242_s1 + $0x1224] ss:$16 sps:$4 sm:$0xff]  }
  0xe2   :  { %v7689_v21 = vld [vmem:[%s11242_s1 + $0x1204] ss:$16 sps:$4 sm:$0xff]  }
  0xe3   :  { %5208 = vmatpush2.bf16.msra.mxu0 %v7593_v33 }
  0xe4   :  { %5249 = vmatpush2.bf16.msra.mxu1 %v7596_v34  ;;  %5209 = vmatprep.subr.bf16.mxu0 %v7601_v36  ;;  %v7648_v36 = vld [vmem:[%s11242_s1 + $0x10c0] ss:$16 sps:$4 sm:$0xff]  }
  0xe5   :  { %5250 = vmatprep.subr.bf16.mxu1 %v7604_v37  ;;  %v7651_v37 = vld [vmem:[%s11242_s1 + $0x12c0] ss:$16 sps:$4 sm:$0xff]  }
  0xe7   :  { %5210 = vmatpush2.bf16.msra.mxu0 %v7599_v38 }
  0xe8   :  { %5251 = vmatpush2.bf16.msra.mxu1 %v7602_v32  ;;  %5211 = vmatprep.subr.bf16.mxu0 %v7607_v40 }
  0xe9   :  { %5252 = vmatprep.subr.bf16.mxu1 %v7610_v44  ;;  %v7656_v44 = vld [vmem:[%s11242_s1 + $0x10a4] ss:$16 sps:$4 sm:$0xff]  }
  0xeb   :  { %5212 = vmatpush2.bf16.msra.mxu0 %v7605_v45  ;;  %v7659_v45 = vld [vmem:[%s11242_s1 + $0x12a4] ss:$16 sps:$4 sm:$0xff]  }
  0xec   :  { %5253 = vmatpush2.bf16.msra.mxu1 %v7608_v46  ;;  %5213 = vmatprep.subr.bf16.mxu0 %v7613_v47 }
  0xed   :  { %5254 = vmatprep.subr.bf16.mxu1 %v7616_v48  ;;  %v7654_v48 = vld [vmem:[%s11242_s1 + $0x10a0] ss:$16 sps:$4 sm:$0xff]  }
  0xef   :  { %5214 = vmatpush2.bf16.msra.mxu0 %v7611_v51  ;;  %v7657_v51 = vld [vmem:[%s11242_s1 + $0x12a0] ss:$16 sps:$4 sm:$0xff]  }
  0xf0   :  { %5255 = vmatpush2.bf16.msra.mxu1 %v7614_v52  ;;  %5215 = vmatprep.subr.bf16.mxu0 %v7619_v53 }
  0xf1   :  { %5256 = vmatprep.subr.bf16.mxu1 %v7622_v55 }
  0xf3   :  { %5216 = vmatpush2.bf16.msra.mxu0 %v7617_v56 }
  0xf4   :  { %5257 = vmatpush2.bf16.msra.mxu1 %v7620_v57  ;;  %5217 = vmatprep.subr.bf16.mxu0 %v7625_v58  ;;  %v7662_v58 = vld [vmem:[%s11242_s1 + $0x1084] ss:$16 sps:$4 sm:$0xff]  }
  0xf5   :  { %5258 = vmatprep.subr.bf16.mxu1 %v7628_v61  ;;  %v7665_v61 = vld [vmem:[%s11242_s1 + $0x1284] ss:$16 sps:$4 sm:$0xff]  }
  0xf7   :  { %5218 = vmatpush2.bf16.msra.mxu0 %v7623_v62  ;;  %v7660_v62 = vld [vmem:[%s11242_s1 + $0x1080] ss:$16 sps:$4 sm:$0xff]  }
  0xf8   :  { %5259 = vmatpush2.bf16.msra.mxu1 %v7626_v63  ;;  %5219 = vmatprep.subr.bf16.mxu0 %v7631_v2  ;;  %v7663_v63 = vld [vmem:[%s11242_s1 + $0x1280] ss:$16 sps:$4 sm:$0xff]   ;;  %v7668_v2 = vld [vmem:[%s11242_s1 + $0x1064] ss:$16 sps:$4 sm:$0xff]  }
  0xf9   :  { %5260 = vmatprep.subr.bf16.mxu1 %v7634_v3  ;;  %v7671_v3 = vld [vmem:[%s11242_s1 + $0x1264] ss:$16 sps:$4 sm:$0xff]  }
  0xfb   :  { %5220 = vmatpush2.bf16.msra.mxu0 %v7629_v5  ;;  %v7666_v5 = vld [vmem:[%s11242_s1 + $0x1060] ss:$16 sps:$4 sm:$0xff]  }
  0xfc   :  { %5261 = vmatpush2.bf16.msra.mxu1 %v7632_v7  ;;  %5221 = vmatprep.subr.bf16.mxu0 %v7637_v8  ;;  %v7669_v7 = vld [vmem:[%s11242_s1 + $0x1260] ss:$16 sps:$4 sm:$0xff]   ;;  %v7674_v8 = vld [vmem:[%s11242_s1 + $0x1044] ss:$16 sps:$4 sm:$0xff]  }
  0xfd   :  { %5262 = vmatprep.subr.bf16.mxu1 %v7640_v9  ;;  %v7677_v9 = vld [vmem:[%s11242_s1 + $0x1244] ss:$16 sps:$4 sm:$0xff]  }
  0xff   :  { %5222 = vmatpush2.bf16.msra.mxu0 %v7635_v10  ;;  %v7672_v10 = vld [vmem:[%s11242_s1 + $0x1040] ss:$16 sps:$4 sm:$0xff]  }
 0x100   :  { %5263 = vmatpush2.bf16.msra.mxu1 %v7638_v12  ;;  %5273 = vmatprep.subr.bf16.mxu0 %v7644_v19  ;;  %v7680_v12 = vld [vmem:[%s11242_s1 + $0x1024] ss:$16 sps:$4 sm:$0xff]   ;;  %v7681_v19 = vld [vmem:[%s11242_s1 + $0x1220] ss:$16 sps:$4 sm:$0xff]  }
 0x101   :  { %5314 = vmatprep.subr.bf16.mxu1 %v7647_v20  ;;  %v7686_v20 = vld [vmem:[%s11242_s1 + $0x1004] ss:$16 sps:$4 sm:$0xff]  }
 0x102   :  { %v4979_v33 = vpop.f32.mrf.mxu0  ;;  %5224 = vmatmul.mubr.bf16.vlgmr.msra.gmra.mxu0 %v9408_v15 }
 0x103   :  { %v5020_v34 = vpop.f32.mrf.mxu1  ;;  %5265 = vmatmul.mubr.bf16.vlgmr.msra.gmra.mxu1 %v9423_v39  ;;  %v4980_v38 = vadd.f32 %v4979_v33, %v815_v27  ;;  %5274 = vmatpush1.bf16.msra.mxu0 %v7642_v24  ;;  %v7684_v24 = vld [vmem:[%s11242_s1 + $0x1000] ss:$16 sps:$4 sm:$0xff]   ;;  %v7692_v27 = vld [vmem:[%s11242_s1 + $0x11e4] ss:$16 sps:$4 sm:$0xff]  }
 0x104   :  { %5315 = vmatpush1.bf16.msra.mxu1 %v7645_v25  ;;  %v4981_v32 = vpop.f32.mrf.mxu0  ;;  %5275 = vmatprep.subr.bf16.mxu0 %v7650_v28  ;;  %v7687_v25 = vld [vmem:[%s11242_s1 + $0x1200] ss:$16 sps:$4 sm:$0xff]   ;;  %v7695_v28 = vld [vmem:[%s11242_s1 + $0x13e4] ss:$16 sps:$4 sm:$0xff]  }
 0x105   :  { %v5022_v40 = vpop.f32.mrf.mxu1  ;;  %5316 = vmatprep.subr.bf16.mxu1 %v7653_v29  ;;  %v9455_v46 = vadd.f32 %v5020_v34, %v4980_v38  ;;  %v4982_v47 = vadd.f32 %v4981_v32, %v819_v30  ;;  %5305 = vmatprep.mubr.bf16.mxu0 %v9419_v22  ;;  %v7690_v29 = vld [vmem:[%s11242_s1 + $0x11e0] ss:$16 sps:$4 sm:$0xff]   ;;  %v7698_v33 = vld [vmem:[%s11242_s1 + $0x11c4] ss:$16 sps:$4 sm:$0xff]  }
 0x106   :  { %5346 = vmatprep.mubr.bf16.mxu1 %v9439_v31  ;;  %v4983_v52 = vpop.f32.mrf.mxu0  ;;  %v7693_v30 = vld [vmem:[%s11242_s1 + $0x13e0] ss:$16 sps:$4 sm:$0xff]   ;;  %v7701_v34 = vld [vmem:[%s11242_s1 + $0x13c4] ss:$16 sps:$4 sm:$0xff]  }
 0x107   :  { %v5024_v53 = vpop.f32.mrf.mxu1  ;;  %v9465_v55 = vadd.f32 %v5022_v40, %v4982_v47  ;;  %5276 = vmatpush1.bf16.msra.mxu0 %v7648_v36  ;;  %v7696_v36 = vld [vmem:[%s11242_s1 + $0x11c0] ss:$16 sps:$4 sm:$0xff]   ;;  %v7704_v38 = vld [vmem:[%s11242_s1 + $0x11a4] ss:$16 sps:$4 sm:$0xff]  }
 0x108   :  { %5317 = vmatpush1.bf16.msra.mxu1 %v7651_v37  ;;  %v4984_v56 = vpop.f32.mrf.mxu0  ;;  %5277 = vmatprep.subr.bf16.mxu0 %v7656_v44  ;;  %v7699_v37 = vld [vmem:[%s11242_s1 + $0x13c0] ss:$16 sps:$4 sm:$0xff]   ;;  %v7707_v32 = vld [vmem:[%s11242_s1 + $0x13a4] ss:$16 sps:$4 sm:$0xff]  }
 0x109   :  { %v5025_v57 = vpop.f32.mrf.mxu1  ;;  %5318 = vmatprep.subr.bf16.mxu1 %v7659_v45  ;;  %v7702_v40 = vld [vmem:[%s11242_s1 + $0x11a0] ss:$16 sps:$4 sm:$0xff]   ;;  %v7710_v45 = vld [vmem:[%s11242_s1 + $0x1184] ss:$16 sps:$4 sm:$0xff]  }
 0x10a   :  { %v7705_v44 = vld [vmem:[%s11242_s1 + $0x13a0] ss:$16 sps:$4 sm:$0xff]   ;;  %v7713_v47 = vld [vmem:[%s11242_s1 + $0x1384] ss:$16 sps:$4 sm:$0xff]  }
 0x10b   :  { %5278 = vmatpush1.bf16.msra.mxu0 %v7654_v48  ;;  %v7708_v48 = vld [vmem:[%s11242_s1 + $0x1180] ss:$16 sps:$4 sm:$0xff]   ;;  %v7716_v52 = vld [vmem:[%s11242_s1 + $0x1164] ss:$16 sps:$4 sm:$0xff]  }
 0x10c   :  { %5319 = vmatpush1.bf16.msra.mxu1 %v7657_v51  ;;  %5279 = vmatprep.subr.bf16.mxu0 %v7662_v58  ;;  %v7711_v51 = vld [vmem:[%s11242_s1 + $0x1380] ss:$16 sps:$4 sm:$0xff]   ;;  %v7719_v53 = vld [vmem:[%s11242_s1 + $0x1364] ss:$16 sps:$4 sm:$0xff]  }
 0x10d   :  { %5320 = vmatprep.subr.bf16.mxu1 %v7665_v61  ;;  %v7714_v56 = vld [vmem:[%s11242_s1 + $0x1160] ss:$16 sps:$4 sm:$0xff]   ;;  %v7722_v58 = vld [vmem:[%s11242_s1 + $0x1144] ss:$16 sps:$4 sm:$0xff]  }
 0x10e   :  { %v7717_v57 = vld [vmem:[%s11242_s1 + $0x1360] ss:$16 sps:$4 sm:$0xff]   ;;  %v7725_v61 = vld [vmem:[%s11242_s1 + $0x1344] ss:$16 sps:$4 sm:$0xff]  }
 0x10f   :  { %5280 = vmatpush1.bf16.msra.mxu0 %v7660_v62  ;;  %v934_v62 = vcombine.high %v9371_v1, %v9371_v1  ;;  %v7731_v1 = vld [vmem:[%s11242_s1 + $0x1324] ss:$16 sps:$4 sm:$0xff]  }
 0x110   :  { %5321 = vmatpush1.bf16.msra.mxu1 %v7663_v63  ;;  %5281 = vmatprep.subr.bf16.mxu0 %v7668_v2  ;;  %v7720_v63 = vld [vmem:[%s11242_s1 + $0x1140] ss:$16 sps:$4 sm:$0xff]  }
 0x111   :  { %5322 = vmatprep.subr.bf16.mxu1 %v7671_v3  ;;  %v7723_v2 = vld [vmem:[%s11242_s1 + $0x1340] ss:$16 sps:$4 sm:$0xff]   ;;  %v7728_v3 = vld [vmem:[%s11242_s1 + $0x1124] ss:$16 sps:$4 sm:$0xff]  }
 0x113   :  { %5282 = vmatpush1.bf16.msra.mxu0 %v7666_v5  ;;  %v9608_v5 = vrot.slane %v934_v62, %v8662_v49  ;;  %v7759_v62 = vld [vmem:[%s11242_s1 + $0x1680] ss:$16 sps:$4 sm:$0xff]  }
 0x114   :  { %5323 = vmatpush1.bf16.msra.mxu1 %v7669_v7  ;;  %5283 = vmatprep.subr.bf16.mxu0 %v7674_v8  ;;  %v7726_v7 = vld [vmem:[%s11242_s1 + $0x1120] ss:$16 sps:$4 sm:$0xff]  }
 0x115   :  { %5324 = vmatprep.subr.bf16.mxu1 %v7677_v9  ;;  %v7729_v8 = vld [vmem:[%s11242_s1 + $0x1320] ss:$16 sps:$4 sm:$0xff]   ;;  %v7734_v9 = vld [vmem:[%s11242_s1 + $0x1104] ss:$16 sps:$4 sm:$0xff]  }
 0x117   :  { %5284 = vmatpush1.bf16.msra.mxu0 %v7672_v10  ;;  %v7737_v10 = vld [vmem:[%s11242_s1 + $0x1304] ss:$16 sps:$4 sm:$0xff]  }
 0x118   :  { %5325 = vmatpush1.bf16.msra.mxu1 %v7675_v11  ;;  %5285 = vmatprep.subr.bf16.mxu0 %v7680_v12  ;;  %v950_v11 = vcombine.high %v9608_v5, %v9608_v5  ;;  %v9626_v12 = vrot.slane %v9381_v4, %v8662_v49  ;;  %v7743_v4 = vld [vmem:[%s11242_s1 + $0x16e4] ss:$16 sps:$4 sm:$0xff]  }
 0x119   :  { %5326 = vmatprep.subr.bf16.mxu1 %v7683_v14  ;;  %v7732_v14 = vld [vmem:[%s11242_s1 + $0x1100] ss:$16 sps:$4 sm:$0xff]  }
 0x11b   :  { %5286 = vmatpush1.bf16.msra.mxu0 %v7678_v16  ;;  %v7735_v16 = vld [vmem:[%s11242_s1 + $0x1300] ss:$16 sps:$4 sm:$0xff]  }
 0x11c   :  { %5327 = vmatpush1.bf16.msra.mxu1 %v7681_v19  ;;  %5287 = vmatprep.subr.bf16.mxu0 %v7686_v20  ;;  %v7740_v19 = vld [vmem:[%s11242_s1 + $0x14e4] ss:$16 sps:$4 sm:$0xff]   ;;  %v7738_v20 = vld [vmem:[%s11242_s1 + $0x14e0] ss:$16 sps:$4 sm:$0xff]  }
 0x11d   :  { %5328 = vmatprep.subr.bf16.mxu1 %v7689_v21  ;;  %v7741_v21 = vld [vmem:[%s11242_s1 + $0x16e0] ss:$16 sps:$4 sm:$0xff]  }
 0x11f   :  { %5288 = vmatpush1.bf16.msra.mxu0 %v7684_v24  ;;  %v9647_v24 = vrot.slane %v950_v11, %v8662_v49  ;;  %v7776_v11 = vld [vmem:[%s11242_s1 + $0x1424] ss:$16 sps:$4 sm:$0xff]  }
 0x120   :  { %5329 = vmatpush1.bf16.msra.mxu1 %v7687_v25  ;;  %5289 = vmatprep.subr.bf16.mxu0 %v7692_v27  ;;  %v9651_v25 = vcombine.high %v9626_v12, %v9626_v12  ;;  %v7746_v27 = vld [vmem:[%s11242_s1 + $0x14c4] ss:$16 sps:$4 sm:$0xff]  }
 0x121   :  { %5330 = vmatprep.subr.bf16.mxu1 %v7695_v28  ;;  %v7749_v28 = vld [vmem:[%s11242_s1 + $0x16c4] ss:$16 sps:$4 sm:$0xff]  }
 0x123   :  { %5290 = vmatpush2.bf16.msra.mxu0 %v7690_v29  ;;  %v7744_v29 = vld [vmem:[%s11242_s1 + $0x14c0] ss:$16 sps:$4 sm:$0xff]  }
 0x124   :  { %5331 = vmatpush2.bf16.msra.mxu1 %v7693_v30  ;;  %5291 = vmatprep.subr.bf16.mxu0 %v7698_v33  ;;  %v7747_v30 = vld [vmem:[%s11242_s1 + $0x16c0] ss:$16 sps:$4 sm:$0xff]   ;;  %v9667_v33 = vcombine.high %v9647_v24, %v9647_v24 }
 0x125   :  { %5332 = vmatprep.subr.bf16.mxu1 %v7701_v34 }
 0x127   :  { %5292 = vmatpush2.bf16.msra.mxu0 %v7696_v36 }
 0x128   :  { %5333 = vmatpush2.bf16.msra.mxu1 %v7699_v37  ;;  %5293 = vmatprep.subr.bf16.mxu0 %v7704_v38 }
 0x129   :  { %5334 = vmatprep.subr.bf16.mxu1 %v7707_v32 }
 0x12b   :  { %5294 = vmatpush2.bf16.msra.mxu0 %v7702_v40  ;;  %v7752_v40 = vld [vmem:[%s11242_s1 + $0x14a4] ss:$16 sps:$4 sm:$0xff]  }
 0x12c   :  { %5335 = vmatpush2.bf16.msra.mxu1 %v7705_v44  ;;  %5295 = vmatprep.subr.bf16.mxu0 %v7710_v45  ;;  %v7755_v44 = vld [vmem:[%s11242_s1 + $0x16a4] ss:$16 sps:$4 sm:$0xff]  }
 0x12d   :  { %5336 = vmatprep.subr.bf16.mxu1 %v7713_v47 }
 0x12f   :  { %5296 = vmatpush2.bf16.msra.mxu0 %v7708_v48  ;;  %v7753_v48 = vld [vmem:[%s11242_s1 + $0x16a0] ss:$16 sps:$4 sm:$0xff]  }
 0x130   :  { %5337 = vmatpush2.bf16.msra.mxu1 %v7711_v51  ;;  %5297 = vmatprep.subr.bf16.mxu0 %v7716_v52 }
 0x131   :  { %5338 = vmatprep.subr.bf16.mxu1 %v7719_v53 }
 0x133   :  { %5298 = vmatpush2.bf16.msra.mxu0 %v7714_v56 }
 0x134   :  { %5339 = vmatpush2.bf16.msra.mxu1 %v7717_v57  ;;  %5299 = vmatprep.subr.bf16.mxu0 %v7722_v58  ;;  %v7758_v57 = vld [vmem:[%s11242_s1 + $0x1484] ss:$16 sps:$4 sm:$0xff]  }
 0x135   :  { %5340 = vmatprep.subr.bf16.mxu1 %v7725_v61  ;;  %v7761_v58 = vld [vmem:[%s11242_s1 + $0x1684] ss:$16 sps:$4 sm:$0xff]   ;;  %v7756_v61 = vld [vmem:[%s11242_s1 + $0x1480] ss:$16 sps:$4 sm:$0xff]  }
 0x137   :  { %5300 = vmatpush2.bf16.msra.mxu0 %v7720_v63  ;;  %v7764_v63 = vld [vmem:[%s11242_s1 + $0x1464] ss:$16 sps:$4 sm:$0xff]  }
 0x138   :  { %5341 = vmatpush2.bf16.msra.mxu1 %v7723_v2  ;;  %5301 = vmatprep.subr.bf16.mxu0 %v7728_v3  ;;  %v7767_v2 = vld [vmem:[%s11242_s1 + $0x1664] ss:$16 sps:$4 sm:$0xff]   ;;  %v7762_v3 = vld [vmem:[%s11242_s1 + $0x1460] ss:$16 sps:$4 sm:$0xff]  }
 0x139   :  { %5342 = vmatprep.subr.bf16.mxu1 %v7731_v1  ;;  %v7765_v1 = vld [vmem:[%s11242_s1 + $0x1660] ss:$16 sps:$4 sm:$0xff]  }
 0x13b   :  { %5302 = vmatpush2.bf16.msra.mxu0 %v7726_v7  ;;  %v7770_v7 = vld [vmem:[%s11242_s1 + $0x1444] ss:$16 sps:$4 sm:$0xff]  }
 0x13c   :  { %5343 = vmatpush2.bf16.msra.mxu1 %v7729_v8  ;;  %5303 = vmatprep.subr.bf16.mxu0 %v7734_v9  ;;  %v7773_v8 = vld [vmem:[%s11242_s1 + $0x1644] ss:$16 sps:$4 sm:$0xff]   ;;  %v7768_v9 = vld [vmem:[%s11242_s1 + $0x1440] ss:$16 sps:$4 sm:$0xff]  }
 0x13d   :  { %5344 = vmatprep.subr.bf16.mxu1 %v7737_v10  ;;  %v7771_v10 = vld [vmem:[%s11242_s1 + $0x1640] ss:$16 sps:$4 sm:$0xff]  }
 0x13f   :  { %5304 = vmatpush2.bf16.msra.mxu0 %v7732_v14  ;;  %v7779_v14 = vld [vmem:[%s11242_s1 + $0x1624] ss:$16 sps:$4 sm:$0xff]  }
 0x140   :  { %5345 = vmatpush2.bf16.msra.mxu1 %v7735_v16  ;;  %5355 = vmatprep.subr.bf16.mxu0 %v7740_v19  ;;  %v7774_v16 = vld [vmem:[%s11242_s1 + $0x1420] ss:$16 sps:$4 sm:$0xff]  }
 0x141   :  { %5396 = vmatprep.subr.bf16.mxu1 %v7743_v4  ;;  %v7777_v19 = vld [vmem:[%s11242_s1 + $0x1620] ss:$16 sps:$4 sm:$0xff]   ;;  %v7782_v4 = vld [vmem:[%s11242_s1 + $0x1404] ss:$16 sps:$4 sm:$0xff]  }
 0x142   :  { %v5061_v34 = vpop.f32.mrf.mxu0  ;;  %5306 = vmatmul.mubr.bf16.vlgmr.msra.gmra.mxu0 %v9626_v12 }
 0x143   :  { %v5102_v36 = vpop.f32.mrf.mxu1  ;;  %5347 = vmatmul.mubr.bf16.vlgmr.msra.gmra.mxu1 %v9651_v25  ;;  %v5062_v37 = vadd.f32 %v5061_v34, %v9455_v46  ;;  %5356 = vmatpush1.bf16.msra.mxu0 %v7738_v20  ;;  %v7750_v46 = vld [vmem:[%s11242_s1 + $0x14a0] ss:$16 sps:$4 sm:$0xff]   ;;  %v7785_v20 = vld [vmem:[%s11242_s1 + $0x1604] ss:$16 sps:$4 sm:$0xff]  }
 0x144   :  { %5397 = vmatpush1.bf16.msra.mxu1 %v7741_v21  ;;  %v5063_v38 = vpop.f32.mrf.mxu0  ;;  %5357 = vmatprep.subr.bf16.mxu0 %v7746_v27  ;;  %v7780_v21 = vld [vmem:[%s11242_s1 + $0x1400] ss:$16 sps:$4 sm:$0xff]  }
 0x145   :  { %v5104_v32 = vpop.f32.mrf.mxu1  ;;  %5398 = vmatprep.subr.bf16.mxu1 %v7749_v28  ;;  %v9678_v45 = vadd.f32 %v5102_v36, %v5062_v37  ;;  %v5064_v47 = vadd.f32 %v5063_v38, %v9465_v55  ;;  %5387 = vmatprep.mubr.bf16.mxu0 %v9647_v24  ;;  %v7783_v27 = vld [vmem:[%s11242_s1 + $0x1600] ss:$16 sps:$4 sm:$0xff]   ;;  %v7788_v28 = vld [vmem:[%s11242_s1 + $0x15e4] ss:$16 sps:$4 sm:$0xff]  }
 0x146   :  { %5428 = vmatprep.mubr.bf16.mxu1 %v9667_v33  ;;  %v5065_v51 = vpop.f32.mrf.mxu0  ;;  %v7789_v34 = vld [vmem:[%s11242_s1 + $0x17e0] ss:$16 sps:$4 sm:$0xff]   ;;  %v7794_v36 = vld [vmem:[%s11242_s1 + $0x15c4] ss:$16 sps:$4 sm:$0xff]  }
 0x147   :  { %v5106_v52 = vpop.f32.mrf.mxu1  ;;  %v9689_v53 = vadd.f32 %v5104_v32, %v5064_v47  ;;  %5358 = vmatpush1.bf16.msra.mxu0 %v7744_v29  ;;  %v7791_v29 = vld [vmem:[%s11242_s1 + $0x17e4] ss:$16 sps:$4 sm:$0xff]   ;;  %v7792_v38 = vld [vmem:[%s11242_s1 + $0x15c0] ss:$16 sps:$4 sm:$0xff]  }
 0x148   :  { %5399 = vmatpush1.bf16.msra.mxu1 %v7747_v30  ;;  %v5066_v56 = vpop.f32.mrf.mxu0  ;;  %5359 = vmatprep.subr.bf16.mxu0 %v7752_v40  ;;  %v7786_v30 = vld [vmem:[%s11242_s1 + $0x15e0] ss:$16 sps:$4 sm:$0xff]   ;;  %v7797_v37 = vld [vmem:[%s11242_s1 + $0x17c4] ss:$16 sps:$4 sm:$0xff]  }
 0x149   :  { %v5107_v55 = vpop.f32.mrf.mxu1  ;;  %5400 = vmatprep.subr.bf16.mxu1 %v7755_v44  ;;  %v7795_v32 = vld [vmem:[%s11242_s1 + $0x17c0] ss:$16 sps:$4 sm:$0xff]   ;;  %v7800_v40 = vld [vmem:[%s11242_s1 + $0x15a4] ss:$16 sps:$4 sm:$0xff]  }
 0x14a   :  { %v7803_v44 = vld [vmem:[%s11242_s1 + $0x17a4] ss:$16 sps:$4 sm:$0xff]   ;;  %v7798_v47 = vld [vmem:[%s11242_s1 + $0x15a0] ss:$16 sps:$4 sm:$0xff]  }
 0x14b   :  { %5360 = vmatpush1.bf16.msra.mxu0 %v7750_v46  ;;  %v7801_v46 = vld [vmem:[%s11242_s1 + $0x17a0] ss:$16 sps:$4 sm:$0xff]   ;;  %v7809_v51 = vld [vmem:[%s11242_s1 + $0x1784] ss:$16 sps:$4 sm:$0xff]  }
 0x14c   :  { %5401 = vmatpush1.bf16.msra.mxu1 %v7753_v48  ;;  %5361 = vmatprep.subr.bf16.mxu0 %v7758_v57  ;;  %v7806_v48 = vld [vmem:[%s11242_s1 + $0x1584] ss:$16 sps:$4 sm:$0xff]   ;;  %v7804_v52 = vld [vmem:[%s11242_s1 + $0x1580] ss:$16 sps:$4 sm:$0xff]  }
 0x14d   :  { %5402 = vmatprep.subr.bf16.mxu1 %v7761_v58  ;;  %v7807_v56 = vld [vmem:[%s11242_s1 + $0x1780] ss:$16 sps:$4 sm:$0xff]   ;;  %v7812_v55 = vld [vmem:[%s11242_s1 + $0x1564] ss:$16 sps:$4 sm:$0xff]  }
 0x14e   :  { %v7815_v57 = vld [vmem:[%s11242_s1 + $0x1764] ss:$16 sps:$4 sm:$0xff]   ;;  %v7810_v58 = vld [vmem:[%s11242_s1 + $0x1560] ss:$16 sps:$4 sm:$0xff]  }
 0x14f   :  { %5362 = vmatpush1.bf16.msra.mxu0 %v7756_v61  ;;  %v7813_v61 = vld [vmem:[%s11242_s1 + $0x1760] ss:$16 sps:$4 sm:$0xff]  }
 0x150   :  { %5403 = vmatpush1.bf16.msra.mxu1 %v7759_v62  ;;  %5363 = vmatprep.subr.bf16.mxu0 %v7764_v63  ;;  %v7818_v62 = vld [vmem:[%s11242_s1 + $0x1544] ss:$16 sps:$4 sm:$0xff]  }
 0x151   :  { %5404 = vmatprep.subr.bf16.mxu1 %v7767_v2  ;;  %v7821_v63 = vld [vmem:[%s11242_s1 + $0x1744] ss:$16 sps:$4 sm:$0xff]   ;;  %v7816_v2 = vld [vmem:[%s11242_s1 + $0x1540] ss:$16 sps:$4 sm:$0xff]  }
 0x153   :  { %5364 = vmatpush1.bf16.msra.mxu0 %v7762_v3  ;;  %v7819_v3 = vld [vmem:[%s11242_s1 + $0x1740] ss:$16 sps:$4 sm:$0xff]  }
 0x154   :  { %5405 = vmatpush1.bf16.msra.mxu1 %v7765_v1  ;;  %5365 = vmatprep.subr.bf16.mxu0 %v7770_v7  ;;  %v7824_v1 = vld [vmem:[%s11242_s1 + $0x1524] ss:$16 sps:$4 sm:$0xff]  }
 0x155   :  { %5406 = vmatprep.subr.bf16.mxu1 %v7773_v8  ;;  %v7827_v7 = vld [vmem:[%s11242_s1 + $0x1724] ss:$16 sps:$4 sm:$0xff]   ;;  %v7822_v8 = vld [vmem:[%s11242_s1 + $0x1520] ss:$16 sps:$4 sm:$0xff]  }
 0x157   :  { %5366 = vmatpush1.bf16.msra.mxu0 %v7768_v9  ;;  %v7825_v9 = vld [vmem:[%s11242_s1 + $0x1720] ss:$16 sps:$4 sm:$0xff]  }
 0x158   :  { %5407 = vmatpush1.bf16.msra.mxu1 %v7771_v10  ;;  %5367 = vmatprep.subr.bf16.mxu0 %v7776_v11  ;;  %v7830_v10 = vld [vmem:[%s11242_s1 + $0x1504] ss:$16 sps:$4 sm:$0xff]  }
 0x159   :  { %5408 = vmatprep.subr.bf16.mxu1 %v7779_v14  ;;  %v7833_v11 = vld [vmem:[%s11242_s1 + $0x1704] ss:$16 sps:$4 sm:$0xff]   ;;  %v9843_v14 = vrot.slane %v9608_v5, %v8662_v49  ;;  %v7840_v5 = vld [vmem:[%s11242_s1 + $0xec] ss:$16 sps:$4 sm:$0xff]  }
 0x15b   :  { %5368 = vmatpush1.bf16.msra.mxu0 %v7774_v16  ;;  %v7828_v16 = vld [vmem:[%s11242_s1 + $0x1500] ss:$16 sps:$4 sm:$0xff]  }
 0x15c   :  { %5409 = vmatpush1.bf16.msra.mxu1 %v7777_v19  ;;  %5369 = vmatprep.subr.bf16.mxu0 %v7782_v4  ;;  %v7831_v19 = vld [vmem:[%s11242_s1 + $0x1700] ss:$16 sps:$4 sm:$0xff]   ;;  %v7837_v4 = vld [vmem:[%s11242_s1 + $0x1864] ss:$16 sps:$4 sm:$0xff]  }
 0x15d   :  { %5410 = vmatprep.subr.bf16.mxu1 %v7785_v20  ;;  %v7835_v20 = vld [vmem:[%s11242_s1 + $0x1860] ss:$16 sps:$4 sm:$0xff]  }
 0x15f   :  { %5370 = vmatpush1.bf16.msra.mxu0 %v7780_v21  ;;  %v7838_v21 = vld [vmem:[%s11242_s1 + $0xe8] ss:$16 sps:$4 sm:$0xff]  }
 0x160   :  { %5411 = vmatpush1.bf16.msra.mxu1 %v7783_v27  ;;  %5371 = vmatprep.subr.bf16.mxu0 %v7788_v28  ;;  %v9865_v27 = vcombine.high %v9843_v14, %v9843_v14  ;;  %v7843_v28 = vld [vmem:[%s11242_s1 + $0x1844] ss:$16 sps:$4 sm:$0xff]  }
 0x161   :  { %5412 = vmatprep.subr.bf16.mxu1 %v7791_v29  ;;  %v7846_v29 = vld [vmem:[%s11242_s1 + $0xcc] ss:$16 sps:$4 sm:$0xff]  }
 0x163   :  { %5372 = vmatpush2.bf16.msra.mxu0 %v7786_v30  ;;  %v7841_v30 = vld [vmem:[%s11242_s1 + $0x1840] ss:$16 sps:$4 sm:$0xff]  }
 0x164   :  { %5413 = vmatpush2.bf16.msra.mxu1 %v7789_v34  ;;  %5373 = vmatprep.subr.bf16.mxu0 %v7794_v36  ;;  %v7844_v34 = vld [vmem:[%s11242_s1 + $0xc8] ss:$16 sps:$4 sm:$0xff]  }
 0x165   :  { %5414 = vmatprep.subr.bf16.mxu1 %v7797_v37 }
 0x167   :  { %5374 = vmatpush2.bf16.msra.mxu0 %v7792_v38 }
 0x168   :  { %5415 = vmatpush2.bf16.msra.mxu1 %v7795_v32  ;;  %5375 = vmatprep.subr.bf16.mxu0 %v7800_v40 }
 0x169   :  { %5416 = vmatprep.subr.bf16.mxu1 %v7803_v44  ;;  %v7849_v44 = vld [vmem:[%s11242_s1 + $0x1824] ss:$16 sps:$4 sm:$0xff]  }
 0x16b   :  { %5376 = vmatpush2.bf16.msra.mxu0 %v7798_v47  ;;  %v7852_v47 = vld [vmem:[%s11242_s1 + $0xac] ss:$16 sps:$4 sm:$0xff]  }
 0x16c   :  { %5417 = vmatpush2.bf16.msra.mxu1 %v7801_v46  ;;  %5377 = vmatprep.subr.bf16.mxu0 %v7806_v48 }
 0x16d   :  { %5418 = vmatprep.subr.bf16.mxu1 %v7809_v51  ;;  %v7850_v51 = vld [vmem:[%s11242_s1 + $0xa8] ss:$16 sps:$4 sm:$0xff]  }
 0x16f   :  { %5378 = vmatpush2.bf16.msra.mxu0 %v7804_v52  ;;  %v8495_v52 = vmov 0  }
 0x170   :  { %5419 = vmatpush2.bf16.msra.mxu1 %v7807_v56  ;;  %5379 = vmatprep.subr.bf16.mxu0 %v7812_v55 }
 0x171   :  { %5420 = vmatprep.subr.bf16.mxu1 %v7815_v57 }
 0x173   :  { %5380 = vmatpush2.bf16.msra.mxu0 %v7810_v58 }
 0x174   :  { %5421 = vmatpush2.bf16.msra.mxu1 %v7813_v61  ;;  %5381 = vmatprep.subr.bf16.mxu0 %v7818_v62  ;;  %v7855_v61 = vld [vmem:[%s11242_s1 + $0x1804] ss:$16 sps:$4 sm:$0xff]   ;;  %v7858_v62 = vld [vmem:[%s11242_s1 + $0x8c] ss:$16 sps:$4 sm:$0xff]  }
 0x175   :  { %5422 = vmatprep.subr.bf16.mxu1 %v7821_v63  ;;  %v7856_v63 = vld [vmem:[%s11242_s1 + $0x88] ss:$16 sps:$4 sm:$0xff]  }
 0x177   :  { %5382 = vmatpush2.bf16.msra.mxu0 %v7816_v2  ;;  %v6389_v2 = vld.sshfl [vmem:[%s11241_s0 + $0x18] sm:$0x1 pattern:$0x75316420] }
 0x178   :  { %5423 = vmatpush2.bf16.msra.mxu1 %v7819_v3  ;;  %5383 = vmatprep.subr.bf16.mxu0 %v7824_v1  ;;  %v7861_v3 = vld [vmem:[%s11242_s1 + $0x6c] ss:$16 sps:$4 sm:$0xff]  }
 0x179   :  { %5424 = vmatprep.subr.bf16.mxu1 %v7827_v7  ;;  %v7864_v1 = vld [vmem:[%s11242_s1 + $0x2ec] ss:$16 sps:$4 sm:$0xff]   ;;  %v7859_v7 = vld [vmem:[%s11242_s1 + $0x68] ss:$16 sps:$4 sm:$0xff]  }
 0x17b   :  { %5384 = vmatpush2.bf16.msra.mxu0 %v7822_v8  ;;  %v7862_v8 = vld [vmem:[%s11242_s1 + $0x2e8] ss:$16 sps:$4 sm:$0xff]  }
 0x17c   :  { %5425 = vmatpush2.bf16.msra.mxu1 %v7825_v9  ;;  %5385 = vmatprep.subr.bf16.mxu0 %v7830_v10  ;;  %v9929_v9 = vrot.slane %v6389_v2, %v8662_v49  ;;  %v7867_v10 = vld [vmem:[%s11242_s1 + $0x4c] ss:$16 sps:$4 sm:$0xff]   ;;  %v7865_v49 = vld [vmem:[%s11242_s1 + $0x48] ss:$16 sps:$4 sm:$0xff]  }
 0x17d   :  { %5426 = vmatprep.subr.bf16.mxu1 %v7833_v11  ;;  %v7870_v11 = vld [vmem:[%s11242_s1 + $0x2cc] ss:$16 sps:$4 sm:$0xff]  }
 0x17e   :  { %v7915_v2 = vld [vmem:[%s11242_s1 + $0x14c] ss:$16 sps:$4 sm:$0xff]  }
 0x17f   :  { %5386 = vmatpush2.bf16.msra.mxu0 %v7828_v16  ;;  %v7868_v16 = vld [vmem:[%s11242_s1 + $0x2c8] ss:$16 sps:$4 sm:$0xff]  }
 0x180   :  { %5427 = vmatpush2.bf16.msra.mxu1 %v7831_v19  ;;  %5445 = vmatprep.subr.bf16.mxu0 %v7837_v4  ;;  %v7873_v19 = vld [vmem:[%s11242_s1 + $0x2c] ss:$16 sps:$4 sm:$0xff]  }
 0x181   :  { %5478 = vmatprep.subr.bf16.mxu1 %v7840_v5  ;;  %v7876_v4 = vld [vmem:[%s11242_s1 + $0x2ac] ss:$16 sps:$4 sm:$0xff]   ;;  %v7871_v5 = vld [vmem:[%s11242_s1 + $0x28] ss:$16 sps:$4 sm:$0xff]  }
 0x182   :  { %v5143_v36 = vpop.f32.mrf.mxu0  ;;  %5388 = vmatmul.mubr.bf16.vlgmr.msra.gmra.mxu0 %v9843_v14 }
 0x183   :  { %v5184_v37 = vpop.f32.mrf.mxu1  ;;  %5429 = vmatmul.mubr.bf16.vlgmr.msra.gmra.mxu1 %v9865_v27  ;;  %v5144_v38 = vadd.f32 %v5143_v36, %v9678_v45  ;;  %5446 = vmatpush1.bf16.msra.mxu0 %v7835_v20  ;;  %v7847_v45 = vld [vmem:[%s11242_s1 + $0x1820] ss:$16 sps:$4 sm:$0xff]   ;;  %v7874_v20 = vld [vmem:[%s11242_s1 + $0x2a8] ss:$16 sps:$4 sm:$0xff]  }
 0x184   :  { %5479 = vmatpush1.bf16.msra.mxu1 %v7838_v21  ;;  %v5145_v32 = vpop.f32.mrf.mxu0  ;;  %5447 = vmatprep.subr.bf16.mxu0 %v7843_v28  ;;  %v7879_v21 = vld [vmem:[%s11242_s1 + $0xc] ss:$16 sps:$4 sm:$0xff]   ;;  %v7877_v28 = vld [vmem:[%s11242_s1 + $0x8] ss:$16 sps:$4 sm:$0xff]  }
 0x185   :  { %v5186_v40 = vpop.f32.mrf.mxu1  ;;  %5480 = vmatprep.subr.bf16.mxu1 %v7846_v29  ;;  %v9888_v46 = vadd.f32 %v5184_v37, %v5144_v38  ;;  %v5146_v48 = vadd.f32 %v5145_v32, %v9689_v53  ;;  %5469 = vmatprep.mubr.bf16.mxu0 %v8495_v52  ;;  %v7880_v29 = vld [vmem:[%s11242_s1 + $0x288] ss:$16 sps:$4 sm:$0xff]   ;;  %v7891_v38 = vld [vmem:[%s11242_s1 + $0x1cc] ss:$16 sps:$4 sm:$0xff]  }
 0x186   :  { %5510 = vmatprep.mubr.bf16.mxu1 %v8690_v60  ;;  %v5147_v56 = vpop.f32.mrf.mxu0  ;;  %v7853_v60 = vld [vmem:[%s11242_s1 + $0x1800] ss:$16 sps:$4 sm:$0xff]   ;;  %v7883_v36 = vld [vmem:[%s11242_s1 + $0x1e8] ss:$16 sps:$4 sm:$0xff]   ;;  %v7894_v32 = vld [vmem:[%s11242_s1 + $0x24c] ss:$16 sps:$4 sm:$0xff]  }
 0x187   :  { %v5188_v55 = vpop.f32.mrf.mxu1  ;;  %v9899_v57 = vadd.f32 %v5186_v40, %v5146_v48  ;;  %5448 = vmatpush1.bf16.msra.mxu0 %v7841_v30  ;;  %v7885_v30 = vld [vmem:[%s11242_s1 + $0x1ec] ss:$16 sps:$4 sm:$0xff]   ;;  %v7886_v37 = vld [vmem:[%s11242_s1 + $0x268] ss:$16 sps:$4 sm:$0xff]  }
 0x188   :  { %5481 = vmatpush1.bf16.msra.mxu1 %v7844_v34  ;;  %v5148_v53 = vpop.f32.mrf.mxu0  ;;  %5449 = vmatprep.subr.bf16.mxu0 %v7849_v44  ;;  %v7888_v34 = vld [vmem:[%s11242_s1 + $0x26c] ss:$16 sps:$4 sm:$0xff]   ;;  %v7889_v40 = vld [vmem:[%s11242_s1 + $0x1c8] ss:$16 sps:$4 sm:$0xff]  }
 0x189   :  { %v5189_v58 = vpop.f32.mrf.mxu1  ;;  %5482 = vmatprep.subr.bf16.mxu1 %v7852_v47  ;;  %v7892_v44 = vld [vmem:[%s11242_s1 + $0x248] ss:$16 sps:$4 sm:$0xff]   ;;  %v7897_v47 = vld [vmem:[%s11242_s1 + $0x1ac] ss:$16 sps:$4 sm:$0xff]  }
 0x18a   :  { %v7900_v48 = vld [vmem:[%s11242_s1 + $0x22c] ss:$16 sps:$4 sm:$0xff]   ;;  %v7901_v53 = vld [vmem:[%s11242_s1 + $0x188] ss:$16 sps:$4 sm:$0xff]  }
 0x18b   :  { %5450 = vmatpush1.bf16.msra.mxu0 %v7847_v45  ;;  %v7895_v45 = vld [vmem:[%s11242_s1 + $0x1a8] ss:$16 sps:$4 sm:$0xff]   ;;  %v7903_v56 = vld [vmem:[%s11242_s1 + $0x18c] ss:$16 sps:$4 sm:$0xff]  }
 0x18c   :  { %5483 = vmatpush1.bf16.msra.mxu1 %v7850_v51  ;;  %5451 = vmatprep.subr.bf16.mxu0 %v7855_v61  ;;  %v7898_v51 = vld [vmem:[%s11242_s1 + $0x228] ss:$16 sps:$4 sm:$0xff]   ;;  %v7906_v55 = vld [vmem:[%s11242_s1 + $0x20c] ss:$16 sps:$4 sm:$0xff]  }
 0x18d   :  { %5484 = vmatprep.subr.bf16.mxu1 %v7858_v62  ;;  %v7904_v58 = vld [vmem:[%s11242_s1 + $0x208] ss:$16 sps:$4 sm:$0xff]   ;;  %v7909_v61 = vld [vmem:[%s11242_s1 + $0x16c] ss:$16 sps:$4 sm:$0xff]  }
 0x18e   :  { %v7912_v62 = vld [vmem:[%s11242_s1 + $0x3ec] ss:$16 sps:$4 sm:$0xff]  }
 0x18f   :  { %5452 = vmatpush1.bf16.msra.mxu0 %v7853_v60  ;;  %v7907_v60 = vld [vmem:[%s11242_s1 + $0x168] ss:$16 sps:$4 sm:$0xff]  }
 0x190   :  { %5485 = vmatpush1.bf16.msra.mxu1 %v7856_v63  ;;  %5519 = vmatprep.subr.bf16.mxu0 %v7864_v1  ;;  %v7910_v63 = vld [vmem:[%s11242_s1 + $0x3e8] ss:$16 sps:$4 sm:$0xff]  }
 0x191   :  { %5486 = vmatprep.subr.bf16.mxu1 %v7861_v3  ;;  %v7918_v3 = vld [vmem:[%s11242_s1 + $0x3cc] ss:$16 sps:$4 sm:$0xff]   ;;  %v7913_v1 = vld [vmem:[%s11242_s1 + $0x148] ss:$16 sps:$4 sm:$0xff]  }
 0x192   :  { %7174 = vmatmul.mubr.msk.bf16.vlgmr.msra.gmra.mxu0 %vm4941_vm0, %v9929_v9 }
 0x193   :  { %5520 = vmatpush1.bf16.msra.mxu0 %v7862_v8  ;;  %5551 = vmatprep.mubr.bf16.mxu0 %v8703_v0  ;;  %v7882_v0 = vld [vmem:[%s11242_s1 + $0x28c] ss:$16 sps:$4 sm:$0xff]  }
 0x194   :  { %5487 = vmatpush1.bf16.msra.mxu1 %v7859_v7  ;;  %5521 = vmatprep.subr.bf16.mxu0 %v7870_v11  ;;  %v7916_v7 = vld [vmem:[%s11242_s1 + $0x3c8] ss:$16 sps:$4 sm:$0xff]   ;;  %v7921_v8 = vld [vmem:[%s11242_s1 + $0x12c] ss:$16 sps:$4 sm:$0xff]  }
 0x195   :  { %5488 = vmatprep.subr.bf16.mxu1 %v7867_v10  ;;  %v7924_v10 = vld [vmem:[%s11242_s1 + $0x3ac] ss:$16 sps:$4 sm:$0xff]   ;;  %v7919_v11 = vld [vmem:[%s11242_s1 + $0x128] ss:$16 sps:$4 sm:$0xff]  }
 0x197   :  { %5522 = vmatpush1.bf16.msra.mxu0 %v7868_v16  ;;  %v7927_v16 = vld [vmem:[%s11242_s1 + $0x10c] ss:$16 sps:$4 sm:$0xff]  }
 0x198   :  { %5489 = vmatpush1.bf16.msra.mxu1 %v7865_v49  ;;  %5523 = vmatprep.subr.bf16.mxu0 %v7876_v4  ;;  %v7922_v49 = vld [vmem:[%s11242_s1 + $0x3a8] ss:$16 sps:$4 sm:$0xff]  }
 0x199   :  { %5490 = vmatprep.subr.bf16.mxu1 %v7873_v19  ;;  %v7930_v19 = vld [vmem:[%s11242_s1 + $0x38c] ss:$16 sps:$4 sm:$0xff]   ;;  %v7925_v4 = vld [vmem:[%s11242_s1 + $0x108] ss:$16 sps:$4 sm:$0xff]  }
 0x19b   :  { %5524 = vmatpush1.bf16.msra.mxu0 %v7874_v20  ;;  %v7933_v20 = vld [vmem:[%s11242_s1 + $0x36c] ss:$16 sps:$4 sm:$0xff]  }
 0x19c   :  { %5491 = vmatpush1.bf16.msra.mxu1 %v7871_v5  ;;  %5525 = vmatprep.subr.bf16.mxu0 %v7882_v0  ;;  %v7928_v5 = vld [vmem:[%s11242_s1 + $0x388] ss:$16 sps:$4 sm:$0xff]  }
 0x19d   :  { %5492 = vmatprep.subr.bf16.mxu1 %v7879_v21  ;;  %v7936_v21 = vld [vmem:[%s11242_s1 + $0x4ec] ss:$16 sps:$4 sm:$0xff]   ;;  %v7931_v0 = vld [vmem:[%s11242_s1 + $0x368] ss:$16 sps:$4 sm:$0xff]  }
 0x19f   :  { %5526 = vmatpush1.bf16.msra.mxu0 %v7880_v29  ;;  %v7939_v29 = vld [vmem:[%s11242_s1 + $0x34c] ss:$16 sps:$4 sm:$0xff]  }
 0x1a0   :  { %5493 = vmatpush1.bf16.msra.mxu1 %v7877_v28  ;;  %5527 = vmatprep.subr.bf16.mxu0 %v7888_v34  ;;  %v7934_v28 = vld [vmem:[%s11242_s1 + $0x4e8] ss:$16 sps:$4 sm:$0xff]  }
 0x1a1   :  { %5494 = vmatprep.subr.bf16.mxu1 %v7885_v30  ;;  %v7942_v30 = vld [vmem:[%s11242_s1 + $0x4cc] ss:$16 sps:$4 sm:$0xff]   ;;  %v7937_v34 = vld [vmem:[%s11242_s1 + $0x348] ss:$16 sps:$4 sm:$0xff]  }
 0x1a3   :  { %5528 = vmatpush1.bf16.msra.mxu0 %v7886_v37 }
 0x1a4   :  { %5495 = vmatpush2.bf16.msra.mxu1 %v7883_v36  ;;  %5529 = vmatprep.subr.bf16.mxu0 %v7894_v32  ;;  %v7940_v36 = vld [vmem:[%s11242_s1 + $0x4c8] ss:$16 sps:$4 sm:$0xff]  }
 0x1a5   :  { %5496 = vmatprep.subr.bf16.mxu1 %v7891_v38 }
 0x1a7   :  { %5530 = vmatpush1.bf16.msra.mxu0 %v7892_v44 }
 0x1a8   :  { %5497 = vmatpush2.bf16.msra.mxu1 %v7889_v40  ;;  %5531 = vmatprep.subr.bf16.mxu0 %v7900_v48  ;;  %v7948_v48 = vld [vmem:[%s11242_s1 + $0x4ac] ss:$16 sps:$4 sm:$0xff]  }
 0x1a9   :  { %5498 = vmatprep.subr.bf16.mxu1 %v7897_v47  ;;  %v7945_v47 = vld [vmem:[%s11242_s1 + $0x32c] ss:$16 sps:$4 sm:$0xff]  }
 0x1ab   :  { %5532 = vmatpush1.bf16.msra.mxu0 %v7898_v51  ;;  %v7946_v51 = vld [vmem:[%s11242_s1 + $0x4a8] ss:$16 sps:$4 sm:$0xff]  }
 0x1ac   :  { %5499 = vmatpush2.bf16.msra.mxu1 %v7895_v45  ;;  %5533 = vmatprep.subr.bf16.mxu0 %v7906_v55 }
 0x1ad   :  { %5500 = vmatprep.subr.bf16.mxu1 %v7903_v56 }
 0x1af   :  { %5534 = vmatpush1.bf16.msra.mxu0 %v7904_v58 }
 0x1b0   :  { %5501 = vmatpush2.bf16.msra.mxu1 %v7901_v53  ;;  %5535 = vmatprep.subr.bf16.mxu0 %v7912_v62  ;;  %v7954_v62 = vld [vmem:[%s11242_s1 + $0x48c] ss:$16 sps:$4 sm:$0xff]  }
 0x1b1   :  { %5502 = vmatprep.subr.bf16.mxu1 %v7909_v61 }
 0x1b3   :  { %5536 = vmatpush2.bf16.msra.mxu0 %v7910_v63  ;;  %v7957_v63 = vld [vmem:[%s11242_s1 + $0x46c] ss:$16 sps:$4 sm:$0xff]  }
 0x1b4   :  { %5503 = vmatpush2.bf16.msra.mxu1 %v7907_v60  ;;  %5537 = vmatprep.subr.bf16.mxu0 %v7918_v3  ;;  %v7952_v60 = vld [vmem:[%s11242_s1 + $0x488] ss:$16 sps:$4 sm:$0xff]  }
 0x1b5   :  { %5504 = vmatprep.subr.bf16.mxu1 %v7915_v2  ;;  %v7960_v2 = vld [vmem:[%s11242_s1 + $0x6ec] ss:$16 sps:$4 sm:$0xff]   ;;  %v7955_v3 = vld [vmem:[%s11242_s1 + $0x468] ss:$16 sps:$4 sm:$0xff]  }
 0x1b7   :  { %5538 = vmatpush2.bf16.msra.mxu0 %v7916_v7  ;;  %v7963_v7 = vld [vmem:[%s11242_s1 + $0x44c] ss:$16 sps:$4 sm:$0xff]  }
 0x1b8   :  { %5505 = vmatpush2.bf16.msra.mxu1 %v7913_v1  ;;  %5539 = vmatprep.subr.bf16.mxu0 %v7924_v10  ;;  %v7958_v1 = vld [vmem:[%s11242_s1 + $0x6e8] ss:$16 sps:$4 sm:$0xff]  }
 0x1b9   :  { %5506 = vmatprep.subr.bf16.mxu1 %v7921_v8  ;;  %v7966_v8 = vld [vmem:[%s11242_s1 + $0x6cc] ss:$16 sps:$4 sm:$0xff]   ;;  %v7961_v10 = vld [vmem:[%s11242_s1 + $0x448] ss:$16 sps:$4 sm:$0xff]  }
 0x1bb   :  { %5540 = vmatpush2.bf16.msra.mxu0 %v7922_v49  ;;  %v7969_v49 = vld [vmem:[%s11242_s1 + $0x42c] ss:$16 sps:$4 sm:$0xff]  }
 0x1bc   :  { %5507 = vmatpush2.bf16.msra.mxu1 %v7919_v11  ;;  %5541 = vmatprep.subr.bf16.mxu0 %v7930_v19  ;;  %v7964_v11 = vld [vmem:[%s11242_s1 + $0x6c8] ss:$16 sps:$4 sm:$0xff]  }
 0x1bd   :  { %5508 = vmatprep.subr.bf16.mxu1 %v7927_v16  ;;  %v7972_v16 = vld [vmem:[%s11242_s1 + $0x6ac] ss:$16 sps:$4 sm:$0xff]   ;;  %v7967_v19 = vld [vmem:[%s11242_s1 + $0x428] ss:$16 sps:$4 sm:$0xff]  }
 0x1bf   :  { %5542 = vmatpush2.bf16.msra.mxu0 %v7928_v5  ;;  %v7978_v5 = vld [vmem:[%s11242_s1 + $0x68c] ss:$16 sps:$4 sm:$0xff]  }
 0x1c0   :  { %5509 = vmatpush2.bf16.msra.mxu1 %v7925_v4  ;;  %5543 = vmatprep.subr.bf16.mxu0 %v7933_v20  ;;  %v7975_v4 = vld [vmem:[%s11242_s1 + $0x40c] ss:$16 sps:$4 sm:$0xff]   ;;  %v7973_v20 = vld [vmem:[%s11242_s1 + $0x408] ss:$16 sps:$4 sm:$0xff]  }
 0x1c1   :  { %5560 = vmatprep.subr.bf16.mxu1 %v7936_v21  ;;  %v7981_v21 = vld [vmem:[%s11242_s1 + $0x5ec] ss:$16 sps:$4 sm:$0xff]  }
 0x1c2   :  { %v5225_v37 = vpop.f32.mrf.mxu0 }
 0x1c3   :  { %v5266_v38 = vpop.f32.mrf.mxu1  ;;  %5511 = vmatmul.mubr.bf16.vlgmr.msra.gmra.mxu1 %v8740_v13  ;;  %v5226_v32 = vadd.f32 %v5225_v37, %v9888_v46  ;;  %5544 = vmatpush2.bf16.msra.mxu0 %v7931_v0  ;;  %v7943_v46 = vld [vmem:[%s11242_s1 + $0x328] ss:$16 sps:$4 sm:$0xff]   ;;  %v7984_v0 = vld [vmem:[%s11242_s1 + $0x66c] ss:$16 sps:$4 sm:$0xff]  }
 0x1c4   :  { %5561 = vmatpush1.bf16.msra.mxu1 %v7934_v28  ;;  %v5227_v40 = vpop.f32.mrf.mxu0  ;;  %5545 = vmatprep.subr.bf16.mxu0 %v7939_v29  ;;  %v7979_v28 = vld [vmem:[%s11242_s1 + $0x5e8] ss:$16 sps:$4 sm:$0xff]  }
 0x1c5   :  { %v5268_v44 = vpop.f32.mrf.mxu1  ;;  %5562 = vmatprep.subr.bf16.mxu1 %v7942_v30  ;;  %v10098_v45 = vadd.f32 %v5266_v38, %v5226_v32  ;;  %v5228_v13 = vadd.f32 %v5227_v40, %v9899_v57  ;;  %5592 = vmatprep.mubr.bf16.mxu1 %v8752_v17  ;;  %v7951_v57 = vld [vmem:[%s11242_s1 + $0x30c] ss:$16 sps:$4 sm:$0xff]   ;;  %v7949_v17 = vld [vmem:[%s11242_s1 + $0x308] ss:$16 sps:$4 sm:$0xff]  }
 0x1c6   :  { %v5229_v56 = vpop.f32.mrf.mxu0  ;;  %v7982_v29 = vld [vmem:[%s11242_s1 + $0x668] ss:$16 sps:$4 sm:$0xff]   ;;  %v7987_v30 = vld [vmem:[%s11242_s1 + $0x5cc] ss:$16 sps:$4 sm:$0xff]  }
 0x1c7   :  { %v5270_v55 = vpop.f32.mrf.mxu1  ;;  %v10108_v53 = vadd.f32 %v5268_v44, %v5228_v13  ;;  %5546 = vmatpush2.bf16.msra.mxu0 %v7937_v34  ;;  %v7990_v34 = vld [vmem:[%s11242_s1 + $0x64c] ss:$16 sps:$4 sm:$0xff]   ;;  %v7988_v37 = vld [vmem:[%s11242_s1 + $0x648] ss:$16 sps:$4 sm:$0xff]  }
 0x1c8   :  { %5563 = vmatpush1.bf16.msra.mxu1 %v7940_v36  ;;  %v5230_v58 = vpop.f32.mrf.mxu0  ;;  %5547 = vmatprep.subr.bf16.mxu0 %v7945_v47  ;;  %v7985_v36 = vld [vmem:[%s11242_s1 + $0x5c8] ss:$16 sps:$4 sm:$0xff]   ;;  %v7993_v38 = vld [vmem:[%s11242_s1 + $0x5ac] ss:$16 sps:$4 sm:$0xff]  }
 0x1c9   :  { %v5271_v61 = vpop.f32.mrf.mxu1  ;;  %5564 = vmatprep.subr.bf16.mxu1 %v7948_v48  ;;  %v7996_v32 = vld [vmem:[%s11242_s1 + $0x62c] ss:$16 sps:$4 sm:$0xff]   ;;  %v7991_v40 = vld [vmem:[%s11242_s1 + $0x5a8] ss:$16 sps:$4 sm:$0xff]  }
 0x1ca   :  { %v7994_v44 = vld [vmem:[%s11242_s1 + $0x628] ss:$16 sps:$4 sm:$0xff]   ;;  %v7999_v47 = vld [vmem:[%s11242_s1 + $0x58c] ss:$16 sps:$4 sm:$0xff]  }
 0x1cb   :  { %5548 = vmatpush2.bf16.msra.mxu0 %v7943_v46  ;;  %v8002_v48 = vld [vmem:[%s11242_s1 + $0x60c] ss:$16 sps:$4 sm:$0xff]  }
 0x1cc   :  { %5565 = vmatpush1.bf16.msra.mxu1 %v7946_v51  ;;  %5549 = vmatprep.subr.bf16.mxu0 %v7951_v57 }
 0x1cd   :  { %5566 = vmatprep.subr.bf16.mxu1 %v7954_v62 }
 0x1cf   :  { %5550 = vmatpush2.bf16.msra.mxu0 %v7949_v17 }
 0x1d0   :  { %5567 = vmatpush1.bf16.msra.mxu1 %v7952_v60  ;;  %5601 = vmatprep.subr.bf16.mxu0 %v7960_v2 }
 0x1d1   :  { %5568 = vmatprep.subr.bf16.mxu1 %v7957_v63 }
 0x1d2   :  { %5552 = vmatmul.mubr.bf16.vlgmr.msra.gmra.mxu0 %v8756_v18  ;;  %v7970_v18 = vld [vmem:[%s11242_s1 + $0x6a8] ss:$16 sps:$4 sm:$0xff]  }
 0x1d3   :  { %5602 = vmatpush1.bf16.msra.mxu0 %v7958_v1  ;;  %5633 = vmatprep.mubr.bf16.mxu0 %v8772_v23  ;;  %v7976_v23 = vld [vmem:[%s11242_s1 + $0x688] ss:$16 sps:$4 sm:$0xff]  }
 0x1d4   :  { %5569 = vmatpush1.bf16.msra.mxu1 %v7955_v3  ;;  %5603 = vmatprep.subr.bf16.mxu0 %v7966_v8 }
 0x1d5   :  { %5570 = vmatprep.subr.bf16.mxu1 %v7963_v7 }
 0x1d7   :  { %5604 = vmatpush1.bf16.msra.mxu0 %v7964_v11 }
 0x1d8   :  { %5571 = vmatpush1.bf16.msra.mxu1 %v7961_v10  ;;  %5605 = vmatprep.subr.bf16.mxu0 %v7972_v16 }
 0x1d9   :  { %5572 = vmatprep.subr.bf16.mxu1 %v7969_v49 }
 0x1db   :  { %5606 = vmatpush1.bf16.msra.mxu0 %v7970_v18 }
 0x1dc   :  { %5573 = vmatpush1.bf16.msra.mxu1 %v7967_v19  ;;  %5607 = vmatprep.subr.bf16.mxu0 %v7978_v5 }
 0x1dd   :  { %5574 = vmatprep.subr.bf16.mxu1 %v7975_v4 }
 0x1df   :  { %5608 = vmatpush1.bf16.msra.mxu0 %v7976_v23 }
 0x1e0   :  { %5575 = vmatpush1.bf16.msra.mxu1 %v7973_v20  ;;  %5609 = vmatprep.subr.bf16.mxu0 %v7984_v0 }
 0x1e1   :  { %5576 = vmatprep.subr.bf16.mxu1 %v7981_v21 }
 0x1e3   :  { %5610 = vmatpush1.bf16.msra.mxu0 %v7982_v29 }
 0x1e4   :  { %5577 = vmatpush2.bf16.msra.mxu1 %v7979_v28  ;;  %5611 = vmatprep.subr.bf16.mxu0 %v7990_v34 }
 0x1e5   :  { %5578 = vmatprep.subr.bf16.mxu1 %v7987_v30 }
 0x1e7   :  { %5612 = vmatpush1.bf16.msra.mxu0 %v7988_v37 }
 0x1e8   :  { %5579 = vmatpush2.bf16.msra.mxu1 %v7985_v36  ;;  %5613 = vmatprep.subr.bf16.mxu0 %v7996_v32 }
 0x1e9   :  { %5580 = vmatprep.subr.bf16.mxu1 %v7993_v38 }
 0x1ea   :  { %10 = vsyncpa [#allocation3], 0  ;;  %v7997_v13 = vld [vmem:[%s11242_s1 + $0x588] ss:$16 sps:$4 sm:$0xff]   ;;  %v8005_v51 = vld [vmem:[%s11242_s1 + $0x56c] ss:$16 sps:$4 sm:$0xff]  }
 0x1eb   :  { %5614 = vmatpush1.bf16.msra.mxu0 %v7994_v44  ;;  %v8000_v46 = vld [vmem:[%s11242_s1 + $0x608] ss:$16 sps:$4 sm:$0xff]   ;;  %v8008_v56 = vld [vmem:[%s11242_s1 + $0x7ec] ss:$16 sps:$4 sm:$0xff]   ;;  %vm6362_vm1 = vcmask 41984  }
 0x1ec   :  { %5581 = vmatpush2.bf16.msra.mxu1 %v7991_v40  ;;  %5615 = vmatprep.subr.bf16.mxu0 %v8002_v48  ;;  %v8003_v55 = vld [vmem:[%s11242_s1 + $0x568] ss:$16 sps:$4 sm:$0xff]   ;;  %v8011_v61 = vld [vmem:[%s11242_s1 + $0x54c] ss:$16 sps:$4 sm:$0xff]  }
 0x1ed   :  { %5582 = vmatprep.subr.bf16.mxu1 %v7999_v47  ;;  %v8006_v58 = vld [vmem:[%s11242_s1 + $0x7e8] ss:$16 sps:$4 sm:$0xff]   ;;  %v8014_v57 = vld [vmem:[%s11242_s1 + $0x7cc] ss:$16 sps:$4 sm:$0xff]  }
 0x1ee   :  { %v8009_v62 = vld [vmem:[%s11242_s1 + $0x548] ss:$16 sps:$4 sm:$0xff]   ;;  %v8017_v60 = vld [vmem:[%s11242_s1 + $0x52c] ss:$16 sps:$4 sm:$0xff]  }
 0x1ef   :  { %5616 = vmatpush1.bf16.msra.mxu0 %v8000_v46  ;;  %v8012_v17 = vld [vmem:[%s11242_s1 + $0x7c8] ss:$16 sps:$4 sm:$0xff]   ;;  %v8020_v63 = vld [vmem:[%s11242_s1 + $0x7ac] ss:$16 sps:$4 sm:$0xff]  }
 0x1f0   :  { %5583 = vmatpush2.bf16.msra.mxu1 %v7997_v13  ;;  %5617 = vmatprep.subr.bf16.mxu0 %v8008_v56  ;;  %v8015_v2 = vld [vmem:[%s11242_s1 + $0x528] ss:$16 sps:$4 sm:$0xff]   ;;  %v8023_v1 = vld [vmem:[%s11242_s1 + $0x50c] ss:$16 sps:$4 sm:$0xff]  }
 0x1f1   :  { %5584 = vmatprep.subr.bf16.mxu1 %v8005_v51  ;;  %v8018_v3 = vld [vmem:[%s11242_s1 + $0x7a8] ss:$16 sps:$4 sm:$0xff]   ;;  %v8026_v7 = vld [vmem:[%s11242_s1 + $0x78c] ss:$16 sps:$4 sm:$0xff]  }
 0x1f2   :  { %v8021_v8 = vld [vmem:[%s11242_s1 + $0x508] ss:$16 sps:$4 sm:$0xff]   ;;  %v8029_v11 = vld [vmem:[%s11242_s1 + $0x76c] ss:$16 sps:$4 sm:$0xff]  }
 0x1f3   :  { %5618 = vmatpush2.bf16.msra.mxu0 %v8006_v58  ;;  %v8024_v10 = vld [vmem:[%s11242_s1 + $0x788] ss:$16 sps:$4 sm:$0xff]   ;;  %v8032_v49 = vld [vmem:[%s11242_s1 + $0x8ec] ss:$16 sps:$4 sm:$0xff]  }
 0x1f4   :  { %5585 = vmatpush2.bf16.msra.mxu1 %v8003_v55  ;;  %5619 = vmatprep.subr.bf16.mxu0 %v8014_v57  ;;  %v8027_v16 = vld [vmem:[%s11242_s1 + $0x768] ss:$16 sps:$4 sm:$0xff]   ;;  %v8035_v18 = vld [vmem:[%s11242_s1 + $0x74c] ss:$16 sps:$4 sm:$0xff]  }
 0x1f5   :  { %5586 = vmatprep.subr.bf16.mxu1 %v8011_v61  ;;  %v8030_v19 = vld [vmem:[%s11242_s1 + $0x8e8] ss:$16 sps:$4 sm:$0xff]   ;;  %v8038_v4 = vld [vmem:[%s11242_s1 + $0x8cc] ss:$16 sps:$4 sm:$0xff]  }
 0x1f6   :  { %v8033_v21 = vld [vmem:[%s11242_s1 + $0x748] ss:$16 sps:$4 sm:$0xff]   ;;  %v8053_v46 = vld [vmem:[%s11242_s1 + $0x86c] ss:$16 sps:$4 sm:$0xff]  }
 0x1f7   :  { %5620 = vmatpush2.bf16.msra.mxu0 %v8012_v17  ;;  %v8036_v0 = vld [vmem:[%s11242_s1 + $0x8c8] ss:$16 sps:$4 sm:$0xff]   ;;  %v8056_v51 = vld [vmem:[%s11242_s1 + $0xaec] ss:$16 sps:$4 sm:$0xff]  }
 0x1f8   :  { %5587 = vmatpush2.bf16.msra.mxu1 %v8009_v62  ;;  %5621 = vmatprep.subr.bf16.mxu0 %v8020_v63  ;;  %v8039_v32 = vld [vmem:[%s11242_s1 + $0x728] ss:$16 sps:$4 sm:$0xff]   ;;  %v8059_v58 = vld [vmem:[%s11242_s1 + $0x84c] ss:$16 sps:$4 sm:$0xff]  }
 0x1f9   :  { %5588 = vmatprep.subr.bf16.mxu1 %v8017_v60  ;;  %v8042_v40 = vld [vmem:[%s11242_s1 + $0x8a8] ss:$16 sps:$4 sm:$0xff]   ;;  %v8062_v61 = vld [vmem:[%s11242_s1 + $0xacc] ss:$16 sps:$4 sm:$0xff]  }
 0x1fa   :  { %v8045_v48 = vld [vmem:[%s11242_s1 + $0x708] ss:$16 sps:$4 sm:$0xff]   ;;  %v8065_v17 = vld [vmem:[%s11242_s1 + $0x82c] ss:$16 sps:$4 sm:$0xff]  }
 0x1fb   :  { %5622 = vmatpush2.bf16.msra.mxu0 %v8018_v3  ;;  %v8048_v13 = vld [vmem:[%s11242_s1 + $0x888] ss:$16 sps:$4 sm:$0xff]  }
 0x1fc   :  { %5589 = vmatpush2.bf16.msra.mxu1 %v8015_v2  ;;  %5623 = vmatprep.subr.bf16.mxu0 %v8026_v7  ;;  %v8051_v56 = vld [vmem:[%s11242_s1 + $0x868] ss:$16 sps:$4 sm:$0xff]   ;;  %v8071_v2 = vld [vmem:[%s11242_s1 + $0x80c] ss:$16 sps:$4 sm:$0xff]  }
 0x1fd   :  { %5590 = vmatprep.subr.bf16.mxu1 %v8023_v1  ;;  %v8054_v55 = vld [vmem:[%s11242_s1 + $0xae8] ss:$16 sps:$4 sm:$0xff]   ;;  %v8077_v7 = vld [vmem:[%s11242_s1 + $0x9ec] ss:$16 sps:$4 sm:$0xff]  }
 0x1fe   :  { %v8057_v57 = vld [vmem:[%s11242_s1 + $0x848] ss:$16 sps:$4 sm:$0xff]  }
 0x1ff   :  { %5624 = vmatpush2.bf16.msra.mxu0 %v8024_v10  ;;  %v8060_v62 = vld [vmem:[%s11242_s1 + $0xac8] ss:$16 sps:$4 sm:$0xff]  }
 0x200   :  { %5591 = vmatpush2.bf16.msra.mxu1 %v8021_v8  ;;  %5625 = vmatprep.subr.bf16.mxu0 %v8029_v11  ;;  %v8063_v60 = vld [vmem:[%s11242_s1 + $0x828] ss:$16 sps:$4 sm:$0xff]   ;;  %v8080_v8 = vld [vmem:[%s11242_s1 + $0xa6c] ss:$16 sps:$4 sm:$0xff]  }
 0x201   :  { %5642 = vmatprep.subr.bf16.mxu1 %v8032_v49  ;;  %v8066_v63 = vld [vmem:[%s11242_s1 + $0xaa8] ss:$16 sps:$4 sm:$0xff]   ;;  %v8083_v49 = vld [vmem:[%s11242_s1 + $0x9cc] ss:$16 sps:$4 sm:$0xff]  }
 0x202   :  { %v5307_v5 = vpop.f32.mrf.mxu0  ;;  %v8069_v3 = vld [vmem:[%s11242_s1 + $0x808] ss:$16 sps:$4 sm:$0xff]  }
 0x203   :  { %v5348_v20 = vpop.f32.mrf.mxu1  ;;  %5593 = vmatmul.mubr.bf16.vlgmr.msra.gmra.mxu1 %v8951_v26  ;;  %v5308_v23 = vadd.f32 %v5307_v5, %v10098_v45  ;;  %5626 = vmatpush2.bf16.msra.mxu0 %v8027_v16  ;;  %v8041_v26 = vld [vmem:[%s11242_s1 + $0x72c] ss:$16 sps:$4 sm:$0xff]   ;;  %v8072_v1 = vld [vmem:[%s11242_s1 + $0xa88] ss:$16 sps:$4 sm:$0xff]  }
 0x204   :  { %5643 = vmatpush1.bf16.msra.mxu1 %v8030_v19  ;;  %v5309_v28 = vpop.f32.mrf.mxu0  ;;  %5627 = vmatprep.subr.bf16.mxu0 %v8035_v18  ;;  %v8044_v45 = vld [vmem:[%s11242_s1 + $0x8ac] ss:$16 sps:$4 sm:$0xff]   ;;  %v8075_v10 = vld [vmem:[%s11242_s1 + $0x9e8] ss:$16 sps:$4 sm:$0xff]  }
 0x205   :  { %v5350_v29 = vpop.f32.mrf.mxu1  ;;  %5644 = vmatprep.subr.bf16.mxu1 %v8038_v4  ;;  %v10300_v30 = vadd.f32 %v5348_v20, %v5308_v23  ;;  %v5310_v34 = vadd.f32 %v5309_v28, %v10108_v53  ;;  %5674 = vmatprep.mubr.bf16.mxu1 %v9004_v41  ;;  %v8047_v41 = vld [vmem:[%s11242_s1 + $0x70c] ss:$16 sps:$4 sm:$0xff]   ;;  %v8078_v11 = vld [vmem:[%s11242_s1 + $0xa68] ss:$16 sps:$4 sm:$0xff]  }
 0x206   :  { %v5311_v36 = vpop.f32.mrf.mxu0  ;;  %v8050_v53 = vld [vmem:[%s11242_s1 + $0x88c] ss:$16 sps:$4 sm:$0xff]   ;;  %v8081_v19 = vld [vmem:[%s11242_s1 + $0x9c8] ss:$16 sps:$4 sm:$0xff]  }
 0x207   :  { %v5352_v37 = vpop.f32.mrf.mxu1  ;;  %v10304_v38 = vadd.f32 %v5350_v29, %v5310_v34  ;;  %5628 = vmatpush2.bf16.msra.mxu0 %v8033_v21  ;;  %v8086_v16 = vld [vmem:[%s11242_s1 + $0xa4c] ss:$16 sps:$4 sm:$0xff]   ;;  %v8084_v18 = vld [vmem:[%s11242_s1 + $0xa48] ss:$16 sps:$4 sm:$0xff]  }
 0x208   :  { %5645 = vmatpush1.bf16.msra.mxu1 %v8036_v0  ;;  %v5312_v44 = vpop.f32.mrf.mxu0  ;;  %5629 = vmatprep.subr.bf16.mxu0 %v8041_v26  ;;  %v8089_v4 = vld [vmem:[%s11242_s1 + $0x9ac] ss:$16 sps:$4 sm:$0xff]   ;;  %v8087_v20 = vld [vmem:[%s11242_s1 + $0x9a8] ss:$16 sps:$4 sm:$0xff]  }
 0x209   :  { %v5353_v47 = vpop.f32.mrf.mxu1  ;;  %5646 = vmatprep.subr.bf16.mxu1 %v8044_v45  ;;  %v8092_v5 = vld [vmem:[%s11242_s1 + $0xa2c] ss:$16 sps:$4 sm:$0xff]   ;;  %v8090_v23 = vld [vmem:[%s11242_s1 + $0xa28] ss:$16 sps:$4 sm:$0xff]  }
 0x20a   :  { %v8095_v21 = vld [vmem:[%s11242_s1 + $0x98c] ss:$16 sps:$4 sm:$0xff]   ;;  %v8093_v28 = vld [vmem:[%s11242_s1 + $0x988] ss:$16 sps:$4 sm:$0xff]  }
 0x20b   :  { %5630 = vmatpush2.bf16.msra.mxu0 %v8039_v32  ;;  %v8098_v0 = vld [vmem:[%s11242_s1 + $0xa0c] ss:$16 sps:$4 sm:$0xff]   ;;  %v8096_v29 = vld [vmem:[%s11242_s1 + $0xa08] ss:$16 sps:$4 sm:$0xff]  }
 0x20c   :  { %5647 = vmatpush1.bf16.msra.mxu1 %v8042_v40  ;;  %5631 = vmatprep.subr.bf16.mxu0 %v8047_v41  ;;  %v8101_v26 = vld [vmem:[%s11242_s1 + $0x96c] ss:$16 sps:$4 sm:$0xff]   ;;  %v8099_v34 = vld [vmem:[%s11242_s1 + $0x968] ss:$16 sps:$4 sm:$0xff]  }
 0x20d   :  { %5648 = vmatprep.subr.bf16.mxu1 %v8050_v53  ;;  %v8104_v45 = vld [vmem:[%s11242_s1 + $0xbec] ss:$16 sps:$4 sm:$0xff]   ;;  %v8102_v36 = vld [vmem:[%s11242_s1 + $0xbe8] ss:$16 sps:$4 sm:$0xff]  }
 0x20e   :  { %v8107_v37 = vld [vmem:[%s11242_s1 + $0x94c] ss:$16 sps:$4 sm:$0xff]   ;;  %v8105_v40 = vld [vmem:[%s11242_s1 + $0x948] ss:$16 sps:$4 sm:$0xff]  }
 0x20f   :  { %5632 = vmatpush2.bf16.msra.mxu0 %v8045_v48  ;;  %v8110_v32 = vld [vmem:[%s11242_s1 + $0xbcc] ss:$16 sps:$4 sm:$0xff]   ;;  %v8108_v44 = vld [vmem:[%s11242_s1 + $0xbc8] ss:$16 sps:$4 sm:$0xff]  }
 0x210   :  { %5649 = vmatpush1.bf16.msra.mxu1 %v8048_v13  ;;  %5683 = vmatprep.subr.bf16.mxu0 %v8056_v51  ;;  %v8113_v47 = vld [vmem:[%s11242_s1 + $0x92c] ss:$16 sps:$4 sm:$0xff]   ;;  %v8111_v53 = vld [vmem:[%s11242_s1 + $0x928] ss:$16 sps:$4 sm:$0xff]  }
 0x211   :  { %5650 = vmatprep.subr.bf16.mxu1 %v8053_v46  ;;  %v8116_v41 = vld [vmem:[%s11242_s1 + $0xbac] ss:$16 sps:$4 sm:$0xff]   ;;  %v8114_v48 = vld [vmem:[%s11242_s1 + $0xba8] ss:$16 sps:$4 sm:$0xff]  }
 0x212   :  { %5634 = vmatmul.mubr.bf16.vlgmr.msra.gmra.mxu0 %v8964_v6  ;;  %v8068_v6 = vld [vmem:[%s11242_s1 + $0xaac] ss:$16 sps:$4 sm:$0xff]   ;;  %v8117_v51 = vld [vmem:[%s11242_s1 + $0x908] ss:$16 sps:$4 sm:$0xff]  }
 0x213   :  { %5684 = vmatpush1.bf16.msra.mxu0 %v8054_v55  ;;  %5715 = vmatprep.mubr.bf16.mxu0 %v9009_v43  ;;  %v8074_v43 = vld [vmem:[%s11242_s1 + $0xa8c] ss:$16 sps:$4 sm:$0xff]  }
 0x214   :  { %5651 = vmatpush1.bf16.msra.mxu1 %v8051_v56  ;;  %5685 = vmatprep.subr.bf16.mxu0 %v8062_v61  ;;  %v8119_v13 = vld [vmem:[%s11242_s1 + $0x90c] ss:$16 sps:$4 sm:$0xff]   ;;  %v8120_v56 = vld [vmem:[%s11242_s1 + $0xb88] ss:$16 sps:$4 sm:$0xff]  }
 0x215   :  { %5652 = vmatprep.subr.bf16.mxu1 %v8059_v58  ;;  %v8122_v46 = vld [vmem:[%s11242_s1 + $0xb8c] ss:$16 sps:$4 sm:$0xff]   ;;  %v8123_v61 = vld [vmem:[%s11242_s1 + $0xb68] ss:$16 sps:$4 sm:$0xff]  }
 0x216   :  { %v8125_v55 = vld [vmem:[%s11242_s1 + $0xb6c] ss:$16 sps:$4 sm:$0xff]  }
 0x217   :  { %5686 = vmatpush1.bf16.msra.mxu0 %v8060_v62  ;;  %v8128_v58 = vld [vmem:[%s11242_s1 + $0xcec] ss:$16 sps:$4 sm:$0xff]  }
 0x218   :  { %5653 = vmatpush1.bf16.msra.mxu1 %v8057_v57  ;;  %5687 = vmatprep.subr.bf16.mxu0 %v8068_v6  ;;  %v8126_v57 = vld [vmem:[%s11242_s1 + $0xce8] ss:$16 sps:$4 sm:$0xff]   ;;  %v8131_v62 = vld [vmem:[%s11242_s1 + $0xb4c] ss:$16 sps:$4 sm:$0xff]  }
 0x219   :  { %5654 = vmatprep.subr.bf16.mxu1 %v8065_v17  ;;  %v8134_v17 = vld [vmem:[%s11242_s1 + $0xccc] ss:$16 sps:$4 sm:$0xff]  }
 0x21b   :  { %5688 = vmatpush1.bf16.msra.mxu0 %v8066_v63 }
 0x21c   :  { %5655 = vmatpush1.bf16.msra.mxu1 %v8063_v60  ;;  %5689 = vmatprep.subr.bf16.mxu0 %v8074_v43  ;;  %v8132_v43 = vld [vmem:[%s11242_s1 + $0xcc8] ss:$16 sps:$4 sm:$0xff]  }
 0x21d   :  { %5656 = vmatprep.subr.bf16.mxu1 %v8071_v2  ;;  %v8129_v2 = vld [vmem:[%s11242_s1 + $0xb48] ss:$16 sps:$4 sm:$0xff]  }
 0x21f   :  { %5690 = vmatpush1.bf16.msra.mxu0 %v8072_v1 }
 0x220   :  { %5657 = vmatpush1.bf16.msra.mxu1 %v8069_v3  ;;  %5691 = vmatprep.subr.bf16.mxu0 %v8080_v8 }
 0x221   :  { %5658 = vmatprep.subr.bf16.mxu1 %v8077_v7 }
 0x223   :  { %5692 = vmatpush1.bf16.msra.mxu0 %v8078_v11 }
 0x224   :  { %5659 = vmatpush2.bf16.msra.mxu1 %v8075_v10  ;;  %5693 = vmatprep.subr.bf16.mxu0 %v8086_v16  ;;  %v8135_v16 = vld [vmem:[%s11242_s1 + $0xb28] ss:$16 sps:$4 sm:$0xff]  }
 0x225   :  { %5660 = vmatprep.subr.bf16.mxu1 %v8083_v49 }
 0x227   :  { %5694 = vmatpush1.bf16.msra.mxu0 %v8084_v18 }
 0x228   :  { %5661 = vmatpush2.bf16.msra.mxu1 %v8081_v19  ;;  %5695 = vmatprep.subr.bf16.mxu0 %v8092_v5  ;;  %v8138_v19 = vld [vmem:[%s11242_s1 + $0xca8] ss:$16 sps:$4 sm:$0xff]  }
 0x229   :  { %5662 = vmatprep.subr.bf16.mxu1 %v8089_v4  ;;  %v8141_v5 = vld [vmem:[%s11242_s1 + $0xb08] ss:$16 sps:$4 sm:$0xff]  }
 0x22b   :  { %5696 = vmatpush1.bf16.msra.mxu0 %v8090_v23  ;;  %v8149_v23 = vld [vmem:[%s11242_s1 + $0xc6c] ss:$16 sps:$4 sm:$0xff]  }
 0x22c   :  { %5663 = vmatpush2.bf16.msra.mxu1 %v8087_v20  ;;  %5697 = vmatprep.subr.bf16.mxu0 %v8098_v0  ;;  %v8144_v20 = vld [vmem:[%s11242_s1 + $0xc88] ss:$16 sps:$4 sm:$0xff]  }
 0x22d   :  { %5664 = vmatprep.subr.bf16.mxu1 %v8095_v21  ;;  %v8152_v21 = vld [vmem:[%s11242_s1 + $0xeec] ss:$16 sps:$4 sm:$0xff]   ;;  %v8147_v0 = vld [vmem:[%s11242_s1 + $0xc68] ss:$16 sps:$4 sm:$0xff]  }
 0x22f   :  { %5698 = vmatpush1.bf16.msra.mxu0 %v8096_v29  ;;  %v8155_v29 = vld [vmem:[%s11242_s1 + $0xc4c] ss:$16 sps:$4 sm:$0xff]  }
 0x230   :  { %5665 = vmatpush2.bf16.msra.mxu1 %v8093_v28  ;;  %5699 = vmatprep.subr.bf16.mxu0 %v8104_v45  ;;  %v8150_v28 = vld [vmem:[%s11242_s1 + $0xee8] ss:$16 sps:$4 sm:$0xff]  }
 0x231   :  { %5666 = vmatprep.subr.bf16.mxu1 %v8101_v26  ;;  %v8158_v26 = vld [vmem:[%s11242_s1 + $0xecc] ss:$16 sps:$4 sm:$0xff]  }
 0x233   :  { %5700 = vmatpush2.bf16.msra.mxu0 %v8102_v36  ;;  %v8153_v36 = vld [vmem:[%s11242_s1 + $0xc48] ss:$16 sps:$4 sm:$0xff]  }
 0x234   :  { %5667 = vmatpush2.bf16.msra.mxu1 %v8099_v34  ;;  %5701 = vmatprep.subr.bf16.mxu0 %v8110_v32 }
 0x235   :  { %5668 = vmatprep.subr.bf16.mxu1 %v8107_v37  ;;  %v8156_v37 = vld [vmem:[%s11242_s1 + $0xec8] ss:$16 sps:$4 sm:$0xff]  }
 0x237   :  { %5702 = vmatpush2.bf16.msra.mxu0 %v8108_v44 }
 0x238   :  { %5669 = vmatpush2.bf16.msra.mxu1 %v8105_v40  ;;  %5703 = vmatprep.subr.bf16.mxu0 %v8116_v41  ;;  %v8161_v40 = vld [vmem:[%s11242_s1 + $0xc2c] ss:$16 sps:$4 sm:$0xff]   ;;  %v8159_v41 = vld [vmem:[%s11242_s1 + $0xc28] ss:$16 sps:$4 sm:$0xff]  }
 0x239   :  { %5670 = vmatprep.subr.bf16.mxu1 %v8113_v47 }
 0x23b   :  { %5704 = vmatpush2.bf16.msra.mxu0 %v8114_v48 }
 0x23c   :  { %5671 = vmatpush2.bf16.msra.mxu1 %v8111_v53  ;;  %5705 = vmatprep.subr.bf16.mxu0 %v8122_v46  ;;  %v8162_v53 = vld [vmem:[%s11242_s1 + $0xea8] ss:$16 sps:$4 sm:$0xff]  }
 0x23d   :  { %5672 = vmatprep.subr.bf16.mxu1 %v8119_v13  ;;  %v8167_v13 = vld [vmem:[%s11242_s1 + $0xc0c] ss:$16 sps:$4 sm:$0xff]   ;;  %v8165_v46 = vld [vmem:[%s11242_s1 + $0xc08] ss:$16 sps:$4 sm:$0xff]  }
 0x23f   :  { %5706 = vmatpush2.bf16.msra.mxu0 %v8120_v56  ;;  %v8173_v56 = vld [vmem:[%s11242_s1 + $0xdec] ss:$16 sps:$4 sm:$0xff]  }
 0x240   :  { %5673 = vmatpush2.bf16.msra.mxu1 %v8117_v51  ;;  %5707 = vmatprep.subr.bf16.mxu0 %v8125_v55  ;;  %v8168_v51 = vld [vmem:[%s11242_s1 + $0xe88] ss:$16 sps:$4 sm:$0xff]   ;;  %v8176_v55 = vld [vmem:[%s11242_s1 + $0xe6c] ss:$16 sps:$4 sm:$0xff]  }
 0x241   :  { %5724 = vmatprep.subr.bf16.mxu1 %v8128_v58  ;;  %v8171_v58 = vld [vmem:[%s11242_s1 + $0xde8] ss:$16 sps:$4 sm:$0xff]  }
 0x242   :  { %v5389_v6 = vpop.f32.mrf.mxu0 }
 0x243   :  { %v5430_v60 = vpop.f32.mrf.mxu1  ;;  %5675 = vmatmul.mubr.bf16.vlgmr.msra.gmra.mxu1 %v9180_v50  ;;  %v5390_v63 = vadd.f32 %v5389_v6, %v10300_v30  ;;  %5708 = vmatpush2.bf16.msra.mxu0 %v8123_v61  ;;  %v8137_v50 = vld [vmem:[%s11242_s1 + $0xb2c] ss:$16 sps:$4 sm:$0xff]   ;;  %v8174_v61 = vld [vmem:[%s11242_s1 + $0xe68] ss:$16 sps:$4 sm:$0xff]  }
 0x244   :  { %5725 = vmatpush1.bf16.msra.mxu1 %v8126_v57  ;;  %v5391_v3 = vpop.f32.mrf.mxu0  ;;  %5709 = vmatprep.subr.bf16.mxu0 %v8131_v62  ;;  %v8140_v30 = vld [vmem:[%s11242_s1 + $0xcac] ss:$16 sps:$4 sm:$0xff]   ;;  %v8180_v6 = vld [vmem:[%s11242_s1 + $0xe48] ss:$16 sps:$4 sm:$0xff]  }
 0x245   :  { %v5432_v1 = vpop.f32.mrf.mxu1  ;;  %5726 = vmatprep.subr.bf16.mxu1 %v8134_v17  ;;  %v5431_v7 = vadd.f32 %v5430_v60, %v5390_v63  ;;  %v5392_v8 = vadd.f32 %v5391_v3, %v10304_v38  ;;  %5756 = vmatprep.mubr.bf16.mxu1 %v9192_v54  ;;  %v8143_v54 = vld [vmem:[%s11242_s1 + $0xb0c] ss:$16 sps:$4 sm:$0xff]   ;;  %v8177_v17 = vld [vmem:[%s11242_s1 + $0xdc8] ss:$16 sps:$4 sm:$0xff]  }
 0x246   :  { %v5393_v10 = vpop.f32.mrf.mxu0  ;;  %v8146_v38 = vld [vmem:[%s11242_s1 + $0xc8c] ss:$16 sps:$4 sm:$0xff]  }
 0x247   :  { %v5434_v11 = vpop.f32.mrf.mxu1  ;;  %v5433_v49 = vadd.f32 %v5432_v1, %v5392_v8  ;;  %5710 = vmatpush2.bf16.msra.mxu0 %v8129_v2  ;;  %v8179_v57 = vld [vmem:[%s11242_s1 + $0xdcc] ss:$16 sps:$4 sm:$0xff]   ;;  %v8183_v2 = vld [vmem:[%s11242_s1 + $0xda8] ss:$16 sps:$4 sm:$0xff]  }
 0x248   :  { %5727 = vmatpush1.bf16.msra.mxu1 %v8132_v43  ;;  %v5394_v18 = vpop.f32.mrf.mxu0  ;;  %5711 = vmatprep.subr.bf16.mxu0 %v8137_v50  ;;  %v8182_v62 = vld [vmem:[%s11242_s1 + $0xe4c] ss:$16 sps:$4 sm:$0xff]   ;;  %v8186_v43 = vld [vmem:[%s11242_s1 + $0xe28] ss:$16 sps:$4 sm:$0xff]  }
 0x249   :  { %v5435_v4 = vpop.f32.mrf.mxu1  ;;  %5728 = vmatprep.subr.bf16.mxu1 %v8140_v30  ;;  %v8185_v60 = vld [vmem:[%s11242_s1 + $0xdac] ss:$16 sps:$4 sm:$0xff]   ;;  %v8189_v50 = vld [vmem:[%s11242_s1 + $0xd88] ss:$16 sps:$4 sm:$0xff]  }
 0x24a   :  { %v8188_v63 = vld [vmem:[%s11242_s1 + $0xe2c] ss:$16 sps:$4 sm:$0xff]   ;;  %v8192_v30 = vld [vmem:[%s11242_s1 + $0xe08] ss:$16 sps:$4 sm:$0xff]  }
 0x24b   :  { %5712 = vmatpush2.bf16.msra.mxu0 %v8135_v16  ;;  %v8191_v3 = vld [vmem:[%s11242_s1 + $0xd8c] ss:$16 sps:$4 sm:$0xff]   ;;  %v8195_v10 = vld [vmem:[%s11242_s1 + $0xd68] ss:$16 sps:$4 sm:$0xff]  }
 0x24c   :  { %5729 = vmatpush1.bf16.msra.mxu1 %v8138_v19  ;;  %5713 = vmatprep.subr.bf16.mxu0 %v8143_v54  ;;  %v8194_v1 = vld [vmem:[%s11242_s1 + $0xe0c] ss:$16 sps:$4 sm:$0xff]   ;;  %v8198_v11 = vld [vmem:[%s11242_s1 + $0xfe8] ss:$16 sps:$4 sm:$0xff]  }
 0x24d   :  { %5730 = vmatprep.subr.bf16.mxu1 %v8146_v38  ;;  %v8200_v8 = vld [vmem:[%s11242_s1 + $0xfec] ss:$16 sps:$4 sm:$0xff]   ;;  %v8201_v19 = vld [vmem:[%s11242_s1 + $0xd48] ss:$16 sps:$4 sm:$0xff]  }
 0x24e   :  { %v8206_v16 = vld [vmem:[%s11242_s1 + $0xfcc] ss:$16 sps:$4 sm:$0xff]   ;;  %v8204_v18 = vld [vmem:[%s11242_s1 + $0xfc8] ss:$16 sps:$4 sm:$0xff]  }
 0x24f   :  { %5714 = vmatpush2.bf16.msra.mxu0 %v8141_v5  ;;  %v8209_v4 = vld [vmem:[%s11242_s1 + $0xd2c] ss:$16 sps:$4 sm:$0xff]   ;;  %v8207_v38 = vld [vmem:[%s11242_s1 + $0xd28] ss:$16 sps:$4 sm:$0xff]  }
 0x250   :  { %5731 = vmatpush1.bf16.msra.mxu1 %v8144_v20  ;;  %5765 = vmatprep.subr.bf16.mxu0 %v8152_v21  ;;  %v8212_v54 = vld [vmem:[%s11242_s1 + $0xfac] ss:$16 sps:$4 sm:$0xff]   ;;  %v8210_v5 = vld [vmem:[%s11242_s1 + $0xfa8] ss:$16 sps:$4 sm:$0xff]  }
 0x251   :  { %5732 = vmatprep.subr.bf16.mxu1 %v8149_v23  ;;  %v8215_v20 = vld [vmem:[%s11242_s1 + $0xd0c] ss:$16 sps:$4 sm:$0xff]   ;;  %v8213_v21 = vld [vmem:[%s11242_s1 + $0xd08] ss:$16 sps:$4 sm:$0xff]  }
 0x252   :  { %v5471_v45 = vpop.f32.mrf.mxu0  ;;  %5716 = vmatmul.mubr.bf16.vlgmr.msra.gmra.mxu0 %v9196_v35  ;;  %v8164_v35 = vld [vmem:[%s11242_s1 + $0xeac] ss:$16 sps:$4 sm:$0xff]  }
 0x253   :  { %v10541_v34 = vadd.f32 %v5471_v45, %v5431_v7  ;;  %5766 = vmatpush1.bf16.msra.mxu0 %v8150_v28  ;;  %5797 = vmatprep.mubr.bf16.mxu0 %v9212_v59  ;;  %v8170_v59 = vld [vmem:[%s11242_s1 + $0xe8c] ss:$16 sps:$4 sm:$0xff]   ;;  %v8222_v45 = vld [vmem:[%s11242_s1 + $0x10e8] ss:$16 sps:$4 sm:$0xff]  }
 0x254   :  { %5733 = vmatpush1.bf16.msra.mxu1 %v8147_v0  ;;  %v5473_v32 = vpop.f32.mrf.mxu0  ;;  %5767 = vmatprep.subr.bf16.mxu0 %v8158_v26  ;;  %v8197_v7 = vld [vmem:[%s11242_s1 + $0xd6c] ss:$16 sps:$4 sm:$0xff]   ;;  %v8216_v0 = vld [vmem:[%s11242_s1 + $0xf88] ss:$16 sps:$4 sm:$0xff]  }
 0x255   :  { %5734 = vmatprep.subr.bf16.mxu1 %v8155_v29  ;;  %v10555_v44 = vadd.f32 %v5473_v32, %v5433_v49  ;;  %v8203_v49 = vld [vmem:[%s11242_s1 + $0xd4c] ss:$16 sps:$4 sm:$0xff]   ;;  %v8219_v26 = vld [vmem:[%s11242_s1 + $0xf68] ss:$16 sps:$4 sm:$0xff]  }
 0x256   :  { %v5475_v47 = vpop.f32.mrf.mxu0  ;;  %v8218_v23 = vld [vmem:[%s11242_s1 + $0xf8c] ss:$16 sps:$4 sm:$0xff]  }
 0x257   :  { %5768 = vmatpush1.bf16.msra.mxu0 %v8156_v37  ;;  %v8221_v28 = vld [vmem:[%s11242_s1 + $0xf6c] ss:$16 sps:$4 sm:$0xff]  }
 0x258   :  { %5735 = vmatpush1.bf16.msra.mxu1 %v8153_v36  ;;  %v5476_v48 = vpop.f32.mrf.mxu0  ;;  %5769 = vmatprep.subr.bf16.mxu0 %v8164_v35  ;;  %v8224_v29 = vld [vmem:[%s11242_s1 + $0x10ec] ss:$16 sps:$4 sm:$0xff]   ;;  %v8228_v35 = vld [vmem:[%s11242_s1 + $0x10c8] ss:$16 sps:$4 sm:$0xff]  }
 0x259   :  { %5736 = vmatprep.subr.bf16.mxu1 %v8161_v40  ;;  %v8227_v36 = vld [vmem:[%s11242_s1 + $0xf4c] ss:$16 sps:$4 sm:$0xff]   ;;  %v8225_v40 = vld [vmem:[%s11242_s1 + $0xf48] ss:$16 sps:$4 sm:$0xff]  }
 0x25a   :  { %v8230_v37 = vld [vmem:[%s11242_s1 + $0x10cc] ss:$16 sps:$4 sm:$0xff]   ;;  %v8231_v48 = vld [vmem:[%s11242_s1 + $0xf28] ss:$16 sps:$4 sm:$0xff]  }
 0x25b   :  { %5770 = vmatpush1.bf16.msra.mxu0 %v8162_v53 }
 0x25c   :  { %5737 = vmatpush1.bf16.msra.mxu1 %v8159_v41  ;;  %5771 = vmatprep.subr.bf16.mxu0 %v8170_v59  ;;  %v8233_v41 = vld [vmem:[%s11242_s1 + $0xf2c] ss:$16 sps:$4 sm:$0xff]  }
 0x25d   :  { %5738 = vmatprep.subr.bf16.mxu1 %v8167_v13  ;;  %v8234_v13 = vld [vmem:[%s11242_s1 + $0x10a8] ss:$16 sps:$4 sm:$0xff]  }
 0x25f   :  { %5772 = vmatpush1.bf16.msra.mxu0 %v8168_v51  ;;  %v822_v51 = vsub.s32 2, %v8644_v42 }
 0x260   :  { %5739 = vmatpush1.bf16.msra.mxu1 %v8165_v46  ;;  %5773 = vmatprep.subr.bf16.mxu0 %v8176_v55  ;;  %v8239_v46 = vld [vmem:[%s11242_s1 + $0xf0c] ss:$16 sps:$4 sm:$0xff]   ;;  %v8237_v55 = vld [vmem:[%s11242_s1 + $0xf08] ss:$16 sps:$4 sm:$0xff]  }
 0x261   :  { %5740 = vmatprep.subr.bf16.mxu1 %v8173_v56  ;;  %v826_v56 = vsub.s32 3, %v8644_v42  ;;  %v8248_v42 = vld [vmem:[%s11242_s1 + $0x12ec] ss:$16 sps:$4 sm:$0xff]  }
 0x263   :  { %5774 = vmatpush1.bf16.msra.mxu0 %v8174_v61  ;;  %v8245_v61 = vld [vmem:[%s11242_s1 + $0x106c] ss:$16 sps:$4 sm:$0xff]  }
 0x264   :  { %5741 = vmatpush2.bf16.msra.mxu1 %v8171_v58  ;;  %5775 = vmatprep.subr.bf16.mxu0 %v8182_v62  ;;  %v8240_v58 = vld [vmem:[%s11242_s1 + $0x1088] ss:$16 sps:$4 sm:$0xff]  }
 0x265   :  { %5742 = vmatprep.subr.bf16.mxu1 %v8179_v57  ;;  %v8471_v57 = vld [vmem:[%s11243_s2] sm:$0xf] }
 0x266   :  { %v823_v62 = vrot.slane %v8471_v57, %v822_v51  ;;  %v8300_v51 = vld [vmem:[%s11242_s1 + $0x13c8] ss:$16 sps:$4 sm:$0xff]  }
 0x267   :  { %5776 = vmatpush1.bf16.msra.mxu0 %v8180_v6  ;;  %v8243_v6 = vld [vmem:[%s11242_s1 + $0x1068] ss:$16 sps:$4 sm:$0xff]  }
 0x268   :  { %5743 = vmatpush2.bf16.msra.mxu1 %v8177_v17  ;;  %5777 = vmatprep.subr.bf16.mxu0 %v8188_v63  ;;  %v827_v17 = vrot.slane %v8471_v57, %v826_v56  ;;  %v8251_v63 = vld [vmem:[%s11242_s1 + $0x104c] ss:$16 sps:$4 sm:$0xff]  }
 0x269   :  { %5744 = vmatprep.subr.bf16.mxu1 %v8185_v60  ;;  %v8246_v60 = vld [vmem:[%s11242_s1 + $0x12e8] ss:$16 sps:$4 sm:$0xff]   ;;  %v8305_v56 = vld [vmem:[%s11242_s1 + $0x112c] ss:$16 sps:$4 sm:$0xff]  }
 0x26a   :  { %v8314_v57 = vld [vmem:[%s11242_s1 + $0x138c] ss:$16 sps:$4 sm:$0xff]  }
 0x26b   :  { %5778 = vmatpush1.bf16.msra.mxu0 %v8186_v43 }
 0x26c   :  { %5745 = vmatpush2.bf16.msra.mxu1 %v8183_v2  ;;  %5779 = vmatprep.subr.bf16.mxu0 %v8194_v1  ;;  %v8254_v2 = vld [vmem:[%s11242_s1 + $0x12cc] ss:$16 sps:$4 sm:$0xff]  }
 0x26d   :  { %5746 = vmatprep.subr.bf16.mxu1 %v8191_v3 }
 0x26f   :  { %5780 = vmatpush1.bf16.msra.mxu0 %v8192_v30  ;;  %v8249_v30 = vld [vmem:[%s11242_s1 + $0x1048] ss:$16 sps:$4 sm:$0xff]  }
 0x270   :  { %5747 = vmatpush2.bf16.msra.mxu1 %v8189_v50  ;;  %5781 = vmatprep.subr.bf16.mxu0 %v8200_v8 }
 0x271   :  { %5748 = vmatprep.subr.bf16.mxu1 %v8197_v7  ;;  %v8252_v7 = vld [vmem:[%s11242_s1 + $0x12c8] ss:$16 sps:$4 sm:$0xff]  }
 0x273   :  { %5782 = vmatpush2.bf16.msra.mxu0 %v8198_v11 }
 0x274   :  { %5749 = vmatpush2.bf16.msra.mxu1 %v8195_v10  ;;  %5783 = vmatprep.subr.bf16.mxu0 %v8206_v16  ;;  %v8260_v10 = vld [vmem:[%s11242_s1 + $0x12ac] ss:$16 sps:$4 sm:$0xff]   ;;  %v8255_v16 = vld [vmem:[%s11242_s1 + $0x1028] ss:$16 sps:$4 sm:$0xff]  }
 0x275   :  { %5750 = vmatprep.subr.bf16.mxu1 %v8203_v49 }
 0x277   :  { %5784 = vmatpush2.bf16.msra.mxu0 %v8204_v18 }
 0x278   :  { %5751 = vmatpush2.bf16.msra.mxu1 %v8201_v19  ;;  %5785 = vmatprep.subr.bf16.mxu0 %v8212_v54  ;;  %v8258_v19 = vld [vmem:[%s11242_s1 + $0x12a8] ss:$16 sps:$4 sm:$0xff]  }
 0x279   :  { %5752 = vmatprep.subr.bf16.mxu1 %v8209_v4  ;;  %v8263_v4 = vld [vmem:[%s11242_s1 + $0x100c] ss:$16 sps:$4 sm:$0xff]   ;;  %v8261_v54 = vld [vmem:[%s11242_s1 + $0x1008] ss:$16 sps:$4 sm:$0xff]  }
 0x27b   :  { %5786 = vmatpush2.bf16.msra.mxu0 %v8210_v5  ;;  %v8269_v5 = vld [vmem:[%s11242_s1 + $0x11ec] ss:$16 sps:$4 sm:$0xff]  }
 0x27c   :  { %5753 = vmatpush2.bf16.msra.mxu1 %v8207_v38  ;;  %5787 = vmatprep.subr.bf16.mxu0 %v8218_v23  ;;  %v8264_v38 = vld [vmem:[%s11242_s1 + $0x1288] ss:$16 sps:$4 sm:$0xff]  }
 0x27d   :  { %5754 = vmatprep.subr.bf16.mxu1 %v8215_v20  ;;  %v8272_v20 = vld [vmem:[%s11242_s1 + $0x126c] ss:$16 sps:$4 sm:$0xff]   ;;  %v8267_v23 = vld [vmem:[%s11242_s1 + $0x11e8] ss:$16 sps:$4 sm:$0xff]  }
 0x27f   :  { %5788 = vmatpush2.bf16.msra.mxu0 %v8216_v0  ;;  %v8275_v0 = vld [vmem:[%s11242_s1 + $0x11cc] ss:$16 sps:$4 sm:$0xff]  }
 0x280   :  { %5755 = vmatpush2.bf16.msra.mxu1 %v8213_v21  ;;  %5789 = vmatprep.subr.bf16.mxu0 %v8221_v28  ;;  %v8270_v21 = vld [vmem:[%s11242_s1 + $0x1268] ss:$16 sps:$4 sm:$0xff]   ;;  %v8278_v28 = vld [vmem:[%s11242_s1 + $0x124c] ss:$16 sps:$4 sm:$0xff]  }
 0x281   :  { %5806 = vmatprep.subr.bf16.mxu1 %v8224_v29  ;;  %v8273_v29 = vld [vmem:[%s11242_s1 + $0x11c8] ss:$16 sps:$4 sm:$0xff]  }
 0x283   :  { %v5512_v32 = vpop.f32.mrf.mxu1  ;;  %5757 = vmatmul.mubr.bf16.vlgmr.msra.gmra.mxu1 %v9408_v15  ;;  %5790 = vmatpush2.bf16.msra.mxu0 %v8219_v26  ;;  %v8236_v15 = vld [vmem:[%s11242_s1 + $0x10ac] ss:$16 sps:$4 sm:$0xff]   ;;  %v8276_v26 = vld [vmem:[%s11242_s1 + $0x1248] ss:$16 sps:$4 sm:$0xff]  }
 0x284   :  { %5807 = vmatpush1.bf16.msra.mxu1 %v8222_v45  ;;  %5791 = vmatprep.subr.bf16.mxu0 %v8227_v36  ;;  %v5513_v43 = vadd.f32 %v5512_v32, %v823_v62  ;;  %v8281_v45 = vld [vmem:[%s11242_s1 + $0x11ac] ss:$16 sps:$4 sm:$0xff]   ;;  %v8282_v32 = vld [vmem:[%s11242_s1 + $0x1228] ss:$16 sps:$4 sm:$0xff]  }
 0x285   :  { %v5514_v47 = vpop.f32.mrf.mxu1  ;;  %5808 = vmatprep.subr.bf16.mxu1 %v8230_v37  ;;  %5838 = vmatprep.mubr.bf16.mxu1 %v9419_v22  ;;  %v8242_v22 = vld [vmem:[%s11242_s1 + $0x108c] ss:$16 sps:$4 sm:$0xff]   ;;  %v8279_v37 = vld [vmem:[%s11242_s1 + $0x11a8] ss:$16 sps:$4 sm:$0xff]  }
 0x286   :  { %v5515_v1 = vadd.f32 %v5514_v47, %v827_v17  ;;  %v8284_v36 = vld [vmem:[%s11242_s1 + $0x122c] ss:$16 sps:$4 sm:$0xff]   ;;  %v8285_v47 = vld [vmem:[%s11242_s1 + $0x1188] ss:$16 sps:$4 sm:$0xff]  }
 0x287   :  { %v5516_v53 = vpop.f32.mrf.mxu1  ;;  %5792 = vmatpush2.bf16.msra.mxu0 %v8225_v40  ;;  %v8287_v40 = vld [vmem:[%s11242_s1 + $0x118c] ss:$16 sps:$4 sm:$0xff]   ;;  %v8309_v62 = vld [vmem:[%s11242_s1 + $0x1108] ss:$16 sps:$4 sm:$0xff]  }
 0x288   :  { %5809 = vmatpush1.bf16.msra.mxu1 %v8228_v35  ;;  %5793 = vmatprep.subr.bf16.mxu0 %v8233_v41  ;;  %v8290_v35 = vld [vmem:[%s11242_s1 + $0x120c] ss:$16 sps:$4 sm:$0xff]   ;;  %v8288_v41 = vld [vmem:[%s11242_s1 + $0x1208] ss:$16 sps:$4 sm:$0xff]  }
 0x289   :  { %v5517_v59 = vpop.f32.mrf.mxu1  ;;  %5810 = vmatprep.subr.bf16.mxu1 %v8236_v15  ;;  %v8293_v15 = vld [vmem:[%s11242_s1 + $0x116c] ss:$16 sps:$4 sm:$0xff]   ;;  %v8312_v17 = vld [vmem:[%s11242_s1 + $0x1388] ss:$16 sps:$4 sm:$0xff]  }
 0x28a   :  { %v8296_v53 = vld [vmem:[%s11242_s1 + $0x13ec] ss:$16 sps:$4 sm:$0xff]  }
 0x28b   :  { %5794 = vmatpush2.bf16.msra.mxu0 %v8231_v48  ;;  %v8291_v48 = vld [vmem:[%s11242_s1 + $0x1168] ss:$16 sps:$4 sm:$0xff]   ;;  %v8299_v59 = vld [vmem:[%s11242_s1 + $0x114c] ss:$16 sps:$4 sm:$0xff]  }
 0x28c   :  { %5811 = vmatpush1.bf16.msra.mxu1 %v8234_v13  ;;  %5795 = vmatprep.subr.bf16.mxu0 %v8239_v46  ;;  %v8294_v13 = vld [vmem:[%s11242_s1 + $0x13e8] ss:$16 sps:$4 sm:$0xff]   ;;  %v8302_v46 = vld [vmem:[%s11242_s1 + $0x13cc] ss:$16 sps:$4 sm:$0xff]  }
 0x28d   :  { %5812 = vmatprep.subr.bf16.mxu1 %v8242_v22  ;;  %v8297_v22 = vld [vmem:[%s11242_s1 + $0x1148] ss:$16 sps:$4 sm:$0xff]  }
 0x28f   :  { %5796 = vmatpush2.bf16.msra.mxu0 %v8237_v55  ;;  %v8308_v55 = vld [vmem:[%s11242_s1 + $0x13ac] ss:$16 sps:$4 sm:$0xff]  }
 0x290   :  { %5813 = vmatpush1.bf16.msra.mxu1 %v8240_v58  ;;  %5847 = vmatprep.subr.bf16.mxu0 %v8248_v42  ;;  %v8303_v58 = vld [vmem:[%s11242_s1 + $0x1128] ss:$16 sps:$4 sm:$0xff]   ;;  %v8311_v42 = vld [vmem:[%s11242_s1 + $0x110c] ss:$16 sps:$4 sm:$0xff]  }
 0x291   :  { %5814 = vmatprep.subr.bf16.mxu1 %v8245_v61  ;;  %v8306_v61 = vld [vmem:[%s11242_s1 + $0x13a8] ss:$16 sps:$4 sm:$0xff]  }
 0x292   :  { %v5553_v3 = vpop.f32.mrf.mxu0  ;;  %5798 = vmatmul.mubr.bf16.vlgmr.msra.gmra.mxu0 %v9423_v39  ;;  %v8257_v39 = vld [vmem:[%s11242_s1 + $0x102c] ss:$16 sps:$4 sm:$0xff]  }
 0x293   :  { %v10746_v50 = vadd.f32 %v5553_v3, %v5513_v43  ;;  %5848 = vmatpush1.bf16.msra.mxu0 %v8246_v60  ;;  %5879 = vmatprep.mubr.bf16.mxu0 %v9439_v31  ;;  %v8266_v31 = vld [vmem:[%s11242_s1 + $0x128c] ss:$16 sps:$4 sm:$0xff]  }
 0x294   :  { %5815 = vmatpush1.bf16.msra.mxu1 %v8243_v6  ;;  %v5555_v8 = vpop.f32.mrf.mxu0  ;;  %5849 = vmatprep.subr.bf16.mxu0 %v8254_v2  ;;  %v8317_v6 = vld [vmem:[%s11242_s1 + $0x136c] ss:$16 sps:$4 sm:$0xff]   ;;  %v8318_v2 = vld [vmem:[%s11242_s1 + $0x14e8] ss:$16 sps:$4 sm:$0xff]  }
 0x295   :  { %5816 = vmatprep.subr.bf16.mxu1 %v8251_v63  ;;  %v10760_v11 = vadd.f32 %v5555_v8, %v5515_v1  ;;  %v8320_v60 = vld [vmem:[%s11242_s1 + $0x14ec] ss:$16 sps:$4 sm:$0xff]   ;;  %v8315_v63 = vld [vmem:[%s11242_s1 + $0x1368] ss:$16 sps:$4 sm:$0xff]  }
 0x296   :  { %v5557_v49 = vpop.f32.mrf.mxu0  ;;  %v8323_v43 = vld [vmem:[%s11242_s1 + $0x134c] ss:$16 sps:$4 sm:$0xff]   ;;  %v8324_v8 = vld [vmem:[%s11242_s1 + $0x14c8] ss:$16 sps:$4 sm:$0xff]  }
 0x297   :  { %5850 = vmatpush1.bf16.msra.mxu0 %v8252_v7  ;;  %v8326_v3 = vld [vmem:[%s11242_s1 + $0x14cc] ss:$16 sps:$4 sm:$0xff]   ;;  %v8321_v7 = vld [vmem:[%s11242_s1 + $0x1348] ss:$16 sps:$4 sm:$0xff]  }
 0x298   :  { %5817 = vmatpush1.bf16.msra.mxu1 %v8249_v30  ;;  %v5558_v18 = vpop.f32.mrf.mxu0  ;;  %5851 = vmatprep.subr.bf16.mxu0 %v8260_v10  ;;  %v8329_v10 = vld [vmem:[%s11242_s1 + $0x132c] ss:$16 sps:$4 sm:$0xff]  }
 0x299   :  { %5818 = vmatprep.subr.bf16.mxu1 %v8257_v39 }
 0x29b   :  { %5852 = vmatpush1.bf16.msra.mxu0 %v8258_v19  ;;  %v8330_v19 = vld [vmem:[%s11242_s1 + $0x14a8] ss:$16 sps:$4 sm:$0xff]  }
 0x29c   :  { %5819 = vmatpush1.bf16.msra.mxu1 %v8255_v16  ;;  %5853 = vmatprep.subr.bf16.mxu0 %v8266_v31  ;;  %v8327_v16 = vld [vmem:[%s11242_s1 + $0x1328] ss:$16 sps:$4 sm:$0xff]  }
 0x29d   :  { %5820 = vmatprep.subr.bf16.mxu1 %v8263_v4  ;;  %v8333_v4 = vld [vmem:[%s11242_s1 + $0x1308] ss:$16 sps:$4 sm:$0xff]  }
 0x29e   :  { %v8336_v31 = vld [vmem:[%s11242_s1 + $0x1488] ss:$16 sps:$4 sm:$0xff]  }
 0x29f   :  { %5854 = vmatpush1.bf16.msra.mxu0 %v8264_v38  ;;  %v8344_v38 = vld [vmem:[%s11242_s1 + $0x16ec] ss:$16 sps:$4 sm:$0xff]  }
 0x2a0   :  { %5821 = vmatpush1.bf16.msra.mxu1 %v8261_v54  ;;  %5855 = vmatprep.subr.bf16.mxu0 %v8272_v20  ;;  %v8341_v54 = vld [vmem:[%s11242_s1 + $0x146c] ss:$16 sps:$4 sm:$0xff]   ;;  %v8342_v20 = vld [vmem:[%s11242_s1 + $0x16e8] ss:$16 sps:$4 sm:$0xff]  }
 0x2a1   :  { %5822 = vmatprep.subr.bf16.mxu1 %v8269_v5  ;;  %v8339_v5 = vld [vmem:[%s11242_s1 + $0x1468] ss:$16 sps:$4 sm:$0xff]  }
 0x2a3   :  { %5856 = vmatpush1.bf16.msra.mxu0 %v8270_v21  ;;  %v8350_v21 = vld [vmem:[%s11242_s1 + $0x16cc] ss:$16 sps:$4 sm:$0xff]  }
 0x2a4   :  { %5823 = vmatpush2.bf16.msra.mxu1 %v8267_v23  ;;  %5857 = vmatprep.subr.bf16.mxu0 %v8278_v28  ;;  %v8347_v23 = vld [vmem:[%s11242_s1 + $0x144c] ss:$16 sps:$4 sm:$0xff]  }
 0x2a5   :  { %5824 = vmatprep.subr.bf16.mxu1 %v8275_v0 }
 0x2a7   :  { %5858 = vmatpush1.bf16.msra.mxu0 %v8276_v26  ;;  %v8348_v26 = vld [vmem:[%s11242_s1 + $0x16c8] ss:$16 sps:$4 sm:$0xff]  }
 0x2a8   :  { %5825 = vmatpush2.bf16.msra.mxu1 %v8273_v29  ;;  %5859 = vmatprep.subr.bf16.mxu0 %v8284_v36  ;;  %v8345_v29 = vld [vmem:[%s11242_s1 + $0x1448] ss:$16 sps:$4 sm:$0xff]   ;;  %v8353_v36 = vld [vmem:[%s11242_s1 + $0x142c] ss:$16 sps:$4 sm:$0xff]  }
 0x2a9   :  { %5826 = vmatprep.subr.bf16.mxu1 %v8281_v45 }
 0x2ab   :  { %5860 = vmatpush1.bf16.msra.mxu0 %v8282_v32 }
 0x2ac   :  { %5827 = vmatpush2.bf16.msra.mxu1 %v8279_v37  ;;  %5861 = vmatprep.subr.bf16.mxu0 %v8290_v35  ;;  %v8354_v35 = vld [vmem:[%s11242_s1 + $0x16a8] ss:$16 sps:$4 sm:$0xff]  }
 0x2ad   :  { %5828 = vmatprep.subr.bf16.mxu1 %v8287_v40  ;;  %v8351_v40 = vld [vmem:[%s11242_s1 + $0x1428] ss:$16 sps:$4 sm:$0xff]  }
 0x2af   :  { %5862 = vmatpush1.bf16.msra.mxu0 %v8288_v41  ;;  %v8359_v41 = vld [vmem:[%s11242_s1 + $0x140c] ss:$16 sps:$4 sm:$0xff]  }
 0x2b0   :  { %5829 = vmatpush2.bf16.msra.mxu1 %v8285_v47  ;;  %5863 = vmatprep.subr.bf16.mxu0 %v8296_v53  ;;  %v8360_v53 = vld [vmem:[%s11242_s1 + $0x1688] ss:$16 sps:$4 sm:$0xff]  }
 0x2b1   :  { %5830 = vmatprep.subr.bf16.mxu1 %v8293_v15  ;;  %v8357_v15 = vld [vmem:[%s11242_s1 + $0x1408] ss:$16 sps:$4 sm:$0xff]  }
 0x2b3   :  { %5864 = vmatpush2.bf16.msra.mxu0 %v8294_v13  ;;  %v8368_v13 = vld [vmem:[%s11242_s1 + $0x166c] ss:$16 sps:$4 sm:$0xff]  }
 0x2b4   :  { %5831 = vmatpush2.bf16.msra.mxu1 %v8291_v48  ;;  %5865 = vmatprep.subr.bf16.mxu0 %v8302_v46  ;;  %v8365_v48 = vld [vmem:[%s11242_s1 + $0x15ec] ss:$16 sps:$4 sm:$0xff]   ;;  %v8366_v46 = vld [vmem:[%s11242_s1 + $0x1668] ss:$16 sps:$4 sm:$0xff]  }
 0x2b5   :  { %5832 = vmatprep.subr.bf16.mxu1 %v8299_v59  ;;  %v8363_v59 = vld [vmem:[%s11242_s1 + $0x15e8] ss:$16 sps:$4 sm:$0xff]  }
 0x2b7   :  { %5866 = vmatpush2.bf16.msra.mxu0 %v8300_v51  ;;  %v8374_v51 = vld [vmem:[%s11242_s1 + $0x164c] ss:$16 sps:$4 sm:$0xff]  }
 0x2b8   :  { %5833 = vmatpush2.bf16.msra.mxu1 %v8297_v22  ;;  %5867 = vmatprep.subr.bf16.mxu0 %v8308_v55  ;;  %v8371_v22 = vld [vmem:[%s11242_s1 + $0x15cc] ss:$16 sps:$4 sm:$0xff]   ;;  %v8372_v55 = vld [vmem:[%s11242_s1 + $0x1648] ss:$16 sps:$4 sm:$0xff]  }
 0x2b9   :  { %5834 = vmatprep.subr.bf16.mxu1 %v8305_v56  ;;  %v8369_v56 = vld [vmem:[%s11242_s1 + $0x15c8] ss:$16 sps:$4 sm:$0xff]  }
 0x2bb   :  { %5868 = vmatpush2.bf16.msra.mxu0 %v8306_v61  ;;  %v8380_v61 = vld [vmem:[%s11242_s1 + $0x162c] ss:$16 sps:$4 sm:$0xff]  }
 0x2bc   :  { %5835 = vmatpush2.bf16.msra.mxu1 %v8303_v58  ;;  %5869 = vmatprep.subr.bf16.mxu0 %v8314_v57  ;;  %v8377_v58 = vld [vmem:[%s11242_s1 + $0x15ac] ss:$16 sps:$4 sm:$0xff]   ;;  %v8378_v57 = vld [vmem:[%s11242_s1 + $0x1628] ss:$16 sps:$4 sm:$0xff]  }
 0x2bd   :  { %5836 = vmatprep.subr.bf16.mxu1 %v8311_v42  ;;  %v8375_v42 = vld [vmem:[%s11242_s1 + $0x15a8] ss:$16 sps:$4 sm:$0xff]  }
 0x2bf   :  { %5870 = vmatpush2.bf16.msra.mxu0 %v8312_v17  ;;  %v8386_v17 = vld [vmem:[%s11242_s1 + $0x160c] ss:$16 sps:$4 sm:$0xff]  }
 0x2c0   :  { %5837 = vmatpush2.bf16.msra.mxu1 %v8309_v62  ;;  %5871 = vmatprep.subr.bf16.mxu0 %v8317_v6  ;;  %v8383_v62 = vld [vmem:[%s11242_s1 + $0x158c] ss:$16 sps:$4 sm:$0xff]   ;;  %v8381_v6 = vld [vmem:[%s11242_s1 + $0x1588] ss:$16 sps:$4 sm:$0xff]  }
 0x2c1   :  { %5888 = vmatprep.subr.bf16.mxu1 %v8320_v60  ;;  %v8384_v60 = vld [vmem:[%s11242_s1 + $0x1608] ss:$16 sps:$4 sm:$0xff]  }
 0x2c3   :  { %v5594_v1 = vpop.f32.mrf.mxu1  ;;  %5839 = vmatmul.mubr.bf16.vlgmr.msra.gmra.mxu1 %v9626_v12  ;;  %5872 = vmatpush2.bf16.msra.mxu0 %v8315_v63  ;;  %v8332_v12 = vld [vmem:[%s11242_s1 + $0x14ac] ss:$16 sps:$4 sm:$0xff]  }
 0x2c4   :  { %v5595_v30 = vadd.f32 %v5594_v1, %v10746_v50  ;;  %5889 = vmatpush1.bf16.msra.mxu1 %v8318_v2  ;;  %5873 = vmatprep.subr.bf16.mxu0 %v8323_v43  ;;  %v8389_v63 = vld [vmem:[%s11242_s1 + $0x156c] ss:$16 sps:$4 sm:$0xff]   ;;  %v8387_v43 = vld [vmem:[%s11242_s1 + $0x1568] ss:$16 sps:$4 sm:$0xff]  }
 0x2c5   :  { %v5596_v39 = vpop.f32.mrf.mxu1  ;;  %5890 = vmatprep.subr.bf16.mxu1 %v8326_v3  ;;  %5920 = vmatprep.mubr.bf16.mxu1 %v9647_v24  ;;  %v8338_v24 = vld [vmem:[%s11242_s1 + $0x148c] ss:$16 sps:$4 sm:$0xff]   ;;  %v8390_v3 = vld [vmem:[%s11242_s1 + $0x17e8] ss:$16 sps:$4 sm:$0xff]  }
 0x2c6   :  { %v5597_v50 = vadd.f32 %v5596_v39, %v10760_v11  ;;  %v8335_v11 = vld [vmem:[%s11242_s1 + $0x130c] ss:$16 sps:$4 sm:$0xff]  }
 0x2c7   :  { %v5598_v49 = vpop.f32.mrf.mxu1  ;;  %5874 = vmatpush2.bf16.msra.mxu0 %v8321_v7  ;;  %v8392_v2 = vld [vmem:[%s11242_s1 + $0x17ec] ss:$16 sps:$4 sm:$0xff]   ;;  %v8393_v7 = vld [vmem:[%s11242_s1 + $0x1548] ss:$16 sps:$4 sm:$0xff]  }
 0x2c8   :  { %5891 = vmatpush1.bf16.msra.mxu1 %v8324_v8  ;;  %5875 = vmatprep.subr.bf16.mxu0 %v8329_v10  ;;  %v8395_v1 = vld [vmem:[%s11242_s1 + $0x154c] ss:$16 sps:$4 sm:$0xff]   ;;  %v8396_v8 = vld [vmem:[%s11242_s1 + $0x17c8] ss:$16 sps:$4 sm:$0xff]  }
 0x2c9   :  { %v5599_v18 = vpop.f32.mrf.mxu1  ;;  %5892 = vmatprep.subr.bf16.mxu1 %v8332_v12  ;;  %v8401_v39 = vld [vmem:[%s11242_s1 + $0x152c] ss:$16 sps:$4 sm:$0xff]   ;;  %v8399_v12 = vld [vmem:[%s11242_s1 + $0x1528] ss:$16 sps:$4 sm:$0xff]  }
 0x2ca   :  { %v8404_v10 = vld [vmem:[%s11242_s1 + $0x17ac] ss:$16 sps:$4 sm:$0xff]   ;;  %v8408_v18 = vld [vmem:[%s11242_s1 + $0x1788] ss:$16 sps:$4 sm:$0xff]  }
 0x2cb   :  { %5876 = vmatpush2.bf16.msra.mxu0 %v8327_v16  ;;  %v8407_v49 = vld [vmem:[%s11242_s1 + $0x150c] ss:$16 sps:$4 sm:$0xff]  }
 0x2cc   :  { %5893 = vmatpush1.bf16.msra.mxu1 %v8330_v19  ;;  %5877 = vmatprep.subr.bf16.mxu0 %v8335_v11  ;;  %v8410_v16 = vld [vmem:[%s11242_s1 + $0x178c] ss:$16 sps:$4 sm:$0xff]   ;;  %v8405_v19 = vld [vmem:[%s11242_s1 + $0x1508] ss:$16 sps:$4 sm:$0xff]  }
 0x2cd   :  { %5894 = vmatprep.subr.bf16.mxu1 %v8338_v24  ;;  %v8413_v11 = vld [vmem:[%s11242_s1 + $0x176c] ss:$16 sps:$4 sm:$0xff]  }
 0x2ce   :  { %v8416_v24 = vld [vmem:[%s11242_s1 + $0x186c] ss:$16 sps:$4 sm:$0xff]  }
 0x2cf   :  { %5878 = vmatpush2.bf16.msra.mxu0 %v8333_v4  ;;  %v8411_v4 = vld [vmem:[%s11242_s1 + $0x1768] ss:$16 sps:$4 sm:$0xff]  }
 0x2d0   :  { %5895 = vmatpush1.bf16.msra.mxu1 %v8336_v31  ;;  %5929 = vmatprep.subr.bf16.mxu0 %v8344_v38  ;;  %v8414_v31 = vld [vmem:[%s11242_s1 + $0x1868] ss:$16 sps:$4 sm:$0xff]   ;;  %v8422_v38 = vld [vmem:[%s11242_s1 + $0x184c] ss:$16 sps:$4 sm:$0xff]  }
 0x2d1   :  { %5896 = vmatprep.subr.bf16.mxu1 %v8341_v54  ;;  %v8419_v54 = vld [vmem:[%s11242_s1 + $0x174c] ss:$16 sps:$4 sm:$0xff]  }
 0x2d2   :  { %v5635_v0 = vpop.f32.mrf.mxu0  ;;  %5880 = vmatmul.mubr.bf16.vlgmr.msra.gmra.mxu0 %v9651_v25  ;;  %v8356_v25 = vld [vmem:[%s11242_s1 + $0x16ac] ss:$16 sps:$4 sm:$0xff]  }
 0x2d3   :  { %v10948_v28 = vadd.f32 %v5635_v0, %v5595_v30  ;;  %5930 = vmatpush1.bf16.msra.mxu0 %v8342_v20  ;;  %5961 = vmatprep.mubr.bf16.mxu0 %v9667_v33  ;;  %v8362_v33 = vld [vmem:[%s11242_s1 + $0x168c] ss:$16 sps:$4 sm:$0xff]  }
 0x2d4   :  { %5897 = vmatpush1.bf16.msra.mxu1 %v8339_v5  ;;  %v5637_v45 = vpop.f32.mrf.mxu0  ;;  %5931 = vmatprep.subr.bf16.mxu0 %v8350_v21  ;;  %v8398_v30 = vld [vmem:[%s11242_s1 + $0x17cc] ss:$16 sps:$4 sm:$0xff]   ;;  %v8420_v21 = vld [vmem:[%s11242_s1 + $0x1848] ss:$16 sps:$4 sm:$0xff]  }
 0x2d5   :  { %5898 = vmatprep.subr.bf16.mxu1 %v8347_v23  ;;  %v10962_v37 = vadd.f32 %v5637_v45, %v5597_v50  ;;  %v8402_v50 = vld [vmem:[%s11242_s1 + $0x17a8] ss:$16 sps:$4 sm:$0xff]  }
 0x2d6   :  { %v5639_v32 = vpop.f32.mrf.mxu0  ;;  %v8417_v23 = vld [vmem:[%s11242_s1 + $0x1748] ss:$16 sps:$4 sm:$0xff]  }
 0x2d7   :  { %5932 = vmatpush1.bf16.msra.mxu0 %v8348_v26  ;;  %v8423_v45 = vld [vmem:[%s11242_s1 + $0x1728] ss:$16 sps:$4 sm:$0xff]  }
 0x2d8   :  { %5899 = vmatpush1.bf16.msra.mxu1 %v8345_v29  ;;  %v5640_v47 = vpop.f32.mrf.mxu0  ;;  %5933 = vmatprep.subr.bf16.mxu0 %v8356_v25  ;;  %v8425_v29 = vld [vmem:[%s11242_s1 + $0x172c] ss:$16 sps:$4 sm:$0xff]   ;;  %v8429_v32 = vld [vmem:[%s11242_s1 + $0x1708] ss:$16 sps:$4 sm:$0xff]  }
 0x2d9   :  { %5900 = vmatprep.subr.bf16.mxu1 %v8353_v36  ;;  %v8426_v36 = vld [vmem:[%s11242_s1 + $0x1828] ss:$16 sps:$4 sm:$0xff]   ;;  %v6012_v47 = vmax.f32 %v10555_v44, 0.0  ;;  %v8438_v44 = vld [vmem:[%s11244_s3 + $0x30] sm:$0xff]  }
 0x2db   :  { %5934 = vmatpush1.bf16.msra.mxu0 %v8354_v35  ;;  %v8435_v35 = vld [vmem:[%s11244_s3 + $0x78] sm:$0xff]  }
 0x2dc   :  { %5901 = vmatpush1.bf16.msra.mxu1 %v8351_v40  ;;  %5935 = vmatprep.subr.bf16.mxu0 %v8362_v33  ;;  %v8432_v40 = vld [vmem:[%s11242_s1 + $0x1808] ss:$16 sps:$4 sm:$0xff]   ;;  %v8437_v33 = vld [vmem:[%s11244_s3 + $0x70] sm:$0xff]  }
 0x2dd   :  { %5902 = vmatprep.subr.bf16.mxu1 %v8359_v41  ;;  %v8436_v41 = vld [vmem:[%s11244_s3 + $0x38] sm:$0xff]  }
 0x2df   :  { %5936 = vmatpush1.bf16.msra.mxu0 %v8360_v53 }
 0x2e0   :  { %5903 = vmatpush1.bf16.msra.mxu1 %v8357_v15  ;;  %5937 = vmatprep.subr.bf16.mxu0 %v8368_v13  ;;  %v6016_v15 = vpack.c.bf16 %v6012_v47, %v6012_v47 }
 0x2e1   :  { %5904 = vmatprep.subr.bf16.mxu1 %v8365_v48 }
 0x2e3   :  { %5938 = vmatpush1.bf16.msra.mxu0 %v8366_v46 }
 0x2e4   :  { %5905 = vmatpush2.bf16.msra.mxu1 %v8363_v59  ;;  %5939 = vmatprep.subr.bf16.mxu0 %v8374_v51  ;;  %v8439_v59 = vld [vmem:[%s11244_s3 + $0x68] sm:$0xff]   ;;  %v8441_v51 = vld [vmem:[%s11244_s3 + $0x60] sm:$0xff]  }
 0x2e5   :  { %5906 = vmatprep.subr.bf16.mxu1 %v8371_v22 }
 0x2e7   :  { %5940 = vmatpush1.bf16.msra.mxu0 %v8372_v55  ;;  %v8452_v55 = vld [vmem:[%s11244_s3 + $0xb8] sm:$0xff]  }
 0x2e8   :  { %5907 = vmatpush2.bf16.msra.mxu1 %v8369_v56  ;;  %5941 = vmatprep.subr.bf16.mxu0 %v8380_v61  ;;  %v8451_v56 = vld [vmem:[%s11244_s3 + $0xf8] sm:$0xff]  }
 0x2e9   :  { %5908 = vmatprep.subr.bf16.mxu1 %v8377_v58  ;;  %v8442_v58 = vld [vmem:[%s11244_s3 + $0x20] sm:$0xff]   ;;  %v8443_v61 = vld [vmem:[%s11244_s3 + $0x58] sm:$0xff]  }
 0x2eb   :  { %5942 = vmatpush1.bf16.msra.mxu0 %v8378_v57  ;;  %v8445_v57 = vld [vmem:[%s11244_s3 + $0x50] sm:$0xff]  }
 0x2ec   :  { %5909 = vmatpush2.bf16.msra.mxu1 %v8375_v42  ;;  %5943 = vmatprep.subr.bf16.mxu0 %v8386_v17  ;;  %v8444_v42 = vld [vmem:[%s11244_s3 + $0x18] sm:$0xff]   ;;  %v8447_v17 = vld [vmem:[%s11244_s3 + $0x48] sm:$0xff]  }
 0x2ed   :  { %5910 = vmatprep.subr.bf16.mxu1 %v8383_v62  ;;  %v8446_v62 = vld [vmem:[%s11244_s3 + $0x10] sm:$0xff]  }
 0x2ef   :  { %5944 = vmatpush1.bf16.msra.mxu0 %v8384_v60  ;;  %v8449_v60 = vld [vmem:[%s11244_s3 + $0x40] sm:$0xff]  }
 0x2f0   :  { %5911 = vmatpush2.bf16.msra.mxu1 %v8381_v6  ;;  %5945 = vmatprep.subr.bf16.mxu0 %v8392_v2  ;;  %v8448_v6 = vld [vmem:[%s11244_s3 + $0x8] sm:$0xff]   ;;  %v6011_v2 = vmax.f32 %v10541_v34, 0.0 }
 0x2f1   :  { %5912 = vmatprep.subr.bf16.mxu1 %v8389_v63  ;;  %v8450_v63 = vld [vmem:[%s11244_s3] sm:$0xff]   ;;  %v8455_v34 = vld [vmem:[%s11244_s3 + $0xe8] sm:$0xff]  }
 0x2f3   :  { %5946 = vmatpush2.bf16.msra.mxu0 %v8390_v3  ;;  %v8453_v3 = vld [vmem:[%s11244_s3 + $0xf0] sm:$0xff]  }
 0x2f4   :  { %5913 = vmatpush2.bf16.msra.mxu1 %v8387_v43  ;;  %5947 = vmatprep.subr.bf16.mxu0 %v8398_v30  ;;  %v6015_v43 = vpack.c.bf16 %v6011_v2, %v6011_v2 }
 0x2f5   :  { %5914 = vmatprep.subr.bf16.mxu1 %v8395_v1  ;;  %v8454_v1 = vld [vmem:[%s11244_s3 + $0xb0] sm:$0xff]  }
 0x2f7   :  { %5948 = vmatpush2.bf16.msra.mxu0 %v8396_v8 }
 0x2f8   :  { %5915 = vmatpush2.bf16.msra.mxu1 %v8393_v7  ;;  %5949 = vmatprep.subr.bf16.mxu0 %v8404_v10  ;;  %v8456_v10 = vld [vmem:[%s11244_s3 + $0xa8] sm:$0xff]  }
 0x2f9   :  { %5916 = vmatprep.subr.bf16.mxu1 %v8401_v39 }
 0x2fb   :  { %5950 = vmatpush2.bf16.msra.mxu0 %v8402_v50 }
 0x2fc   :  { %5917 = vmatpush2.bf16.msra.mxu1 %v8399_v12  ;;  %5951 = vmatprep.subr.bf16.mxu0 %v8410_v16  ;;  %v8458_v16 = vld [vmem:[%s11244_s3 + $0xa0] sm:$0xff]  }
 0x2fd   :  { %5918 = vmatprep.subr.bf16.mxu1 %v8407_v49  ;;  %v8457_v49 = vld [vmem:[%s11244_s3 + $0xe0] sm:$0xff]  }
 0x2ff   :  { %5952 = vmatpush2.bf16.msra.mxu0 %v8408_v18  ;;  %v8460_v18 = vld [vmem:[%s11244_s3 + $0x98] sm:$0xff]  }
 0x300   :  { %5919 = vmatpush2.bf16.msra.mxu1 %v8405_v19  ;;  %5953 = vmatprep.subr.bf16.mxu0 %v8413_v11  ;;  %v8459_v19 = vld [vmem:[%s11244_s3 + $0xd8] sm:$0xff]   ;;  %v8461_v11 = vld [vmem:[%s11244_s3 + $0xd0] sm:$0xff]  }
 0x301   :  { %5978 = vmatprep.subr.bf16.mxu1 %v8416_v24  ;;  %v8462_v24 = vld [vmem:[%s11244_s3 + $0x90] sm:$0xff]  }
 0x303   :  { %v5676_v5 = vpop.f32.mrf.mxu1  ;;  %5921 = vmatmul.mubr.bf16.vlgmr.msra.gmra.mxu1 %v9843_v14  ;;  %5954 = vmatpush2.bf16.msra.mxu0 %v8411_v4  ;;  %v8428_v14 = vld [vmem:[%s11242_s1 + $0x182c] ss:$16 sps:$4 sm:$0xff]  }
 0x304   :  { %v5677_v20 = vadd.f32 %v5676_v5, %v10948_v28  ;;  %5979 = vmatpush1.bf16.msra.mxu1 %v8414_v31  ;;  %5955 = vmatprep.subr.bf16.mxu0 %v8419_v54 }
 0x305   :  { %v5678_v0 = vpop.f32.mrf.mxu1  ;;  %5980 = vmatprep.subr.bf16.mxu1 %v8422_v38  ;;  %6002 = vmatprep.mubr.bf16.mxu1 %v8495_v52  ;;  %v8434_v52 = vld [vmem:[%s11242_s1 + $0x180c] ss:$16 sps:$4 sm:$0xff]  }
 0x306   :  { %v5679_v28 = vadd.f32 %v5678_v0, %v10962_v37  ;;  %v8431_v37 = vld [vmem:[%s11242_s1 + $0x170c] ss:$16 sps:$4 sm:$0xff]   ;;  %v8465_v0 = vld [vmem:[%s11244_s3 + $0xc0] sm:$0xff]  }
 0x307   :  { %v5680_v26 = vpop.f32.mrf.mxu1  ;;  %5956 = vmatpush2.bf16.msra.mxu0 %v8417_v23  ;;  %v8463_v38 = vld [vmem:[%s11244_s3 + $0xc8] sm:$0xff]  }
 0x308   :  { %5981 = vmatpush1.bf16.msra.mxu1 %v8420_v21  ;;  %5957 = vmatprep.subr.bf16.mxu0 %v8425_v29  ;;  %v8466_v29 = vld [vmem:[%s11244_s3 + $0x80] sm:$0xff]  }
 0x309   :  { %v5681_v25 = vpop.f32.mrf.mxu1  ;;  %5982 = vmatprep.subr.bf16.mxu1 %v8428_v14 }
 0x30b   :  { %5958 = vmatpush2.bf16.msra.mxu0 %v8423_v45 }
 0x30c   :  { %5983 = vmatpush1.bf16.msra.mxu1 %v8426_v36  ;;  %5959 = vmatprep.subr.bf16.mxu0 %v8431_v37 }
 0x30d   :  { %5984 = vmatprep.subr.bf16.mxu1 %v8434_v52 }
 0x30f   :  { %5960 = vmatpush2.bf16.msra.mxu0 %v8429_v32 }
 0x310   :  { %5985 = vmatpush1.bf16.msra.mxu1 %v8432_v40  ;;  %7209 = vmatprep.subr.bf16.mxu0 %v8435_v35 }
 0x311   :  { %7231 = vmatprep.subr.bf16.mxu1 %v8451_v56 }
 0x312   :  { %v5717_v53 = vpop.f32.mrf.mxu0  ;;  %5962 = vmatmul.mubr.bf16.vlgmr.msra.gmra.mxu0 %v9865_v27  ;;  %v8440_v27 = vld [vmem:[%s11244_s3 + $0x28] sm:$0xff]  }
 0x313   :  { %7175 = vmatmul.mubr.msk.bf16.vlgmr.msra.gmra.mxu1 %vm4941_vm0, %v9929_v9  ;;  %v5718_v48 = vadd.f32 %v5717_v53, %v5677_v20  ;;  %7210 = vmatpush3.bf16.msra.mxu0 %v8436_v41  ;;  %v8464_v20 = vld [vmem:[%s11244_s3 + $0x88] sm:$0xff]  }
 0x314   :  { %6314 = vmatprep.mubr.bf16.mxu0 %v6016_v15  ;;  %v5719_v13 = vpop.f32.mrf.mxu0  ;;  %7211 = vmatprep.subr.bf16.mxu0 %v8437_v33 }
 0x315   :  { %v5720_v46 = vadd.f32 %v5719_v13, %v5679_v28  ;;  %7232 = vmatpush3.bf16.msra.mxu1 %v8452_v55 }
 0x316   :  { %v5721_v22 = vpop.f32.mrf.mxu0  ;;  %7233 = vmatprep.subr.bf16.mxu1 %v8453_v3 }
 0x317   :  { %7212 = vmatpush3.bf16.msra.mxu0 %v8438_v44 }
 0x318   :  { %v5722_v9 = vpop.f32.mrf.mxu0  ;;  %7213 = vmatprep.subr.bf16.mxu0 %v8439_v59 }
 0x319   :  { %7234 = vmatpush3.bf16.msra.mxu1 %v8454_v1  ;;  %v7176_v1 = vld [vmem:[%s11245_s4] ss:$0 sm:$0xff]  ;;  %s8496_s4 = smov [#allocation2]  }
 0x31a   :  { %7235 = vmatprep.subr.bf16.mxu1 %v8455_v34  ;;  %s6381_s16 = sshll.u32 %s8496_s4, 4  ;;  %s6382_s16 = int_to_ptr.vmem [resolvable:$true] %s6381_s16 }
 0x31b   :  { %7214 = vmatpush3.bf16.msra.mxu0 %v8440_v27  ;;  %s8472_s17 = scalar_lea.vmem %s6382_s16, 32  ;;  %p8477_p1 = scmp.lt.s32.totalorder %s6382_s16, %s6382_s16 }
 0x31c   :  { %7215 = vmatprep.subr.bf16.mxu0 %v8441_v51  ;;  %p8473_p0 = scmp.ne.s32.totalorder %s6382_s16, %s8472_s17  ;;  %p8478_p2 = scmp.lt.s32.totalorder %s8472_s17, %s8472_s17 }
 0x31d   :  { %7236 = vmatpush3.bf16.msra.mxu1 %v8456_v10 }
 0x31e   :  { %7237 = vmatprep.subr.bf16.mxu1 %v8457_v49  ;;  %p8479_p3 = por %p8478_p2, %p8477_p1 }
 0x31f   :  { %7216 = vmatpush3.bf16.msra.mxu0 %v8442_v58 }
 0x320   :  { %7217 = vmatprep.subr.bf16.mxu0 %v8443_v61  ;;  %p8480_p4 = pnand %p8479_p3, %p8473_p0 }
 0x321   :  { %7238 = vmatpush3.bf16.msra.mxu1 %v8458_v16 }
 0x322   :  { %7239 = vmatprep.subr.bf16.mxu1 %v8459_v19 }
 0x323   :  { %7218 = vmatpush3.bf16.msra.mxu0 %v8444_v42 }
 0x324   :  { %7219 = vmatprep.subr.bf16.mxu0 %v8445_v57 }
 0x325   :  { %7240 = vmatpush3.bf16.msra.mxu1 %v8460_v18 }
 0x326   :  { %7241 = vmatprep.subr.bf16.mxu1 %v8461_v11 }
 0x327   :  { %7220 = vmatpush3.bf16.msra.mxu0 %v8446_v62 }
 0x328   :  { %7221 = vmatprep.subr.bf16.mxu0 %v8447_v17 }
 0x329   :  { %7242 = vmatpush3.bf16.msra.mxu1 %v8462_v24 }
 0x32a   :  { %7243 = vmatprep.subr.bf16.mxu1 %v8463_v38 }
 0x32b   :  { %7222 = vmatpush3.bf16.msra.mxu0 %v8448_v6 }
 0x32c   :  { %7223 = vmatprep.subr.bf16.mxu0 %v8449_v60 }
 0x32d   :  { %7244 = vmatpush3.bf16.msra.mxu1 %v8464_v20 }
 0x32e   :  { %7245 = vmatprep.subr.bf16.mxu1 %v8465_v0 }
 0x32f   :  { %7224 = vmatpush3.bf16.msra.mxu0 %v8450_v63 }
 0x331   :  { %7246 = vmatpush3.bf16.msra.mxu1 %v8466_v29 }
 0x332   :  { %6315 = vmatmul.mubr.bf16.vlgmr.msra.gmra.mxu0 %v6015_v43 }
 0x343   :  { %v5758_v30 = vpop.f32.mrf.mxu1 }
 0x344   :  { %v5759_v7 = vadd.f32 %v5758_v30, %v5718_v48 }
 0x345   :  { %v5760_v8 = vpop.f32.mrf.mxu1 }
 0x346   :  { %v5761_v39 = vadd.f32 %v5760_v8, %v5720_v46 }
 0x347   :  { %v5762_v12 = vpop.f32.mrf.mxu1 }
 0x349   :  { %v5763_v50 = vpop.f32.mrf.mxu1 }
 0x352   :  { %v5799_v4 = vpop.f32.mrf.mxu0 }
 0x353   :  { %v5800_v31 = vadd.f32 %v5799_v4, %v5759_v7 }
 0x354   :  { %v5801_v54 = vpop.f32.mrf.mxu0 }
 0x355   :  { %v5802_v5 = vadd.f32 %v5801_v54, %v5761_v39 }
 0x356   :  { %v5803_v23 = vpop.f32.mrf.mxu0 }
 0x358   :  { %v5804_v21 = vpop.f32.mrf.mxu0 }
 0x383   :  { %v5840_v14 = vpop.f32.mrf.mxu1 }
 0x384   :  { %v5841_v28 = vadd.f32 %v5840_v14, %v5800_v31 }
 0x385   :  { %v5842_v26 = vpop.f32.mrf.mxu1 }
 0x386   :  { %v5843_v45 = vadd.f32 %v5842_v26, %v5802_v5 }
 0x387   :  { %v5844_v36 = vpop.f32.mrf.mxu1 }
 0x389   :  { %v5845_v25 = vpop.f32.mrf.mxu1 }
 0x392   :  { %v5881_v37 = vpop.f32.mrf.mxu0 }
 0x393   :  { %v5882_v15 = vadd.f32 %v5881_v37, %v5841_v28 }
 0x394   :  { %v5883_v52 = vpop.f32.mrf.mxu0 }
 0x395   :  { %v5884_v53 = vadd.f32 %v5883_v52, %v5843_v45 }
 0x396   :  { %v5885_v32 = vpop.f32.mrf.mxu0 }
 0x398   :  { %v5886_v40 = vpop.f32.mrf.mxu0 }
 0x3c3   :  { %v5922_v35 = vpop.f32.mrf.mxu1 }
 0x3c4   :  { %v5923_v48 = vadd.f32 %v5922_v35, %v5882_v15 }
 0x3c5   :  { %v5924_v47 = vpop.f32.mrf.mxu1 }
 0x3c6   :  { %v5925_v59 = vadd.f32 %v5924_v47, %v5884_v53 }
 0x3c7   :  { %v5926_v41 = vpop.f32.mrf.mxu1 }
 0x3c9   :  { %v5927_v33 = vpop.f32.mrf.mxu1 }
 0x3d2   :  { %v5963_v44 = vpop.f32.mrf.mxu0 }
 0x3d3   :  { %v6004_v13 = vpop.f32.mrf.mxu1  ;;  %v5964_v46 = vadd.f32 %v5963_v44, %v5923_v48 }
 0x3d4   :  { %v5965_v22 = vpop.f32.mrf.mxu0 }
 0x3d5   :  { %v6006_v27 = vpop.f32.mrf.mxu1  ;;  %v6005_v9 = vadd.f32 %v6004_v13, %v5964_v46  ;;  %v5966_v51 = vadd.f32 %v5965_v22, %v5925_v59 }
 0x3d6   :  { %v5967_v56 = vpop.f32.mrf.mxu0 }
 0x3d7   :  { %v6008_v55 = vpop.f32.mrf.mxu1  ;;  %v6007_v58 = vadd.f32 %v6006_v27, %v5966_v51  ;;  %v6013_v61 = vmax.f32 %v6005_v9, 0.0 }
 0x3d8   :  { %v5968_v42 = vpop.f32.mrf.mxu0 }
 0x3d9   :  { %v6009_v57 = vpop.f32.mrf.mxu1  ;;  %v6014_v62 = vmax.f32 %v6007_v58, 0.0  ;;  %v6017_v6 = vpack.c.bf16 %v6013_v61, %v6013_v61 }
 0x3db   :  { %v6018_v17 = vpack.c.bf16 %v6014_v62, %v6014_v62 }
 0x3dd   :  { %6354 = vmatprep.mubr.bf16.mxu1 %v6018_v17 }
 0x3de   :  { %6355 = vmatmul.mubr.bf16.vlgmr.msra.gmra.mxu1 %v6017_v6 }
 0x3f2   :  { %v7225_v60 = vpop.f32.mrf.mxu0 }
 0x3f4   :  { %v7226_v63 = vpop.f32.mrf.mxu0 }
 0x3f5   :  { %v7227_v2 = vadd.f32 %v7226_v63, %v7225_v60 }
 0x3f6   :  { %v7228_v43 = vpop.f32.mrf.mxu0 }
 0x3f7   :  { %v6317_v8 = vadd.f32 %v7227_v2, %v7176_v1 }
 0x3f8   :  { %v7229_v3 = vpop.f32.mrf.mxu0 }
 0x49e   :  { %v7247_v30 = vpop.f32.mrf.mxu1 }
 0x4a0   :  { %v7248_v7 = vpop.f32.mrf.mxu1 }
 0x4a1   :  { %v7249_v34 = vadd.f32 %v7248_v7, %v7247_v30 }
 0x4a2   :  { %v7250_v39 = vpop.f32.mrf.mxu1 }
 0x4a3   :  { %v6357_v10 = vadd.f32 %v7249_v34, %v6317_v8 }
 0x4a4   :  { %v7251_v12 = vpop.f32.mrf.mxu1 }
 0x4a5   :  { %v6363_v50 = vsel %vm6362_vm1, %v6357_v10, -inf }
 0x4a6   :  { %6364 = vmax.xlane.f32.xlu0 %v6363_v50 }
 0x52f   :  { %v6365_v49 = vpop.xlane.xlu0 %6364 }
 0x530   :  { %v6366_v16 = vsub.f32 %v6357_v10, %v6365_v49 }
 0x532   :  { %v6367_v19 = vmul.f32 1.442695, %v6366_v16 }
 0x534   :  { %8467 = vpow2.f32 %v6367_v19 }
 0x541   :  { %v8468_v18 = vpop.eup %8467 }
 0x542   :  { %v6369_v11 = vsel %vm6362_vm1, %v8468_v18, 0.0 }
 0x543   :  { %6370 = vadd.xlane.f32.xlu0 %v6369_v11 }
 0x5cc   :  { %v6371_v24 = vpop.xlane.xlu0 %6370 }
 0x5cd   :  { %8469 = vrcp.f32 %v6371_v24 }
 0x5da   :  { %v8470_v4 = vpop.eup %8469 }
 0x5db   :  { %v6373_v31 = vmul.f32 %v8470_v4, %v8468_v18 }
 0x5dd   :  { %6374 = vst.msk [vmem:[#allocation2] sm:$0x3] %vm6362_vm1, %v6373_v31 }
 0x5de   :  { %8483 = shalt.err (!%p8480_p4)
}
 0x5df   :  { %6384 = dma.vmem_to_hbm [thread:$0]  %s6382_s16, 32, %s11246_s5, [#allocation3]  }
 0x5e0   :  { %8492 = dma.done.wait [#allocation3], 32  }
 0x5e1   :  { %8493 = vsyncadd [#allocation3], 4294967264 }
 0x5e2   :  { %6388 = vsyncpa [#allocation3], 1 }

</bundles_post_ra>
